<compile_context>
chip_gen: v7x
topology: tpu7x:2x2x1
jax: 0.10.0
libtpu: 0.0.40
codegen_flags: <defaults>
</compile_context>

<pallas_src>
import functools

import jax
import jax.numpy as jnp
from jax.experimental import pallas as pl
from jax.experimental.pallas import tpu as pltpu


VMEM_LIMIT = 32 * 1024 * 1024  # safe on v5e/v6e (128 MiB VMEM) and v7x (64 MiB)


def _compiler_params():
    return pltpu.CompilerParams(
        dimension_semantics=("parallel", "parallel"),
        vmem_limit_bytes=VMEM_LIMIT,
    )


# ----------------------------------------------------------------------------
# Fused conv3x3 + bias + ReLU (+ H-direction half of the 2x2 maxpool)
# ----------------------------------------------------------------------------
def _conv3x3_kernel(*refs, W, pool):
    # refs = (x_row_0 .. x_row_{R-1}, w_ref, b_ref, o_ref), R = 4 if pool else 3
    #   x_row_k : (1, 1, W+2, Cin) bf16   padded input row  (out_row*stride + k)
    #   w_ref   : (3, 3, Cin, Cout) bf16
    #   b_ref   : (1, Cout) f32
    #   o_ref   : (1, 1, W, Cout) bf16    (H-pooled row when pool=True)
    nrow = 4 if pool else 3
    xrefs = refs[:nrow]
    w_ref, b_ref, o_ref = refs[nrow], refs[nrow + 1], refs[nrow + 2]

    def conv_one_row(r0):
        acc = None
        for ky in range(3):
            for kx in range(3):
                xs = xrefs[r0 + ky][0, 0, kx:kx + W, :]          # (W, Cin) bf16
                t = jnp.dot(xs, w_ref[ky, kx],
                            preferred_element_type=jnp.float32)  # MXU bf16 -> f32
                acc = t if acc is None else acc + t
        return jnp.maximum(acc + b_ref[...], 0.0)                # f32 bias + ReLU

    y = conv_one_row(0)
    if pool:
        y = jnp.maximum(y, conv_one_row(1))                      # H-direction max
    o_ref[0, 0] = y.astype(o_ref.dtype)


def conv3x3_relu(x, w_torch, b, *, pool):
    """x: (B,H,W,Cin) bf16; w_torch: (Cout,Cin,3,3); padding=1, ReLU.

    pool=True fuses the H-direction half of the 2x2 maxpool and returns
    (B, H//2, W, Cout); the caller finishes the W-direction max.
    """
    B, H, W, Cin = x.shape
    Cout = w_torch.shape[0]
    wk = jnp.transpose(w_torch, (2, 3, 1, 0)).astype(jnp.bfloat16)   # (3,3,Cin,Cout)
    b2 = b.reshape(1, Cout).astype(jnp.float32)
    xp = jnp.pad(x, ((0, 0), (1, 1), (1, 1), (0, 0)))                # (B,H+2,W+2,Cin)

    stride = 2 if pool else 1
    nrow = 4 if pool else 3
    Ho = H // 2 if pool else H

    def row_spec(k):
        return pl.BlockSpec((1, 1, W + 2, Cin),
                            lambda bb, i, k=k: (bb, stride * i + k, 0, 0))

    in_specs = [row_spec(k) for k in range(nrow)] + [
        pl.BlockSpec((3, 3, Cin, Cout), lambda bb, i: (0, 0, 0, 0)),
        pl.BlockSpec((1, Cout), lambda bb, i: (0, 0)),
    ]

    kern = functools.partial(_conv3x3_kernel, W=W, pool=pool)
    return pl.pallas_call(
        kern,
        out_shape=jax.ShapeDtypeStruct((B, Ho, W, Cout), jnp.bfloat16),
        grid=(B, Ho),
        in_specs=in_specs,
        out_specs=pl.BlockSpec((1, 1, W, Cout), lambda bb, i: (bb, i, 0, 0)),
        compiler_params=_compiler_params(),
    )(*([xp] * nrow), wk, b2)


def conv_relu_pool(x, w_torch, b):
    y = conv3x3_relu(x, w_torch, b, pool=True)          # (B, H//2, W, Cout)
    # W-direction half of the 2x2 maxpool: strided-slice maximum (no transpose;
    # XLA fuses it with the next layer's pad).
    return jnp.maximum(y[:, :, 0::2, :], y[:, :, 1::2, :])


# ----------------------------------------------------------------------------
# M-tiled matmul + bias (decoder ConvTranspose layers, grouped-column layout)
# ----------------------------------------------------------------------------
def _mm_bias_kernel(x_ref, w_ref, b_ref, o_ref):
    y = jnp.dot(x_ref[0], w_ref[...], preferred_element_type=jnp.float32)
    o_ref[0] = (y + b_ref[...]).astype(o_ref.dtype)


def _pick_tm(M, cap=1024):
    if M <= cap:
        return M
    tm = cap - cap % 8
    while tm >= 8:
        if M % tm == 0:
            return tm
        tm -= 8
    return M


def matmul_bias(x, w, b, out_dtype=jnp.bfloat16):
    """x: (B, M, K), w: (K, N), b: (N,) -> (B, M, N); grid over (B, M tiles)."""
    B, M, K = x.shape
    N = w.shape[1]
    TM = _pick_tm(M)
    return pl.pallas_call(
        _mm_bias_kernel,
        out_shape=jax.ShapeDtypeStruct((B, M, N), out_dtype),
        grid=(B, M // TM),
        in_specs=[
            pl.BlockSpec((1, TM, K), lambda bb, m: (bb, m, 0)),
            pl.BlockSpec((K, N), lambda bb, m: (0, 0)),
            pl.BlockSpec((1, N), lambda bb, m: (0, 0)),
        ],
        out_specs=pl.BlockSpec((1, TM, N), lambda bb, m: (bb, m, 0)),
        compiler_params=_compiler_params(),
    )(x.astype(jnp.bfloat16), w.astype(jnp.bfloat16),
      b.reshape(1, N).astype(jnp.float32))


# ----------------------------------------------------------------------------
# Fused up3 (ConvTranspose) + outc (1x1 conv) + sigmoid
# ----------------------------------------------------------------------------
def _up3_outc_kernel(x_ref, w3_ref, b3_ref, woc_ref, boc_ref, o_ref):
    u3 = jnp.dot(x_ref[0], w3_ref[...], preferred_element_type=jnp.float32)
    u3 = u3 + b3_ref[...]                                          # (TM, 4*64) f32
    s = jnp.dot(u3.astype(jnp.bfloat16), woc_ref[...],
                preferred_element_type=jnp.float32) + boc_ref[...]
    o_ref[0] = jax.nn.sigmoid(s).astype(o_ref.dtype)               # (TM, 4) f32


def up3_outc_sigmoid(x, w3f, b3f, woc_blk, boc):
    B, M, K = x.shape
    N3 = w3f.shape[1]
    TM = _pick_tm(M)
    return pl.pallas_call(
        _up3_outc_kernel,
        out_shape=jax.ShapeDtypeStruct((B, M, 4), jnp.float32),
        grid=(B, M // TM),
        in_specs=[
            pl.BlockSpec((1, TM, K), lambda bb, m: (bb, m, 0)),
            pl.BlockSpec((K, N3), lambda bb, m: (0, 0)),
            pl.BlockSpec((1, N3), lambda bb, m: (0, 0)),
            pl.BlockSpec((N3, 4), lambda bb, m: (0, 0)),
            pl.BlockSpec((1, 1), lambda bb, m: (0, 0)),
        ],
        out_specs=pl.BlockSpec((1, TM, 4), lambda bb, m: (bb, m, 0)),
        compiler_params=_compiler_params(),
    )(x.astype(jnp.bfloat16), w3f.astype(jnp.bfloat16), b3f, woc_blk, boc)


# ----------------------------------------------------------------------------
# Parameter init (synthetic, torch layouts / shapes of the nn.Module)
# ----------------------------------------------------------------------------
def init_params(key):
    keys = jax.random.split(key, 16)

    def w_(k, shape):
        return (jax.random.normal(k, shape, jnp.float32) * 0.05).astype(jnp.float32)

    def b_(k, n):
        return (jax.random.normal(k, (n,), jnp.float32) * 0.01).astype(jnp.float32)

    return {
        "conv1": (w_(keys[0], (64, 3, 3, 3)), b_(keys[1], 64)),
        "conv2": (w_(keys[2], (128, 64, 3, 3)), b_(keys[3], 128)),
        "conv3": (w_(keys[4], (256, 128, 3, 3)), b_(keys[5], 256)),
        "conv4": (w_(keys[6], (512, 256, 3, 3)), b_(keys[7], 512)),
        "up1": (w_(keys[8], (512, 256, 2, 2)), b_(keys[9], 256)),
        "up2": (w_(keys[10], (256, 128, 2, 2)), b_(keys[11], 128)),
        "up3": (w_(keys[12], (128, 64, 2, 2)), b_(keys[13], 64)),
        "outc": (w_(keys[14], (1, 64, 1, 1)), b_(keys[15], 1)),
    }


def _deconv_weight(w_torch):
    # torch ConvTranspose2d weight (Cin, Cout, 2, 2) -> (Cin, 4*Cout), columns
    # grouped as (a, b, co): value for output pixel (2i+a, 2j+b), channel co.
    Cin, Cout = w_torch.shape[0], w_torch.shape[1]
    return jnp.transpose(w_torch, (0, 2, 3, 1)).reshape(Cin, 4 * Cout)


# ----------------------------------------------------------------------------
# Forward pass (matches RefugeeCampDetector.forward; c1/c2/c3 are unused there)
# ----------------------------------------------------------------------------
def refugee_camp_detector(params, x_nchw):
    x = jnp.transpose(x_nchw, (0, 2, 3, 1)).astype(jnp.bfloat16)   # NHWC bf16

    # encoder: conv3x3 + ReLU with fused 2x2 maxpool halves
    p1 = conv_relu_pool(x, *params["conv1"])
    p2 = conv_relu_pool(p1, *params["conv2"])
    p3 = conv_relu_pool(p2, *params["conv3"])
    c4 = conv3x3_relu(p3, *params["conv4"], pool=False)            # (B,H3,W3,512)

    # decoder: per-pixel ConvTranspose chain in grouped-column layout
    B, H3, W3, C4 = c4.shape
    M3 = H3 * W3
    (w1, b1), (w2, b2) = params["up1"], params["up2"]
    (w3, b3), (woc, boc) = params["up3"], params["outc"]
    C1, C2, C3 = w1.shape[1], w2.shape[1], w3.shape[1]             # 256, 128, 64

    u1 = matmul_bias(c4.reshape(B, M3, C4), _deconv_weight(w1), jnp.tile(b1, 4))
    u2 = matmul_bias(u1.reshape(B, 4 * M3, C1), _deconv_weight(w2), jnp.tile(b2, 4))

    # outc(1x1) folded into the up3 kernel via a block-diagonal (4*C3, 4) weight:
    # 2x2-tap group g of up3's output -> output column g.
    woc_vec = woc.reshape(1, C3).astype(jnp.float32)
    woc_blk = (jnp.eye(4, dtype=jnp.float32)[:, None, :]
               * woc_vec.reshape(1, C3, 1)).reshape(4 * C3, 4).astype(jnp.bfloat16)
    o = up3_outc_sigmoid(
        u2.reshape(B, 16 * M3, C2),
        _deconv_weight(w3),
        jnp.tile(b3, 4).reshape(1, 4 * C3).astype(jnp.float32),
        woc_blk,
        boc.reshape(1, 1).astype(jnp.float32),
    )                                                              # (B, 16*M3, 4)

    # single cheap interleave, on the 1-channel output only:
    # flat row = (((i*W3+j)*2+a)*2+b)*4 + (c*2+d), column = e*2+f
    o = o.reshape(B, H3, W3, 2, 2, 2, 2, 2, 2)       # b, i, j, a, b_, c, d, e, f
    o = o.transpose(0, 1, 3, 5, 7, 2, 4, 6, 8)       # b, i, a, c, e, j, b_, d, f
    o = o.reshape(B, 8 * H3, 8 * W3)
    return o[:, None, :, :]                          # (B, 1, H, W) f32


if __name__ == "__main__":
    key = jax.random.PRNGKey(0)
    pkey, xkey = jax.random.split(key)
    params = init_params(pkey)

    # batch=2, channels=3 (conv1 expects 3), spatial=16 (divisible by 8 for pools)
    x = jax.random.normal(xkey, (2, 3, 16, 16), jnp.float32)

    fwd = jax.jit(refugee_camp_detector)
    y = jax.block_until_ready(fwd(params, x))

    assert y.shape == (2, 1, 16, 16), y.shape
    assert bool(jnp.all(jnp.isfinite(y)))
    assert bool(jnp.all((y >= 0.0) & (y <= 1.0)))  # sigmoid range
    print("KERNEL_OK")
</pallas_src>

<mosaic_0001>
module attributes {stable_mosaic.version = 11 : i64} {
  func.func @_conv3x3_kernel(%arg0: i32, %arg1: i32, %arg2: memref<1x1x18x3xbf16, #tpu.memory_space<vmem>>, %arg3: memref<1x1x18x3xbf16, #tpu.memory_space<vmem>>, %arg4: memref<1x1x18x3xbf16, #tpu.memory_space<vmem>>, %arg5: memref<1x1x18x3xbf16, #tpu.memory_space<vmem>>, %arg6: memref<3x3x3x64xbf16, #tpu.memory_space<vmem>>, %arg7: memref<1x64xf32, #tpu.memory_space<vmem>>, %arg8: memref<1x1x16x64xbf16, #tpu.memory_space<vmem>>) attributes {dimension_semantics = [#tpu.dimension_semantics<parallel>, #tpu.dimension_semantics<parallel>], iteration_bounds = array<i64: 2, 8>, scalar_prefetch = 0 : i64, scratch_operands = 0 : i64, tpu.core_type = #tpu.core_type<tc>, window_params = [{transform_indices = @transform_0, window_bounds = array<i64: 1, 1, 18, 3>}, {transform_indices = @transform_1, window_bounds = array<i64: 1, 1, 18, 3>}, {transform_indices = @transform_2, window_bounds = array<i64: 1, 1, 18, 3>}, {transform_indices = @transform_3, window_bounds = array<i64: 1, 1, 18, 3>}, {pipeline_mode = #tpu.pipeline_mode<synchronous>, transform_indices = @transform_4, window_bounds = array<i64: 3, 3, 3, 64>}, {pipeline_mode = #tpu.pipeline_mode<synchronous>, transform_indices = @transform_5, window_bounds = array<i64: 1, 64>}, {transform_indices = @transform_6, window_bounds = array<i64: 1, 1, 16, 64>}]} {
    %c0 = arith.constant 0 : index
    %c0_0 = arith.constant 0 : index
    %c0_1 = arith.constant 0 : index
    %c0_2 = arith.constant 0 : index
    %0 = vector.load %arg2[%c0, %c0_0, %c0_1, %c0_2] : memref<1x1x18x3xbf16, #tpu.memory_space<vmem>>, vector<1x1x16x3xbf16>
    %1 = vector.shape_cast %0 : vector<1x1x16x3xbf16> to vector<16x3xbf16>
    %c0_3 = arith.constant 0 : index
    %c0_4 = arith.constant 0 : index
    %c0_5 = arith.constant 0 : index
    %c0_6 = arith.constant 0 : index
    %2 = vector.load %arg6[%c0_3, %c0_4, %c0_5, %c0_6] : memref<3x3x3x64xbf16, #tpu.memory_space<vmem>>, vector<1x1x3x64xbf16>
    %3 = vector.shape_cast %2 : vector<1x1x3x64xbf16> to vector<3x64xbf16>
    %cst = arith.constant dense<0.000000e+00> : vector<16x64xf32>
    %4 = tpu.matmul %1, %3, %cst {dimension_numbers = #tpu.dot_dimension_numbers<[1], [0], [0], [1], [0, 0, 1, 1], [], []>} : vector<16x3xbf16>, vector<3x64xbf16>, vector<16x64xf32> -> vector<16x64xf32>
    %c0_7 = arith.constant 0 : index
    %c0_8 = arith.constant 0 : index
    %c1 = arith.constant 1 : index
    %c0_9 = arith.constant 0 : index
    %5 = vector.load %arg2[%c0_7, %c0_8, %c1, %c0_9] : memref<1x1x18x3xbf16, #tpu.memory_space<vmem>>, vector<1x1x16x3xbf16>
    %6 = vector.shape_cast %5 : vector<1x1x16x3xbf16> to vector<16x3xbf16>
    %c0_10 = arith.constant 0 : index
    %c1_11 = arith.constant 1 : index
    %c0_12 = arith.constant 0 : index
    %c0_13 = arith.constant 0 : index
    %7 = vector.load %arg6[%c0_10, %c1_11, %c0_12, %c0_13] : memref<3x3x3x64xbf16, #tpu.memory_space<vmem>>, vector<1x1x3x64xbf16>
    %8 = vector.shape_cast %7 : vector<1x1x3x64xbf16> to vector<3x64xbf16>
    %cst_14 = arith.constant dense<0.000000e+00> : vector<16x64xf32>
    %9 = tpu.matmul %6, %8, %cst_14 {dimension_numbers = #tpu.dot_dimension_numbers<[1], [0], [0], [1], [0, 0, 1, 1], [], []>} : vector<16x3xbf16>, vector<3x64xbf16>, vector<16x64xf32> -> vector<16x64xf32>
    %10 = arith.addf %4, %9 : vector<16x64xf32>
    %c0_15 = arith.constant 0 : index
    %c0_16 = arith.constant 0 : index
    %c2 = arith.constant 2 : index
    %c0_17 = arith.constant 0 : index
    %11 = vector.load %arg2[%c0_15, %c0_16, %c2, %c0_17] : memref<1x1x18x3xbf16, #tpu.memory_space<vmem>>, vector<1x1x16x3xbf16>
    %12 = vector.shape_cast %11 : vector<1x1x16x3xbf16> to vector<16x3xbf16>
    %c0_18 = arith.constant 0 : index
    %c2_19 = arith.constant 2 : index
    %c0_20 = arith.constant 0 : index
    %c0_21 = arith.constant 0 : index
    %13 = vector.load %arg6[%c0_18, %c2_19, %c0_20, %c0_21] : memref<3x3x3x64xbf16, #tpu.memory_space<vmem>>, vector<1x1x3x64xbf16>
    %14 = vector.shape_cast %13 : vector<1x1x3x64xbf16> to vector<3x64xbf16>
    %cst_22 = arith.constant dense<0.000000e+00> : vector<16x64xf32>
    %15 = tpu.matmul %12, %14, %cst_22 {dimension_numbers = #tpu.dot_dimension_numbers<[1], [0], [0], [1], [0, 0, 1, 1], [], []>} : vector<16x3xbf16>, vector<3x64xbf16>, vector<16x64xf32> -> vector<16x64xf32>
    %16 = arith.addf %10, %15 : vector<16x64xf32>
    %c0_23 = arith.constant 0 : index
    %c0_24 = arith.constant 0 : index
    %c0_25 = arith.constant 0 : index
    %c0_26 = arith.constant 0 : index
    %17 = vector.load %arg3[%c0_23, %c0_24, %c0_25, %c0_26] : memref<1x1x18x3xbf16, #tpu.memory_space<vmem>>, vector<1x1x16x3xbf16>
    %18 = vector.shape_cast %17 : vector<1x1x16x3xbf16> to vector<16x3xbf16>
    %c1_27 = arith.constant 1 : index
    %c0_28 = arith.constant 0 : index
    %c0_29 = arith.constant 0 : index
    %c0_30 = arith.constant 0 : index
    %19 = vector.load %arg6[%c1_27, %c0_28, %c0_29, %c0_30] : memref<3x3x3x64xbf16, #tpu.memory_space<vmem>>, vector<1x1x3x64xbf16>
    %20 = vector.shape_cast %19 : vector<1x1x3x64xbf16> to vector<3x64xbf16>
    %cst_31 = arith.constant dense<0.000000e+00> : vector<16x64xf32>
    %21 = tpu.matmul %18, %20, %cst_31 {dimension_numbers = #tpu.dot_dimension_numbers<[1], [0], [0], [1], [0, 0, 1, 1], [], []>} : vector<16x3xbf16>, vector<3x64xbf16>, vector<16x64xf32> -> vector<16x64xf32>
    %22 = arith.addf %16, %21 : vector<16x64xf32>
    %c0_32 = arith.constant 0 : index
    %c0_33 = arith.constant 0 : index
    %c1_34 = arith.constant 1 : index
    %c0_35 = arith.constant 0 : index
    %23 = vector.load %arg3[%c0_32, %c0_33, %c1_34, %c0_35] : memref<1x1x18x3xbf16, #tpu.memory_space<vmem>>, vector<1x1x16x3xbf16>
    %24 = vector.shape_cast %23 : vector<1x1x16x3xbf16> to vector<16x3xbf16>
    %c1_36 = arith.constant 1 : index
    %c1_37 = arith.constant 1 : index
    %c0_38 = arith.constant 0 : index
    %c0_39 = arith.constant 0 : index
    %25 = vector.load %arg6[%c1_36, %c1_37, %c0_38, %c0_39] : memref<3x3x3x64xbf16, #tpu.memory_space<vmem>>, vector<1x1x3x64xbf16>
    %26 = vector.shape_cast %25 : vector<1x1x3x64xbf16> to vector<3x64xbf16>
    %cst_40 = arith.constant dense<0.000000e+00> : vector<16x64xf32>
    %27 = tpu.matmul %24, %26, %cst_40 {dimension_numbers = #tpu.dot_dimension_numbers<[1], [0], [0], [1], [0, 0, 1, 1], [], []>} : vector<16x3xbf16>, vector<3x64xbf16>, vector<16x64xf32> -> vector<16x64xf32>
    %28 = arith.addf %22, %27 : vector<16x64xf32>
    %c0_41 = arith.constant 0 : index
    %c0_42 = arith.constant 0 : index
    %c2_43 = arith.constant 2 : index
    %c0_44 = arith.constant 0 : index
    %29 = vector.load %arg3[%c0_41, %c0_42, %c2_43, %c0_44] : memref<1x1x18x3xbf16, #tpu.memory_space<vmem>>, vector<1x1x16x3xbf16>
    %30 = vector.shape_cast %29 : vector<1x1x16x3xbf16> to vector<16x3xbf16>
    %c1_45 = arith.constant 1 : index
    %c2_46 = arith.constant 2 : index
    %c0_47 = arith.constant 0 : index
    %c0_48 = arith.constant 0 : index
    %31 = vector.load %arg6[%c1_45, %c2_46, %c0_47, %c0_48] : memref<3x3x3x64xbf16, #tpu.memory_space<vmem>>, vector<1x1x3x64xbf16>
    %32 = vector.shape_cast %31 : vector<1x1x3x64xbf16> to vector<3x64xbf16>
    %cst_49 = arith.constant dense<0.000000e+00> : vector<16x64xf32>
    %33 = tpu.matmul %30, %32, %cst_49 {dimension_numbers = #tpu.dot_dimension_numbers<[1], [0], [0], [1], [0, 0, 1, 1], [], []>} : vector<16x3xbf16>, vector<3x64xbf16>, vector<16x64xf32> -> vector<16x64xf32>
    %34 = arith.addf %28, %33 : vector<16x64xf32>
    %c0_50 = arith.constant 0 : index
    %c0_51 = arith.constant 0 : index
    %c0_52 = arith.constant 0 : index
    %c0_53 = arith.constant 0 : index
    %35 = vector.load %arg4[%c0_50, %c0_51, %c0_52, %c0_53] : memref<1x1x18x3xbf16, #tpu.memory_space<vmem>>, vector<1x1x16x3xbf16>
    %36 = vector.shape_cast %35 : vector<1x1x16x3xbf16> to vector<16x3xbf16>
    %c2_54 = arith.constant 2 : index
    %c0_55 = arith.constant 0 : index
    %c0_56 = arith.constant 0 : index
    %c0_57 = arith.constant 0 : index
    %37 = vector.load %arg6[%c2_54, %c0_55, %c0_56, %c0_57] : memref<3x3x3x64xbf16, #tpu.memory_space<vmem>>, vector<1x1x3x64xbf16>
    %38 = vector.shape_cast %37 : vector<1x1x3x64xbf16> to vector<3x64xbf16>
    %cst_58 = arith.constant dense<0.000000e+00> : vector<16x64xf32>
    %39 = tpu.matmul %36, %38, %cst_58 {dimension_numbers = #tpu.dot_dimension_numbers<[1], [0], [0], [1], [0, 0, 1, 1], [], []>} : vector<16x3xbf16>, vector<3x64xbf16>, vector<16x64xf32> -> vector<16x64xf32>
    %40 = arith.addf %34, %39 : vector<16x64xf32>
    %c0_59 = arith.constant 0 : index
    %c0_60 = arith.constant 0 : index
    %c1_61 = arith.constant 1 : index
    %c0_62 = arith.constant 0 : index
    %41 = vector.load %arg4[%c0_59, %c0_60, %c1_61, %c0_62] : memref<1x1x18x3xbf16, #tpu.memory_space<vmem>>, vector<1x1x16x3xbf16>
    %42 = vector.shape_cast %41 : vector<1x1x16x3xbf16> to vector<16x3xbf16>
    %c2_63 = arith.constant 2 : index
    %c1_64 = arith.constant 1 : index
    %c0_65 = arith.constant 0 : index
    %c0_66 = arith.constant 0 : index
    %43 = vector.load %arg6[%c2_63, %c1_64, %c0_65, %c0_66] : memref<3x3x3x64xbf16, #tpu.memory_space<vmem>>, vector<1x1x3x64xbf16>
    %44 = vector.shape_cast %43 : vector<1x1x3x64xbf16> to vector<3x64xbf16>
    %cst_67 = arith.constant dense<0.000000e+00> : vector<16x64xf32>
    %45 = tpu.matmul %42, %44, %cst_67 {dimension_numbers = #tpu.dot_dimension_numbers<[1], [0], [0], [1], [0, 0, 1, 1], [], []>} : vector<16x3xbf16>, vector<3x64xbf16>, vector<16x64xf32> -> vector<16x64xf32>
    %46 = arith.addf %40, %45 : vector<16x64xf32>
    %c0_68 = arith.constant 0 : index
    %c0_69 = arith.constant 0 : index
    %c2_70 = arith.constant 2 : index
    %c0_71 = arith.constant 0 : index
    %47 = vector.load %arg4[%c0_68, %c0_69, %c2_70, %c0_71] : memref<1x1x18x3xbf16, #tpu.memory_space<vmem>>, vector<1x1x16x3xbf16>
    %48 = vector.shape_cast %47 : vector<1x1x16x3xbf16> to vector<16x3xbf16>
    %c2_72 = arith.constant 2 : index
    %c2_73 = arith.constant 2 : index
    %c0_74 = arith.constant 0 : index
    %c0_75 = arith.constant 0 : index
    %49 = vector.load %arg6[%c2_72, %c2_73, %c0_74, %c0_75] : memref<3x3x3x64xbf16, #tpu.memory_space<vmem>>, vector<1x1x3x64xbf16>
    %50 = vector.shape_cast %49 : vector<1x1x3x64xbf16> to vector<3x64xbf16>
    %cst_76 = arith.constant dense<0.000000e+00> : vector<16x64xf32>
    %51 = tpu.matmul %48, %50, %cst_76 {dimension_numbers = #tpu.dot_dimension_numbers<[1], [0], [0], [1], [0, 0, 1, 1], [], []>} : vector<16x3xbf16>, vector<3x64xbf16>, vector<16x64xf32> -> vector<16x64xf32>
    %52 = arith.addf %46, %51 : vector<16x64xf32>
    %c0_77 = arith.constant 0 : index
    %c0_78 = arith.constant 0 : index
    %53 = vector.load %arg7[%c0_77, %c0_78] : memref<1x64xf32, #tpu.memory_space<vmem>>, vector<1x64xf32>
    %54 = vector.broadcast %53 : vector<1x64xf32> to vector<16x64xf32>
    %55 = arith.addf %52, %54 : vector<16x64xf32>
    %cst_79 = arith.constant 0.000000e+00 : f32
    %56 = vector.broadcast %cst_79 : f32 to vector<16x64xf32>
    %57 = arith.maximumf %55, %56 : vector<16x64xf32>
    %c0_80 = arith.constant 0 : index
    %c0_81 = arith.constant 0 : index
    %c0_82 = arith.constant 0 : index
    %c0_83 = arith.constant 0 : index
    %58 = vector.load %arg3[%c0_80, %c0_81, %c0_82, %c0_83] : memref<1x1x18x3xbf16, #tpu.memory_space<vmem>>, vector<1x1x16x3xbf16>
    %59 = vector.shape_cast %58 : vector<1x1x16x3xbf16> to vector<16x3xbf16>
    %c0_84 = arith.constant 0 : index
    %c0_85 = arith.constant 0 : index
    %c0_86 = arith.constant 0 : index
    %c0_87 = arith.constant 0 : index
    %60 = vector.load %arg6[%c0_84, %c0_85, %c0_86, %c0_87] : memref<3x3x3x64xbf16, #tpu.memory_space<vmem>>, vector<1x1x3x64xbf16>
    %61 = vector.shape_cast %60 : vector<1x1x3x64xbf16> to vector<3x64xbf16>
    %cst_88 = arith.constant dense<0.000000e+00> : vector<16x64xf32>
    %62 = tpu.matmul %59, %61, %cst_88 {dimension_numbers = #tpu.dot_dimension_numbers<[1], [0], [0], [1], [0, 0, 1, 1], [], []>} : vector<16x3xbf16>, vector<3x64xbf16>, vector<16x64xf32> -> vector<16x64xf32>
    %c0_89 = arith.constant 0 : index
    %c0_90 = arith.constant 0 : index
    %c1_91 = arith.constant 1 : index
    %c0_92 = arith.constant 0 : index
    %63 = vector.load %arg3[%c0_89, %c0_90, %c1_91, %c0_92] : memref<1x1x18x3xbf16, #tpu.memory_space<vmem>>, vector<1x1x16x3xbf16>
    %64 = vector.shape_cast %63 : vector<1x1x16x3xbf16> to vector<16x3xbf16>
    %c0_93 = arith.constant 0 : index
    %c1_94 = arith.constant 1 : index
    %c0_95 = arith.constant 0 : index
    %c0_96 = arith.constant 0 : index
    %65 = vector.load %arg6[%c0_93, %c1_94, %c0_95, %c0_96] : memref<3x3x3x64xbf16, #tpu.memory_space<vmem>>, vector<1x1x3x64xbf16>
    %66 = vector.shape_cast %65 : vector<1x1x3x64xbf16> to vector<3x64xbf16>
    %cst_97 = arith.constant dense<0.000000e+00> : vector<16x64xf32>
    %67 = tpu.matmul %64, %66, %cst_97 {dimension_numbers = #tpu.dot_dimension_numbers<[1], [0], [0], [1], [0, 0, 1, 1], [], []>} : vector<16x3xbf16>, vector<3x64xbf16>, vector<16x64xf32> -> vector<16x64xf32>
    %68 = arith.addf %62, %67 : vector<16x64xf32>
    %c0_98 = arith.constant 0 : index
    %c0_99 = arith.constant 0 : index
    %c2_100 = arith.constant 2 : index
    %c0_101 = arith.constant 0 : index
    %69 = vector.load %arg3[%c0_98, %c0_99, %c2_100, %c0_101] : memref<1x1x18x3xbf16, #tpu.memory_space<vmem>>, vector<1x1x16x3xbf16>
    %70 = vector.shape_cast %69 : vector<1x1x16x3xbf16> to vector<16x3xbf16>
    %c0_102 = arith.constant 0 : index
    %c2_103 = arith.constant 2 : index
    %c0_104 = arith.constant 0 : index
    %c0_105 = arith.constant 0 : index
    %71 = vector.load %arg6[%c0_102, %c2_103, %c0_104, %c0_105] : memref<3x3x3x64xbf16, #tpu.memory_space<vmem>>, vector<1x1x3x64xbf16>
    %72 = vector.shape_cast %71 : vector<1x1x3x64xbf16> to vector<3x64xbf16>
    %cst_106 = arith.constant dense<0.000000e+00> : vector<16x64xf32>
    %73 = tpu.matmul %70, %72, %cst_106 {dimension_numbers = #tpu.dot_dimension_numbers<[1], [0], [0], [1], [0, 0, 1, 1], [], []>} : vector<16x3xbf16>, vector<3x64xbf16>, vector<16x64xf32> -> vector<16x64xf32>
    %74 = arith.addf %68, %73 : vector<16x64xf32>
    %c0_107 = arith.constant 0 : index
    %c0_108 = arith.constant 0 : index
    %c0_109 = arith.constant 0 : index
    %c0_110 = arith.constant 0 : index
    %75 = vector.load %arg4[%c0_107, %c0_108, %c0_109, %c0_110] : memref<1x1x18x3xbf16, #tpu.memory_space<vmem>>, vector<1x1x16x3xbf16>
    %76 = vector.shape_cast %75 : vector<1x1x16x3xbf16> to vector<16x3xbf16>
    %c1_111 = arith.constant 1 : index
    %c0_112 = arith.constant 0 : index
    %c0_113 = arith.constant 0 : index
    %c0_114 = arith.constant 0 : index
    %77 = vector.load %arg6[%c1_111, %c0_112, %c0_113, %c0_114] : memref<3x3x3x64xbf16, #tpu.memory_space<vmem>>, vector<1x1x3x64xbf16>
    %78 = vector.shape_cast %77 : vector<1x1x3x64xbf16> to vector<3x64xbf16>
    %cst_115 = arith.constant dense<0.000000e+00> : vector<16x64xf32>
    %79 = tpu.matmul %76, %78, %cst_115 {dimension_numbers = #tpu.dot_dimension_numbers<[1], [0], [0], [1], [0, 0, 1, 1], [], []>} : vector<16x3xbf16>, vector<3x64xbf16>, vector<16x64xf32> -> vector<16x64xf32>
    %80 = arith.addf %74, %79 : vector<16x64xf32>
    %c0_116 = arith.constant 0 : index
    %c0_117 = arith.constant 0 : index
    %c1_118 = arith.constant 1 : index
    %c0_119 = arith.constant 0 : index
    %81 = vector.load %arg4[%c0_116, %c0_117, %c1_118, %c0_119] : memref<1x1x18x3xbf16, #tpu.memory_space<vmem>>, vector<1x1x16x3xbf16>
    %82 = vector.shape_cast %81 : vector<1x1x16x3xbf16> to vector<16x3xbf16>
    %c1_120 = arith.constant 1 : index
    %c1_121 = arith.constant 1 : index
    %c0_122 = arith.constant 0 : index
    %c0_123 = arith.constant 0 : index
    %83 = vector.load %arg6[%c1_120, %c1_121, %c0_122, %c0_123] : memref<3x3x3x64xbf16, #tpu.memory_space<vmem>>, vector<1x1x3x64xbf16>
    %84 = vector.shape_cast %83 : vector<1x1x3x64xbf16> to vector<3x64xbf16>
    %cst_124 = arith.constant dense<0.000000e+00> : vector<16x64xf32>
    %85 = tpu.matmul %82, %84, %cst_124 {dimension_numbers = #tpu.dot_dimension_numbers<[1], [0], [0], [1], [0, 0, 1, 1], [], []>} : vector<16x3xbf16>, vector<3x64xbf16>, vector<16x64xf32> -> vector<16x64xf32>
    %86 = arith.addf %80, %85 : vector<16x64xf32>
    %c0_125 = arith.constant 0 : index
    %c0_126 = arith.constant 0 : index
    %c2_127 = arith.constant 2 : index
    %c0_128 = arith.constant 0 : index
    %87 = vector.load %arg4[%c0_125, %c0_126, %c2_127, %c0_128] : memref<1x1x18x3xbf16, #tpu.memory_space<vmem>>, vector<1x1x16x3xbf16>
    %88 = vector.shape_cast %87 : vector<1x1x16x3xbf16> to vector<16x3xbf16>
    %c1_129 = arith.constant 1 : index
    %c2_130 = arith.constant 2 : index
    %c0_131 = arith.constant 0 : index
    %c0_132 = arith.constant 0 : index
    %89 = vector.load %arg6[%c1_129, %c2_130, %c0_131, %c0_132] : memref<3x3x3x64xbf16, #tpu.memory_space<vmem>>, vector<1x1x3x64xbf16>
    %90 = vector.shape_cast %89 : vector<1x1x3x64xbf16> to vector<3x64xbf16>
    %cst_133 = arith.constant dense<0.000000e+00> : vector<16x64xf32>
    %91 = tpu.matmul %88, %90, %cst_133 {dimension_numbers = #tpu.dot_dimension_numbers<[1], [0], [0], [1], [0, 0, 1, 1], [], []>} : vector<16x3xbf16>, vector<3x64xbf16>, vector<16x64xf32> -> vector<16x64xf32>
    %92 = arith.addf %86, %91 : vector<16x64xf32>
    %c0_134 = arith.constant 0 : index
    %c0_135 = arith.constant 0 : index
    %c0_136 = arith.constant 0 : index
    %c0_137 = arith.constant 0 : index
    %93 = vector.load %arg5[%c0_134, %c0_135, %c0_136, %c0_137] : memref<1x1x18x3xbf16, #tpu.memory_space<vmem>>, vector<1x1x16x3xbf16>
    %94 = vector.shape_cast %93 : vector<1x1x16x3xbf16> to vector<16x3xbf16>
    %c2_138 = arith.constant 2 : index
    %c0_139 = arith.constant 0 : index
    %c0_140 = arith.constant 0 : index
    %c0_141 = arith.constant 0 : index
    %95 = vector.load %arg6[%c2_138, %c0_139, %c0_140, %c0_141] : memref<3x3x3x64xbf16, #tpu.memory_space<vmem>>, vector<1x1x3x64xbf16>
    %96 = vector.shape_cast %95 : vector<1x1x3x64xbf16> to vector<3x64xbf16>
    %cst_142 = arith.constant dense<0.000000e+00> : vector<16x64xf32>
    %97 = tpu.matmul %94, %96, %cst_142 {dimension_numbers = #tpu.dot_dimension_numbers<[1], [0], [0], [1], [0, 0, 1, 1], [], []>} : vector<16x3xbf16>, vector<3x64xbf16>, vector<16x64xf32> -> vector<16x64xf32>
    %98 = arith.addf %92, %97 : vector<16x64xf32>
    %c0_143 = arith.constant 0 : index
    %c0_144 = arith.constant 0 : index
    %c1_145 = arith.constant 1 : index
    %c0_146 = arith.constant 0 : index
    %99 = vector.load %arg5[%c0_143, %c0_144, %c1_145, %c0_146] : memref<1x1x18x3xbf16, #tpu.memory_space<vmem>>, vector<1x1x16x3xbf16>
    %100 = vector.shape_cast %99 : vector<1x1x16x3xbf16> to vector<16x3xbf16>
    %c2_147 = arith.constant 2 : index
    %c1_148 = arith.constant 1 : index
    %c0_149 = arith.constant 0 : index
    %c0_150 = arith.constant 0 : index
    %101 = vector.load %arg6[%c2_147, %c1_148, %c0_149, %c0_150] : memref<3x3x3x64xbf16, #tpu.memory_space<vmem>>, vector<1x1x3x64xbf16>
    %102 = vector.shape_cast %101 : vector<1x1x3x64xbf16> to vector<3x64xbf16>
    %cst_151 = arith.constant dense<0.000000e+00> : vector<16x64xf32>
    %103 = tpu.matmul %100, %102, %cst_151 {dimension_numbers = #tpu.dot_dimension_numbers<[1], [0], [0], [1], [0, 0, 1, 1], [], []>} : vector<16x3xbf16>, vector<3x64xbf16>, vector<16x64xf32> -> vector<16x64xf32>
    %104 = arith.addf %98, %103 : vector<16x64xf32>
    %c0_152 = arith.constant 0 : index
    %c0_153 = arith.constant 0 : index
    %c2_154 = arith.constant 2 : index
    %c0_155 = arith.constant 0 : index
    %105 = vector.load %arg5[%c0_152, %c0_153, %c2_154, %c0_155] : memref<1x1x18x3xbf16, #tpu.memory_space<vmem>>, vector<1x1x16x3xbf16>
    %106 = vector.shape_cast %105 : vector<1x1x16x3xbf16> to vector<16x3xbf16>
    %c2_156 = arith.constant 2 : index
    %c2_157 = arith.constant 2 : index
    %c0_158 = arith.constant 0 : index
    %c0_159 = arith.constant 0 : index
    %107 = vector.load %arg6[%c2_156, %c2_157, %c0_158, %c0_159] : memref<3x3x3x64xbf16, #tpu.memory_space<vmem>>, vector<1x1x3x64xbf16>
    %108 = vector.shape_cast %107 : vector<1x1x3x64xbf16> to vector<3x64xbf16>
    %cst_160 = arith.constant dense<0.000000e+00> : vector<16x64xf32>
    %109 = tpu.matmul %106, %108, %cst_160 {dimension_numbers = #tpu.dot_dimension_numbers<[1], [0], [0], [1], [0, 0, 1, 1], [], []>} : vector<16x3xbf16>, vector<3x64xbf16>, vector<16x64xf32> -> vector<16x64xf32>
    %110 = arith.addf %104, %109 : vector<16x64xf32>
    %c0_161 = arith.constant 0 : index
    %c0_162 = arith.constant 0 : index
    %111 = vector.load %arg7[%c0_161, %c0_162] : memref<1x64xf32, #tpu.memory_space<vmem>>, vector<1x64xf32>
    %112 = vector.broadcast %111 : vector<1x64xf32> to vector<16x64xf32>
    %113 = arith.addf %110, %112 : vector<16x64xf32>
    %cst_163 = arith.constant 0.000000e+00 : f32
    %114 = vector.broadcast %cst_163 : f32 to vector<16x64xf32>
    %115 = arith.maximumf %113, %114 : vector<16x64xf32>
    %116 = arith.maximumf %57, %115 : vector<16x64xf32>
    %117 = arith.truncf %116 : vector<16x64xf32> to vector<16x64xbf16>
    %c0_164 = arith.constant 0 : index
    %c0_165 = arith.constant 0 : index
    %c0_166 = arith.constant 0 : index
    %c0_167 = arith.constant 0 : index
    %118 = vector.load %arg8[%c0_164, %c0_165, %c0_166, %c0_167] : memref<1x1x16x64xbf16, #tpu.memory_space<vmem>>, vector<1x1x16x64xbf16>
    %119 = vector.shape_cast %118 : vector<1x1x16x64xbf16> to vector<16x64xbf16>
    %120 = vector.shape_cast %117 : vector<16x64xbf16> to vector<1x1x16x64xbf16>
    tpu.vector_store %arg8[%c0_164, %c0_165, %c0_166, %c0_167], %120 {strides = array<i32>} : memref<1x1x16x64xbf16, #tpu.memory_space<vmem>>, vector<1x1x16x64xbf16>,
    return
  }
  func.func @transform_0(%arg0: i32, %arg1: i32) -> (i32, i32, i32, i32) {
    %c2_i32 = arith.constant 2 : i32
    %0 = arith.muli %c2_i32, %arg1 : i32
    %c0_i32 = arith.constant 0 : i32
    %1 = arith.addi %0, %c0_i32 : i32
    %c0_i32_0 = arith.constant 0 : i32
    %c0_i32_1 = arith.constant 0 : i32
    %c0_i32_2 = arith.constant 0 : i32
    return %arg0, %1, %c0_i32_0, %c0_i32_1 : i32, i32, i32, i32
  }
  func.func @transform_1(%arg0: i32, %arg1: i32) -> (i32, i32, i32, i32) {
    %c2_i32 = arith.constant 2 : i32
    %0 = arith.muli %c2_i32, %arg1 : i32
    %c1_i32 = arith.constant 1 : i32
    %1 = arith.addi %0, %c1_i32 : i32
    %c0_i32 = arith.constant 0 : i32
    %c0_i32_0 = arith.constant 0 : i32
    %c0_i32_1 = arith.constant 0 : i32
    return %arg0, %1, %c0_i32, %c0_i32_0 : i32, i32, i32, i32
  }
  func.func @transform_2(%arg0: i32, %arg1: i32) -> (i32, i32, i32, i32) {
    %c2_i32 = arith.constant 2 : i32
    %0 = arith.muli %c2_i32, %arg1 : i32
    %c2_i32_0 = arith.constant 2 : i32
    %1 = arith.addi %0, %c2_i32_0 : i32
    %c0_i32 = arith.constant 0 : i32
    %c0_i32_1 = arith.constant 0 : i32
    %c0_i32_2 = arith.constant 0 : i32
    return %arg0, %1, %c0_i32, %c0_i32_1 : i32, i32, i32, i32
  }
  func.func @transform_3(%arg0: i32, %arg1: i32) -> (i32, i32, i32, i32) {
    %c2_i32 = arith.constant 2 : i32
    %0 = arith.muli %c2_i32, %arg1 : i32
    %c3_i32 = arith.constant 3 : i32
    %1 = arith.addi %0, %c3_i32 : i32
    %c0_i32 = arith.constant 0 : i32
    %c0_i32_0 = arith.constant 0 : i32
    %c0_i32_1 = arith.constant 0 : i32
    return %arg0, %1, %c0_i32, %c0_i32_0 : i32, i32, i32, i32
  }
  func.func @transform_4(%arg0: i32, %arg1: i32) -> (i32, i32, i32, i32) {
    %c0_i32 = arith.constant 0 : i32
    %c0_i32_0 = arith.constant 0 : i32
    %c0_i32_1 = arith.constant 0 : i32
    %c0_i32_2 = arith.constant 0 : i32
    %c0_i32_3 = arith.constant 0 : i32
    return %c0_i32, %c0_i32_0, %c0_i32_1, %c0_i32_2 : i32, i32, i32, i32
  }
  func.func @transform_5(%arg0: i32, %arg1: i32) -> (i32, i32) {
    %c0_i32 = arith.constant 0 : i32
    %c0_i32_0 = arith.constant 0 : i32
    %c0_i32_1 = arith.constant 0 : i32
    return %c0_i32, %c0_i32_0 : i32, i32
  }
  func.func @transform_6(%arg0: i32, %arg1: i32) -> (i32, i32, i32, i32) {
    %c0_i32 = arith.constant 0 : i32
    %c0_i32_0 = arith.constant 0 : i32
    %c0_i32_1 = arith.constant 0 : i32
    return %arg0, %arg1, %c0_i32, %c0_i32_0 : i32, i32, i32, i32
  }
}

module attributes {stable_mosaic.version = 11 : i64} {
  func.func @_conv3x3_kernel(%arg0: i32, %arg1: i32, %arg2: memref<1x1x10x64xbf16, #tpu.memory_space<vmem>>, %arg3: memref<1x1x10x64xbf16, #tpu.memory_space<vmem>>, %arg4: memref<1x1x10x64xbf16, #tpu.memory_space<vmem>>, %arg5: memref<1x1x10x64xbf16, #tpu.memory_space<vmem>>, %arg6: memref<3x3x64x128xbf16, #tpu.memory_space<vmem>>, %arg7: memref<1x128xf32, #tpu.memory_space<vmem>>, %arg8: memref<1x1x8x128xbf16, #tpu.memory_space<vmem>>) attributes {dimension_semantics = [#tpu.dimension_semantics<parallel>, #tpu.dimension_semantics<parallel>], iteration_bounds = array<i64: 2, 4>, scalar_prefetch = 0 : i64, scratch_operands = 0 : i64, tpu.core_type = #tpu.core_type<tc>, window_params = [{transform_indices = @transform_0, window_bounds = array<i64: 1, 1, 10, 64>}, {transform_indices = @transform_1, window_bounds = array<i64: 1, 1, 10, 64>}, {transform_indices = @transform_2, window_bounds = array<i64: 1, 1, 10, 64>}, {transform_indices = @transform_3, window_bounds = array<i64: 1, 1, 10, 64>}, {pipeline_mode = #tpu.pipeline_mode<synchronous>, transform_indices = @transform_4, window_bounds = array<i64: 3, 3, 64, 128>}, {pipeline_mode = #tpu.pipeline_mode<synchronous>, transform_indices = @transform_5, window_bounds = array<i64: 1, 128>}, {transform_indices = @transform_6, window_bounds = array<i64: 1, 1, 8, 128>}]} {
    %c0 = arith.constant 0 : index
    %c0_0 = arith.constant 0 : index
    %c0_1 = arith.constant 0 : index
    %c0_2 = arith.constant 0 : index
    %0 = vector.load %arg2[%c0, %c0_0, %c0_1, %c0_2] : memref<1x1x10x64xbf16, #tpu.memory_space<vmem>>, vector<1x1x8x64xbf16>
    %1 = vector.shape_cast %0 : vector<1x1x8x64xbf16> to vector<8x64xbf16>
    %c0_3 = arith.constant 0 : index
    %c0_4 = arith.constant 0 : index
    %c0_5 = arith.constant 0 : index
    %c0_6 = arith.constant 0 : index
    %2 = vector.load %arg6[%c0_3, %c0_4, %c0_5, %c0_6] : memref<3x3x64x128xbf16, #tpu.memory_space<vmem>>, vector<1x1x64x128xbf16>
    %3 = vector.shape_cast %2 : vector<1x1x64x128xbf16> to vector<64x128xbf16>
    %cst = arith.constant dense<0.000000e+00> : vector<8x128xf32>
    %4 = tpu.matmul %1, %3, %cst {dimension_numbers = #tpu.dot_dimension_numbers<[1], [0], [0], [1], [0, 0, 1, 1], [], []>} : vector<8x64xbf16>, vector<64x128xbf16>, vector<8x128xf32> -> vector<8x128xf32>
    %c0_7 = arith.constant 0 : index
    %c0_8 = arith.constant 0 : index
    %c1 = arith.constant 1 : index
    %c0_9 = arith.constant 0 : index
    %5 = vector.load %arg2[%c0_7, %c0_8, %c1, %c0_9] : memref<1x1x10x64xbf16, #tpu.memory_space<vmem>>, vector<1x1x8x64xbf16>
    %6 = vector.shape_cast %5 : vector<1x1x8x64xbf16> to vector<8x64xbf16>
    %c0_10 = arith.constant 0 : index
    %c1_11 = arith.constant 1 : index
    %c0_12 = arith.constant 0 : index
    %c0_13 = arith.constant 0 : index
    %7 = vector.load %arg6[%c0_10, %c1_11, %c0_12, %c0_13] : memref<3x3x64x128xbf16, #tpu.memory_space<vmem>>, vector<1x1x64x128xbf16>
    %8 = vector.shape_cast %7 : vector<1x1x64x128xbf16> to vector<64x128xbf16>
    %cst_14 = arith.constant dense<0.000000e+00> : vector<8x128xf32>
    %9 = tpu.matmul %6, %8, %cst_14 {dimension_numbers = #tpu.dot_dimension_numbers<[1], [0], [0], [1], [0, 0, 1, 1], [], []>} : vector<8x64xbf16>, vector<64x128xbf16>, vector<8x128xf32> -> vector<8x128xf32>
    %10 = arith.addf %4, %9 : vector<8x128xf32>
    %c0_15 = arith.constant 0 : index
    %c0_16 = arith.constant 0 : index
    %c2 = arith.constant 2 : index
    %c0_17 = arith.constant 0 : index
    %11 = vector.load %arg2[%c0_15, %c0_16, %c2, %c0_17] : memref<1x1x10x64xbf16, #tpu.memory_space<vmem>>, vector<1x1x8x64xbf16>
    %12 = vector.shape_cast %11 : vector<1x1x8x64xbf16> to vector<8x64xbf16>
    %c0_18 = arith.constant 0 : index
    %c2_19 = arith.constant 2 : index
    %c0_20 = arith.constant 0 : index
    %c0_21 = arith.constant 0 : index
    %13 = vector.load %arg6[%c0_18, %c2_19, %c0_20, %c0_21] : memref<3x3x64x128xbf16, #tpu.memory_space<vmem>>, vector<1x1x64x128xbf16>
    %14 = vector.shape_cast %13 : vector<1x1x64x128xbf16> to vector<64x128xbf16>
    %cst_22 = arith.constant dense<0.000000e+00> : vector<8x128xf32>
    %15 = tpu.matmul %12, %14, %cst_22 {dimension_numbers = #tpu.dot_dimension_numbers<[1], [0], [0], [1], [0, 0, 1, 1], [], []>} : vector<8x64xbf16>, vector<64x128xbf16>, vector<8x128xf32> -> vector<8x128xf32>
    %16 = arith.addf %10, %15 : vector<8x128xf32>
    %c0_23 = arith.constant 0 : index
    %c0_24 = arith.constant 0 : index
    %c0_25 = arith.constant 0 : index
    %c0_26 = arith.constant 0 : index
    %17 = vector.load %arg3[%c0_23, %c0_24, %c0_25, %c0_26] : memref<1x1x10x64xbf16, #tpu.memory_space<vmem>>, vector<1x1x8x64xbf16>
    %18 = vector.shape_cast %17 : vector<1x1x8x64xbf16> to vector<8x64xbf16>
    %c1_27 = arith.constant 1 : index
    %c0_28 = arith.constant 0 : index
    %c0_29 = arith.constant 0 : index
    %c0_30 = arith.constant 0 : index
    %19 = vector.load %arg6[%c1_27, %c0_28, %c0_29, %c0_30] : memref<3x3x64x128xbf16, #tpu.memory_space<vmem>>, vector<1x1x64x128xbf16>
    %20 = vector.shape_cast %19 : vector<1x1x64x128xbf16> to vector<64x128xbf16>
    %cst_31 = arith.constant dense<0.000000e+00> : vector<8x128xf32>
    %21 = tpu.matmul %18, %20, %cst_31 {dimension_numbers = #tpu.dot_dimension_numbers<[1], [0], [0], [1], [0, 0, 1, 1], [], []>} : vector<8x64xbf16>, vector<64x128xbf16>, vector<8x128xf32> -> vector<8x128xf32>
    %22 = arith.addf %16, %21 : vector<8x128xf32>
    %c0_32 = arith.constant 0 : index
    %c0_33 = arith.constant 0 : index
    %c1_34 = arith.constant 1 : index
    %c0_35 = arith.constant 0 : index
    %23 = vector.load %arg3[%c0_32, %c0_33, %c1_34, %c0_35] : memref<1x1x10x64xbf16, #tpu.memory_space<vmem>>, vector<1x1x8x64xbf16>
    %24 = vector.shape_cast %23 : vector<1x1x8x64xbf16> to vector<8x64xbf16>
    %c1_36 = arith.constant 1 : index
    %c1_37 = arith.constant 1 : index
    %c0_38 = arith.constant 0 : index
    %c0_39 = arith.constant 0 : index
    %25 = vector.load %arg6[%c1_36, %c1_37, %c0_38, %c0_39] : memref<3x3x64x128xbf16, #tpu.memory_space<vmem>>, vector<1x1x64x128xbf16>
    %26 = vector.shape_cast %25 : vector<1x1x64x128xbf16> to vector<64x128xbf16>
    %cst_40 = arith.constant dense<0.000000e+00> : vector<8x128xf32>
    %27 = tpu.matmul %24, %26, %cst_40 {dimension_numbers = #tpu.dot_dimension_numbers<[1], [0], [0], [1], [0, 0, 1, 1], [], []>} : vector<8x64xbf16>, vector<64x128xbf16>, vector<8x128xf32> -> vector<8x128xf32>
    %28 = arith.addf %22, %27 : vector<8x128xf32>
    %c0_41 = arith.constant 0 : index
    %c0_42 = arith.constant 0 : index
    %c2_43 = arith.constant 2 : index
    %c0_44 = arith.constant 0 : index
    %29 = vector.load %arg3[%c0_41, %c0_42, %c2_43, %c0_44] : memref<1x1x10x64xbf16, #tpu.memory_space<vmem>>, vector<1x1x8x64xbf16>
    %30 = vector.shape_cast %29 : vector<1x1x8x64xbf16> to vector<8x64xbf16>
    %c1_45 = arith.constant 1 : index
    %c2_46 = arith.constant 2 : index
    %c0_47 = arith.constant 0 : index
    %c0_48 = arith.constant 0 : index
    %31 = vector.load %arg6[%c1_45, %c2_46, %c0_47, %c0_48] : memref<3x3x64x128xbf16, #tpu.memory_space<vmem>>, vector<1x1x64x128xbf16>
    %32 = vector.shape_cast %31 : vector<1x1x64x128xbf16> to vector<64x128xbf16>
    %cst_49 = arith.constant dense<0.000000e+00> : vector<8x128xf32>
    %33 = tpu.matmul %30, %32, %cst_49 {dimension_numbers = #tpu.dot_dimension_numbers<[1], [0], [0], [1], [0, 0, 1, 1], [], []>} : vector<8x64xbf16>, vector<64x128xbf16>, vector<8x128xf32> -> vector<8x128xf32>
    %34 = arith.addf %28, %33 : vector<8x128xf32>
    %c0_50 = arith.constant 0 : index
    %c0_51 = arith.constant 0 : index
    %c0_52 = arith.constant 0 : index
    %c0_53 = arith.constant 0 : index
    %35 = vector.load %arg4[%c0_50, %c0_51, %c0_52, %c0_53] : memref<1x1x10x64xbf16, #tpu.memory_space<vmem>>, vector<1x1x8x64xbf16>
    %36 = vector.shape_cast %35 : vector<1x1x8x64xbf16> to vector<8x64xbf16>
    %c2_54 = arith.constant 2 : index
    %c0_55 = arith.constant 0 : index
    %c0_56 = arith.constant 0 : index
    %c0_57 = arith.constant 0 : index
    %37 = vector.load %arg6[%c2_54, %c0_55, %c0_56, %c0_57] : memref<3x3x64x128xbf16, #tpu.memory_space<vmem>>, vector<1x1x64x128xbf16>
    %38 = vector.shape_cast %37 : vector<1x1x64x128xbf16> to vector<64x128xbf16>
    %cst_58 = arith.constant dense<0.000000e+00> : vector<8x128xf32>
    %39 = tpu.matmul %36, %38, %cst_58 {dimension_numbers = #tpu.dot_dimension_numbers<[1], [0], [0], [1], [0, 0, 1, 1], [], []>} : vector<8x64xbf16>, vector<64x128xbf16>, vector<8x128xf32> -> vector<8x128xf32>
    %40 = arith.addf %34, %39 : vector<8x128xf32>
    %c0_59 = arith.constant 0 : index
    %c0_60 = arith.constant 0 : index
    %c1_61 = arith.constant 1 : index
    %c0_62 = arith.constant 0 : index
    %41 = vector.load %arg4[%c0_59, %c0_60, %c1_61, %c0_62] : memref<1x1x10x64xbf16, #tpu.memory_space<vmem>>, vector<1x1x8x64xbf16>
    %42 = vector.shape_cast %41 : vector<1x1x8x64xbf16> to vector<8x64xbf16>
    %c2_63 = arith.constant 2 : index
    %c1_64 = arith.constant 1 : index
    %c0_65 = arith.constant 0 : index
    %c0_66 = arith.constant 0 : index
    %43 = vector.load %arg6[%c2_63, %c1_64, %c0_65, %c0_66] : memref<3x3x64x128xbf16, #tpu.memory_space<vmem>>, vector<1x1x64x128xbf16>
    %44 = vector.shape_cast %43 : vector<1x1x64x128xbf16> to vector<64x128xbf16>
    %cst_67 = arith.constant dense<0.000000e+00> : vector<8x128xf32>
    %45 = tpu.matmul %42, %44, %cst_67 {dimension_numbers = #tpu.dot_dimension_numbers<[1], [0], [0], [1], [0, 0, 1, 1], [], []>} : vector<8x64xbf16>, vector<64x128xbf16>, vector<8x128xf32> -> vector<8x128xf32>
    %46 = arith.addf %40, %45 : vector<8x128xf32>
    %c0_68 = arith.constant 0 : index
    %c0_69 = arith.constant 0 : index
    %c2_70 = arith.constant 2 : index
    %c0_71 = arith.constant 0 : index
    %47 = vector.load %arg4[%c0_68, %c0_69, %c2_70, %c0_71] : memref<1x1x10x64xbf16, #tpu.memory_space<vmem>>, vector<1x1x8x64xbf16>
    %48 = vector.shape_cast %47 : vector<1x1x8x64xbf16> to vector<8x64xbf16>
    %c2_72 = arith.constant 2 : index
    %c2_73 = arith.constant 2 : index
    %c0_74 = arith.constant 0 : index
    %c0_75 = arith.constant 0 : index
    %49 = vector.load %arg6[%c2_72, %c2_73, %c0_74, %c0_75] : memref<3x3x64x128xbf16, #tpu.memory_space<vmem>>, vector<1x1x64x128xbf16>
    %50 = vector.shape_cast %49 : vector<1x1x64x128xbf16> to vector<64x128xbf16>
    %cst_76 = arith.constant dense<0.000000e+00> : vector<8x128xf32>
    %51 = tpu.matmul %48, %50, %cst_76 {dimension_numbers = #tpu.dot_dimension_numbers<[1], [0], [0], [1], [0, 0, 1, 1], [], []>} : vector<8x64xbf16>, vector<64x128xbf16>, vector<8x128xf32> -> vector<8x128xf32>
    %52 = arith.addf %46, %51 : vector<8x128xf32>
    %c0_77 = arith.constant 0 : index
    %c0_78 = arith.constant 0 : index
    %53 = vector.load %arg7[%c0_77, %c0_78] : memref<1x128xf32, #tpu.memory_space<vmem>>, vector<1x128xf32>
    %54 = vector.broadcast %53 : vector<1x128xf32> to vector<8x128xf32>
    %55 = arith.addf %52, %54 : vector<8x128xf32>
    %cst_79 = arith.constant 0.000000e+00 : f32
    %56 = vector.broadcast %cst_79 : f32 to vector<8x128xf32>
    %57 = arith.maximumf %55, %56 : vector<8x128xf32>
    %c0_80 = arith.constant 0 : index
    %c0_81 = arith.constant 0 : index
    %c0_82 = arith.constant 0 : index
    %c0_83 = arith.constant 0 : index
    %58 = vector.load %arg3[%c0_80, %c0_81, %c0_82, %c0_83] : memref<1x1x10x64xbf16, #tpu.memory_space<vmem>>, vector<1x1x8x64xbf16>
    %59 = vector.shape_cast %58 : vector<1x1x8x64xbf16> to vector<8x64xbf16>
    %c0_84 = arith.constant 0 : index
    %c0_85 = arith.constant 0 : index
    %c0_86 = arith.constant 0 : index
    %c0_87 = arith.constant 0 : index
    %60 = vector.load %arg6[%c0_84, %c0_85, %c0_86, %c0_87] : memref<3x3x64x128xbf16, #tpu.memory_space<vmem>>, vector<1x1x64x128xbf16>
    %61 = vector.shape_cast %60 : vector<1x1x64x128xbf16> to vector<64x128xbf16>
    %cst_88 = arith.constant dense<0.000000e+00> : vector<8x128xf32>
    %62 = tpu.matmul %59, %61, %cst_88 {dimension_numbers = #tpu.dot_dimension_numbers<[1], [0], [0], [1], [0, 0, 1, 1], [], []>} : vector<8x64xbf16>, vector<64x128xbf16>, vector<8x128xf32> -> vector<8x128xf32>
    %c0_89 = arith.constant 0 : index
    %c0_90 = arith.constant 0 : index
    %c1_91 = arith.constant 1 : index
    %c0_92 = arith.constant 0 : index
    %63 = vector.load %arg3[%c0_89, %c0_90, %c1_91, %c0_92] : memref<1x1x10x64xbf16, #tpu.memory_space<vmem>>, vector<1x1x8x64xbf16>
    %64 = vector.shape_cast %63 : vector<1x1x8x64xbf16> to vector<8x64xbf16>
    %c0_93 = arith.constant 0 : index
    %c1_94 = arith.constant 1 : index
    %c0_95 = arith.constant 0 : index
    %c0_96 = arith.constant 0 : index
    %65 = vector.load %arg6[%c0_93, %c1_94, %c0_95, %c0_96] : memref<3x3x64x128xbf16, #tpu.memory_space<vmem>>, vector<1x1x64x128xbf16>
    %66 = vector.shape_cast %65 : vector<1x1x64x128xbf16> to vector<64x128xbf16>
    %cst_97 = arith.constant dense<0.000000e+00> : vector<8x128xf32>
    %67 = tpu.matmul %64, %66, %cst_97 {dimension_numbers = #tpu.dot_dimension_numbers<[1], [0], [0], [1], [0, 0, 1, 1], [], []>} : vector<8x64xbf16>, vector<64x128xbf16>, vector<8x128xf32> -> vector<8x128xf32>
    %68 = arith.addf %62, %67 : vector<8x128xf32>
    %c0_98 = arith.constant 0 : index
    %c0_99 = arith.constant 0 : index
    %c2_100 = arith.constant 2 : index
    %c0_101 = arith.constant 0 : index
    %69 = vector.load %arg3[%c0_98, %c0_99, %c2_100, %c0_101] : memref<1x1x10x64xbf16, #tpu.memory_space<vmem>>, vector<1x1x8x64xbf16>
    %70 = vector.shape_cast %69 : vector<1x1x8x64xbf16> to vector<8x64xbf16>
    %c0_102 = arith.constant 0 : index
    %c2_103 = arith.constant 2 : index
    %c0_104 = arith.constant 0 : index
    %c0_105 = arith.constant 0 : index
    %71 = vector.load %arg6[%c0_102, %c2_103, %c0_104, %c0_105] : memref<3x3x64x128xbf16, #tpu.memory_space<vmem>>, vector<1x1x64x128xbf16>
    %72 = vector.shape_cast %71 : vector<1x1x64x128xbf16> to vector<64x128xbf16>
    %cst_106 = arith.constant dense<0.000000e+00> : vector<8x128xf32>
    %73 = tpu.matmul %70, %72, %cst_106 {dimension_numbers = #tpu.dot_dimension_numbers<[1], [0], [0], [1], [0, 0, 1, 1], [], []>} : vector<8x64xbf16>, vector<64x128xbf16>, vector<8x128xf32> -> vector<8x128xf32>
    %74 = arith.addf %68, %73 : vector<8x128xf32>
    %c0_107 = arith.constant 0 : index
    %c0_108 = arith.constant 0 : index
    %c0_109 = arith.constant 0 : index
    %c0_110 = arith.constant 0 : index
    %75 = vector.load %arg4[%c0_107, %c0_108, %c0_109, %c0_110] : memref<1x1x10x64xbf16, #tpu.memory_space<vmem>>, vector<1x1x8x64xbf16>
    %76 = vector.shape_cast %75 : vector<1x1x8x64xbf16> to vector<8x64xbf16>
    %c1_111 = arith.constant 1 : index
    %c0_112 = arith.constant 0 : index
    %c0_113 = arith.constant 0 : index
    %c0_114 = arith.constant 0 : index
    %77 = vector.load %arg6[%c1_111, %c0_112, %c0_113, %c0_114] : memref<3x3x64x128xbf16, #tpu.memory_space<vmem>>, vector<1x1x64x128xbf16>
    %78 = vector.shape_cast %77 : vector<1x1x64x128xbf16> to vector<64x128xbf16>
    %cst_115 = arith.constant dense<0.000000e+00> : vector<8x128xf32>
    %79 = tpu.matmul %76, %78, %cst_115 {dimension_numbers = #tpu.dot_dimension_numbers<[1], [0], [0], [1], [0, 0, 1, 1], [], []>} : vector<8x64xbf16>, vector<64x128xbf16>, vector<8x128xf32> -> vector<8x128xf32>
    %80 = arith.addf %74, %79 : vector<8x128xf32>
    %c0_116 = arith.constant 0 : index
    %c0_117 = arith.constant 0 : index
    %c1_118 = arith.constant 1 : index
    %c0_119 = arith.constant 0 : index
    %81 = vector.load %arg4[%c0_116, %c0_117, %c1_118, %c0_119] : memref<1x1x10x64xbf16, #tpu.memory_space<vmem>>, vector<1x1x8x64xbf16>
    %82 = vector.shape_cast %81 : vector<1x1x8x64xbf16> to vector<8x64xbf16>
    %c1_120 = arith.constant 1 : index
    %c1_121 = arith.constant 1 : index
    %c0_122 = arith.constant 0 : index
    %c0_123 = arith.constant 0 : index
    %83 = vector.load %arg6[%c1_120, %c1_121, %c0_122, %c0_123] : memref<3x3x64x128xbf16, #tpu.memory_space<vmem>>, vector<1x1x64x128xbf16>
    %84 = vector.shape_cast %83 : vector<1x1x64x128xbf16> to vector<64x128xbf16>
    %cst_124 = arith.constant dense<0.000000e+00> : vector<8x128xf32>
    %85 = tpu.matmul %82, %84, %cst_124 {dimension_numbers = #tpu.dot_dimension_numbers<[1], [0], [0], [1], [0, 0, 1, 1], [], []>} : vector<8x64xbf16>, vector<64x128xbf16>, vector<8x128xf32> -> vector<8x128xf32>
    %86 = arith.addf %80, %85 : vector<8x128xf32>
    %c0_125 = arith.constant 0 : index
    %c0_126 = arith.constant 0 : index
    %c2_127 = arith.constant 2 : index
    %c0_128 = arith.constant 0 : index
    %87 = vector.load %arg4[%c0_125, %c0_126, %c2_127, %c0_128] : memref<1x1x10x64xbf16, #tpu.memory_space<vmem>>, vector<1x1x8x64xbf16>
    %88 = vector.shape_cast %87 : vector<1x1x8x64xbf16> to vector<8x64xbf16>
    %c1_129 = arith.constant 1 : index
    %c2_130 = arith.constant 2 : index
    %c0_131 = arith.constant 0 : index
    %c0_132 = arith.constant 0 : index
    %89 = vector.load %arg6[%c1_129, %c2_130, %c0_131, %c0_132] : memref<3x3x64x128xbf16, #tpu.memory_space<vmem>>, vector<1x1x64x128xbf16>
    %90 = vector.shape_cast %89 : vector<1x1x64x128xbf16> to vector<64x128xbf16>
    %cst_133 = arith.constant dense<0.000000e+00> : vector<8x128xf32>
    %91 = tpu.matmul %88, %90, %cst_133 {dimension_numbers = #tpu.dot_dimension_numbers<[1], [0], [0], [1], [0, 0, 1, 1], [], []>} : vector<8x64xbf16>, vector<64x128xbf16>, vector<8x128xf32> -> vector<8x128xf32>
    %92 = arith.addf %86, %91 : vector<8x128xf32>
    %c0_134 = arith.constant 0 : index
    %c0_135 = arith.constant 0 : index
    %c0_136 = arith.constant 0 : index
    %c0_137 = arith.constant 0 : index
    %93 = vector.load %arg5[%c0_134, %c0_135, %c0_136, %c0_137] : memref<1x1x10x64xbf16, #tpu.memory_space<vmem>>, vector<1x1x8x64xbf16>
    %94 = vector.shape_cast %93 : vector<1x1x8x64xbf16> to vector<8x64xbf16>
    %c2_138 = arith.constant 2 : index
    %c0_139 = arith.constant 0 : index
    %c0_140 = arith.constant 0 : index
    %c0_141 = arith.constant 0 : index
    %95 = vector.load %arg6[%c2_138, %c0_139, %c0_140, %c0_141] : memref<3x3x64x128xbf16, #tpu.memory_space<vmem>>, vector<1x1x64x128xbf16>
    %96 = vector.shape_cast %95 : vector<1x1x64x128xbf16> to vector<64x128xbf16>
    %cst_142 = arith.constant dense<0.000000e+00> : vector<8x128xf32>
    %97 = tpu.matmul %94, %96, %cst_142 {dimension_numbers = #tpu.dot_dimension_numbers<[1], [0], [0], [1], [0, 0, 1, 1], [], []>} : vector<8x64xbf16>, vector<64x128xbf16>, vector<8x128xf32> -> vector<8x128xf32>
    %98 = arith.addf %92, %97 : vector<8x128xf32>
    %c0_143 = arith.constant 0 : index
    %c0_144 = arith.constant 0 : index
    %c1_145 = arith.constant 1 : index
    %c0_146 = arith.constant 0 : index
    %99 = vector.load %arg5[%c0_143, %c0_144, %c1_145, %c0_146] : memref<1x1x10x64xbf16, #tpu.memory_space<vmem>>, vector<1x1x8x64xbf16>
    %100 = vector.shape_cast %99 : vector<1x1x8x64xbf16> to vector<8x64xbf16>
    %c2_147 = arith.constant 2 : index
    %c1_148 = arith.constant 1 : index
    %c0_149 = arith.constant 0 : index
    %c0_150 = arith.constant 0 : index
    %101 = vector.load %arg6[%c2_147, %c1_148, %c0_149, %c0_150] : memref<3x3x64x128xbf16, #tpu.memory_space<vmem>>, vector<1x1x64x128xbf16>
    %102 = vector.shape_cast %101 : vector<1x1x64x128xbf16> to vector<64x128xbf16>
    %cst_151 = arith.constant dense<0.000000e+00> : vector<8x128xf32>
    %103 = tpu.matmul %100, %102, %cst_151 {dimension_numbers = #tpu.dot_dimension_numbers<[1], [0], [0], [1], [0, 0, 1, 1], [], []>} : vector<8x64xbf16>, vector<64x128xbf16>, vector<8x128xf32> -> vector<8x128xf32>
    %104 = arith.addf %98, %103 : vector<8x128xf32>
    %c0_152 = arith.constant 0 : index
    %c0_153 = arith.constant 0 : index
    %c2_154 = arith.constant 2 : index
    %c0_155 = arith.constant 0 : index
    %105 = vector.load %arg5[%c0_152, %c0_153, %c2_154, %c0_155] : memref<1x1x10x64xbf16, #tpu.memory_space<vmem>>, vector<1x1x8x64xbf16>
    %106 = vector.shape_cast %105 : vector<1x1x8x64xbf16> to vector<8x64xbf16>
    %c2_156 = arith.constant 2 : index
    %c2_157 = arith.constant 2 : index
    %c0_158 = arith.constant 0 : index
    %c0_159 = arith.constant 0 : index
    %107 = vector.load %arg6[%c2_156, %c2_157, %c0_158, %c0_159] : memref<3x3x64x128xbf16, #tpu.memory_space<vmem>>, vector<1x1x64x128xbf16>
    %108 = vector.shape_cast %107 : vector<1x1x64x128xbf16> to vector<64x128xbf16>
    %cst_160 = arith.constant dense<0.000000e+00> : vector<8x128xf32>
    %109 = tpu.matmul %106, %108, %cst_160 {dimension_numbers = #tpu.dot_dimension_numbers<[1], [0], [0], [1], [0, 0, 1, 1], [], []>} : vector<8x64xbf16>, vector<64x128xbf16>, vector<8x128xf32> -> vector<8x128xf32>
    %110 = arith.addf %104, %109 : vector<8x128xf32>
    %c0_161 = arith.constant 0 : index
    %c0_162 = arith.constant 0 : index
    %111 = vector.load %arg7[%c0_161, %c0_162] : memref<1x128xf32, #tpu.memory_space<vmem>>, vector<1x128xf32>
    %112 = vector.broadcast %111 : vector<1x128xf32> to vector<8x128xf32>
    %113 = arith.addf %110, %112 : vector<8x128xf32>
    %cst_163 = arith.constant 0.000000e+00 : f32
    %114 = vector.broadcast %cst_163 : f32 to vector<8x128xf32>
    %115 = arith.maximumf %113, %114 : vector<8x128xf32>
    %116 = arith.maximumf %57, %115 : vector<8x128xf32>
    %117 = arith.truncf %116 : vector<8x128xf32> to vector<8x128xbf16>
    %c0_164 = arith.constant 0 : index
    %c0_165 = arith.constant 0 : index
    %c0_166 = arith.constant 0 : index
    %c0_167 = arith.constant 0 : index
    %118 = vector.load %arg8[%c0_164, %c0_165, %c0_166, %c0_167] : memref<1x1x8x128xbf16, #tpu.memory_space<vmem>>, vector<1x1x8x128xbf16>
    %119 = vector.shape_cast %118 : vector<1x1x8x128xbf16> to vector<8x128xbf16>
    %120 = vector.shape_cast %117 : vector<8x128xbf16> to vector<1x1x8x128xbf16>
    tpu.vector_store %arg8[%c0_164, %c0_165, %c0_166, %c0_167], %120 {strides = array<i32>} : memref<1x1x8x128xbf16, #tpu.memory_space<vmem>>, vector<1x1x8x128xbf16>,
    return
  }
  func.func @transform_0(%arg0: i32, %arg1: i32) -> (i32, i32, i32, i32) {
    %c2_i32 = arith.constant 2 : i32
    %0 = arith.muli %c2_i32, %arg1 : i32
    %c0_i32 = arith.constant 0 : i32
    %1 = arith.addi %0, %c0_i32 : i32
    %c0_i32_0 = arith.constant 0 : i32
    %c0_i32_1 = arith.constant 0 : i32
    %c0_i32_2 = arith.constant 0 : i32
    return %arg0, %1, %c0_i32_0, %c0_i32_1 : i32, i32, i32, i32
  }
  func.func @transform_1(%arg0: i32, %arg1: i32) -> (i32, i32, i32, i32) {
    %c2_i32 = arith.constant 2 : i32
    %0 = arith.muli %c2_i32, %arg1 : i32
    %c1_i32 = arith.constant 1 : i32
    %1 = arith.addi %0, %c1_i32 : i32
    %c0_i32 = arith.constant 0 : i32
    %c0_i32_0 = arith.constant 0 : i32
    %c0_i32_1 = arith.constant 0 : i32
    return %arg0, %1, %c0_i32, %c0_i32_0 : i32, i32, i32, i32
  }
  func.func @transform_2(%arg0: i32, %arg1: i32) -> (i32, i32, i32, i32) {
    %c2_i32 = arith.constant 2 : i32
    %0 = arith.muli %c2_i32, %arg1 : i32
    %c2_i32_0 = arith.constant 2 : i32
    %1 = arith.addi %0, %c2_i32_0 : i32
    %c0_i32 = arith.constant 0 : i32
    %c0_i32_1 = arith.constant 0 : i32
    %c0_i32_2 = arith.constant 0 : i32
    return %arg0, %1, %c0_i32, %c0_i32_1 : i32, i32, i32, i32
  }
  func.func @transform_3(%arg0: i32, %arg1: i32) -> (i32, i32, i32, i32) {
    %c2_i32 = arith.constant 2 : i32
    %0 = arith.muli %c2_i32, %arg1 : i32
    %c3_i32 = arith.constant 3 : i32
    %1 = arith.addi %0, %c3_i32 : i32
    %c0_i32 = arith.constant 0 : i32
    %c0_i32_0 = arith.constant 0 : i32
    %c0_i32_1 = arith.constant 0 : i32
    return %arg0, %1, %c0_i32, %c0_i32_0 : i32, i32, i32, i32
  }
  func.func @transform_4(%arg0: i32, %arg1: i32) -> (i32, i32, i32, i32) {
    %c0_i32 = arith.constant 0 : i32
    %c0_i32_0 = arith.constant 0 : i32
    %c0_i32_1 = arith.constant 0 : i32
    %c0_i32_2 = arith.constant 0 : i32
    %c0_i32_3 = arith.constant 0 : i32
    return %c0_i32, %c0_i32_0, %c0_i32_1, %c0_i32_2 : i32, i32, i32, i32
  }
  func.func @transform_5(%arg0: i32, %arg1: i32) -> (i32, i32) {
    %c0_i32 = arith.constant 0 : i32
    %c0_i32_0 = arith.constant 0 : i32
    %c0_i32_1 = arith.constant 0 : i32
    return %c0_i32, %c0_i32_0 : i32, i32
  }
  func.func @transform_6(%arg0: i32, %arg1: i32) -> (i32, i32, i32, i32) {
    %c0_i32 = arith.constant 0 : i32
    %c0_i32_0 = arith.constant 0 : i32
    %c0_i32_1 = arith.constant 0 : i32
    return %arg0, %arg1, %c0_i32, %c0_i32_0 : i32, i32, i32, i32
  }
}

module attributes {stable_mosaic.version = 11 : i64} {
  func.func @_conv3x3_kernel(%arg0: i32, %arg1: i32, %arg2: memref<1x1x6x128xbf16, #tpu.memory_space<vmem>>, %arg3: memref<1x1x6x128xbf16, #tpu.memory_space<vmem>>, %arg4: memref<1x1x6x128xbf16, #tpu.memory_space<vmem>>, %arg5: memref<1x1x6x128xbf16, #tpu.memory_space<vmem>>, %arg6: memref<3x3x128x256xbf16, #tpu.memory_space<vmem>>, %arg7: memref<1x256xf32, #tpu.memory_space<vmem>>, %arg8: memref<1x1x4x256xbf16, #tpu.memory_space<vmem>>) attributes {dimension_semantics = [#tpu.dimension_semantics<parallel>, #tpu.dimension_semantics<parallel>], iteration_bounds = array<i64: 2, 2>, scalar_prefetch = 0 : i64, scratch_operands = 0 : i64, tpu.core_type = #tpu.core_type<tc>, window_params = [{transform_indices = @transform_0, window_bounds = array<i64: 1, 1, 6, 128>}, {transform_indices = @transform_1, window_bounds = array<i64: 1, 1, 6, 128>}, {transform_indices = @transform_2, window_bounds = array<i64: 1, 1, 6, 128>}, {transform_indices = @transform_3, window_bounds = array<i64: 1, 1, 6, 128>}, {pipeline_mode = #tpu.pipeline_mode<synchronous>, transform_indices = @transform_4, window_bounds = array<i64: 3, 3, 128, 256>}, {pipeline_mode = #tpu.pipeline_mode<synchronous>, transform_indices = @transform_5, window_bounds = array<i64: 1, 256>}, {transform_indices = @transform_6, window_bounds = array<i64: 1, 1, 4, 256>}]} {
    %c0 = arith.constant 0 : index
    %c0_0 = arith.constant 0 : index
    %c0_1 = arith.constant 0 : index
    %c0_2 = arith.constant 0 : index
    %0 = vector.load %arg2[%c0, %c0_0, %c0_1, %c0_2] : memref<1x1x6x128xbf16, #tpu.memory_space<vmem>>, vector<1x1x4x128xbf16>
    %1 = vector.shape_cast %0 : vector<1x1x4x128xbf16> to vector<4x128xbf16>
    %c0_3 = arith.constant 0 : index
    %c0_4 = arith.constant 0 : index
    %c0_5 = arith.constant 0 : index
    %c0_6 = arith.constant 0 : index
    %2 = vector.load %arg6[%c0_3, %c0_4, %c0_5, %c0_6] : memref<3x3x128x256xbf16, #tpu.memory_space<vmem>>, vector<1x1x128x256xbf16>
    %3 = vector.shape_cast %2 : vector<1x1x128x256xbf16> to vector<128x256xbf16>
    %cst = arith.constant dense<0.000000e+00> : vector<4x256xf32>
    %4 = tpu.matmul %1, %3, %cst {dimension_numbers = #tpu.dot_dimension_numbers<[1], [0], [0], [1], [0, 0, 1, 1], [], []>} : vector<4x128xbf16>, vector<128x256xbf16>, vector<4x256xf32> -> vector<4x256xf32>
    %c0_7 = arith.constant 0 : index
    %c0_8 = arith.constant 0 : index
    %c1 = arith.constant 1 : index
    %c0_9 = arith.constant 0 : index
    %5 = vector.load %arg2[%c0_7, %c0_8, %c1, %c0_9] : memref<1x1x6x128xbf16, #tpu.memory_space<vmem>>, vector<1x1x4x128xbf16>
    %6 = vector.shape_cast %5 : vector<1x1x4x128xbf16> to vector<4x128xbf16>
    %c0_10 = arith.constant 0 : index
    %c1_11 = arith.constant 1 : index
    %c0_12 = arith.constant 0 : index
    %c0_13 = arith.constant 0 : index
    %7 = vector.load %arg6[%c0_10, %c1_11, %c0_12, %c0_13] : memref<3x3x128x256xbf16, #tpu.memory_space<vmem>>, vector<1x1x128x256xbf16>
    %8 = vector.shape_cast %7 : vector<1x1x128x256xbf16> to vector<128x256xbf16>
    %cst_14 = arith.constant dense<0.000000e+00> : vector<4x256xf32>
    %9 = tpu.matmul %6, %8, %cst_14 {dimension_numbers = #tpu.dot_dimension_numbers<[1], [0], [0], [1], [0, 0, 1, 1], [], []>} : vector<4x128xbf16>, vector<128x256xbf16>, vector<4x256xf32> -> vector<4x256xf32>
    %10 = arith.addf %4, %9 : vector<4x256xf32>
    %c0_15 = arith.constant 0 : index
    %c0_16 = arith.constant 0 : index
    %c2 = arith.constant 2 : index
    %c0_17 = arith.constant 0 : index
    %11 = vector.load %arg2[%c0_15, %c0_16, %c2, %c0_17] : memref<1x1x6x128xbf16, #tpu.memory_space<vmem>>, vector<1x1x4x128xbf16>
    %12 = vector.shape_cast %11 : vector<1x1x4x128xbf16> to vector<4x128xbf16>
    %c0_18 = arith.constant 0 : index
    %c2_19 = arith.constant 2 : index
    %c0_20 = arith.constant 0 : index
    %c0_21 = arith.constant 0 : index
    %13 = vector.load %arg6[%c0_18, %c2_19, %c0_20, %c0_21] : memref<3x3x128x256xbf16, #tpu.memory_space<vmem>>, vector<1x1x128x256xbf16>
    %14 = vector.shape_cast %13 : vector<1x1x128x256xbf16> to vector<128x256xbf16>
    %cst_22 = arith.constant dense<0.000000e+00> : vector<4x256xf32>
    %15 = tpu.matmul %12, %14, %cst_22 {dimension_numbers = #tpu.dot_dimension_numbers<[1], [0], [0], [1], [0, 0, 1, 1], [], []>} : vector<4x128xbf16>, vector<128x256xbf16>, vector<4x256xf32> -> vector<4x256xf32>
    %16 = arith.addf %10, %15 : vector<4x256xf32>
    %c0_23 = arith.constant 0 : index
    %c0_24 = arith.constant 0 : index
    %c0_25 = arith.constant 0 : index
    %c0_26 = arith.constant 0 : index
    %17 = vector.load %arg3[%c0_23, %c0_24, %c0_25, %c0_26] : memref<1x1x6x128xbf16, #tpu.memory_space<vmem>>, vector<1x1x4x128xbf16>
    %18 = vector.shape_cast %17 : vector<1x1x4x128xbf16> to vector<4x128xbf16>
    %c1_27 = arith.constant 1 : index
    %c0_28 = arith.constant 0 : index
    %c0_29 = arith.constant 0 : index
    %c0_30 = arith.constant 0 : index
    %19 = vector.load %arg6[%c1_27, %c0_28, %c0_29, %c0_30] : memref<3x3x128x256xbf16, #tpu.memory_space<vmem>>, vector<1x1x128x256xbf16>
    %20 = vector.shape_cast %19 : vector<1x1x128x256xbf16> to vector<128x256xbf16>
    %cst_31 = arith.constant dense<0.000000e+00> : vector<4x256xf32>
    %21 = tpu.matmul %18, %20, %cst_31 {dimension_numbers = #tpu.dot_dimension_numbers<[1], [0], [0], [1], [0, 0, 1, 1], [], []>} : vector<4x128xbf16>, vector<128x256xbf16>, vector<4x256xf32> -> vector<4x256xf32>
    %22 = arith.addf %16, %21 : vector<4x256xf32>
    %c0_32 = arith.constant 0 : index
    %c0_33 = arith.constant 0 : index
    %c1_34 = arith.constant 1 : index
    %c0_35 = arith.constant 0 : index
    %23 = vector.load %arg3[%c0_32, %c0_33, %c1_34, %c0_35] : memref<1x1x6x128xbf16, #tpu.memory_space<vmem>>, vector<1x1x4x128xbf16>
    %24 = vector.shape_cast %23 : vector<1x1x4x128xbf16> to vector<4x128xbf16>
    %c1_36 = arith.constant 1 : index
    %c1_37 = arith.constant 1 : index
    %c0_38 = arith.constant 0 : index
    %c0_39 = arith.constant 0 : index
    %25 = vector.load %arg6[%c1_36, %c1_37, %c0_38, %c0_39] : memref<3x3x128x256xbf16, #tpu.memory_space<vmem>>, vector<1x1x128x256xbf16>
    %26 = vector.shape_cast %25 : vector<1x1x128x256xbf16> to vector<128x256xbf16>
    %cst_40 = arith.constant dense<0.000000e+00> : vector<4x256xf32>
    %27 = tpu.matmul %24, %26, %cst_40 {dimension_numbers = #tpu.dot_dimension_numbers<[1], [0], [0], [1], [0, 0, 1, 1], [], []>} : vector<4x128xbf16>, vector<128x256xbf16>, vector<4x256xf32> -> vector<4x256xf32>
    %28 = arith.addf %22, %27 : vector<4x256xf32>
    %c0_41 = arith.constant 0 : index
    %c0_42 = arith.constant 0 : index
    %c2_43 = arith.constant 2 : index
    %c0_44 = arith.constant 0 : index
    %29 = vector.load %arg3[%c0_41, %c0_42, %c2_43, %c0_44] : memref<1x1x6x128xbf16, #tpu.memory_space<vmem>>, vector<1x1x4x128xbf16>
    %30 = vector.shape_cast %29 : vector<1x1x4x128xbf16> to vector<4x128xbf16>
    %c1_45 = arith.constant 1 : index
    %c2_46 = arith.constant 2 : index
    %c0_47 = arith.constant 0 : index
    %c0_48 = arith.constant 0 : index
    %31 = vector.load %arg6[%c1_45, %c2_46, %c0_47, %c0_48] : memref<3x3x128x256xbf16, #tpu.memory_space<vmem>>, vector<1x1x128x256xbf16>
    %32 = vector.shape_cast %31 : vector<1x1x128x256xbf16> to vector<128x256xbf16>
    %cst_49 = arith.constant dense<0.000000e+00> : vector<4x256xf32>
    %33 = tpu.matmul %30, %32, %cst_49 {dimension_numbers = #tpu.dot_dimension_numbers<[1], [0], [0], [1], [0, 0, 1, 1], [], []>} : vector<4x128xbf16>, vector<128x256xbf16>, vector<4x256xf32> -> vector<4x256xf32>
    %34 = arith.addf %28, %33 : vector<4x256xf32>
    %c0_50 = arith.constant 0 : index
    %c0_51 = arith.constant 0 : index
    %c0_52 = arith.constant 0 : index
    %c0_53 = arith.constant 0 : index
    %35 = vector.load %arg4[%c0_50, %c0_51, %c0_52, %c0_53] : memref<1x1x6x128xbf16, #tpu.memory_space<vmem>>, vector<1x1x4x128xbf16>
    %36 = vector.shape_cast %35 : vector<1x1x4x128xbf16> to vector<4x128xbf16>
    %c2_54 = arith.constant 2 : index
    %c0_55 = arith.constant 0 : index
    %c0_56 = arith.constant 0 : index
    %c0_57 = arith.constant 0 : index
    %37 = vector.load %arg6[%c2_54, %c0_55, %c0_56, %c0_57] : memref<3x3x128x256xbf16, #tpu.memory_space<vmem>>, vector<1x1x128x256xbf16>
    %38 = vector.shape_cast %37 : vector<1x1x128x256xbf16> to vector<128x256xbf16>
    %cst_58 = arith.constant dense<0.000000e+00> : vector<4x256xf32>
    %39 = tpu.matmul %36, %38, %cst_58 {dimension_numbers = #tpu.dot_dimension_numbers<[1], [0], [0], [1], [0, 0, 1, 1], [], []>} : vector<4x128xbf16>, vector<128x256xbf16>, vector<4x256xf32> -> vector<4x256xf32>
    %40 = arith.addf %34, %39 : vector<4x256xf32>
    %c0_59 = arith.constant 0 : index
    %c0_60 = arith.constant 0 : index
    %c1_61 = arith.constant 1 : index
    %c0_62 = arith.constant 0 : index
    %41 = vector.load %arg4[%c0_59, %c0_60, %c1_61, %c0_62] : memref<1x1x6x128xbf16, #tpu.memory_space<vmem>>, vector<1x1x4x128xbf16>
    %42 = vector.shape_cast %41 : vector<1x1x4x128xbf16> to vector<4x128xbf16>
    %c2_63 = arith.constant 2 : index
    %c1_64 = arith.constant 1 : index
    %c0_65 = arith.constant 0 : index
    %c0_66 = arith.constant 0 : index
    %43 = vector.load %arg6[%c2_63, %c1_64, %c0_65, %c0_66] : memref<3x3x128x256xbf16, #tpu.memory_space<vmem>>, vector<1x1x128x256xbf16>
    %44 = vector.shape_cast %43 : vector<1x1x128x256xbf16> to vector<128x256xbf16>
    %cst_67 = arith.constant dense<0.000000e+00> : vector<4x256xf32>
    %45 = tpu.matmul %42, %44, %cst_67 {dimension_numbers = #tpu.dot_dimension_numbers<[1], [0], [0], [1], [0, 0, 1, 1], [], []>} : vector<4x128xbf16>, vector<128x256xbf16>, vector<4x256xf32> -> vector<4x256xf32>
    %46 = arith.addf %40, %45 : vector<4x256xf32>
    %c0_68 = arith.constant 0 : index
    %c0_69 = arith.constant 0 : index
    %c2_70 = arith.constant 2 : index
    %c0_71 = arith.constant 0 : index
    %47 = vector.load %arg4[%c0_68, %c0_69, %c2_70, %c0_71] : memref<1x1x6x128xbf16, #tpu.memory_space<vmem>>, vector<1x1x4x128xbf16>
    %48 = vector.shape_cast %47 : vector<1x1x4x128xbf16> to vector<4x128xbf16>
    %c2_72 = arith.constant 2 : index
    %c2_73 = arith.constant 2 : index
    %c0_74 = arith.constant 0 : index
    %c0_75 = arith.constant 0 : index
    %49 = vector.load %arg6[%c2_72, %c2_73, %c0_74, %c0_75] : memref<3x3x128x256xbf16, #tpu.memory_space<vmem>>, vector<1x1x128x256xbf16>
    %50 = vector.shape_cast %49 : vector<1x1x128x256xbf16> to vector<128x256xbf16>
    %cst_76 = arith.constant dense<0.000000e+00> : vector<4x256xf32>
    %51 = tpu.matmul %48, %50, %cst_76 {dimension_numbers = #tpu.dot_dimension_numbers<[1], [0], [0], [1], [0, 0, 1, 1], [], []>} : vector<4x128xbf16>, vector<128x256xbf16>, vector<4x256xf32> -> vector<4x256xf32>
    %52 = arith.addf %46, %51 : vector<4x256xf32>
    %c0_77 = arith.constant 0 : index
    %c0_78 = arith.constant 0 : index
    %53 = vector.load %arg7[%c0_77, %c0_78] : memref<1x256xf32, #tpu.memory_space<vmem>>, vector<1x256xf32>
    %54 = vector.broadcast %53 : vector<1x256xf32> to vector<4x256xf32>
    %55 = arith.addf %52, %54 : vector<4x256xf32>
    %cst_79 = arith.constant 0.000000e+00 : f32
    %56 = vector.broadcast %cst_79 : f32 to vector<4x256xf32>
    %57 = arith.maximumf %55, %56 : vector<4x256xf32>
    %c0_80 = arith.constant 0 : index
    %c0_81 = arith.constant 0 : index
    %c0_82 = arith.constant 0 : index
    %c0_83 = arith.constant 0 : index
    %58 = vector.load %arg3[%c0_80, %c0_81, %c0_82, %c0_83] : memref<1x1x6x128xbf16, #tpu.memory_space<vmem>>, vector<1x1x4x128xbf16>
    %59 = vector.shape_cast %58 : vector<1x1x4x128xbf16> to vector<4x128xbf16>
    %c0_84 = arith.constant 0 : index
    %c0_85 = arith.constant 0 : index
    %c0_86 = arith.constant 0 : index
    %c0_87 = arith.constant 0 : index
    %60 = vector.load %arg6[%c0_84, %c0_85, %c0_86, %c0_87] : memref<3x3x128x256xbf16, #tpu.memory_space<vmem>>, vector<1x1x128x256xbf16>
    %61 = vector.shape_cast %60 : vector<1x1x128x256xbf16> to vector<128x256xbf16>
    %cst_88 = arith.constant dense<0.000000e+00> : vector<4x256xf32>
    %62 = tpu.matmul %59, %61, %cst_88 {dimension_numbers = #tpu.dot_dimension_numbers<[1], [0], [0], [1], [0, 0, 1, 1], [], []>} : vector<4x128xbf16>, vector<128x256xbf16>, vector<4x256xf32> -> vector<4x256xf32>
    %c0_89 = arith.constant 0 : index
    %c0_90 = arith.constant 0 : index
    %c1_91 = arith.constant 1 : index
    %c0_92 = arith.constant 0 : index
    %63 = vector.load %arg3[%c0_89, %c0_90, %c1_91, %c0_92] : memref<1x1x6x128xbf16, #tpu.memory_space<vmem>>, vector<1x1x4x128xbf16>
    %64 = vector.shape_cast %63 : vector<1x1x4x128xbf16> to vector<4x128xbf16>
    %c0_93 = arith.constant 0 : index
    %c1_94 = arith.constant 1 : index
    %c0_95 = arith.constant 0 : index
    %c0_96 = arith.constant 0 : index
    %65 = vector.load %arg6[%c0_93, %c1_94, %c0_95, %c0_96] : memref<3x3x128x256xbf16, #tpu.memory_space<vmem>>, vector<1x1x128x256xbf16>
    %66 = vector.shape_cast %65 : vector<1x1x128x256xbf16> to vector<128x256xbf16>
    %cst_97 = arith.constant dense<0.000000e+00> : vector<4x256xf32>
    %67 = tpu.matmul %64, %66, %cst_97 {dimension_numbers = #tpu.dot_dimension_numbers<[1], [0], [0], [1], [0, 0, 1, 1], [], []>} : vector<4x128xbf16>, vector<128x256xbf16>, vector<4x256xf32> -> vector<4x256xf32>
    %68 = arith.addf %62, %67 : vector<4x256xf32>
    %c0_98 = arith.constant 0 : index
    %c0_99 = arith.constant 0 : index
    %c2_100 = arith.constant 2 : index
    %c0_101 = arith.constant 0 : index
    %69 = vector.load %arg3[%c0_98, %c0_99, %c2_100, %c0_101] : memref<1x1x6x128xbf16, #tpu.memory_space<vmem>>, vector<1x1x4x128xbf16>
    %70 = vector.shape_cast %69 : vector<1x1x4x128xbf16> to vector<4x128xbf16>
    %c0_102 = arith.constant 0 : index
    %c2_103 = arith.constant 2 : index
    %c0_104 = arith.constant 0 : index
    %c0_105 = arith.constant 0 : index
    %71 = vector.load %arg6[%c0_102, %c2_103, %c0_104, %c0_105] : memref<3x3x128x256xbf16, #tpu.memory_space<vmem>>, vector<1x1x128x256xbf16>
    %72 = vector.shape_cast %71 : vector<1x1x128x256xbf16> to vector<128x256xbf16>
    %cst_106 = arith.constant dense<0.000000e+00> : vector<4x256xf32>
    %73 = tpu.matmul %70, %72, %cst_106 {dimension_numbers = #tpu.dot_dimension_numbers<[1], [0], [0], [1], [0, 0, 1, 1], [], []>} : vector<4x128xbf16>, vector<128x256xbf16>, vector<4x256xf32> -> vector<4x256xf32>
    %74 = arith.addf %68, %73 : vector<4x256xf32>
    %c0_107 = arith.constant 0 : index
    %c0_108 = arith.constant 0 : index
    %c0_109 = arith.constant 0 : index
    %c0_110 = arith.constant 0 : index
    %75 = vector.load %arg4[%c0_107, %c0_108, %c0_109, %c0_110] : memref<1x1x6x128xbf16, #tpu.memory_space<vmem>>, vector<1x1x4x128xbf16>
    %76 = vector.shape_cast %75 : vector<1x1x4x128xbf16> to vector<4x128xbf16>
    %c1_111 = arith.constant 1 : index
    %c0_112 = arith.constant 0 : index
    %c0_113 = arith.constant 0 : index
    %c0_114 = arith.constant 0 : index
    %77 = vector.load %arg6[%c1_111, %c0_112, %c0_113, %c0_114] : memref<3x3x128x256xbf16, #tpu.memory_space<vmem>>, vector<1x1x128x256xbf16>
    %78 = vector.shape_cast %77 : vector<1x1x128x256xbf16> to vector<128x256xbf16>
    %cst_115 = arith.constant dense<0.000000e+00> : vector<4x256xf32>
    %79 = tpu.matmul %76, %78, %cst_115 {dimension_numbers = #tpu.dot_dimension_numbers<[1], [0], [0], [1], [0, 0, 1, 1], [], []>} : vector<4x128xbf16>, vector<128x256xbf16>, vector<4x256xf32> -> vector<4x256xf32>
    %80 = arith.addf %74, %79 : vector<4x256xf32>
    %c0_116 = arith.constant 0 : index
    %c0_117 = arith.constant 0 : index
    %c1_118 = arith.constant 1 : index
    %c0_119 = arith.constant 0 : index
    %81 = vector.load %arg4[%c0_116, %c0_117, %c1_118, %c0_119] : memref<1x1x6x128xbf16, #tpu.memory_space<vmem>>, vector<1x1x4x128xbf16>
    %82 = vector.shape_cast %81 : vector<1x1x4x128xbf16> to vector<4x128xbf16>
    %c1_120 = arith.constant 1 : index
    %c1_121 = arith.constant 1 : index
    %c0_122 = arith.constant 0 : index
    %c0_123 = arith.constant 0 : index
    %83 = vector.load %arg6[%c1_120, %c1_121, %c0_122, %c0_123] : memref<3x3x128x256xbf16, #tpu.memory_space<vmem>>, vector<1x1x128x256xbf16>
    %84 = vector.shape_cast %83 : vector<1x1x128x256xbf16> to vector<128x256xbf16>
    %cst_124 = arith.constant dense<0.000000e+00> : vector<4x256xf32>
    %85 = tpu.matmul %82, %84, %cst_124 {dimension_numbers = #tpu.dot_dimension_numbers<[1], [0], [0], [1], [0, 0, 1, 1], [], []>} : vector<4x128xbf16>, vector<128x256xbf16>, vector<4x256xf32> -> vector<4x256xf32>
    %86 = arith.addf %80, %85 : vector<4x256xf32>
    %c0_125 = arith.constant 0 : index
    %c0_126 = arith.constant 0 : index
    %c2_127 = arith.constant 2 : index
    %c0_128 = arith.constant 0 : index
    %87 = vector.load %arg4[%c0_125, %c0_126, %c2_127, %c0_128] : memref<1x1x6x128xbf16, #tpu.memory_space<vmem>>, vector<1x1x4x128xbf16>
    %88 = vector.shape_cast %87 : vector<1x1x4x128xbf16> to vector<4x128xbf16>
    %c1_129 = arith.constant 1 : index
    %c2_130 = arith.constant 2 : index
    %c0_131 = arith.constant 0 : index
    %c0_132 = arith.constant 0 : index
    %89 = vector.load %arg6[%c1_129, %c2_130, %c0_131, %c0_132] : memref<3x3x128x256xbf16, #tpu.memory_space<vmem>>, vector<1x1x128x256xbf16>
    %90 = vector.shape_cast %89 : vector<1x1x128x256xbf16> to vector<128x256xbf16>
    %cst_133 = arith.constant dense<0.000000e+00> : vector<4x256xf32>
    %91 = tpu.matmul %88, %90, %cst_133 {dimension_numbers = #tpu.dot_dimension_numbers<[1], [0], [0], [1], [0, 0, 1, 1], [], []>} : vector<4x128xbf16>, vector<128x256xbf16>, vector<4x256xf32> -> vector<4x256xf32>
    %92 = arith.addf %86, %91 : vector<4x256xf32>
    %c0_134 = arith.constant 0 : index
    %c0_135 = arith.constant 0 : index
    %c0_136 = arith.constant 0 : index
    %c0_137 = arith.constant 0 : index
    %93 = vector.load %arg5[%c0_134, %c0_135, %c0_136, %c0_137] : memref<1x1x6x128xbf16, #tpu.memory_space<vmem>>, vector<1x1x4x128xbf16>
    %94 = vector.shape_cast %93 : vector<1x1x4x128xbf16> to vector<4x128xbf16>
    %c2_138 = arith.constant 2 : index
    %c0_139 = arith.constant 0 : index
    %c0_140 = arith.constant 0 : index
    %c0_141 = arith.constant 0 : index
    %95 = vector.load %arg6[%c2_138, %c0_139, %c0_140, %c0_141] : memref<3x3x128x256xbf16, #tpu.memory_space<vmem>>, vector<1x1x128x256xbf16>
    %96 = vector.shape_cast %95 : vector<1x1x128x256xbf16> to vector<128x256xbf16>
    %cst_142 = arith.constant dense<0.000000e+00> : vector<4x256xf32>
    %97 = tpu.matmul %94, %96, %cst_142 {dimension_numbers = #tpu.dot_dimension_numbers<[1], [0], [0], [1], [0, 0, 1, 1], [], []>} : vector<4x128xbf16>, vector<128x256xbf16>, vector<4x256xf32> -> vector<4x256xf32>
    %98 = arith.addf %92, %97 : vector<4x256xf32>
    %c0_143 = arith.constant 0 : index
    %c0_144 = arith.constant 0 : index
    %c1_145 = arith.constant 1 : index
    %c0_146 = arith.constant 0 : index
    %99 = vector.load %arg5[%c0_143, %c0_144, %c1_145, %c0_146] : memref<1x1x6x128xbf16, #tpu.memory_space<vmem>>, vector<1x1x4x128xbf16>
    %100 = vector.shape_cast %99 : vector<1x1x4x128xbf16> to vector<4x128xbf16>
    %c2_147 = arith.constant 2 : index
    %c1_148 = arith.constant 1 : index
    %c0_149 = arith.constant 0 : index
    %c0_150 = arith.constant 0 : index
    %101 = vector.load %arg6[%c2_147, %c1_148, %c0_149, %c0_150] : memref<3x3x128x256xbf16, #tpu.memory_space<vmem>>, vector<1x1x128x256xbf16>
    %102 = vector.shape_cast %101 : vector<1x1x128x256xbf16> to vector<128x256xbf16>
    %cst_151 = arith.constant dense<0.000000e+00> : vector<4x256xf32>
    %103 = tpu.matmul %100, %102, %cst_151 {dimension_numbers = #tpu.dot_dimension_numbers<[1], [0], [0], [1], [0, 0, 1, 1], [], []>} : vector<4x128xbf16>, vector<128x256xbf16>, vector<4x256xf32> -> vector<4x256xf32>
    %104 = arith.addf %98, %103 : vector<4x256xf32>
    %c0_152 = arith.constant 0 : index
    %c0_153 = arith.constant 0 : index
    %c2_154 = arith.constant 2 : index
    %c0_155 = arith.constant 0 : index
    %105 = vector.load %arg5[%c0_152, %c0_153, %c2_154, %c0_155] : memref<1x1x6x128xbf16, #tpu.memory_space<vmem>>, vector<1x1x4x128xbf16>
    %106 = vector.shape_cast %105 : vector<1x1x4x128xbf16> to vector<4x128xbf16>
    %c2_156 = arith.constant 2 : index
    %c2_157 = arith.constant 2 : index
    %c0_158 = arith.constant 0 : index
    %c0_159 = arith.constant 0 : index
    %107 = vector.load %arg6[%c2_156, %c2_157, %c0_158, %c0_159] : memref<3x3x128x256xbf16, #tpu.memory_space<vmem>>, vector<1x1x128x256xbf16>
    %108 = vector.shape_cast %107 : vector<1x1x128x256xbf16> to vector<128x256xbf16>
    %cst_160 = arith.constant dense<0.000000e+00> : vector<4x256xf32>
    %109 = tpu.matmul %106, %108, %cst_160 {dimension_numbers = #tpu.dot_dimension_numbers<[1], [0], [0], [1], [0, 0, 1, 1], [], []>} : vector<4x128xbf16>, vector<128x256xbf16>, vector<4x256xf32> -> vector<4x256xf32>
    %110 = arith.addf %104, %109 : vector<4x256xf32>
    %c0_161 = arith.constant 0 : index
    %c0_162 = arith.constant 0 : index
    %111 = vector.load %arg7[%c0_161, %c0_162] : memref<1x256xf32, #tpu.memory_space<vmem>>, vector<1x256xf32>
    %112 = vector.broadcast %111 : vector<1x256xf32> to vector<4x256xf32>
    %113 = arith.addf %110, %112 : vector<4x256xf32>
    %cst_163 = arith.constant 0.000000e+00 : f32
    %114 = vector.broadcast %cst_163 : f32 to vector<4x256xf32>
    %115 = arith.maximumf %113, %114 : vector<4x256xf32>
    %116 = arith.maximumf %57, %115 : vector<4x256xf32>
    %117 = arith.truncf %116 : vector<4x256xf32> to vector<4x256xbf16>
    %c0_164 = arith.constant 0 : index
    %c0_165 = arith.constant 0 : index
    %c0_166 = arith.constant 0 : index
    %c0_167 = arith.constant 0 : index
    %118 = vector.load %arg8[%c0_164, %c0_165, %c0_166, %c0_167] : memref<1x1x4x256xbf16, #tpu.memory_space<vmem>>, vector<1x1x4x256xbf16>
    %119 = vector.shape_cast %118 : vector<1x1x4x256xbf16> to vector<4x256xbf16>
    %120 = vector.shape_cast %117 : vector<4x256xbf16> to vector<1x1x4x256xbf16>
    tpu.vector_store %arg8[%c0_164, %c0_165, %c0_166, %c0_167], %120 {strides = array<i32>} : memref<1x1x4x256xbf16, #tpu.memory_space<vmem>>, vector<1x1x4x256xbf16>,
    return
  }
  func.func @transform_0(%arg0: i32, %arg1: i32) -> (i32, i32, i32, i32) {
    %c2_i32 = arith.constant 2 : i32
    %0 = arith.muli %c2_i32, %arg1 : i32
    %c0_i32 = arith.constant 0 : i32
    %1 = arith.addi %0, %c0_i32 : i32
    %c0_i32_0 = arith.constant 0 : i32
    %c0_i32_1 = arith.constant 0 : i32
    %c0_i32_2 = arith.constant 0 : i32
    return %arg0, %1, %c0_i32_0, %c0_i32_1 : i32, i32, i32, i32
  }
  func.func @transform_1(%arg0: i32, %arg1: i32) -> (i32, i32, i32, i32) {
    %c2_i32 = arith.constant 2 : i32
    %0 = arith.muli %c2_i32, %arg1 : i32
    %c1_i32 = arith.constant 1 : i32
    %1 = arith.addi %0, %c1_i32 : i32
    %c0_i32 = arith.constant 0 : i32
    %c0_i32_0 = arith.constant 0 : i32
    %c0_i32_1 = arith.constant 0 : i32
    return %arg0, %1, %c0_i32, %c0_i32_0 : i32, i32, i32, i32
  }
  func.func @transform_2(%arg0: i32, %arg1: i32) -> (i32, i32, i32, i32) {
    %c2_i32 = arith.constant 2 : i32
    %0 = arith.muli %c2_i32, %arg1 : i32
    %c2_i32_0 = arith.constant 2 : i32
    %1 = arith.addi %0, %c2_i32_0 : i32
    %c0_i32 = arith.constant 0 : i32
    %c0_i32_1 = arith.constant 0 : i32
    %c0_i32_2 = arith.constant 0 : i32
    return %arg0, %1, %c0_i32, %c0_i32_1 : i32, i32, i32, i32
  }
  func.func @transform_3(%arg0: i32, %arg1: i32) -> (i32, i32, i32, i32) {
    %c2_i32 = arith.constant 2 : i32
    %0 = arith.muli %c2_i32, %arg1 : i32
    %c3_i32 = arith.constant 3 : i32
    %1 = arith.addi %0, %c3_i32 : i32
    %c0_i32 = arith.constant 0 : i32
    %c0_i32_0 = arith.constant 0 : i32
    %c0_i32_1 = arith.constant 0 : i32
    return %arg0, %1, %c0_i32, %c0_i32_0 : i32, i32, i32, i32
  }
  func.func @transform_4(%arg0: i32, %arg1: i32) -> (i32, i32, i32, i32) {
    %c0_i32 = arith.constant 0 : i32
    %c0_i32_0 = arith.constant 0 : i32
    %c0_i32_1 = arith.constant 0 : i32
    %c0_i32_2 = arith.constant 0 : i32
    %c0_i32_3 = arith.constant 0 : i32
    return %c0_i32, %c0_i32_0, %c0_i32_1, %c0_i32_2 : i32, i32, i32, i32
  }
  func.func @transform_5(%arg0: i32, %arg1: i32) -> (i32, i32) {
    %c0_i32 = arith.constant 0 : i32
    %c0_i32_0 = arith.constant 0 : i32
    %c0_i32_1 = arith.constant 0 : i32
    return %c0_i32, %c0_i32_0 : i32, i32
  }
  func.func @transform_6(%arg0: i32, %arg1: i32) -> (i32, i32, i32, i32) {
    %c0_i32 = arith.constant 0 : i32
    %c0_i32_0 = arith.constant 0 : i32
    %c0_i32_1 = arith.constant 0 : i32
    return %arg0, %arg1, %c0_i32, %c0_i32_0 : i32, i32, i32, i32
  }
}

module attributes {stable_mosaic.version = 11 : i64} {
  func.func @_conv3x3_kernel(%arg0: i32, %arg1: i32, %arg2: memref<1x1x4x256xbf16, #tpu.memory_space<vmem>>, %arg3: memref<1x1x4x256xbf16, #tpu.memory_space<vmem>>, %arg4: memref<1x1x4x256xbf16, #tpu.memory_space<vmem>>, %arg5: memref<3x3x256x512xbf16, #tpu.memory_space<vmem>>, %arg6: memref<1x512xf32, #tpu.memory_space<vmem>>, %arg7: memref<1x1x2x512xbf16, #tpu.memory_space<vmem>>) attributes {dimension_semantics = [#tpu.dimension_semantics<parallel>, #tpu.dimension_semantics<parallel>], iteration_bounds = array<i64: 2, 2>, scalar_prefetch = 0 : i64, scratch_operands = 0 : i64, tpu.core_type = #tpu.core_type<tc>, window_params = [{transform_indices = @transform_0, window_bounds = array<i64: 1, 1, 4, 256>}, {transform_indices = @transform_1, window_bounds = array<i64: 1, 1, 4, 256>}, {transform_indices = @transform_2, window_bounds = array<i64: 1, 1, 4, 256>}, {pipeline_mode = #tpu.pipeline_mode<synchronous>, transform_indices = @transform_3, window_bounds = array<i64: 3, 3, 256, 512>}, {pipeline_mode = #tpu.pipeline_mode<synchronous>, transform_indices = @transform_4, window_bounds = array<i64: 1, 512>}, {transform_indices = @transform_5, window_bounds = array<i64: 1, 1, 2, 512>}]} {
    %c0 = arith.constant 0 : index
    %c0_0 = arith.constant 0 : index
    %c0_1 = arith.constant 0 : index
    %c0_2 = arith.constant 0 : index
    %0 = vector.load %arg2[%c0, %c0_0, %c0_1, %c0_2] : memref<1x1x4x256xbf16, #tpu.memory_space<vmem>>, vector<1x1x2x256xbf16>
    %1 = vector.shape_cast %0 : vector<1x1x2x256xbf16> to vector<2x256xbf16>
    %c0_3 = arith.constant 0 : index
    %c0_4 = arith.constant 0 : index
    %c0_5 = arith.constant 0 : index
    %c0_6 = arith.constant 0 : index
    %2 = vector.load %arg5[%c0_3, %c0_4, %c0_5, %c0_6] : memref<3x3x256x512xbf16, #tpu.memory_space<vmem>>, vector<1x1x256x512xbf16>
    %3 = vector.shape_cast %2 : vector<1x1x256x512xbf16> to vector<256x512xbf16>
    %cst = arith.constant dense<0.000000e+00> : vector<2x512xf32>
    %4 = tpu.matmul %1, %3, %cst {dimension_numbers = #tpu.dot_dimension_numbers<[1], [0], [0], [1], [0, 0, 1, 1], [], []>} : vector<2x256xbf16>, vector<256x512xbf16>, vector<2x512xf32> -> vector<2x512xf32>
    %c0_7 = arith.constant 0 : index
    %c0_8 = arith.constant 0 : index
    %c1 = arith.constant 1 : index
    %c0_9 = arith.constant 0 : index
    %5 = vector.load %arg2[%c0_7, %c0_8, %c1, %c0_9] : memref<1x1x4x256xbf16, #tpu.memory_space<vmem>>, vector<1x1x2x256xbf16>
    %6 = vector.shape_cast %5 : vector<1x1x2x256xbf16> to vector<2x256xbf16>
    %c0_10 = arith.constant 0 : index
    %c1_11 = arith.constant 1 : index
    %c0_12 = arith.constant 0 : index
    %c0_13 = arith.constant 0 : index
    %7 = vector.load %arg5[%c0_10, %c1_11, %c0_12, %c0_13] : memref<3x3x256x512xbf16, #tpu.memory_space<vmem>>, vector<1x1x256x512xbf16>
    %8 = vector.shape_cast %7 : vector<1x1x256x512xbf16> to vector<256x512xbf16>
    %cst_14 = arith.constant dense<0.000000e+00> : vector<2x512xf32>
    %9 = tpu.matmul %6, %8, %cst_14 {dimension_numbers = #tpu.dot_dimension_numbers<[1], [0], [0], [1], [0, 0, 1, 1], [], []>} : vector<2x256xbf16>, vector<256x512xbf16>, vector<2x512xf32> -> vector<2x512xf32>
    %10 = arith.addf %4, %9 : vector<2x512xf32>
    %c0_15 = arith.constant 0 : index
    %c0_16 = arith.constant 0 : index
    %c2 = arith.constant 2 : index
    %c0_17 = arith.constant 0 : index
    %11 = vector.load %arg2[%c0_15, %c0_16, %c2, %c0_17] : memref<1x1x4x256xbf16, #tpu.memory_space<vmem>>, vector<1x1x2x256xbf16>
    %12 = vector.shape_cast %11 : vector<1x1x2x256xbf16> to vector<2x256xbf16>
    %c0_18 = arith.constant 0 : index
    %c2_19 = arith.constant 2 : index
    %c0_20 = arith.constant 0 : index
    %c0_21 = arith.constant 0 : index
    %13 = vector.load %arg5[%c0_18, %c2_19, %c0_20, %c0_21] : memref<3x3x256x512xbf16, #tpu.memory_space<vmem>>, vector<1x1x256x512xbf16>
    %14 = vector.shape_cast %13 : vector<1x1x256x512xbf16> to vector<256x512xbf16>
    %cst_22 = arith.constant dense<0.000000e+00> : vector<2x512xf32>
    %15 = tpu.matmul %12, %14, %cst_22 {dimension_numbers = #tpu.dot_dimension_numbers<[1], [0], [0], [1], [0, 0, 1, 1], [], []>} : vector<2x256xbf16>, vector<256x512xbf16>, vector<2x512xf32> -> vector<2x512xf32>
    %16 = arith.addf %10, %15 : vector<2x512xf32>
    %c0_23 = arith.constant 0 : index
    %c0_24 = arith.constant 0 : index
    %c0_25 = arith.constant 0 : index
    %c0_26 = arith.constant 0 : index
    %17 = vector.load %arg3[%c0_23, %c0_24, %c0_25, %c0_26] : memref<1x1x4x256xbf16, #tpu.memory_space<vmem>>, vector<1x1x2x256xbf16>
    %18 = vector.shape_cast %17 : vector<1x1x2x256xbf16> to vector<2x256xbf16>
    %c1_27 = arith.constant 1 : index
    %c0_28 = arith.constant 0 : index
    %c0_29 = arith.constant 0 : index
    %c0_30 = arith.constant 0 : index
    %19 = vector.load %arg5[%c1_27, %c0_28, %c0_29, %c0_30] : memref<3x3x256x512xbf16, #tpu.memory_space<vmem>>, vector<1x1x256x512xbf16>
    %20 = vector.shape_cast %19 : vector<1x1x256x512xbf16> to vector<256x512xbf16>
    %cst_31 = arith.constant dense<0.000000e+00> : vector<2x512xf32>
    %21 = tpu.matmul %18, %20, %cst_31 {dimension_numbers = #tpu.dot_dimension_numbers<[1], [0], [0], [1], [0, 0, 1, 1], [], []>} : vector<2x256xbf16>, vector<256x512xbf16>, vector<2x512xf32> -> vector<2x512xf32>
    %22 = arith.addf %16, %21 : vector<2x512xf32>
    %c0_32 = arith.constant 0 : index
    %c0_33 = arith.constant 0 : index
    %c1_34 = arith.constant 1 : index
    %c0_35 = arith.constant 0 : index
    %23 = vector.load %arg3[%c0_32, %c0_33, %c1_34, %c0_35] : memref<1x1x4x256xbf16, #tpu.memory_space<vmem>>, vector<1x1x2x256xbf16>
    %24 = vector.shape_cast %23 : vector<1x1x2x256xbf16> to vector<2x256xbf16>
    %c1_36 = arith.constant 1 : index
    %c1_37 = arith.constant 1 : index
    %c0_38 = arith.constant 0 : index
    %c0_39 = arith.constant 0 : index
    %25 = vector.load %arg5[%c1_36, %c1_37, %c0_38, %c0_39] : memref<3x3x256x512xbf16, #tpu.memory_space<vmem>>, vector<1x1x256x512xbf16>
    %26 = vector.shape_cast %25 : vector<1x1x256x512xbf16> to vector<256x512xbf16>
    %cst_40 = arith.constant dense<0.000000e+00> : vector<2x512xf32>
    %27 = tpu.matmul %24, %26, %cst_40 {dimension_numbers = #tpu.dot_dimension_numbers<[1], [0], [0], [1], [0, 0, 1, 1], [], []>} : vector<2x256xbf16>, vector<256x512xbf16>, vector<2x512xf32> -> vector<2x512xf32>
    %28 = arith.addf %22, %27 : vector<2x512xf32>
    %c0_41 = arith.constant 0 : index
    %c0_42 = arith.constant 0 : index
    %c2_43 = arith.constant 2 : index
    %c0_44 = arith.constant 0 : index
    %29 = vector.load %arg3[%c0_41, %c0_42, %c2_43, %c0_44] : memref<1x1x4x256xbf16, #tpu.memory_space<vmem>>, vector<1x1x2x256xbf16>
    %30 = vector.shape_cast %29 : vector<1x1x2x256xbf16> to vector<2x256xbf16>
    %c1_45 = arith.constant 1 : index
    %c2_46 = arith.constant 2 : index
    %c0_47 = arith.constant 0 : index
    %c0_48 = arith.constant 0 : index
    %31 = vector.load %arg5[%c1_45, %c2_46, %c0_47, %c0_48] : memref<3x3x256x512xbf16, #tpu.memory_space<vmem>>, vector<1x1x256x512xbf16>
    %32 = vector.shape_cast %31 : vector<1x1x256x512xbf16> to vector<256x512xbf16>
    %cst_49 = arith.constant dense<0.000000e+00> : vector<2x512xf32>
    %33 = tpu.matmul %30, %32, %cst_49 {dimension_numbers = #tpu.dot_dimension_numbers<[1], [0], [0], [1], [0, 0, 1, 1], [], []>} : vector<2x256xbf16>, vector<256x512xbf16>, vector<2x512xf32> -> vector<2x512xf32>
    %34 = arith.addf %28, %33 : vector<2x512xf32>
    %c0_50 = arith.constant 0 : index
    %c0_51 = arith.constant 0 : index
    %c0_52 = arith.constant 0 : index
    %c0_53 = arith.constant 0 : index
    %35 = vector.load %arg4[%c0_50, %c0_51, %c0_52, %c0_53] : memref<1x1x4x256xbf16, #tpu.memory_space<vmem>>, vector<1x1x2x256xbf16>
    %36 = vector.shape_cast %35 : vector<1x1x2x256xbf16> to vector<2x256xbf16>
    %c2_54 = arith.constant 2 : index
    %c0_55 = arith.constant 0 : index
    %c0_56 = arith.constant 0 : index
    %c0_57 = arith.constant 0 : index
    %37 = vector.load %arg5[%c2_54, %c0_55, %c0_56, %c0_57] : memref<3x3x256x512xbf16, #tpu.memory_space<vmem>>, vector<1x1x256x512xbf16>
    %38 = vector.shape_cast %37 : vector<1x1x256x512xbf16> to vector<256x512xbf16>
    %cst_58 = arith.constant dense<0.000000e+00> : vector<2x512xf32>
    %39 = tpu.matmul %36, %38, %cst_58 {dimension_numbers = #tpu.dot_dimension_numbers<[1], [0], [0], [1], [0, 0, 1, 1], [], []>} : vector<2x256xbf16>, vector<256x512xbf16>, vector<2x512xf32> -> vector<2x512xf32>
    %40 = arith.addf %34, %39 : vector<2x512xf32>
    %c0_59 = arith.constant 0 : index
    %c0_60 = arith.constant 0 : index
    %c1_61 = arith.constant 1 : index
    %c0_62 = arith.constant 0 : index
    %41 = vector.load %arg4[%c0_59, %c0_60, %c1_61, %c0_62] : memref<1x1x4x256xbf16, #tpu.memory_space<vmem>>, vector<1x1x2x256xbf16>
    %42 = vector.shape_cast %41 : vector<1x1x2x256xbf16> to vector<2x256xbf16>
    %c2_63 = arith.constant 2 : index
    %c1_64 = arith.constant 1 : index
    %c0_65 = arith.constant 0 : index
    %c0_66 = arith.constant 0 : index
    %43 = vector.load %arg5[%c2_63, %c1_64, %c0_65, %c0_66] : memref<3x3x256x512xbf16, #tpu.memory_space<vmem>>, vector<1x1x256x512xbf16>
    %44 = vector.shape_cast %43 : vector<1x1x256x512xbf16> to vector<256x512xbf16>
    %cst_67 = arith.constant dense<0.000000e+00> : vector<2x512xf32>
    %45 = tpu.matmul %42, %44, %cst_67 {dimension_numbers = #tpu.dot_dimension_numbers<[1], [0], [0], [1], [0, 0, 1, 1], [], []>} : vector<2x256xbf16>, vector<256x512xbf16>, vector<2x512xf32> -> vector<2x512xf32>
    %46 = arith.addf %40, %45 : vector<2x512xf32>
    %c0_68 = arith.constant 0 : index
    %c0_69 = arith.constant 0 : index
    %c2_70 = arith.constant 2 : index
    %c0_71 = arith.constant 0 : index
    %47 = vector.load %arg4[%c0_68, %c0_69, %c2_70, %c0_71] : memref<1x1x4x256xbf16, #tpu.memory_space<vmem>>, vector<1x1x2x256xbf16>
    %48 = vector.shape_cast %47 : vector<1x1x2x256xbf16> to vector<2x256xbf16>
    %c2_72 = arith.constant 2 : index
    %c2_73 = arith.constant 2 : index
    %c0_74 = arith.constant 0 : index
    %c0_75 = arith.constant 0 : index
    %49 = vector.load %arg5[%c2_72, %c2_73, %c0_74, %c0_75] : memref<3x3x256x512xbf16, #tpu.memory_space<vmem>>, vector<1x1x256x512xbf16>
    %50 = vector.shape_cast %49 : vector<1x1x256x512xbf16> to vector<256x512xbf16>
    %cst_76 = arith.constant dense<0.000000e+00> : vector<2x512xf32>
    %51 = tpu.matmul %48, %50, %cst_76 {dimension_numbers = #tpu.dot_dimension_numbers<[1], [0], [0], [1], [0, 0, 1, 1], [], []>} : vector<2x256xbf16>, vector<256x512xbf16>, vector<2x512xf32> -> vector<2x512xf32>
    %52 = arith.addf %46, %51 : vector<2x512xf32>
    %c0_77 = arith.constant 0 : index
    %c0_78 = arith.constant 0 : index
    %53 = vector.load %arg6[%c0_77, %c0_78] : memref<1x512xf32, #tpu.memory_space<vmem>>, vector<1x512xf32>
    %54 = vector.broadcast %53 : vector<1x512xf32> to vector<2x512xf32>
    %55 = arith.addf %52, %54 : vector<2x512xf32>
    %cst_79 = arith.constant 0.000000e+00 : f32
    %56 = vector.broadcast %cst_79 : f32 to vector<2x512xf32>
    %57 = arith.maximumf %55, %56 : vector<2x512xf32>
    %58 = arith.truncf %57 : vector<2x512xf32> to vector<2x512xbf16>
    %c0_80 = arith.constant 0 : index
    %c0_81 = arith.constant 0 : index
    %c0_82 = arith.constant 0 : index
    %c0_83 = arith.constant 0 : index
    %59 = vector.load %arg7[%c0_80, %c0_81, %c0_82, %c0_83] : memref<1x1x2x512xbf16, #tpu.memory_space<vmem>>, vector<1x1x2x512xbf16>
    %60 = vector.shape_cast %59 : vector<1x1x2x512xbf16> to vector<2x512xbf16>
    %61 = vector.shape_cast %58 : vector<2x512xbf16> to vector<1x1x2x512xbf16>
    tpu.vector_store %arg7[%c0_80, %c0_81, %c0_82, %c0_83], %61 {strides = array<i32>} : memref<1x1x2x512xbf16, #tpu.memory_space<vmem>>, vector<1x1x2x512xbf16>,
    return
  }
  func.func @transform_0(%arg0: i32, %arg1: i32) -> (i32, i32, i32, i32) {
    %c1_i32 = arith.constant 1 : i32
    %0 = arith.muli %c1_i32, %arg1 : i32
    %c0_i32 = arith.constant 0 : i32
    %1 = arith.addi %0, %c0_i32 : i32
    %c0_i32_0 = arith.constant 0 : i32
    %c0_i32_1 = arith.constant 0 : i32
    %c0_i32_2 = arith.constant 0 : i32
    return %arg0, %1, %c0_i32_0, %c0_i32_1 : i32, i32, i32, i32
  }
  func.func @transform_1(%arg0: i32, %arg1: i32) -> (i32, i32, i32, i32) {
    %c1_i32 = arith.constant 1 : i32
    %0 = arith.muli %c1_i32, %arg1 : i32
    %c1_i32_0 = arith.constant 1 : i32
    %1 = arith.addi %0, %c1_i32_0 : i32
    %c0_i32 = arith.constant 0 : i32
    %c0_i32_1 = arith.constant 0 : i32
    %c0_i32_2 = arith.constant 0 : i32
    return %arg0, %1, %c0_i32, %c0_i32_1 : i32, i32, i32, i32
  }
  func.func @transform_2(%arg0: i32, %arg1: i32) -> (i32, i32, i32, i32) {
    %c1_i32 = arith.constant 1 : i32
    %0 = arith.muli %c1_i32, %arg1 : i32
    %c2_i32 = arith.constant 2 : i32
    %1 = arith.addi %0, %c2_i32 : i32
    %c0_i32 = arith.constant 0 : i32
    %c0_i32_0 = arith.constant 0 : i32
    %c0_i32_1 = arith.constant 0 : i32
    return %arg0, %1, %c0_i32, %c0_i32_0 : i32, i32, i32, i32
  }
  func.func @transform_3(%arg0: i32, %arg1: i32) -> (i32, i32, i32, i32) {
    %c0_i32 = arith.constant 0 : i32
    %c0_i32_0 = arith.constant 0 : i32
    %c0_i32_1 = arith.constant 0 : i32
    %c0_i32_2 = arith.constant 0 : i32
    %c0_i32_3 = arith.constant 0 : i32
    return %c0_i32, %c0_i32_0, %c0_i32_1, %c0_i32_2 : i32, i32, i32, i32
  }
  func.func @transform_4(%arg0: i32, %arg1: i32) -> (i32, i32) {
    %c0_i32 = arith.constant 0 : i32
    %c0_i32_0 = arith.constant 0 : i32
    %c0_i32_1 = arith.constant 0 : i32
    return %c0_i32, %c0_i32_0 : i32, i32
  }
  func.func @transform_5(%arg0: i32, %arg1: i32) -> (i32, i32, i32, i32) {
    %c0_i32 = arith.constant 0 : i32
    %c0_i32_0 = arith.constant 0 : i32
    %c0_i32_1 = arith.constant 0 : i32
    return %arg0, %arg1, %c0_i32, %c0_i32_0 : i32, i32, i32, i32
  }
}

module attributes {stable_mosaic.version = 11 : i64} {
  func.func @_mm_bias_kernel(%arg0: i32, %arg1: i32, %arg2: memref<1x4x512xbf16, #tpu.memory_space<vmem>>, %arg3: memref<512x1024xbf16, #tpu.memory_space<vmem>>, %arg4: memref<1x1024xf32, #tpu.memory_space<vmem>>, %arg5: memref<1x4x1024xbf16, #tpu.memory_space<vmem>>) attributes {dimension_semantics = [#tpu.dimension_semantics<parallel>, #tpu.dimension_semantics<parallel>], iteration_bounds = array<i64: 2, 1>, scalar_prefetch = 0 : i64, scratch_operands = 0 : i64, tpu.core_type = #tpu.core_type<tc>, window_params = [{transform_indices = @transform_0, window_bounds = array<i64: 1, 4, 512>}, {pipeline_mode = #tpu.pipeline_mode<synchronous>, transform_indices = @transform_1, window_bounds = array<i64: 512, 1024>}, {pipeline_mode = #tpu.pipeline_mode<synchronous>, transform_indices = @transform_2, window_bounds = array<i64: 1, 1024>}, {transform_indices = @transform_3, window_bounds = array<i64: 1, 4, 1024>}]} {
    %c0 = arith.constant 0 : index
    %c0_0 = arith.constant 0 : index
    %c0_1 = arith.constant 0 : index
    %0 = vector.load %arg2[%c0, %c0_0, %c0_1] : memref<1x4x512xbf16, #tpu.memory_space<vmem>>, vector<1x4x512xbf16>
    %1 = vector.shape_cast %0 : vector<1x4x512xbf16> to vector<4x512xbf16>
    %c0_2 = arith.constant 0 : index
    %c0_3 = arith.constant 0 : index
    %2 = vector.load %arg3[%c0_2, %c0_3] : memref<512x1024xbf16, #tpu.memory_space<vmem>>, vector<512x1024xbf16>
    %cst = arith.constant dense<0.000000e+00> : vector<4x1024xf32>
    %3 = tpu.matmul %1, %2, %cst {dimension_numbers = #tpu.dot_dimension_numbers<[1], [0], [0], [1], [0, 0, 1, 1], [], []>} : vector<4x512xbf16>, vector<512x1024xbf16>, vector<4x1024xf32> -> vector<4x1024xf32>
    %c0_4 = arith.constant 0 : index
    %c0_5 = arith.constant 0 : index
    %4 = vector.load %arg4[%c0_4, %c0_5] : memref<1x1024xf32, #tpu.memory_space<vmem>>, vector<1x1024xf32>
    %5 = vector.broadcast %4 : vector<1x1024xf32> to vector<4x1024xf32>
    %6 = arith.addf %3, %5 : vector<4x1024xf32>
    %7 = arith.truncf %6 : vector<4x1024xf32> to vector<4x1024xbf16>
    %c0_6 = arith.constant 0 : index
    %c0_7 = arith.constant 0 : index
    %c0_8 = arith.constant 0 : index
    %8 = vector.load %arg5[%c0_6, %c0_7, %c0_8] : memref<1x4x1024xbf16, #tpu.memory_space<vmem>>, vector<1x4x1024xbf16>
    %9 = vector.shape_cast %8 : vector<1x4x1024xbf16> to vector<4x1024xbf16>
    %10 = vector.shape_cast %7 : vector<4x1024xbf16> to vector<1x4x1024xbf16>
    tpu.vector_store %arg5[%c0_6, %c0_7, %c0_8], %10 {strides = array<i32>} : memref<1x4x1024xbf16, #tpu.memory_space<vmem>>, vector<1x4x1024xbf16>,
    return
  }
  func.func @transform_0(%arg0: i32, %arg1: i32) -> (i32, i32, i32) {
    %c0_i32 = arith.constant 0 : i32
    %c0_i32_0 = arith.constant 0 : i32
    return %arg0, %arg1, %c0_i32 : i32, i32, i32
  }
  func.func @transform_1(%arg0: i32, %arg1: i32) -> (i32, i32) {
    %c0_i32 = arith.constant 0 : i32
    %c0_i32_0 = arith.constant 0 : i32
    %c0_i32_1 = arith.constant 0 : i32
    return %c0_i32, %c0_i32_0 : i32, i32
  }
  func.func @transform_2(%arg0: i32, %arg1: i32) -> (i32, i32) {
    %c0_i32 = arith.constant 0 : i32
    %c0_i32_0 = arith.constant 0 : i32
    %c0_i32_1 = arith.constant 0 : i32
    return %c0_i32, %c0_i32_0 : i32, i32
  }
  func.func @transform_3(%arg0: i32, %arg1: i32) -> (i32, i32, i32) {
    %c0_i32 = arith.constant 0 : i32
    %c0_i32_0 = arith.constant 0 : i32
    return %arg0, %arg1, %c0_i32 : i32, i32, i32
  }
}

module attributes {stable_mosaic.version = 11 : i64} {
  func.func @_mm_bias_kernel(%arg0: i32, %arg1: i32, %arg2: memref<1x16x256xbf16, #tpu.memory_space<vmem>>, %arg3: memref<256x512xbf16, #tpu.memory_space<vmem>>, %arg4: memref<1x512xf32, #tpu.memory_space<vmem>>, %arg5: memref<1x16x512xbf16, #tpu.memory_space<vmem>>) attributes {dimension_semantics = [#tpu.dimension_semantics<parallel>, #tpu.dimension_semantics<parallel>], iteration_bounds = array<i64: 2, 1>, scalar_prefetch = 0 : i64, scratch_operands = 0 : i64, tpu.core_type = #tpu.core_type<tc>, window_params = [{transform_indices = @transform_0, window_bounds = array<i64: 1, 16, 256>}, {pipeline_mode = #tpu.pipeline_mode<synchronous>, transform_indices = @transform_1, window_bounds = array<i64: 256, 512>}, {pipeline_mode = #tpu.pipeline_mode<synchronous>, transform_indices = @transform_2, window_bounds = array<i64: 1, 512>}, {transform_indices = @transform_3, window_bounds = array<i64: 1, 16, 512>}]} {
    %c0 = arith.constant 0 : index
    %c0_0 = arith.constant 0 : index
    %c0_1 = arith.constant 0 : index
    %0 = vector.load %arg2[%c0, %c0_0, %c0_1] : memref<1x16x256xbf16, #tpu.memory_space<vmem>>, vector<1x16x256xbf16>
    %1 = vector.shape_cast %0 : vector<1x16x256xbf16> to vector<16x256xbf16>
    %c0_2 = arith.constant 0 : index
    %c0_3 = arith.constant 0 : index
    %2 = vector.load %arg3[%c0_2, %c0_3] : memref<256x512xbf16, #tpu.memory_space<vmem>>, vector<256x512xbf16>
    %cst = arith.constant dense<0.000000e+00> : vector<16x512xf32>
    %3 = tpu.matmul %1, %2, %cst {dimension_numbers = #tpu.dot_dimension_numbers<[1], [0], [0], [1], [0, 0, 1, 1], [], []>} : vector<16x256xbf16>, vector<256x512xbf16>, vector<16x512xf32> -> vector<16x512xf32>
    %c0_4 = arith.constant 0 : index
    %c0_5 = arith.constant 0 : index
    %4 = vector.load %arg4[%c0_4, %c0_5] : memref<1x512xf32, #tpu.memory_space<vmem>>, vector<1x512xf32>
    %5 = vector.broadcast %4 : vector<1x512xf32> to vector<16x512xf32>
    %6 = arith.addf %3, %5 : vector<16x512xf32>
    %7 = arith.truncf %6 : vector<16x512xf32> to vector<16x512xbf16>
    %c0_6 = arith.constant 0 : index
    %c0_7 = arith.constant 0 : index
    %c0_8 = arith.constant 0 : index
    %8 = vector.load %arg5[%c0_6, %c0_7, %c0_8] : memref<1x16x512xbf16, #tpu.memory_space<vmem>>, vector<1x16x512xbf16>
    %9 = vector.shape_cast %8 : vector<1x16x512xbf16> to vector<16x512xbf16>
    %10 = vector.shape_cast %7 : vector<16x512xbf16> to vector<1x16x512xbf16>
    tpu.vector_store %arg5[%c0_6, %c0_7, %c0_8], %10 {strides = array<i32>} : memref<1x16x512xbf16, #tpu.memory_space<vmem>>, vector<1x16x512xbf16>,
    return
  }
  func.func @transform_0(%arg0: i32, %arg1: i32) -> (i32, i32, i32) {
    %c0_i32 = arith.constant 0 : i32
    %c0_i32_0 = arith.constant 0 : i32
    return %arg0, %arg1, %c0_i32 : i32, i32, i32
  }
  func.func @transform_1(%arg0: i32, %arg1: i32) -> (i32, i32) {
    %c0_i32 = arith.constant 0 : i32
    %c0_i32_0 = arith.constant 0 : i32
    %c0_i32_1 = arith.constant 0 : i32
    return %c0_i32, %c0_i32_0 : i32, i32
  }
  func.func @transform_2(%arg0: i32, %arg1: i32) -> (i32, i32) {
    %c0_i32 = arith.constant 0 : i32
    %c0_i32_0 = arith.constant 0 : i32
    %c0_i32_1 = arith.constant 0 : i32
    return %c0_i32, %c0_i32_0 : i32, i32
  }
  func.func @transform_3(%arg0: i32, %arg1: i32) -> (i32, i32, i32) {
    %c0_i32 = arith.constant 0 : i32
    %c0_i32_0 = arith.constant 0 : i32
    return %arg0, %arg1, %c0_i32 : i32, i32, i32
  }
}

module attributes {stable_mosaic.version = 11 : i64} {
  func.func @_up3_outc_kernel(%arg0: i32, %arg1: i32, %arg2: memref<1x64x128xbf16, #tpu.memory_space<vmem>>, %arg3: memref<128x256xbf16, #tpu.memory_space<vmem>>, %arg4: memref<1x256xf32, #tpu.memory_space<vmem>>, %arg5: memref<256x4xbf16, #tpu.memory_space<vmem>>, %arg6: memref<1x1xf32, #tpu.memory_space<vmem>>, %arg7: memref<1x64x4xf32, #tpu.memory_space<vmem>>) attributes {dimension_semantics = [#tpu.dimension_semantics<parallel>, #tpu.dimension_semantics<parallel>], iteration_bounds = array<i64: 2, 1>, scalar_prefetch = 0 : i64, scratch_operands = 0 : i64, tpu.core_type = #tpu.core_type<tc>, window_params = [{transform_indices = @transform_0, window_bounds = array<i64: 1, 64, 128>}, {pipeline_mode = #tpu.pipeline_mode<synchronous>, transform_indices = @transform_1, window_bounds = array<i64: 128, 256>}, {pipeline_mode = #tpu.pipeline_mode<synchronous>, transform_indices = @transform_2, window_bounds = array<i64: 1, 256>}, {pipeline_mode = #tpu.pipeline_mode<synchronous>, transform_indices = @transform_3, window_bounds = array<i64: 256, 4>}, {pipeline_mode = #tpu.pipeline_mode<synchronous>, transform_indices = @transform_4, window_bounds = array<i64: 1, 1>}, {transform_indices = @transform_5, window_bounds = array<i64: 1, 64, 4>}]} {
    %c0 = arith.constant 0 : index
    %c0_0 = arith.constant 0 : index
    %c0_1 = arith.constant 0 : index
    %0 = vector.load %arg2[%c0, %c0_0, %c0_1] : memref<1x64x128xbf16, #tpu.memory_space<vmem>>, vector<1x64x128xbf16>
    %1 = vector.shape_cast %0 : vector<1x64x128xbf16> to vector<64x128xbf16>
    %c0_2 = arith.constant 0 : index
    %c0_3 = arith.constant 0 : index
    %2 = vector.load %arg3[%c0_2, %c0_3] : memref<128x256xbf16, #tpu.memory_space<vmem>>, vector<128x256xbf16>
    %cst = arith.constant dense<0.000000e+00> : vector<64x256xf32>
    %3 = tpu.matmul %1, %2, %cst {dimension_numbers = #tpu.dot_dimension_numbers<[1], [0], [0], [1], [0, 0, 1, 1], [], []>} : vector<64x128xbf16>, vector<128x256xbf16>, vector<64x256xf32> -> vector<64x256xf32>
    %c0_4 = arith.constant 0 : index
    %c0_5 = arith.constant 0 : index
    %4 = vector.load %arg4[%c0_4, %c0_5] : memref<1x256xf32, #tpu.memory_space<vmem>>, vector<1x256xf32>
    %5 = vector.broadcast %4 : vector<1x256xf32> to vector<64x256xf32>
    %6 = arith.addf %3, %5 : vector<64x256xf32>
    %7 = arith.truncf %6 : vector<64x256xf32> to vector<64x256xbf16>
    %c0_6 = arith.constant 0 : index
    %c0_7 = arith.constant 0 : index
    %8 = vector.load %arg5[%c0_6, %c0_7] : memref<256x4xbf16, #tpu.memory_space<vmem>>, vector<256x4xbf16>
    %cst_8 = arith.constant dense<0.000000e+00> : vector<64x4xf32>
    %9 = tpu.matmul %7, %8, %cst_8 {dimension_numbers = #tpu.dot_dimension_numbers<[1], [0], [0], [1], [0, 0, 1, 1], [], []>} : vector<64x256xbf16>, vector<256x4xbf16>, vector<64x4xf32> -> vector<64x4xf32>
    %c0_9 = arith.constant 0 : index
    %c0_10 = arith.constant 0 : index
    %10 = vector.load %arg6[%c0_9, %c0_10] : memref<1x1xf32, #tpu.memory_space<vmem>>, vector<1x1xf32>
    %11 = vector.broadcast %10 : vector<1x1xf32> to vector<64x4xf32>
    %12 = arith.addf %9, %11 : vector<64x4xf32>
    %13 = arith.negf %12 : vector<64x4xf32>
    %14 = math.exp %13 : vector<64x4xf32>
    %cst_11 = arith.constant 1.000000e+00 : f32
    %15 = vector.broadcast %cst_11 : f32 to vector<64x4xf32>
    %16 = arith.addf %15, %14 : vector<64x4xf32>
    %17 = arith.divf %15, %16 : vector<64x4xf32>
    %c0_12 = arith.constant 0 : index
    %c0_13 = arith.constant 0 : index
    %c0_14 = arith.constant 0 : index
    %18 = vector.load %arg7[%c0_12, %c0_13, %c0_14] : memref<1x64x4xf32, #tpu.memory_space<vmem>>, vector<1x64x4xf32>
    %19 = vector.shape_cast %18 : vector<1x64x4xf32> to vector<64x4xf32>
    %20 = vector.shape_cast %17 : vector<64x4xf32> to vector<1x64x4xf32>
    tpu.vector_store %arg7[%c0_12, %c0_13, %c0_14], %20 {strides = array<i32>} : memref<1x64x4xf32, #tpu.memory_space<vmem>>, vector<1x64x4xf32>,
    return
  }
  func.func @transform_0(%arg0: i32, %arg1: i32) -> (i32, i32, i32) {
    %c0_i32 = arith.constant 0 : i32
    %c0_i32_0 = arith.constant 0 : i32
    return %arg0, %arg1, %c0_i32 : i32, i32, i32
  }
  func.func @transform_1(%arg0: i32, %arg1: i32) -> (i32, i32) {
    %c0_i32 = arith.constant 0 : i32
    %c0_i32_0 = arith.constant 0 : i32
    %c0_i32_1 = arith.constant 0 : i32
    return %c0_i32, %c0_i32_0 : i32, i32
  }
  func.func @transform_2(%arg0: i32, %arg1: i32) -> (i32, i32) {
    %c0_i32 = arith.constant 0 : i32
    %c0_i32_0 = arith.constant 0 : i32
    %c0_i32_1 = arith.constant 0 : i32
    return %c0_i32, %c0_i32_0 : i32, i32
  }
  func.func @transform_3(%arg0: i32, %arg1: i32) -> (i32, i32) {
    %c0_i32 = arith.constant 0 : i32
    %c0_i32_0 = arith.constant 0 : i32
    %c0_i32_1 = arith.constant 0 : i32
    return %c0_i32, %c0_i32_0 : i32, i32
  }
  func.func @transform_4(%arg0: i32, %arg1: i32) -> (i32, i32) {
    %c0_i32 = arith.constant 0 : i32
    %c0_i32_0 = arith.constant 0 : i32
    %c0_i32_1 = arith.constant 0 : i32
    return %c0_i32, %c0_i32_0 : i32, i32
  }
  func.func @transform_5(%arg0: i32, %arg1: i32) -> (i32, i32, i32) {
    %c0_i32 = arith.constant 0 : i32
    %c0_i32_0 = arith.constant 0 : i32
    return %arg0, %arg1, %c0_i32 : i32, i32, i32
  }
}

</mosaic_0001>

<bundles_post_ra>
// kernel: refugee_camp_detector.7
= control target key start
LH: loop header
LB: loop body
LE: loop exit
PB: predicated region body
PF: predicated region fallthrough
CT: control target
= control target key end

     0   :  { %11 = vsyncpa [#allocation3], 0  ;;  %s2048_s21 = smov 0   ;;  %s2050_s22 = smov 0   ;;  %s2355_s0 = inlined_call_operand.vmem [shape: bf16[2,18,18,3], index: 0, kind: input, shape index: {}, may-alias: {0,1,2,3}]   ;;  %s2356_s1 = inlined_call_operand.vmem [shape: bf16[2,18,18,3], index: 1, kind: input, shape index: {}, may-alias: {0,1,2,3}]   ;;  %s2357_s2 = inlined_call_operand.vmem [shape: bf16[2,18,18,3], index: 2, kind: input, shape index: {}, may-alias: {0,1,2,3}]   ;;  %s2358_s3 = inlined_call_operand.vmem [shape: bf16[2,18,18,3], index: 3, kind: input, shape index: {}, may-alias: {0,1,2,3}]   ;;  %s2359_s4 = inlined_call_operand.vmem [shape: bf16[3,3,3,64], index: 4, kind: input, shape index: {}]   ;;  %s2360_s5 = inlined_call_operand.hbm [shape: f32[1,64], index: 5, kind: input, shape index: {}]   ;;  %s2361_s6 = inlined_call_operand.vmem [shape: bf16[2,8,16,64], index: 6, kind: output, shape index: {}]  }
   0x1   :  { %s2052_s23 = smov 0   ;;  %s2054_s24 = smov 0  }
   0x2   :  { %s2056_s25 = smov 0  }
   0x3 LB: > { %s1645_s26 = sadd.s32 4294967295, %s2007_s25   ;;  %s26_s27 = sadd.s32 1, %s1999_s23  ;;  %s2007_s25 = sphi %s2056_s25, %s17_s25   ;;  %s2003_s24 = sphi %s2054_s24, %s2376_s24   ;;  %s1999_s23 = sphi %s2052_s23, %s2375_s23   ;;  %s1995_s22 = sphi %s2050_s22, %s2374_s22   ;;  %s1991_s21 = sphi %s2048_s21, %s2373_s21  }
   0x4   : > { %p27_p0 = scmp.ge.s32.totalorder %s26_s27, 8  ;;  %s29_s28 = sadd.s32 1, %s2003_s24 }
   0x5   : > { %p1655_p1 = scmp.ge.s32.totalorder %s2007_s25, 1  ;;  %p230_p2 = scmp.lt.s32.totalorder %s2007_s25, 17 }
   0x6   : > { %s2378_s27 = smov (%p27_p0, %s26_s27), 0  ;;  %s2380_s28 = smov (!%p27_p0, %s29_s28), %s2003_s24 }
   0x7   : > { %p2081_p3 = pnand %p1655_p1, %p230_p2  ;;  %p31_p4 = scmp.ge.s32.totalorder %s2380_s28, 2 }
   0x8   : > { %p2085_p5 = scmp.eq.s32.totalorder %s1645_s26, 0  ;;  %s2009_s7 = smov [#allocation2]  }
   0x9   : > { %s2365_s29 = scalar_select %p2081_p3, 1, 0 }
   0xa   : > { %s2366_s30 = scalar_select %p2085_p5, 1, 0 }
   0xb   : > { %p1872_p6 = pneg %p2081_p3  ;;  %s2382_s28 = smov (%p31_p4, %s2380_s28), 0 }
   0xc   : > { %s246_s8 = sshll.u32 %s2009_s7, 4  ;;  %s1937_s12 = scalar_lea.hbm %s2360_s5, 16  ;;  %s247_s8 = int_to_ptr.vmem [resolvable:$true] %s246_s8 }
   0xd   : > { %p2095_p7 = pnand %p2085_p5, %p1872_p6  ;;  %p1938_p8 = scmp.ne.s32.totalorder %s2360_s5, %s1937_s12 }
   0xe   : > { %p1944_p12 = scmp.lt.u32.totalorder %s1937_s12, %s2360_s5 }
   0xf   : > { %p1939_p9 = pneg %p2095_p7 }
  0x11   : > { %p1940_p10 = pnand %p1939_p9, %p1938_p8 }
  0x13   : > { %p1941_p11 = pneg %p1940_p10 }
  0x15   : > { %p1946_p13 = pnand %p1944_p12, %p1941_p11 }
  0x17   : > { %1949 = shalt.err (!%p1946_p13)
}
  0x18   : > { %s1950_s17 = scalar_lea.vmem %s247_s8, 16  ;;  %s1957_s18 = scalar_lea.vmem %s247_s8, 32 }
  0x19   : > { %p1951_p0 = scmp.ne.s32.totalorder %s247_s8, %s1950_s17  ;;  %p1958_p4 = scmp.lt.s32.totalorder %s247_s8, %s247_s8 }
  0x1a   : > { %p1959_p6 = scmp.lt.s32.totalorder %s1957_s18, %s1950_s17 }
  0x1b   : > { %p1953_p1 = pnand %p1951_p0, %p1939_p9 }
  0x1c   : > { %p1960_p5 = por %p1959_p6, %p1958_p4 }
  0x1d   : > { %p1954_p2 = pneg %p1953_p1 }
  0x1f   : > { %p1961_p3 = pnand %p1960_p5, %p1954_p2 }
  0x21   : > { %1964 = shalt.err (!%p1961_p3)
}
  0x22   : > { %1875 = dma.hbm_to_vmem [thread:$0]  (!%p2095_p7), %s2360_s5, 16, %s247_s8, [#allocation3]  }
  0x23   : > { %p2368_p8 = scmp.ne.s32.totalorder %s2365_s29, 0 }
  0x24   : > { %p2369_p10 = scmp.ne.s32.totalorder (!%p2368_p8), %s2366_s30, 0 }
  0x25   : > { %321 = sbr.rel (%p2368_p8) target bundleno = 356 (0x164), region = 44 }
  0x2c   : > { %1986 = dma.done.wait (%p2369_p10), [#allocation3], 16  }
  0x2d   : > { %1988 = vsyncadd (%p2369_p10), [#allocation3], 4294967280  ;;  %vm484_vm0 = vcmask 1040384   ;;  %v2010_v0 = vmov 0.0   ;;  %s2124_s26 = sshll.u32 %s1991_s21, 1  ;;  %p394_p3 = scmp.lt.s32.totalorder %s1995_s22, 1 }
  0x2e   : > { %1755 = vmatprep.subr.bf16.mxu0 %v2010_v0  ;;  %1761 = vmatprep.subr.bf16.mxu1 %v2010_v0  ;;  %vm485_vm1 = vcmask 1041408   ;;  %v2011_v1 = vmov 65535   ;;  %vm2012_vm2 = vmmov 0   ;;  %p396_p5 = scmp.lt.s32.totalorder %s2124_s26, 17  ;;  %s405_s7 = sadd.s32 1, %s2124_s26  ;;  %vm480_vm3 = vcmask 23552  }
  0x2f   : > { %v486_v2 = vsel %vm484_vm0, 4294967295, %v2011_v1  ;;  %1763 = vmatprep.mubr.msk.bf16.mxu1 %vm2012_vm2, %v2010_v0  ;;  %1757 = vmatprep.mubr.msk.bf16.mxu0 %vm2012_vm2, %v2010_v0  ;;  %s2384_s22 = smov (!%p394_p3, %s1995_s22), 1  ;;  %s418_s9 = sadd.s32 2, %s2124_s26  ;;  %v1671_v4 = vld [vmem:[%s2359_s4 + $0x2] sm:$0x3]  ;;  %vm584_vm5 = vcmask 1046528  }
  0x30   : > { %s397_s29 = scalar_select %p396_p5, %s2124_s26, 17  ;;  %v2136_v3 = vsel %vm485_vm1, %v486_v2, 0  ;;  %v455_v5 = vld [vmem:[%s2359_s4] sm:$0x3]  ;;  %v1679_v8 = vld [vmem:[%s2359_s4 + $0x6] sm:$0x3] }
  0x31   : > { %s2139_s30 = smul.u32 54, %s2384_s22  ;;  %v2150_v6 = vand.u32 %v1671_v4, %v2136_v3  ;;  %v2153_v7 = vand.u32 %v2136_v3, %v455_v5  ;;  %p2159_p7 = scmp.lt.s32.totalorder %s405_s7, 17  ;;  %v2175_v12 = vand.u32 %v1679_v8, %v2136_v3  ;;  %v1676_v19 = vld [vmem:[%s2359_s4 + $0x4] sm:$0x3]  ;;  %vm467_vm4 = vsmask.f32 7424 }
  0x32   : > { %s1863_s8 = smul.u32 3, %s397_s29  ;;  %p2163_p9 = scmp.lt.s32.totalorder %s418_s9, 17  ;;  %v1686_v22 = vld [vmem:[%s2359_s4 + $0xa] sm:$0x3]  ;;  %v2196_v25 = vand.u32 %v1676_v19, %v2136_v3  ;;  %v1682_v28 = vld [vmem:[%s2359_s4 + $0x8] sm:$0x3] }
  0x33   : > { %1756 = vmatpush3.bf16.msra.mxu0 %v2150_v6  ;;  %1762 = vmatpush3.bf16.msra.mxu1 %v2153_v7  ;;  %s2386_s7 = smov (!%p2159_p7, %s405_s7), 17  ;;  %s431_s15 = sadd.s32 3, %s2124_s26  ;;  %v2219_v29 = vand.u32 %v1686_v22, %v2136_v3  ;;  %v1692_v41 = vld [vmem:[%s2359_s4 + $0xe] sm:$0x3]  ;;  %v724_v46 = vand.u32 %v1682_v28, %v2136_v3  ;;  %v1689_v58 = vld [vmem:[%s2359_s4 + $0xc] sm:$0x3] }
  0x34   : > { %s400_s14 = sadd.s32 %s2139_s30, %s1863_s8  ;;  %1767 = vmatprep.subr.bf16.mxu0 %v2010_v0  ;;  %1773 = vmatprep.subr.bf16.mxu1 %v2010_v0  ;;  %s2388_s9 = smov (!%p2163_p9, %s418_s9), 17  ;;  %v2245_v51 = vand.u32 %v1692_v41, %v2136_v3  ;;  %v840_v62 = vand.u32 %v1689_v58, %v2136_v3  ;;  %v1696_v1 = vld [vmem:[%s2359_s4 + $0x10] sm:$0x3]  ;;  %vm1471_vm6 = vcmask 519168  }
  0x35   : > { %s1661_s18 = sshll.u32 %s400_s14, 2  ;;  %s1865_s10 = smul.u32 3, %s2386_s7  ;;  %v972_v5 = vand.u32 %v1696_v1, %v2136_v3 }
  0x36   : > { %s402_s8 = scalar_lea.vmem %s2355_s0, %s1661_s18  ;;  %s1866_s13 = smul.u32 3, %s2388_s9 }
  0x37   : > { %v453_v9 = vld [vmem:[%s402_s8] sm:$0xf]  ;;  %v454_v10 = vld [vmem:[%s402_s8 + $0x4] sm:$0xf]  ;;  %s412_s14 = sadd.s32 %s1865_s10, %s2139_s30  ;;  %p2210_p11 = scmp.lt.s32.totalorder %s431_s15, 17 }
  0x38   : > { %v578_v11 = vld [vmem:[%s402_s8] sm:$0xe]  ;;  %v1672_v13 = vcombine.low %v453_v9, %v454_v10  ;;  %v1924_v14 = vld [vmem:[%s402_s8 + $0x8] ss:$0 sps:$4 sm:$0x11]   ;;  %s1663_s16 = sshll.u32 %s412_s14, 2  ;;  %s425_s18 = sadd.s32 %s1866_s13, %s2139_s30 }
  0x39   : > { %v1677_v15 = vcombine.low %v578_v11, %v454_v10  ;;  %v476_v18 = vshll.u32 %v1924_v14, 16  ;;  %s414_s20 = scalar_lea.vmem %s2356_s1, %s1663_s16  ;;  %s1665_s29 = sshll.u32 %s425_s18, 2  ;;  %v586_v32 = vrot.slane %v1924_v14, 1 }
  0x3a   : > { %1764 = vmatmul.mubr.msk.bf16.vlgmr.msra.gmra.mrb[0].mxu1 %vm480_vm3, %v1672_v13  ;;  %v469_v16 = vshrl.u32 %v1672_v13, 16  ;;  %v471_v17 = vshll.u32 %v1672_v13, 16  ;;  %v2201_v26 = vld [vmem:[%s414_s20] sm:$0xff]   ;;  %s2206_s11 = scalar_lea.vmem %s2357_s2, %s1665_s29  ;;  %v1927_v34 = vld [vmem:[%s414_s20 + $0x8] ss:$0 sps:$4 sm:$0x11]  }
  0x3b   : > { %1774 = vmatpush3.bf16.msra.mxu1 %v2175_v12  ;;  %1775 = vmatprep.mubr.msk.bf16.mxu1 %vm2012_vm2, %v2010_v0  ;;  %v478_v21 = vrot.slane %v476_v18, 1  ;;  %v585_v23 = vrot.slane %v1677_v15, 1  ;;  %v695_v30 = vld [vmem:[%s414_s20] sm:$0xf]  ;;  %v696_v31 = vld [vmem:[%s414_s20 + $0x4] sm:$0xf] }
  0x3c   : > { %v473_v20 = vrot.slane %v471_v17, 1  ;;  %1785 = vmatprep.subr.bf16.mxu1 %v2010_v0  ;;  %v1683_v33 = vcombine.low %v695_v30, %v696_v31  ;;  %v769_v35 = vld [vmem:[%s414_s20] sm:$0xe]  ;;  %v886_v38 = vld [vmem:[%s2206_s11 + $0x4] sm:$0xf]  ;;  %v776_v39 = vrot.slane %v1927_v34, 1 }
  0x3d   : > { %v1687_v36 = vcombine.low %v769_v35, %v696_v31  ;;  %v885_v37 = vld [vmem:[%s2206_s11] sm:$0xf]  ;;  %v1930_v44 = vld [vmem:[%s2206_s11 + $0x8] ss:$0 sps:$4 sm:$0x11]   ;;  %v587_v45 = vsel %vm584_vm5, %v585_v23, %v586_v32  ;;  %s2390_s15 = smov (!%p2210_p11, %s431_s15), 17 }
  0x3e   : > { %v474_v24 = vor.u32 %v473_v20, %v469_v16  ;;  %v711_v40 = vshll.u32 %v1683_v33, 16  ;;  %v1693_v43 = vcombine.low %v885_v37, %v886_v38  ;;  %v709_v47 = vshrl.u32 %v1683_v33, 16  ;;  %s1867_s17 = smul.u32 3, %s2390_s15  ;;  %v959_v2 = vld [vmem:[%s2206_s11] sm:$0xe]  ;;  %p445_p12 = scmp.lt.s32.totalorder %s1991_s21, 7 }
  0x3f   : > { %v775_v42 = vrot.slane %v1687_v36, 1  ;;  %v716_v49 = vshll.u32 %v1927_v34, 16  ;;  %v906_v55 = vshll.u32 %v1930_v44, 16  ;;  %v1931_v4 = vld [vmem:[%s2206_s11] sm:$0xff]   ;;  %v1697_v8 = vcombine.low %v959_v2, %v886_v38  ;;  %s1669_s11 = sshll.u32 %s2384_s22, 4 }
  0x40   : > { %v479_v27 = vsel %vm467_vm4, %v474_v24, %v478_v21  ;;  %v713_v48 = vrot.slane %v711_v40, 1  ;;  %v901_v50 = vshll.u32 %v1693_v43, 16  ;;  %v899_v53 = vshrl.u32 %v1693_v43, 16  ;;  %s438_s18 = sadd.s32 %s1867_s17, %s2139_s30  ;;  %s2392_s21 = smov (!%p445_p12, %s1991_s21), 7 }
  0x41   : > { %1758 = vmatmul.mubr.msk.bf16.vlgmr.msra.gmra.mrb[0].mxu0 %vm480_vm3, %v479_v27  ;;  %v777_v52 = vsel %vm584_vm5, %v775_v42, %v776_v39  ;;  %v718_v57 = vrot.slane %v716_v49, 1  ;;  %s1667_s26 = sshll.u32 %s438_s18, 2  ;;  %v908_v60 = vrot.slane %v906_v55, 1  ;;  %v965_v9 = vrot.slane %v1697_v8, 1  ;;  %s1668_s10 = sshll.u32 %s2392_s21, 1 }
  0x42   : > { %1768 = vmatpush3.bf16.msra.mxu0 %v2196_v25  ;;  %1769 = vmatprep.mubr.msk.bf16.mxu0 %vm2012_vm2, %v2010_v0  ;;  %v903_v54 = vrot.slane %v901_v50, 1  ;;  %v714_v56 = vor.u32 %v713_v48, %v709_v47  ;;  %s2260_s30 = scalar_lea.vmem %s2358_s3, %s1667_s26  ;;  %v966_v10 = vrot.slane %v1930_v44, 1  ;;  %s449_s12 = sadd.s32 %s1669_s11, %s1668_s10 }
  0x43   : > { %1776 = vmatmul.mubr.msk.bf16.vlgmr.msra.gmra.mrb[4].mxu1 %vm480_vm3, %v2201_v26  ;;  %1779 = vmatprep.subr.bf16.mxu0 %v2010_v0  ;;  %v1404_v11 = vld [vmem:[%s2260_s30] sm:$0xe]  ;;  %v1935_v15 = vld [vmem:[%s2260_s30 + $0x8] ss:$0 sps:$4 sm:$0x11]   ;;  %s1670_s13 = sshll.u32 %s449_s12, 2 }
  0x44   : > { %1786 = vmatpush3.bf16.msra.mxu1 %v2219_v29  ;;  %1787 = vmatprep.mubr.msk.bf16.mxu1 %vm2012_vm2, %v2010_v0  ;;  %v904_v59 = vor.u32 %v903_v54, %v899_v53  ;;  %v719_v61 = vsel %vm467_vm4, %v714_v56, %v718_v57  ;;  %v967_v3 = vsel %vm584_vm5, %v965_v9, %v966_v10  ;;  %v1933_v14 = vld [vmem:[%s2260_s30] sm:$0xff]   ;;  %v1409_v18 = vrot.slane %v1935_v15, 1  ;;  %s451_s14 = scalar_lea.vmem %s2361_s6, %s1670_s13 }
  0x45   : > { %1797 = vmatprep.subr.bf16.mxu1 %v2010_v0  ;;  %v1354_v21 = vshll.u32 %v1935_v15, 16 }
  0x46   : > { %v909_v63 = vsel %vm467_vm4, %v904_v59, %v908_v60 }
  0x47   : > { %v1356_v24 = vrot.slane %v1354_v21, 1 }
  0x49   : > { %1770 = vmatmul.mubr.msk.bf16.vlgmr.msra.gmra.mrb[4].mxu0 %vm480_vm3, %v587_v45 }
  0x4a   : > { %1780 = vmatpush3.bf16.msra.mxu0 %v724_v46  ;;  %1781 = vmatprep.mubr.msk.bf16.mxu0 %vm2012_vm2, %v2010_v0 }
  0x4b   : > { %1788 = vmatmul.mubr.msk.bf16.vlgmr.msra.gmra.mrb[8].mxu1 %vm480_vm3, %v777_v52  ;;  %1791 = vmatprep.subr.bf16.mxu0 %v2010_v0 }
  0x4c   : > { %1798 = vmatpush3.bf16.msra.mxu1 %v2245_v51  ;;  %1799 = vmatprep.mubr.msk.bf16.mxu1 %vm2012_vm2, %v2010_v0 }
  0x4d   : > { %1809 = vmatprep.subr.bf16.mxu1 %v2010_v0 }
  0x51   : > { %1782 = vmatmul.mubr.msk.bf16.vlgmr.msra.gmra.mrb[8].mxu0 %vm480_vm3, %v719_v61 }
  0x52   : > { %1792 = vmatpush3.bf16.msra.mxu0 %v840_v62  ;;  %1793 = vmatprep.mubr.msk.bf16.mxu0 %vm2012_vm2, %v2010_v0 }
  0x53   : > { %1800 = vmatmul.mubr.msk.bf16.vlgmr.msra.gmra.mrb[12].mxu1 %vm480_vm3, %v909_v63  ;;  %1803 = vmatprep.subr.bf16.mxu0 %v2010_v0 }
  0x54   : > { %1810 = vmatpush3.bf16.msra.mxu1 %v2150_v6  ;;  %1811 = vmatprep.mubr.msk.bf16.mxu1 %vm2012_vm2, %v2010_v0  ;;  %v1335_v6 = vld [vmem:[%s2260_s30] sm:$0xf] }
  0x55   : > { %1821 = vmatprep.subr.bf16.mxu1 %v2010_v0 }
  0x59   : > { %1794 = vmatmul.mubr.msk.bf16.vlgmr.msra.gmra.mrb[12].mxu0 %vm480_vm3, %v1931_v4 }
  0x5a   : > { %1804 = vmatpush3.bf16.msra.mxu0 %v972_v5  ;;  %1805 = vmatprep.mubr.msk.bf16.mxu0 %vm2012_vm2, %v2010_v0 }
  0x5b   : > { %1812 = vmatmul.mubr.msk.bf16.vlgmr.msra.gmra.mrb[16].mxu1 %vm480_vm3, %v719_v61  ;;  %1815 = vmatprep.subr.bf16.mxu0 %v2010_v0 }
  0x5c   : > { %1822 = vmatpush3.bf16.msra.mxu1 %v2196_v25  ;;  %1823 = vmatprep.mubr.msk.bf16.mxu1 %vm2012_vm2, %v2010_v0 }
  0x5d   : > { %1833 = vmatprep.subr.bf16.mxu1 %v2010_v0 }
  0x61   : > { %1806 = vmatmul.mubr.msk.bf16.vlgmr.msra.gmra.mrb[16].mxu0 %vm480_vm3, %v967_v3 }
  0x62   : > { %1816 = vmatpush3.bf16.msra.mxu0 %v2153_v7  ;;  %1817 = vmatprep.mubr.msk.bf16.mxu0 %vm2012_vm2, %v2010_v0  ;;  %v1336_v7 = vld [vmem:[%s2260_s30 + $0x4] sm:$0xf] }
  0x63   : > { %1824 = vmatmul.mubr.msk.bf16.vlgmr.msra.gmra.mrb[20].mxu1 %vm480_vm3, %v777_v52  ;;  %1827 = vmatprep.subr.bf16.mxu0 %v2010_v0  ;;  %v1708_v13 = vcombine.low %v1335_v6, %v1336_v7 }
  0x64   : > { %1834 = vmatpush3.bf16.msra.mxu1 %v724_v46  ;;  %1835 = vmatprep.mubr.msk.bf16.mxu1 %vm2012_vm2, %v2010_v0 }
  0x65   : > { %1845 = vmatprep.subr.bf16.mxu1 %v2010_v0  ;;  %v1349_v16 = vshll.u32 %v1708_v13, 16  ;;  %v1347_v19 = vshrl.u32 %v1708_v13, 16 }
  0x67   : > { %v1351_v20 = vrot.slane %v1349_v16, 1 }
  0x69   : > { %1818 = vmatmul.mubr.msk.bf16.vlgmr.msra.gmra.mrb[20].mxu0 %vm480_vm3, %v2201_v26  ;;  %v1352_v23 = vor.u32 %v1351_v20, %v1347_v19 }
  0x6a   : > { %1828 = vmatpush3.bf16.msra.mxu0 %v2175_v12  ;;  %1829 = vmatprep.mubr.msk.bf16.mxu0 %vm2012_vm2, %v2010_v0  ;;  %v1711_v12 = vcombine.low %v1404_v11, %v1336_v7 }
  0x6b   : > { %1836 = vmatmul.mubr.msk.bf16.vlgmr.msra.gmra.mrb[24].mxu1 %vm480_vm3, %v909_v63  ;;  %1839 = vmatprep.subr.bf16.mxu0 %v2010_v0  ;;  %v1357_v25 = vsel %vm467_vm4, %v1352_v23, %v1356_v24 }
  0x6c   : > { %1846 = vmatpush3.bf16.msra.mxu1 %v840_v62  ;;  %1847 = vmatprep.mubr.msk.bf16.mxu1 %vm2012_vm2, %v2010_v0  ;;  %v1408_v17 = vrot.slane %v1711_v12, 1 }
  0x6d   : > { %1857 = vmatprep.subr.bf16.mxu1 %v2010_v0 }
  0x6e   : > { %v1410_v22 = vsel %vm584_vm5, %v1408_v17, %v1409_v18 }
  0x71   : > { %1830 = vmatmul.mubr.msk.bf16.vlgmr.msra.gmra.mrb[24].mxu0 %vm480_vm3, %v1931_v4 }
  0x72   : > { %1840 = vmatpush3.bf16.msra.mxu0 %v2219_v29  ;;  %1841 = vmatprep.mubr.msk.bf16.mxu0 %vm2012_vm2, %v2010_v0 }
  0x73   : > { %1848 = vmatmul.mubr.msk.bf16.vlgmr.msra.gmra.mrb[28].mxu1 %vm480_vm3, %v1933_v14  ;;  %1851 = vmatprep.subr.bf16.mxu0 %v2010_v0 }
  0x74   : > { %1858 = vmatpush3.bf16.msra.mxu1 %v972_v5  ;;  %1859 = vmatprep.mubr.msk.bf16.mxu1 %vm2012_vm2, %v2010_v0 }
  0x79   : > { %1842 = vmatmul.mubr.msk.bf16.vlgmr.msra.gmra.mrb[28].mxu0 %vm480_vm3, %v967_v3 }
  0x7a   : > { %1852 = vmatpush3.bf16.msra.mxu0 %v2245_v51  ;;  %1853 = vmatprep.mubr.msk.bf16.mxu0 %vm2012_vm2, %v2010_v0 }
  0x7b   : > { %1860 = vmatmul.mubr.msk.bf16.vlgmr.msra.gmra.mrb[32].mxu1 %vm480_vm3, %v1410_v22 }
  0x81   : > { %1854 = vmatmul.mubr.msk.bf16.vlgmr.msra.gmra.mrb[32].mxu0 %vm480_vm3, %v1357_v25 }
 0x10d   : > { %v571_v26 = vpop.f32.mrb[0].mxu1 }
 0x10e   : > { %v1765_v27 = vpop.f32.mrb[1].mxu1 }
 0x10f   : > { %v574_v28 = vpop.f32.mrb[2].mxu1 }
 0x110   : > { %v1766_v29 = vpop.f32.mrb[3].mxu1 }
 0x114   : > { %v525_v30 = vpop.f32.mrb[0].mxu0 }
 0x115   : > { %v572_v31 = vadd.f32 %v571_v26, %v525_v30  ;;  %v1759_v32 = vpop.f32.mrb[1].mxu0 }
 0x116   : > { %v528_v33 = vpop.f32.mrb[2].mxu0  ;;  %v686_v34 = vpop.f32.mrb[4].mxu1 }
 0x117   : > { %v575_v35 = vadd.f32 %v574_v28, %v528_v33  ;;  %v1760_v36 = vpop.f32.mrb[3].mxu0  ;;  %v1777_v0 = vpop.f32.mrb[5].mxu1 }
 0x118   : > { %v689_v37 = vpop.f32.mrb[6].mxu1 }
 0x119   : > { %v1778_v38 = vpop.f32.mrb[7].mxu1 }
 0x11c   : > { %v628_v39 = vpop.f32.mrb[4].mxu0 }
 0x11d   : > { %v635_v40 = vadd.f32 %v628_v39, %v572_v31  ;;  %v1771_v41 = vpop.f32.mrb[5].mxu0 }
 0x11e   : > { %v631_v42 = vpop.f32.mrb[6].mxu0  ;;  %v818_v43 = vpop.f32.mrb[8].mxu1 }
 0x11f   : > { %v636_v44 = vadd.f32 %v631_v42, %v575_v35  ;;  %v1772_v45 = vpop.f32.mrb[7].mxu0  ;;  %v693_v46 = vadd.f32 %v686_v34, %v635_v40  ;;  %v1789_v47 = vpop.f32.mrb[9].mxu1 }
 0x120   : > { %v821_v48 = vpop.f32.mrb[10].mxu1 }
 0x121   : > { %v694_v49 = vadd.f32 %v689_v37, %v636_v44  ;;  %v1790_v50 = vpop.f32.mrb[11].mxu1 }
 0x124   : > { %v760_v51 = vpop.f32.mrb[8].mxu0 }
 0x125   : > { %v767_v52 = vadd.f32 %v760_v51, %v693_v46  ;;  %v1783_v53 = vpop.f32.mrb[9].mxu0 }
 0x126   : > { %v763_v54 = vpop.f32.mrb[10].mxu0  ;;  %v950_v55 = vpop.f32.mrb[12].mxu1 }
 0x127   : > { %v768_v56 = vadd.f32 %v763_v54, %v694_v49  ;;  %v1784_v57 = vpop.f32.mrb[11].mxu0  ;;  %v825_v58 = vadd.f32 %v818_v43, %v767_v52  ;;  %v1801_v59 = vpop.f32.mrb[13].mxu1 }
 0x128   : > { %v953_v60 = vpop.f32.mrb[14].mxu1  ;;  %v1699_v57 = vld [vmem:[#allocation2] ss:$0 sm:$0xff] }
 0x129   : > { %v826_v61 = vadd.f32 %v821_v48, %v768_v56  ;;  %v1802_v62 = vpop.f32.mrb[15].mxu1 }
 0x12c   : > { %v876_v63 = vpop.f32.mrb[12].mxu0 }
 0x12d   : > { %v883_v1 = vadd.f32 %v876_v63, %v825_v58  ;;  %v1795_v2 = vpop.f32.mrb[13].mxu0 }
 0x12e   : > { %v879_v4 = vpop.f32.mrb[14].mxu0  ;;  %v1062_v5 = vpop.f32.mrb[16].mxu1 }
 0x12f   : > { %v884_v8 = vadd.f32 %v879_v4, %v826_v61  ;;  %v1796_v9 = vpop.f32.mrb[15].mxu0  ;;  %v957_v10 = vadd.f32 %v950_v55, %v883_v1  ;;  %v1813_v3 = vpop.f32.mrb[17].mxu1 }
 0x130   : > { %v1065_v6 = vpop.f32.mrb[18].mxu1 }
 0x131   : > { %v958_v7 = vadd.f32 %v953_v60, %v884_v8  ;;  %v1814_v11 = vpop.f32.mrb[19].mxu1 }
 0x134   : > { %v1008_v13 = vpop.f32.mrb[16].mxu0 }
 0x135   : > { %v1015_v14 = vadd.f32 %v1008_v13, %v957_v10  ;;  %v1807_v15 = vpop.f32.mrb[17].mxu0 }
 0x136   : > { %v1011_v12 = vpop.f32.mrb[18].mxu0  ;;  %v1144_v16 = vpop.f32.mrb[20].mxu1 }
 0x137   : > { %v1016_v17 = vadd.f32 %v1011_v12, %v958_v7  ;;  %v1808_v18 = vpop.f32.mrb[19].mxu0  ;;  %v1825_v19 = vpop.f32.mrb[21].mxu1  ;;  %v1024_v62 = vadd.f32 %v1699_v57, %v1015_v14 }
 0x138   : > { %v1147_v20 = vpop.f32.mrb[22].mxu1 }
 0x139   : > { %v1826_v21 = vpop.f32.mrb[23].mxu1  ;;  %v1025_v4 = vadd.f32 %v1699_v57, %v1016_v17  ;;  %v1026_v9 = vmax.f32 %v1024_v62, 0.0 }
 0x13c   : > { %v1103_v22 = vpop.f32.mrb[20].mxu0 }
 0x13d   : > { %v1104_v23 = vadd.f32 %v1103_v22, %v1062_v5  ;;  %v1819_v24 = vpop.f32.mrb[21].mxu0 }
 0x13e   : > { %v1106_v25 = vpop.f32.mrb[22].mxu0  ;;  %v1230_v26 = vpop.f32.mrb[24].mxu1 }
 0x13f   : > { %v1107_v27 = vadd.f32 %v1106_v25, %v1065_v6  ;;  %v1820_v28 = vpop.f32.mrb[23].mxu0  ;;  %v1151_v29 = vadd.f32 %v1144_v16, %v1104_v23  ;;  %v1837_v30 = vpop.f32.mrb[25].mxu1  ;;  %v1027_v6 = vmax.f32 %v1025_v4, 0.0 }
 0x140   : > { %v1233_v31 = vpop.f32.mrb[26].mxu1 }
 0x141   : > { %v1152_v32 = vadd.f32 %v1147_v20, %v1107_v27  ;;  %v1838_v33 = vpop.f32.mrb[27].mxu1 }
 0x144   : > { %v1187_v34 = vpop.f32.mrb[24].mxu0 }
 0x145   : > { %v1194_v35 = vadd.f32 %v1187_v34, %v1151_v29  ;;  %v1831_v36 = vpop.f32.mrb[25].mxu0 }
 0x146   : > { %v1190_v0 = vpop.f32.mrb[26].mxu0  ;;  %v1326_v37 = vpop.f32.mrb[28].mxu1 }
 0x147   : > { %v1195_v38 = vadd.f32 %v1190_v0, %v1152_v32  ;;  %v1832_v39 = vpop.f32.mrb[27].mxu0  ;;  %v1237_v40 = vadd.f32 %v1230_v26, %v1194_v35  ;;  %v1849_v41 = vpop.f32.mrb[29].mxu1 }
 0x148   : > { %v1329_v42 = vpop.f32.mrb[30].mxu1 }
 0x149   : > { %v1238_v43 = vadd.f32 %v1233_v31, %v1195_v38  ;;  %v1850_v44 = vpop.f32.mrb[31].mxu1 }
 0x14c   : > { %v1273_v45 = vpop.f32.mrb[28].mxu0 }
 0x14d   : > { %v1280_v46 = vadd.f32 %v1273_v45, %v1237_v40  ;;  %v1843_v47 = vpop.f32.mrb[29].mxu0 }
 0x14e   : > { %v1276_v48 = vpop.f32.mrb[30].mxu0  ;;  %v1448_v49 = vpop.f32.mrb[32].mxu1 }
 0x14f   : > { %v1281_v50 = vadd.f32 %v1276_v48, %v1238_v43  ;;  %v1844_v51 = vpop.f32.mrb[31].mxu0  ;;  %v1333_v52 = vadd.f32 %v1326_v37, %v1280_v46  ;;  %v1861_v53 = vpop.f32.mrb[33].mxu1 }
 0x150   : > { %v1451_v54 = vpop.f32.mrb[34].mxu1 }
 0x151   : > { %v1334_v55 = vadd.f32 %v1329_v42, %v1281_v50  ;;  %v1862_v56 = vpop.f32.mrb[35].mxu1 }
 0x154   : > { %v1395_v58 = vpop.f32.mrb[32].mxu0 }
 0x155   : > { %v1402_v59 = vadd.f32 %v1395_v58, %v1333_v52  ;;  %v1855_v60 = vpop.f32.mrb[33].mxu0 }
 0x156   : > { %v1398_v61 = vpop.f32.mrb[34].mxu0 }
 0x157   : > { %v1455_v63 = vadd.f32 %v1448_v49, %v1402_v59  ;;  %v1403_v1 = vadd.f32 %v1398_v61, %v1334_v55  ;;  %v1856_v2 = vpop.f32.mrb[35].mxu0 }
 0x159   : > { %v1457_v5 = vadd.f32 %v1699_v57, %v1455_v63  ;;  %v1456_v8 = vadd.f32 %v1451_v54, %v1403_v1 }
 0x15b   : > { %v1459_v10 = vmax.f32 %v1457_v5, 0.0  ;;  %v1458_v3 = vadd.f32 %v1699_v57, %v1456_v8 }
 0x15d   : > { %v1461_v7 = vmax.f32 %v1026_v9, %v1459_v10  ;;  %v1460_v11 = vmax.f32 %v1458_v3, 0.0 }
 0x15f   : > { %v1717_v13 = vpack.c.bf16 %v1461_v7, %v1461_v7  ;;  %v1462_v14 = vmax.f32 %v1027_v6, %v1460_v11 }
 0x161   : > { %1472 = vst.msk [vmem:[%s451_s14] sm:$0xf] %vm1471_vm6, %v1717_v13  ;;  %v1718_v15 = vpack.c.bf16 %v1462_v14, %v1462_v14 }
 0x163   : > { %1473 = vst.msk [vmem:[%s451_s14 + $0x4] sm:$0xf] %vm1471_vm6, %v1718_v15 }
 0x164 PF: > { %s17_s25 = sadd.s32 1, %s2007_s25   ;;  %s2373_s21 = smov %s1999_s23 }
 0x165   : > { %p14_p13 = scmp.ge.s32.totalorder %s17_s25, 18   ;;  %s2374_s22 = smov %s2003_s24 }
 0x166   : > { %s2375_s23 = smov %s2378_s27  ;;  %s2376_s24 = smov %s2382_s28 }
 0x167   :  { %16 = sbr.rel (!%p14_p13) target bundleno = 3 (0x3), region = 96 }
 0x16e   :  { %1503 = vsyncpa [#allocation3], 1 }
 0x16f   :  { %1505 = vsyncpa [#allocation3 + $0x1], 1 }

// kernel: refugee_camp_detector.8
= control target key start
LH: loop header
LB: loop body
LE: loop exit
PB: predicated region body
PF: predicated region fallthrough
CT: control target
= control target key end

     0   :  { %s2376_s21 = smov 0   ;;  %s2378_s22 = smov 0   ;;  %s2883_s0 = inlined_call_operand.vmem [shape: bf16[2,10,10,64], index: 0, kind: input, shape index: {}, may-alias: {0,1,2,3}]   ;;  %s2884_s1 = inlined_call_operand.vmem [shape: bf16[2,10,10,64], index: 1, kind: input, shape index: {}, may-alias: {0,1,2,3}]   ;;  %s2885_s2 = inlined_call_operand.vmem [shape: bf16[2,10,10,64], index: 2, kind: input, shape index: {}, may-alias: {0,1,2,3}]   ;;  %s2886_s3 = inlined_call_operand.vmem [shape: bf16[2,10,10,64], index: 3, kind: input, shape index: {}, may-alias: {0,1,2,3}]   ;;  %s2887_s4 = inlined_call_operand.vmem [shape: bf16[3,3,64,128], index: 4, kind: input, shape index: {}]   ;;  %s2888_s5 = inlined_call_operand.vmem [shape: f32[1,128], index: 5, kind: input, shape index: {}]   ;;  %s2889_s6 = inlined_call_operand.vmem [shape: bf16[2,4,8,128], index: 6, kind: output, shape index: {}]  }
   0x1   :  { %s2380_s23 = smov 0   ;;  %s2382_s24 = smov 0  }
   0x2   :  { %s2384_s25 = smov 0  }
   0x3 LB: > { %s25_s26 = sadd.s32 1, %s2329_s23  ;;  %s28_s27 = sadd.s32 1, %s2333_s24  ;;  %s2337_s25 = sphi %s2384_s25, %s16_s25   ;;  %s2333_s24 = sphi %s2382_s24, %s2893_s24   ;;  %s2329_s23 = sphi %s2380_s23, %s2892_s23   ;;  %s2325_s22 = sphi %s2378_s22, %s2891_s22   ;;  %s2321_s21 = sphi %s2376_s21, %s2890_s21  }
   0x4   : > { %p26_p0 = scmp.ge.s32.totalorder %s25_s26, 4  ;;  %p1762_p1 = scmp.ge.s32.totalorder %s2337_s25, 1 }
   0x5   : > { %p308_p2 = scmp.lt.s32.totalorder %s2337_s25, 9 }
   0x6   : > { %s2895_s26 = smov (%p26_p0, %s25_s26), 0  ;;  %s2897_s27 = smov (!%p26_p0, %s28_s27), %s2333_s24 }
   0x7   : > { %p309_p3 = pnand %p1762_p1, %p308_p2  ;;  %p30_p4 = scmp.ge.s32.totalorder %s2897_s27, 2 }
   0x8   : > { %v2413_v0 = vld [vmem:[%s2887_s4 + $0x20] sm:$0xff] (!%p309_p3)   ;;  %v2339_v1 = vmov (!%p309_p3), 0.0   ;;  %v2426_v3 = vld [vmem:[%s2887_s4 + $0x28] sm:$0xff] (!%p309_p3)   ;;  %vm2340_vm0 = vmmov (!%p309_p3), 0   ;;  %s2431_s10 = sshll.u32 (!%p309_p3), %s2321_s21, 1  ;;  %p380_p5 = scmp.lt.s32.totalorder (!%p309_p3), %s2325_s22, 1 }
   0x9   : > { %s2899_s27 = smov (%p30_p4, %s2897_s27), 0  ;;  %312 = sbr.rel (%p309_p3) target bundleno = 385 (0x181), region = 44 }
   0xa   : > { %1996 = vmatprep.subr.bf16.mxu0 (!%p309_p3), %v2339_v1  ;;  %2008 = vmatprep.subr.bf16.mxu1 (!%p309_p3), %v2339_v1  ;;  %v2420_v2 = vld [vmem:[%s2887_s4] sm:$0xff] (!%p309_p3)   ;;  %v2438_v4 = vld [vmem:[%s2887_s4 + $0x8] sm:$0xff] (!%p309_p3)   ;;  %p382_p6 = scmp.lt.s32.totalorder (!%p309_p3), %s2431_s10, 9  ;;  %v2452_v5 = vld [vmem:[%s2887_s4 + $0x30] sm:$0xff] (!%p309_p3)   ;;  %s391_s28 = sadd.s32 (!%p309_p3), 1, %s2431_s10  ;;  %vm493_vm1 = vcmask (!%p309_p3), 523264  }
   0xb   : > { %1997 = vmatpush3.bf16.msra.mxu0 (!%p309_p3), %v2413_v0  ;;  %2004 = vmatprep.mubr.msk.bf16.mxu0 (!%p309_p3), %vm2340_vm0, %v2339_v1  ;;  %v2460_v6 = vld [vmem:[%s2887_s4 + $0x10] sm:$0xff] (!%p309_p3)   ;;  %v2472_v7 = vld [vmem:[%s2887_s4 + $0x38] sm:$0xff] (!%p309_p3)   ;;  %p394_p7 = scmp.lt.s32.totalorder (!%p309_p3), %s391_s28, 9  ;;  %v2493_v12 = vld [vmem:[%s2887_s4 + $0x60] sm:$0xff] (!%p309_p3)   ;;  %s417_s12 = sadd.s32 (!%p309_p3), 3, %s2431_s10 }
   0xc   : > { %2009 = vmatpush3.bf16.msra.mxu1 (!%p309_p3), %v2420_v2  ;;  %1998 = vmatprep.subr.bf16.mxu0 (!%p309_p3), %v2339_v1  ;;  %v2479_v8 = vld [vmem:[%s2887_s4 + $0x18] sm:$0xff] (!%p309_p3)   ;;  %v2502_v16 = vld [vmem:[%s2887_s4 + $0x40] sm:$0xff] (!%p309_p3)   ;;  %v2508_v18 = vld [vmem:[%s2887_s4 + $0x68] sm:$0xff] (!%p309_p3)   ;;  %s404_s14 = sadd.s32 (!%p309_p3), 2, %s2431_s10  ;;  %p420_p8 = scmp.lt.s32.totalorder (!%p309_p3), %s417_s12, 9 }
   0xd   : > { %2010 = vmatprep.subr.bf16.mxu1 (!%p309_p3), %v2339_v1  ;;  %2016 = vmatprep.mubr.msk.bf16.mxu1 (!%p309_p3), %vm2340_vm0, %v2339_v1  ;;  %v2518_v19 = vld [vmem:[%s2887_s4 + $0x48] sm:$0xff] (!%p309_p3)   ;;  %v2524_v20 = vld [vmem:[%s2887_s4 + $0x70] sm:$0xff] (!%p309_p3)   ;;  %v2550_v23 = vld [vmem:[%s2887_s4 + $0x78] sm:$0xff] (!%p309_p3)   ;;  %p407_p9 = scmp.lt.s32.totalorder (!%p309_p3), %s404_s14, 9  ;;  %p431_p10 = scmp.lt.s32.totalorder (!%p309_p3), %s2321_s21, 3 }
   0xe   : > { %v2538_v22 = vld [vmem:[%s2887_s4 + $0x50] sm:$0xff] (!%p309_p3)   ;;  %v2560_v26 = vld [vmem:[%s2887_s4 + $0x58] sm:$0xff] (!%p309_p3)   ;;  %v2567_v27 = vld [vmem:[%s2887_s4 + $0xa0] sm:$0xff] (!%p309_p3)  }
   0xf   : > { %1999 = vmatpush3.bf16.msra.mxu0 (!%p309_p3), %v2426_v3  ;;  %v2573_v29 = vld [vmem:[%s2887_s4 + $0x80] sm:$0xff] (!%p309_p3)   ;;  %v2588_v32 = vld [vmem:[%s2887_s4 + $0xa8] sm:$0xff] (!%p309_p3)   ;;  %v2603_v35 = vld [vmem:[%s2887_s4 + $0xb0] sm:$0xff] (!%p309_p3)  }
  0x10   : > { %s2901_s22 = smov (!%p380_p5, %s2325_s22), 1  ;;  %2011 = vmatpush3.bf16.msra.mxu1 %v2438_v4  ;;  %2000 = vmatprep.subr.bf16.mxu0 %v2339_v1  ;;  %s2903_s28 = smov (!%p394_p7, %s391_s28), 9  ;;  %v2597_v34 = vld [vmem:[%s2887_s4 + $0x88] sm:$0xff]   ;;  %v2616_v38 = vld [vmem:[%s2887_s4 + $0x90] sm:$0xff]   ;;  %v2623_v40 = vld [vmem:[%s2887_s4 + $0xb8] sm:$0xff]  }
  0x11   : > { %s383_s15 = scalar_select %p382_p6, %s2431_s10, 9  ;;  %2012 = vmatprep.subr.bf16.mxu1 %v2339_v1  ;;  %v2635_v43 = vld [vmem:[%s2887_s4 + $0x98] sm:$0xff]   ;;  %v2644_v45 = vld [vmem:[%s2887_s4 + $0xe0] sm:$0xff]   ;;  %v2662_v51 = vld [vmem:[%s2887_s4 + $0xe8] sm:$0xff]  }
  0x12   : > { %s2463_s18 = smul.u32 20, %s2901_s22  ;;  %s1767_s16 = sshll.u32 %s2903_s28, 1  ;;  %v2655_v49 = vld [vmem:[%s2887_s4 + $0xc0] sm:$0xff]   ;;  %v2672_v52 = vld [vmem:[%s2887_s4 + $0xc8] sm:$0xff]   ;;  %v2681_v54 = vld [vmem:[%s2887_s4 + $0xf0] sm:$0xff]  }
  0x13   : > { %s1764_s19 = sshll.u32 %s383_s15, 1  ;;  %2001 = vmatpush3.bf16.msra.mxu0 %v2452_v5  ;;  %s2905_s12 = smov (!%p420_p8, %s417_s12), 9  ;;  %v2688_v55 = vld [vmem:[%s2887_s4 + $0xd0] sm:$0xff]   ;;  %v2695_v58 = vld [vmem:[%s2887_s4 + $0xf8] sm:$0xff]   ;;  %v2718_v62 = vld [vmem:[%s2887_s4 + $0x100] sm:$0xff]  }
  0x14   : > { %s386_s20 = sadd.s32 %s2463_s18, %s1764_s19  ;;  %2013 = vmatpush3.bf16.msra.mxu1 %v2460_v6  ;;  %2002 = vmatprep.subr.bf16.mxu0 %v2339_v1  ;;  %s398_s28 = sadd.s32 %s2463_s18, %s1767_s16  ;;  %v2702_v59 = vld [vmem:[%s2887_s4 + $0xd8] sm:$0xff]   ;;  %v2731_v63 = vld [vmem:[%s2887_s4 + $0x108] sm:$0xff]  }
  0x15   : > { %s1765_s7 = sshll.u32 %s386_s20, 2  ;;  %2014 = vmatprep.subr.bf16.mxu1 %v2339_v1  ;;  %s1768_s11 = sshll.u32 %s398_s28, 2 }
  0x16   : > { %s2484_s13 = scalar_lea.vmem %s2883_s0, %s1765_s7  ;;  %s2543_s20 = scalar_lea.vmem %s2884_s1, %s1768_s11 }
  0x17   : > { %v438_v9 = vld [vmem:[%s2484_s13] sm:$0xf]  ;;  %v447_v10 = vld [vmem:[%s2484_s13 + $0x4] sm:$0x1]  ;;  %2003 = vmatpush3.bf16.msra.mxu0 %v2472_v7  ;;  %s2907_s14 = smov (!%p407_p9, %s404_s14), 9  ;;  %s1773_s11 = sshll.u32 %s2905_s12, 1 }
  0x18   : > { %v1785_v11 = vcombine.low %v438_v9, %v447_v10  ;;  %2015 = vmatpush3.bf16.msra.mxu1 %v2479_v8  ;;  %2020 = vmatprep.subr.bf16.mxu0 %v2339_v1  ;;  %v604_v21 = vld [vmem:[%s2484_s13] sm:$0xe]  ;;  %s2577_s15 = sadd.s32 %s2463_s18, %s1773_s11  ;;  %v765_v31 = vld [vmem:[%s2543_s20 + $0x4] sm:$0x1]  ;;  %s1770_s12 = sshll.u32 %s2907_s14, 1 }
  0x19   : > { %2032 = vmatprep.subr.bf16.mxu1 %v2339_v1  ;;  %v1804_v24 = vcombine.low %v604_v21, %v447_v10  ;;  %v2554_v25 = vld [vmem:[%s2543_s20] sm:$0xf]  ;;  %s411_s14 = sadd.s32 %s2463_s18, %s1770_s12  ;;  %s2909_s21 = smov (!%p431_p10, %s2321_s21), 3 }
  0x1a   : > { %v463_v13 = vshrl.u32 %v1785_v11, 16  ;;  %v465_v14 = vshll.u32 %v1785_v11, 16  ;;  %v764_v30 = vld [vmem:[%s2543_s20] sm:$0xf]  ;;  %s1771_s28 = sshll.u32 %s411_s14, 2  ;;  %s1775_s16 = sshll.u32 %s2901_s22, 2 }
  0x1b   : > { %2017 = vmatmul.mubr.msk.bf16.vlgmr.msra.gmra.mrb[0].mxu1 %vm493_vm1, %v438_v9  ;;  %v617_v28 = vrot.slane %v1804_v24, 1  ;;  %v1831_v33 = vcombine.low %v764_v30, %v765_v31  ;;  %v855_v36 = vld [vmem:[%s2543_s20] sm:$0xe]  ;;  %s2629_s11 = scalar_lea.vmem %s2885_s2, %s1771_s28  ;;  %s434_s17 = sadd.s32 %s1775_s16, %s2909_s21 }
  0x1c   : > { %v467_v15 = vrot.slane %v465_v14, 1  ;;  %2033 = vmatpush3.bf16.msra.mxu1 %v2493_v12  ;;  %2040 = vmatprep.mubr.msk.bf16.mxu1 %vm2340_vm0, %v2339_v1  ;;  %v1845_v39 = vcombine.low %v855_v36, %v765_v31  ;;  %v1015_v46 = vld [vmem:[%s2629_s11] sm:$0xf]  ;;  %v1016_v47 = vld [vmem:[%s2629_s11 + $0x4] sm:$0x1]  ;;  %s1776_s12 = sshll.u32 %s434_s17, 2 }
  0x1d   : > { %2034 = vmatprep.subr.bf16.mxu1 %v2339_v1  ;;  %v783_v37 = vshll.u32 %v1831_v33, 16  ;;  %v781_v41 = vshrl.u32 %v1831_v33, 16  ;;  %v1872_v50 = vcombine.low %v1015_v46, %v1016_v47  ;;  %v2711_v61 = vld [vmem:[%s2629_s11] sm:$0xf]  ;;  %s436_s13 = scalar_lea.vmem %s2889_s6, %s1776_s12 }
  0x1e   : > { %v468_v17 = vor.u32 %v467_v15, %v463_v13  ;;  %v2637_v44 = vrot.slane %v1845_v39, 1  ;;  %v1106_v9 = vld [vmem:[%s2629_s11] sm:$0xe]  ;;  %s1774_s11 = sshll.u32 %s2577_s15, 2 }
  0x1f   : > { %v785_v42 = vrot.slane %v783_v37, 1  ;;  %v1034_v53 = vshll.u32 %v1872_v50, 16  ;;  %v1032_v56 = vshrl.u32 %v1872_v50, 16  ;;  %v1886_v10 = vcombine.low %v1106_v9, %v1016_v47  ;;  %s426_s20 = scalar_lea.vmem %s2886_s3, %s1774_s11 }
  0x20   : > { %2005 = vmatmul.mubr.msk.bf16.vlgmr.msra.gmra.mrb[0].mxu0 %vm493_vm1, %v468_v17  ;;  %2035 = vmatpush3.bf16.msra.mxu1 %v2508_v18 }
  0x21   : > { %2021 = vmatpush3.bf16.msra.mxu0 %v2502_v16  ;;  %2028 = vmatprep.mubr.msk.bf16.mxu0 %vm2340_vm0, %v2339_v1  ;;  %v786_v48 = vor.u32 %v785_v42, %v781_v41  ;;  %v1036_v57 = vrot.slane %v1034_v53, 1  ;;  %v2757_v11 = vrot.slane %v1886_v10, 1 }
  0x22   : > { %2022 = vmatprep.subr.bf16.mxu0 %v2339_v1  ;;  %2036 = vmatprep.subr.bf16.mxu1 %v2339_v1 }
  0x23   : > { %v2704_v60 = vor.u32 %v1036_v57, %v1032_v56 }
  0x24   : > { %2037 = vmatpush3.bf16.msra.mxu1 %v2524_v20 }
  0x25   : > { %2023 = vmatpush3.bf16.msra.mxu0 %v2518_v19  ;;  %2038 = vmatprep.subr.bf16.mxu1 %v2339_v1 }
  0x26   : > { %2024 = vmatprep.subr.bf16.mxu0 %v2339_v1 }
  0x28   : > { %2039 = vmatpush3.bf16.msra.mxu1 %v2550_v23 }
  0x29   : > { %2025 = vmatpush3.bf16.msra.mxu0 %v2538_v22  ;;  %2056 = vmatprep.subr.bf16.mxu1 %v2339_v1 }
  0x2a   : > { %2026 = vmatprep.subr.bf16.mxu0 %v2339_v1 }
  0x2b   : > { %2041 = vmatmul.mubr.msk.bf16.vlgmr.msra.gmra.mrb[4].mxu1 %vm493_vm1, %v2554_v25 }
  0x2c   : > { %2057 = vmatpush3.bf16.msra.mxu1 %v2567_v27  ;;  %2064 = vmatprep.mubr.msk.bf16.mxu1 %vm2340_vm0, %v2339_v1 }
  0x2d   : > { %2027 = vmatpush3.bf16.msra.mxu0 %v2560_v26  ;;  %2058 = vmatprep.subr.bf16.mxu1 %v2339_v1 }
  0x2e   : > { %2044 = vmatprep.subr.bf16.mxu0 %v2339_v1 }
  0x30   : > { %2029 = vmatmul.mubr.msk.bf16.vlgmr.msra.gmra.mrb[4].mxu0 %vm493_vm1, %v617_v28  ;;  %2059 = vmatpush3.bf16.msra.mxu1 %v2588_v32 }
  0x31   : > { %2045 = vmatpush3.bf16.msra.mxu0 %v2573_v29  ;;  %2052 = vmatprep.mubr.msk.bf16.mxu0 %vm2340_vm0, %v2339_v1 }
  0x32   : > { %2046 = vmatprep.subr.bf16.mxu0 %v2339_v1  ;;  %2060 = vmatprep.subr.bf16.mxu1 %v2339_v1 }
  0x34   : > { %2061 = vmatpush3.bf16.msra.mxu1 %v2603_v35 }
  0x35   : > { %2047 = vmatpush3.bf16.msra.mxu0 %v2597_v34  ;;  %2062 = vmatprep.subr.bf16.mxu1 %v2339_v1 }
  0x36   : > { %2048 = vmatprep.subr.bf16.mxu0 %v2339_v1 }
  0x38   : > { %2063 = vmatpush3.bf16.msra.mxu1 %v2623_v40 }
  0x39   : > { %2049 = vmatpush3.bf16.msra.mxu0 %v2616_v38  ;;  %2080 = vmatprep.subr.bf16.mxu1 %v2339_v1 }
  0x3a   : > { %2050 = vmatprep.subr.bf16.mxu0 %v2339_v1 }
  0x3b   : > { %2065 = vmatmul.mubr.msk.bf16.vlgmr.msra.gmra.mrb[8].mxu1 %vm493_vm1, %v2637_v44 }
  0x3c   : > { %2081 = vmatpush3.bf16.msra.mxu1 %v2644_v45  ;;  %2088 = vmatprep.mubr.msk.bf16.mxu1 %vm2340_vm0, %v2339_v1 }
  0x3d   : > { %2051 = vmatpush3.bf16.msra.mxu0 %v2635_v43  ;;  %2082 = vmatprep.subr.bf16.mxu1 %v2339_v1 }
  0x3e   : > { %2068 = vmatprep.subr.bf16.mxu0 %v2339_v1 }
  0x40   : > { %2053 = vmatmul.mubr.msk.bf16.vlgmr.msra.gmra.mrb[8].mxu0 %vm493_vm1, %v786_v48  ;;  %2083 = vmatpush3.bf16.msra.mxu1 %v2662_v51 }
  0x41   : > { %2069 = vmatpush3.bf16.msra.mxu0 %v2655_v49  ;;  %2076 = vmatprep.mubr.msk.bf16.mxu0 %vm2340_vm0, %v2339_v1 }
  0x42   : > { %2070 = vmatprep.subr.bf16.mxu0 %v2339_v1  ;;  %2084 = vmatprep.subr.bf16.mxu1 %v2339_v1 }
  0x44   : > { %2085 = vmatpush3.bf16.msra.mxu1 %v2681_v54 }
  0x45   : > { %2071 = vmatpush3.bf16.msra.mxu0 %v2672_v52  ;;  %2086 = vmatprep.subr.bf16.mxu1 %v2339_v1 }
  0x46   : > { %2072 = vmatprep.subr.bf16.mxu0 %v2339_v1 }
  0x48   : > { %2087 = vmatpush3.bf16.msra.mxu1 %v2695_v58 }
  0x49   : > { %2073 = vmatpush3.bf16.msra.mxu0 %v2688_v55  ;;  %2104 = vmatprep.subr.bf16.mxu1 %v2339_v1 }
  0x4a   : > { %2074 = vmatprep.subr.bf16.mxu0 %v2339_v1 }
  0x4b   : > { %2089 = vmatmul.mubr.msk.bf16.vlgmr.msra.gmra.mrb[12].mxu1 %vm493_vm1, %v2704_v60 }
  0x4c   : > { %2105 = vmatpush3.bf16.msra.mxu1 %v2413_v0  ;;  %2112 = vmatprep.mubr.msk.bf16.mxu1 %vm2340_vm0, %v2339_v1  ;;  %v2742_v0 = vld [vmem:[%s2887_s4 + $0x110] sm:$0xff]  }
  0x4d   : > { %2075 = vmatpush3.bf16.msra.mxu0 %v2702_v59  ;;  %2106 = vmatprep.subr.bf16.mxu1 %v2339_v1 }
  0x4e   : > { %2092 = vmatprep.subr.bf16.mxu0 %v2339_v1 }
  0x50   : > { %2077 = vmatmul.mubr.msk.bf16.vlgmr.msra.gmra.mrb[12].mxu0 %vm493_vm1, %v2711_v61  ;;  %2107 = vmatpush3.bf16.msra.mxu1 %v2426_v3  ;;  %v2752_v3 = vld [vmem:[%s2887_s4 + $0x118] sm:$0xff]  }
  0x51   : > { %2093 = vmatpush3.bf16.msra.mxu0 %v2718_v62  ;;  %2100 = vmatprep.mubr.msk.bf16.mxu0 %vm2340_vm0, %v2339_v1 }
  0x52   : > { %2094 = vmatprep.subr.bf16.mxu0 %v2339_v1  ;;  %2108 = vmatprep.subr.bf16.mxu1 %v2339_v1 }
  0x54   : > { %2109 = vmatpush3.bf16.msra.mxu1 %v2452_v5  ;;  %v1487_v5 = vld [vmem:[%s426_s20 + $0x4] sm:$0x1] }
  0x55   : > { %2095 = vmatpush3.bf16.msra.mxu0 %v2731_v63  ;;  %2110 = vmatprep.subr.bf16.mxu1 %v2339_v1 }
  0x56   : > { %2096 = vmatprep.subr.bf16.mxu0 %v2339_v1 }
  0x58   : > { %2111 = vmatpush3.bf16.msra.mxu1 %v2472_v7  ;;  %v1544_v7 = vld [vmem:[%s426_s20] sm:$0xe] }
  0x59   : > { %2097 = vmatpush3.bf16.msra.mxu0 %v2742_v0  ;;  %2128 = vmatprep.subr.bf16.mxu1 %v2339_v1 }
  0x5a   : > { %2098 = vmatprep.subr.bf16.mxu0 %v2339_v1 }
  0x5b   : > { %2113 = vmatmul.mubr.msk.bf16.vlgmr.msra.gmra.mrb[16].mxu1 %vm493_vm1, %v786_v48 }
  0x5c   : > { %2129 = vmatpush3.bf16.msra.mxu1 %v2502_v16  ;;  %2136 = vmatprep.mubr.msk.bf16.mxu1 %vm2340_vm0, %v2339_v1 }
  0x5d   : > { %2099 = vmatpush3.bf16.msra.mxu0 %v2752_v3  ;;  %2130 = vmatprep.subr.bf16.mxu1 %v2339_v1 }
  0x5e   : > { %2116 = vmatprep.subr.bf16.mxu0 %v2339_v1 }
  0x60   : > { %2101 = vmatmul.mubr.msk.bf16.vlgmr.msra.gmra.mrb[16].mxu0 %vm493_vm1, %v2757_v11  ;;  %2131 = vmatpush3.bf16.msra.mxu1 %v2518_v19 }
  0x61   : > { %2117 = vmatpush3.bf16.msra.mxu0 %v2420_v2  ;;  %2124 = vmatprep.mubr.msk.bf16.mxu0 %vm2340_vm0, %v2339_v1  ;;  %v1441_v2 = vld [vmem:[%s426_s20] sm:$0xf] }
  0x62   : > { %2118 = vmatprep.subr.bf16.mxu0 %v2339_v1  ;;  %2132 = vmatprep.subr.bf16.mxu1 %v2339_v1 }
  0x64   : > { %2133 = vmatpush3.bf16.msra.mxu1 %v2538_v22 }
  0x65   : > { %2119 = vmatpush3.bf16.msra.mxu0 %v2438_v4  ;;  %2134 = vmatprep.subr.bf16.mxu1 %v2339_v1  ;;  %v1486_v4 = vld [vmem:[%s426_s20] sm:$0xf] }
  0x66   : > { %2120 = vmatprep.subr.bf16.mxu0 %v2339_v1 }
  0x68   : > { %2135 = vmatpush3.bf16.msra.mxu1 %v2560_v26 }
  0x69   : > { %2121 = vmatpush3.bf16.msra.mxu0 %v2460_v6  ;;  %2152 = vmatprep.subr.bf16.mxu1 %v2339_v1  ;;  %v1900_v6 = vcombine.low %v1486_v4, %v1487_v5 }
  0x6a   : > { %2122 = vmatprep.subr.bf16.mxu0 %v2339_v1 }
  0x6b   : > { %2137 = vmatmul.mubr.msk.bf16.vlgmr.msra.gmra.mrb[20].mxu1 %vm493_vm1, %v2637_v44  ;;  %v1494_v13 = vshrl.u32 %v1900_v6, 16 }
  0x6c   : > { %2153 = vmatpush3.bf16.msra.mxu1 %v2573_v29  ;;  %2160 = vmatprep.mubr.msk.bf16.mxu1 %vm2340_vm0, %v2339_v1 }
  0x6d   : > { %2123 = vmatpush3.bf16.msra.mxu0 %v2479_v8  ;;  %2154 = vmatprep.subr.bf16.mxu1 %v2339_v1  ;;  %v1496_v8 = vshll.u32 %v1900_v6, 16 }
  0x6e   : > { %2140 = vmatprep.subr.bf16.mxu0 %v2339_v1 }
  0x6f   : > { %v1498_v14 = vrot.slane %v1496_v8, 1 }
  0x70   : > { %2125 = vmatmul.mubr.msk.bf16.vlgmr.msra.gmra.mrb[20].mxu0 %vm493_vm1, %v2554_v25  ;;  %2155 = vmatpush3.bf16.msra.mxu1 %v2597_v34 }
  0x71   : > { %2141 = vmatpush3.bf16.msra.mxu0 %v2493_v12  ;;  %2148 = vmatprep.mubr.msk.bf16.mxu0 %vm2340_vm0, %v2339_v1  ;;  %v1902_v12 = vcombine.low %v1544_v7, %v1487_v5  ;;  %v1499_v16 = vor.u32 %v1498_v14, %v1494_v13 }
  0x72   : > { %2142 = vmatprep.subr.bf16.mxu0 %v2339_v1  ;;  %2156 = vmatprep.subr.bf16.mxu1 %v2339_v1 }
  0x73   : > { %v1548_v15 = vrot.slane %v1902_v12, 1 }
  0x74   : > { %2157 = vmatpush3.bf16.msra.mxu1 %v2616_v38 }
  0x75   : > { %2143 = vmatpush3.bf16.msra.mxu0 %v2508_v18  ;;  %2158 = vmatprep.subr.bf16.mxu1 %v2339_v1 }
  0x76   : > { %2144 = vmatprep.subr.bf16.mxu0 %v2339_v1 }
  0x78   : > { %2159 = vmatpush3.bf16.msra.mxu1 %v2635_v43 }
  0x79   : > { %2145 = vmatpush3.bf16.msra.mxu0 %v2524_v20  ;;  %2176 = vmatprep.subr.bf16.mxu1 %v2339_v1 }
  0x7a   : > { %2146 = vmatprep.subr.bf16.mxu0 %v2339_v1 }
  0x7b   : > { %2161 = vmatmul.mubr.msk.bf16.vlgmr.msra.gmra.mrb[24].mxu1 %vm493_vm1, %v2704_v60 }
  0x7c   : > { %2177 = vmatpush3.bf16.msra.mxu1 %v2655_v49  ;;  %2184 = vmatprep.mubr.msk.bf16.mxu1 %vm2340_vm0, %v2339_v1 }
  0x7d   : > { %2147 = vmatpush3.bf16.msra.mxu0 %v2550_v23  ;;  %2178 = vmatprep.subr.bf16.mxu1 %v2339_v1 }
  0x7e   : > { %2164 = vmatprep.subr.bf16.mxu0 %v2339_v1 }
  0x80   : > { %2149 = vmatmul.mubr.msk.bf16.vlgmr.msra.gmra.mrb[24].mxu0 %vm493_vm1, %v2711_v61  ;;  %2179 = vmatpush3.bf16.msra.mxu1 %v2672_v52 }
  0x81   : > { %2165 = vmatpush3.bf16.msra.mxu0 %v2567_v27  ;;  %2172 = vmatprep.mubr.msk.bf16.mxu0 %vm2340_vm0, %v2339_v1 }
  0x82   : > { %2166 = vmatprep.subr.bf16.mxu0 %v2339_v1  ;;  %2180 = vmatprep.subr.bf16.mxu1 %v2339_v1 }
  0x84   : > { %2181 = vmatpush3.bf16.msra.mxu1 %v2688_v55 }
  0x85   : > { %2167 = vmatpush3.bf16.msra.mxu0 %v2588_v32  ;;  %2182 = vmatprep.subr.bf16.mxu1 %v2339_v1 }
  0x86   : > { %2168 = vmatprep.subr.bf16.mxu0 %v2339_v1 }
  0x88   : > { %2183 = vmatpush3.bf16.msra.mxu1 %v2702_v59 }
  0x89   : > { %2169 = vmatpush3.bf16.msra.mxu0 %v2603_v35  ;;  %2200 = vmatprep.subr.bf16.mxu1 %v2339_v1 }
  0x8a   : > { %2170 = vmatprep.subr.bf16.mxu0 %v2339_v1 }
  0x8b   : > { %2185 = vmatmul.mubr.msk.bf16.vlgmr.msra.gmra.mrb[28].mxu1 %vm493_vm1, %v1441_v2 }
  0x8c   : > { %2201 = vmatpush3.bf16.msra.mxu1 %v2718_v62  ;;  %2208 = vmatprep.mubr.msk.bf16.mxu1 %vm2340_vm0, %v2339_v1 }
  0x8d   : > { %2171 = vmatpush3.bf16.msra.mxu0 %v2623_v40  ;;  %2202 = vmatprep.subr.bf16.mxu1 %v2339_v1 }
  0x8e   : > { %2188 = vmatprep.subr.bf16.mxu0 %v2339_v1 }
  0x90   : > { %2173 = vmatmul.mubr.msk.bf16.vlgmr.msra.gmra.mrb[28].mxu0 %vm493_vm1, %v2757_v11  ;;  %2203 = vmatpush3.bf16.msra.mxu1 %v2731_v63 }
  0x91   : > { %2189 = vmatpush3.bf16.msra.mxu0 %v2644_v45  ;;  %2196 = vmatprep.mubr.msk.bf16.mxu0 %vm2340_vm0, %v2339_v1 }
  0x92   : > { %2190 = vmatprep.subr.bf16.mxu0 %v2339_v1  ;;  %2204 = vmatprep.subr.bf16.mxu1 %v2339_v1 }
  0x94   : > { %2205 = vmatpush3.bf16.msra.mxu1 %v2742_v0 }
  0x95   : > { %2191 = vmatpush3.bf16.msra.mxu0 %v2662_v51  ;;  %2206 = vmatprep.subr.bf16.mxu1 %v2339_v1 }
  0x96   : > { %2192 = vmatprep.subr.bf16.mxu0 %v2339_v1 }
  0x98   : > { %2207 = vmatpush3.bf16.msra.mxu1 %v2752_v3 }
  0x99   : > { %2193 = vmatpush3.bf16.msra.mxu0 %v2681_v54 }
  0x9a   : > { %2194 = vmatprep.subr.bf16.mxu0 %v2339_v1 }
  0x9b   : > { %2209 = vmatmul.mubr.msk.bf16.vlgmr.msra.gmra.mrb[32].mxu1 %vm493_vm1, %v1548_v15 }
  0x9d   : > { %2195 = vmatpush3.bf16.msra.mxu0 %v2695_v58 }
  0xa0   : > { %2197 = vmatmul.mubr.msk.bf16.vlgmr.msra.gmra.mrb[32].mxu0 %vm493_vm1, %v1499_v16 }
  0xee   : > { %v598_v17 = vpop.f32.mrb[0].mxu1 }
  0xef   : > { %v2018_v18 = vpop.f32.mrb[1].mxu1 }
  0xf0   : > { %v601_v19 = vpop.f32.mrb[2].mxu1 }
  0xf1   : > { %v2019_v21 = vpop.f32.mrb[3].mxu1 }
  0xf3   : > { %v531_v20 = vpop.f32.mrb[0].mxu0 }
  0xf4   : > { %v599_v22 = vadd.f32 %v598_v17, %v531_v20  ;;  %v2006_v23 = vpop.f32.mrb[1].mxu0 }
  0xf5   : > { %v534_v24 = vpop.f32.mrb[2].mxu0 }
  0xf6   : > { %v2007_v25 = vpop.f32.mrb[3].mxu0 }
  0xfe   : > { %v757_v26 = vpop.f32.mrb[4].mxu1 }
  0xff   : > { %v2042_v1 = vpop.f32.mrb[5].mxu1 }
 0x100   : > { %v760_v27 = vpop.f32.mrb[6].mxu1 }
 0x101   : > { %v2043_v29 = vpop.f32.mrb[7].mxu1 }
 0x103   : > { %v679_v28 = vpop.f32.mrb[4].mxu0 }
 0x104   : > { %v685_v30 = vadd.f32 %v679_v28, %v599_v22  ;;  %v2030_v31 = vpop.f32.mrb[5].mxu0 }
 0x105   : > { %v682_v32 = vpop.f32.mrb[6].mxu0 }
 0x106   : > { %v763_v33 = vadd.f32 %v757_v26, %v685_v30  ;;  %v2031_v34 = vpop.f32.mrb[7].mxu0 }
 0x10e   : > { %v930_v35 = vpop.f32.mrb[8].mxu1 }
 0x10f   : > { %v2066_v36 = vpop.f32.mrb[9].mxu1 }
 0x110   : > { %v933_v37 = vpop.f32.mrb[10].mxu1 }
 0x111   : > { %v2067_v39 = vpop.f32.mrb[11].mxu1 }
 0x113   : > { %v848_v38 = vpop.f32.mrb[8].mxu0 }
 0x114   : > { %v854_v40 = vadd.f32 %v848_v38, %v763_v33  ;;  %v2054_v41 = vpop.f32.mrb[9].mxu0  ;;  %v1892_v33 = vld [vmem:[%s2888_s5] ss:$0 sm:$0xff] }
 0x115   : > { %v851_v42 = vpop.f32.mrb[10].mxu0 }
 0x116   : > { %v936_v43 = vadd.f32 %v930_v35, %v854_v40  ;;  %v2055_v44 = vpop.f32.mrb[11].mxu0 }
 0x11e   : > { %v1099_v45 = vpop.f32.mrb[12].mxu1 }
 0x11f   : > { %v2090_v46 = vpop.f32.mrb[13].mxu1 }
 0x120   : > { %v1102_v47 = vpop.f32.mrb[14].mxu1 }
 0x121   : > { %v2091_v49 = vpop.f32.mrb[15].mxu1 }
 0x123   : > { %v1008_v48 = vpop.f32.mrb[12].mxu0 }
 0x124   : > { %v1014_v50 = vadd.f32 %v1008_v48, %v936_v43  ;;  %v2078_v51 = vpop.f32.mrb[13].mxu0 }
 0x125   : > { %v1011_v52 = vpop.f32.mrb[14].mxu0 }
 0x126   : > { %v1105_v53 = vadd.f32 %v1099_v45, %v1014_v50  ;;  %v2079_v54 = vpop.f32.mrb[15].mxu0 }
 0x12e   : > { %v1231_v55 = vpop.f32.mrb[16].mxu1 }
 0x12f   : > { %v2114_v56 = vpop.f32.mrb[17].mxu1 }
 0x130   : > { %v1234_v57 = vpop.f32.mrb[18].mxu1 }
 0x131   : > { %v2115_v59 = vpop.f32.mrb[19].mxu1 }
 0x133   : > { %v1181_v58 = vpop.f32.mrb[16].mxu0 }
 0x134   : > { %v1187_v60 = vadd.f32 %v1181_v58, %v1105_v53  ;;  %v2102_v61 = vpop.f32.mrb[17].mxu0 }
 0x135   : > { %v1184_v62 = vpop.f32.mrb[18].mxu0 }
 0x136   : > { %v2103_v63 = vpop.f32.mrb[19].mxu0  ;;  %v1195_v39 = vadd.f32 %v1892_v33, %v1187_v60 }
 0x138   : > { %v1196_v43 = vmax.f32 %v1195_v39, 0.0 }
 0x13e   : > { %v1311_v0 = vpop.f32.mrb[20].mxu1 }
 0x13f   : > { %v2138_v9 = vpop.f32.mrb[21].mxu1 }
 0x140   : > { %v1314_v10 = vpop.f32.mrb[22].mxu1 }
 0x141   : > { %v2139_v11 = vpop.f32.mrb[23].mxu1 }
 0x143   : > { %v1271_v3 = vpop.f32.mrb[20].mxu0 }
 0x144   : > { %v1272_v2 = vadd.f32 %v1271_v3, %v1231_v55  ;;  %v2126_v4 = vpop.f32.mrb[21].mxu0 }
 0x145   : > { %v1274_v5 = vpop.f32.mrb[22].mxu0 }
 0x146   : > { %v1317_v6 = vadd.f32 %v1311_v0, %v1272_v2  ;;  %v2127_v7 = vpop.f32.mrb[23].mxu0 }
 0x14e   : > { %v1393_v8 = vpop.f32.mrb[24].mxu1 }
 0x14f   : > { %v2162_v12 = vpop.f32.mrb[25].mxu1 }
 0x150   : > { %v1396_v13 = vpop.f32.mrb[26].mxu1 }
 0x151   : > { %v2163_v15 = vpop.f32.mrb[27].mxu1 }
 0x153   : > { %v1352_v14 = vpop.f32.mrb[24].mxu0 }
 0x154   : > { %v1358_v16 = vadd.f32 %v1352_v14, %v1317_v6  ;;  %v2150_v17 = vpop.f32.mrb[25].mxu0 }
 0x155   : > { %v1355_v18 = vpop.f32.mrb[26].mxu0 }
 0x156   : > { %v1399_v19 = vadd.f32 %v1393_v8, %v1358_v16  ;;  %v2151_v20 = vpop.f32.mrb[27].mxu0 }
 0x15e   : > { %v1479_v21 = vpop.f32.mrb[28].mxu1 }
 0x15f   : > { %v2186_v22 = vpop.f32.mrb[29].mxu1 }
 0x160   : > { %v1482_v23 = vpop.f32.mrb[30].mxu1 }
 0x161   : > { %v2187_v25 = vpop.f32.mrb[31].mxu1 }
 0x163   : > { %v1434_v24 = vpop.f32.mrb[28].mxu0 }
 0x164   : > { %v1440_v26 = vadd.f32 %v1434_v24, %v1399_v19  ;;  %v2174_v1 = vpop.f32.mrb[29].mxu0 }
 0x165   : > { %v1437_v27 = vpop.f32.mrb[30].mxu0 }
 0x166   : > { %v1485_v28 = vadd.f32 %v1479_v21, %v1440_v26  ;;  %v2175_v29 = vpop.f32.mrb[31].mxu0 }
 0x16e   : > { %v1586_v30 = vpop.f32.mrb[32].mxu1 }
 0x16f   : > { %v2210_v31 = vpop.f32.mrb[33].mxu1 }
 0x170   : > { %v1589_v32 = vpop.f32.mrb[34].mxu1 }
 0x171   : > { %v2211_v35 = vpop.f32.mrb[35].mxu1 }
 0x173   : > { %v1537_v34 = vpop.f32.mrb[32].mxu0 }
 0x174   : > { %v1543_v36 = vadd.f32 %v1537_v34, %v1485_v28  ;;  %v2198_v37 = vpop.f32.mrb[33].mxu0 }
 0x175   : > { %v1540_v38 = vpop.f32.mrb[34].mxu0 }
 0x176   : > { %v1592_v40 = vadd.f32 %v1586_v30, %v1543_v36  ;;  %v2199_v41 = vpop.f32.mrb[35].mxu0 }
 0x178   : > { %v1593_v42 = vadd.f32 %v1892_v33, %v1592_v40 }
 0x17a   : > { %v1594_v44 = vmax.f32 %v1593_v42, 0.0 }
 0x17c   : > { %v1595_v45 = vmax.f32 %v1196_v43, %v1594_v44 }
 0x17e   : > { %v1596_v46 = vpack.c.bf16 %v1595_v45, %v1595_v45 }
 0x180   : > { %1597 = vst [vmem:[%s436_s13] sm:$0xf] %v1596_v46 }
 0x181 PF: > { %s16_s25 = sadd.s32 1, %s2337_s25   ;;  %s2890_s21 = smov %s2329_s23 }
 0x182   : > { %p13_p11 = scmp.ge.s32.totalorder %s16_s25, 10   ;;  %s2891_s22 = smov %s2333_s24 }
 0x183   : > { %s2892_s23 = smov %s2895_s26  ;;  %s2893_s24 = smov %s2899_s27 }
 0x184   :  { %15 = sbr.rel (!%p13_p11) target bundleno = 3 (0x3), region = 91 }

// kernel: refugee_camp_detector.9
= control target key start
LH: loop header
LB: loop body
LE: loop exit
PB: predicated region body
PF: predicated region fallthrough
CT: control target
= control target key end

     0   :  { %s2976_s21 = smov 0   ;;  %s2978_s22 = smov 0   ;;  %s4145_s0 = inlined_call_operand.vmem [shape: bf16[2,6,6,128], index: 0, kind: input, shape index: {}, may-alias: {0,1,2,3}]   ;;  %s4146_s1 = inlined_call_operand.vmem [shape: bf16[2,6,6,128], index: 1, kind: input, shape index: {}, may-alias: {0,1,2,3}]   ;;  %s4147_s2 = inlined_call_operand.vmem [shape: bf16[2,6,6,128], index: 2, kind: input, shape index: {}, may-alias: {0,1,2,3}]   ;;  %s4148_s3 = inlined_call_operand.vmem [shape: bf16[2,6,6,128], index: 3, kind: input, shape index: {}, may-alias: {0,1,2,3}]   ;;  %s4149_s4 = inlined_call_operand.vmem [shape: bf16[3,3,128,256], index: 4, kind: input, shape index: {}]   ;;  %s4150_s5 = inlined_call_operand.vmem [shape: f32[1,256], index: 5, kind: input, shape index: {}]   ;;  %s4151_s6 = inlined_call_operand.vmem [shape: bf16[2,2,4,256], index: 6, kind: output, shape index: {}]  }
   0x1   :  { %s2980_s23 = smov 0   ;;  %s2982_s24 = smov 0  }
   0x2   :  { %s2984_s25 = smov 0  }
   0x3 LB: > { %s25_s26 = sadd.s32 1, %s2930_s23  ;;  %s28_s27 = sadd.s32 1, %s2934_s24  ;;  %s2938_s25 = sphi %s2984_s25, %s16_s25   ;;  %s2934_s24 = sphi %s2982_s24, %s4382_s24   ;;  %s2930_s23 = sphi %s2980_s23, %s4381_s23   ;;  %s2926_s22 = sphi %s2978_s22, %s4380_s22   ;;  %s2922_s21 = sphi %s2976_s21, %s4379_s21  }
   0x4   : > { %p26_p0 = scmp.ge.s32.totalorder %s25_s26, 2  ;;  %p2336_p1 = scmp.ge.s32.totalorder %s2938_s25, 1 }
   0x5   : > { %p304_p2 = scmp.lt.s32.totalorder %s2938_s25, 5 }
   0x6   : > { %s4384_s26 = smov (%p26_p0, %s25_s26), 0  ;;  %s4386_s27 = smov (!%p26_p0, %s28_s27), %s2934_s24 }
   0x7   : > { %p305_p3 = pnand %p2336_p1, %p304_p2  ;;  %p30_p4 = scmp.ge.s32.totalorder %s4386_s27, 2 }
   0x9   : > { %s4388_s27 = smov (%p30_p4, %s4386_s27), 0  ;;  %308 = sbr.rel (%p305_p3) target bundleno = 532 (0x214), region = 44 }
  0x10   : > { %v3013_v0 = vld [vmem:[%s4149_s4 + $0x84] ss:$8 sps:$4 sm:$0xff]   ;;  %v4152_v2 = vmov 0   ;;  %s3021_s8 = sshll.u32 %s2922_s21, 1  ;;  %p373_p5 = scmp.lt.s32.totalorder %s2926_s22, 1 }
  0x11   : > { %v2676_v1 = vld [vmem:[%s4149_s4 + $0x4] ss:$8 sps:$4 sm:$0xff]   ;;  %586 = vmatprep.mubr.bf16.mxu0 %v4152_v2  ;;  %707 = vmatprep.mubr.bf16.mxu1 %v4152_v2  ;;  %v3028_v3 = vld [vmem:[%s4149_s4 + $0x80] ss:$8 sps:$4 sm:$0xff]   ;;  %v3036_v5 = vld [vmem:[%s4149_s4 + $0x94] ss:$8 sps:$4 sm:$0xff]  }
  0x12   : > { %554 = vmatprep.subr.bf16.mxu0 %v3013_v0  ;;  %v2679_v4 = vld [vmem:[%s4149_s4] ss:$8 sps:$4 sm:$0xff]   ;;  %675 = vmatprep.subr.bf16.mxu1 %v2676_v1  ;;  %v3042_v6 = vld [vmem:[%s4149_s4 + $0x14] ss:$8 sps:$4 sm:$0xff]   ;;  %v3047_v7 = vld [vmem:[%s4149_s4 + $0x90] ss:$8 sps:$4 sm:$0xff]  }
  0x13   : > { %555 = vmatpush1.bf16.msra.mxu0 %v3028_v3  ;;  %676 = vmatpush1.bf16.msra.mxu1 %v2679_v4  ;;  %p375_p6 = scmp.lt.s32.totalorder %s3021_s8, 5  ;;  %v3054_v8 = vld [vmem:[%s4149_s4 + $0x10] ss:$8 sps:$4 sm:$0xff]   ;;  %s4390_s22 = smov (!%p373_p5, %s2926_s22), 1  ;;  %v3063_v9 = vld [vmem:[%s4149_s4 + $0xa4] ss:$8 sps:$4 sm:$0xff]  }
  0x14   : > { %556 = vmatprep.subr.bf16.mxu0 %v3036_v5  ;;  %677 = vmatprep.subr.bf16.mxu1 %v3042_v6  ;;  %v3068_v10 = vld [vmem:[%s4149_s4 + $0x24] ss:$8 sps:$4 sm:$0xff]   ;;  %v3073_v11 = vld [vmem:[%s4149_s4 + $0xa0] ss:$8 sps:$4 sm:$0xff]   ;;  %v3085_v13 = vld [vmem:[%s4149_s4 + $0xb4] ss:$8 sps:$4 sm:$0xff]  }
  0x15   : > { %v3078_v12 = vld [vmem:[%s4149_s4 + $0x20] ss:$8 sps:$4 sm:$0xff]   ;;  %s376_s15 = scalar_select %p375_p6, %s3021_s8, 5  ;;  %v3093_v14 = vld [vmem:[%s4149_s4 + $0x34] ss:$8 sps:$4 sm:$0xff]  }
  0x16   : > { %s3096_s18 = smul.u32 6, %s4390_s22  ;;  %v3101_v15 = vld [vmem:[%s4149_s4 + $0xb0] ss:$8 sps:$4 sm:$0xff]   ;;  %v3113_v17 = vld [vmem:[%s4149_s4 + $0xc4] ss:$8 sps:$4 sm:$0xff]   ;;  %s383_s13 = sadd.s32 1, %s3021_s8 }
  0x17   : > { %557 = vmatpush1.bf16.msra.mxu0 %v3047_v7  ;;  %678 = vmatpush1.bf16.msra.mxu1 %v3054_v8  ;;  %v3108_v16 = vld [vmem:[%s4149_s4 + $0x30] ss:$8 sps:$4 sm:$0xff]   ;;  %v3120_v18 = vld [vmem:[%s4149_s4 + $0x44] ss:$8 sps:$4 sm:$0xff]   ;;  %v3126_v19 = vld [vmem:[%s4149_s4 + $0xc0] ss:$8 sps:$4 sm:$0xff]  }
  0x18   : > { %558 = vmatprep.subr.bf16.mxu0 %v3063_v9  ;;  %679 = vmatprep.subr.bf16.mxu1 %v3068_v10  ;;  %s378_s11 = sadd.s32 %s3096_s18, %s376_s15  ;;  %v3131_v20 = vld [vmem:[%s4149_s4 + $0x40] ss:$8 sps:$4 sm:$0xff]   ;;  %v3138_v21 = vld [vmem:[%s4149_s4 + $0xd4] ss:$8 sps:$4 sm:$0xff]   ;;  %v3157_v23 = vld [vmem:[%s4149_s4 + $0xd0] ss:$8 sps:$4 sm:$0xff]  }
  0x19   : > { %s2338_s15 = sshll.u32 %s378_s11, 2  ;;  %v3145_v22 = vld [vmem:[%s4149_s4 + $0x54] ss:$8 sps:$4 sm:$0xff]   ;;  %v3162_v24 = vld [vmem:[%s4149_s4 + $0x50] ss:$8 sps:$4 sm:$0xff]   ;;  %p386_p7 = scmp.lt.s32.totalorder %s383_s13, 5 }
  0x1a   : > { %s3150_s7 = scalar_lea.vmem %s4145_s0, %s2338_s15  ;;  %v3169_v25 = vld [vmem:[%s4149_s4 + $0xe4] ss:$8 sps:$4 sm:$0xff]   ;;  %v3180_v28 = vld [vmem:[%s4149_s4 + $0xe0] ss:$8 sps:$4 sm:$0xff]   ;;  %v3194_v31 = vld [vmem:[%s4149_s4 + $0xf4] ss:$8 sps:$4 sm:$0xff]  }
  0x1b   : > { %559 = vmatpush1.bf16.msra.mxu0 %v3073_v11  ;;  %680 = vmatpush1.bf16.msra.mxu1 %v3078_v12  ;;  %v3174_v26 = vld [vmem:[%s4149_s4 + $0x64] ss:$8 sps:$4 sm:$0xff]   ;;  %v2722_v27 = vld [vmem:[%s3150_s7] ss:$0 sps:$4 sm:$0x77]   ;;  %s4392_s13 = smov (!%p386_p7, %s383_s13), 5 }
  0x1c   : > { %560 = vmatprep.subr.bf16.mxu0 %v3085_v13  ;;  %681 = vmatprep.subr.bf16.mxu1 %v3093_v14  ;;  %v3187_v29 = vld [vmem:[%s4149_s4 + $0x60] ss:$8 sps:$4 sm:$0xff]   ;;  %v469_v30 = vshll.u32 %v2722_v27, 16  ;;  %v3199_v32 = vld [vmem:[%s4149_s4 + $0x74] ss:$8 sps:$4 sm:$0xff]   ;;  %v467_v34 = vshrl.u32 %v2722_v27, 16  ;;  %s389_s9 = sadd.s32 %s3096_s18, %s4392_s13 }
  0x1d   : > { %v3204_v33 = vld [vmem:[%s4149_s4 + $0xf0] ss:$8 sps:$4 sm:$0xff]   ;;  %v3217_v37 = vld [vmem:[%s4149_s4 + $0x104] ss:$8 sps:$4 sm:$0xff]   ;;  %v428_v40 = vld [vmem:[%s3150_s7] sm:$0x3] }
  0x1e   : > { %v471_v35 = vrot.slane %v469_v30, 1  ;;  %v3212_v36 = vld [vmem:[%s4149_s4 + $0x70] ss:$8 sps:$4 sm:$0xff]   ;;  %v3224_v38 = vld [vmem:[%s4149_s4 + $0x184] ss:$8 sps:$4 sm:$0xff]   ;;  %s2340_s15 = sshll.u32 %s389_s9, 2 }
  0x1f   : > { %561 = vmatpush1.bf16.msra.mxu0 %v3101_v15  ;;  %682 = vmatpush1.bf16.msra.mxu1 %v3108_v16  ;;  %v3230_v41 = vld [vmem:[%s4149_s4 + $0x100] ss:$8 sps:$4 sm:$0xff]   ;;  %v3242_v43 = vld [vmem:[%s4149_s4 + $0x114] ss:$8 sps:$4 sm:$0xff]   ;;  %v3254_v45 = vld [vmem:[%s4149_s4 + $0x110] ss:$8 sps:$4 sm:$0xff]   ;;  %s3322_s14 = scalar_lea.vmem %s4146_s1, %s2340_s15 }
  0x20   : > { %562 = vmatprep.subr.bf16.mxu0 %v3113_v17  ;;  %683 = vmatprep.subr.bf16.mxu1 %v3120_v18  ;;  %v472_v39 = vor.u32 %v471_v35, %v467_v34  ;;  %v3237_v42 = vld [vmem:[%s4149_s4 + $0x180] ss:$8 sps:$4 sm:$0xff]   ;;  %v3249_v44 = vld [vmem:[%s4149_s4 + $0x194] ss:$8 sps:$4 sm:$0xff]   ;;  %v3261_v46 = vld [vmem:[%s4149_s4 + $0x190] ss:$8 sps:$4 sm:$0xff]  }
  0x21   : > { %4229 = vst [vmem:[#allocation2_spill] sm:$0xff] %v3249_v44  ;;  %4230 = vst [vmem:[#allocation3_spill] sm:$0xff] %v3261_v46  ;;  %v3266_v47 = vld [vmem:[%s4149_s4 + $0x124] ss:$8 sps:$4 sm:$0xff]   ;;  %v3281_v49 = vld [vmem:[%s4149_s4 + $0x120] ss:$8 sps:$4 sm:$0xff]  }
  0x22   : > { %v3273_v48 = vld [vmem:[%s4149_s4 + $0x1a4] ss:$8 sps:$4 sm:$0xff]   ;;  %v3288_v50 = vld [vmem:[%s4149_s4 + $0x1a0] ss:$8 sps:$4 sm:$0xff]   ;;  %v3293_v51 = vld [vmem:[%s4149_s4 + $0x134] ss:$8 sps:$4 sm:$0xff]  }
  0x23   : > { %563 = vmatpush1.bf16.msra.mxu0 %v3126_v19  ;;  %684 = vmatpush1.bf16.msra.mxu1 %v3131_v20  ;;  %4231 = vst [vmem:[#allocation4_spill] sm:$0xff] %v3273_v48  ;;  %4232 = vst [vmem:[#allocation5_spill] sm:$0xff] %v3288_v50  ;;  %v3300_v52 = vld [vmem:[%s4149_s4 + $0x1b4] ss:$8 sps:$4 sm:$0xff]   ;;  %v3305_v53 = vld [vmem:[%s4149_s4 + $0x130] ss:$8 sps:$4 sm:$0xff]  }
  0x24   : > { %564 = vmatprep.subr.bf16.mxu0 %v3138_v21  ;;  %685 = vmatprep.subr.bf16.mxu1 %v3145_v22  ;;  %4233 = vst [vmem:[#allocation6_spill] sm:$0xff] %v3300_v52  ;;  %v3312_v54 = vld [vmem:[%s4149_s4 + $0x1b0] ss:$8 sps:$4 sm:$0xff]   ;;  %v3317_v55 = vld [vmem:[%s4149_s4 + $0x144] ss:$8 sps:$4 sm:$0xff]   ;;  %s395_s10 = sadd.s32 2, %s3021_s8 }
  0x25   : > { %4234 = vst [vmem:[#allocation7_spill] sm:$0xff] %v3312_v54  ;;  %v3329_v56 = vld [vmem:[%s4149_s4 + $0x1c4] ss:$8 sps:$4 sm:$0xff]   ;;  %v3334_v57 = vld [vmem:[%s4149_s4 + $0x140] ss:$8 sps:$4 sm:$0xff]   ;;  %p398_p8 = scmp.lt.s32.totalorder %s395_s10, 5 }
  0x26   : > { %4235 = vst [vmem:[#allocation8_spill] sm:$0xff] %v3329_v56  ;;  %v3341_v58 = vld [vmem:[%s4149_s4 + $0x1c0] ss:$8 sps:$4 sm:$0xff]   ;;  %v3348_v59 = vld [vmem:[%s4149_s4 + $0x154] ss:$8 sps:$4 sm:$0xff]   ;;  %s407_s30 = sadd.s32 3, %s3021_s8 }
  0x27   : > { %565 = vmatpush1.bf16.msra.mxu0 %v3157_v23  ;;  %686 = vmatpush1.bf16.msra.mxu1 %v3162_v24  ;;  %4236 = vst [vmem:[#allocation9_spill] sm:$0xff] %v3341_v58  ;;  %v3353_v60 = vld [vmem:[%s4149_s4 + $0x1d4] ss:$8 sps:$4 sm:$0xff]   ;;  %v3358_v61 = vld [vmem:[%s4149_s4 + $0x150] ss:$8 sps:$4 sm:$0xff]   ;;  %s4394_s10 = smov (!%p398_p8, %s395_s10), 5 }
  0x28   : > { %566 = vmatprep.subr.bf16.mxu0 %v3169_v25  ;;  %687 = vmatprep.subr.bf16.mxu1 %v3174_v26  ;;  %4237 = vst [vmem:[#allocation10_spill] sm:$0xff] %v3353_v60  ;;  %v3365_v62 = vld [vmem:[%s4149_s4 + $0x1d0] ss:$8 sps:$4 sm:$0xff]   ;;  %v3372_v63 = vld [vmem:[%s4149_s4 + $0x164] ss:$8 sps:$4 sm:$0xff]   ;;  %s401_s29 = sadd.s32 %s3096_s18, %s4394_s10  ;;  %p410_p9 = scmp.lt.s32.totalorder %s407_s30, 5 }
  0x29   : > { %4238 = vst [vmem:[#allocation11_spill] sm:$0xff] %v3365_v62  ;;  %v3377_v1 = vld [vmem:[%s4149_s4 + $0x1e4] ss:$8 sps:$4 sm:$0xff]   ;;  %v3382_v4 = vld [vmem:[%s4149_s4 + $0x160] ss:$8 sps:$4 sm:$0xff]   ;;  %s2342_s19 = sshll.u32 %s401_s29, 2 }
  0x2a   : > { %4239 = vst [vmem:[#allocation12_spill] sm:$0xff] %v3377_v1  ;;  %v3389_v27 = vld [vmem:[%s4149_s4 + $0x1e0] ss:$8 sps:$4 sm:$0xff]   ;;  %v3396_v30 = vld [vmem:[%s4149_s4 + $0x174] ss:$8 sps:$4 sm:$0xff]   ;;  %s3601_s12 = scalar_lea.vmem %s4147_s2, %s2342_s19  ;;  %s4396_s30 = smov (!%p410_p9, %s407_s30), 5 }
  0x2b   : > { %567 = vmatpush1.bf16.msra.mxu0 %v3180_v28  ;;  %688 = vmatpush1.bf16.msra.mxu1 %v3187_v29  ;;  %4240 = vst [vmem:[#allocation13_spill] sm:$0xff] %v3389_v27  ;;  %v3401_v34 = vld [vmem:[%s4149_s4 + $0x1f4] ss:$8 sps:$4 sm:$0xff]   ;;  %v3406_v35 = vld [vmem:[%s4149_s4 + $0x170] ss:$8 sps:$4 sm:$0xff]   ;;  %s413_s17 = sadd.s32 %s3096_s18, %s4396_s30  ;;  %p420_p10 = scmp.lt.s32.totalorder %s2922_s21, 1 }
  0x2c   : > { %568 = vmatprep.subr.bf16.mxu0 %v3194_v31  ;;  %689 = vmatprep.subr.bf16.mxu1 %v3199_v32  ;;  %4241 = vst [vmem:[#allocation14_spill] sm:$0xff] %v3401_v34  ;;  %s2344_s15 = sshll.u32 %s413_s17, 2  ;;  %s2346_s11 = sshll.u32 %s4390_s22, 2 }
  0x2d   : > { %s4398_s21 = smov (!%p420_p10, %s2922_s21), 1 }
  0x2e   : > { %s2345_s30 = sshll.u32 %s4398_s21, 1 }
  0x2f   : > { %569 = vmatpush1.bf16.msra.mxu0 %v3204_v33  ;;  %690 = vmatpush1.bf16.msra.mxu1 %v3212_v36  ;;  %s424_s29 = sadd.s32 %s2346_s11, %s2345_s30 }
  0x30   : > { %819 = vmatprep.subr.bf16.mxu0 %v3217_v37  ;;  %960 = vmatprep.subr.bf16.mxu1 %v3224_v38  ;;  %s2347_s9 = sshll.u32 %s424_s29, 1 }
  0x31   : > { %s426_s10 = scalar_lea.vmem %s4151_s6, %s2347_s9 }
  0x32   : > { %587 = vmatmul.mubr.bf16.vlgmr.msra.gmra.mrb[0].mxu0 %v472_v39  ;;  %708 = vmatmul.mubr.bf16.vlgmr.msra.gmra.mrb[0].mxu1 %v428_v40  ;;  %v2771_v39 = vld [vmem:[%s3150_s7] ss:$0 sps:$4 sm:$0x66]   ;;  %v3414_v40 = vld [vmem:[%s4149_s4 + $0x1f0] ss:$8 sps:$4 sm:$0xff]   ;;  %s3857_s7 = scalar_lea.vmem %s4148_s3, %s2344_s15 }
  0x33   : > { %820 = vmatpush1.bf16.msra.mxu0 %v3230_v41  ;;  %961 = vmatpush1.bf16.msra.mxu1 %v3237_v42  ;;  %4242 = vst [vmem:[#allocation15_spill] sm:$0xff] %v3414_v40 }
  0x34   : > { %821 = vmatprep.subr.bf16.mxu0 %v3242_v43  ;;  %962 = vmatprep.subr.bf16.mxu1 %v3249_v44  ;;  %v3618_v44 = vld [vmem:[%s4149_s4 + $0x270] ss:$8 sps:$4 sm:$0xff]  }
  0x35   : > { %851 = vmatprep.mubr.bf16.mxu0 %v4152_v2  ;;  %992 = vmatprep.mubr.bf16.mxu1 %v4152_v2  ;;  %v3421_v2 = vld [vmem:[%s4149_s4 + $0x204] ss:$8 sps:$4 sm:$0xff]   ;;  %4272 = vst [vmem:[#allocation44_spill] sm:$0xff] %v3618_v44 }
  0x37   : > { %822 = vmatpush1.bf16.msra.mxu0 %v3254_v45  ;;  %963 = vmatpush1.bf16.msra.mxu1 %v3261_v46 }
  0x38   : > { %823 = vmatprep.subr.bf16.mxu0 %v3266_v47  ;;  %964 = vmatprep.subr.bf16.mxu1 %v3273_v48 }
  0x3b   : > { %824 = vmatpush1.bf16.msra.mxu0 %v3281_v49  ;;  %965 = vmatpush1.bf16.msra.mxu1 %v3288_v50  ;;  %v3517_v50 = vld [vmem:[%s4149_s4 + $0x2b0] ss:$8 sps:$4 sm:$0xff]  }
  0x3c   : > { %825 = vmatprep.subr.bf16.mxu0 %v3293_v51  ;;  %966 = vmatprep.subr.bf16.mxu1 %v3300_v52  ;;  %v3500_v52 = vld [vmem:[%s4149_s4 + $0x234] ss:$8 sps:$4 sm:$0xff]   ;;  %4257 = vst [vmem:[#allocation29_spill] sm:$0xff] %v3517_v50 }
  0x3d   : > { %4254 = vst [vmem:[#allocation26_spill] sm:$0xff] %v3500_v52 }
  0x3f   : > { %826 = vmatpush1.bf16.msra.mxu0 %v3305_v53  ;;  %967 = vmatpush1.bf16.msra.mxu1 %v3312_v54  ;;  %v3493_v54 = vld [vmem:[%s4149_s4 + $0x2a0] ss:$8 sps:$4 sm:$0xff]  }
  0x40   : > { %827 = vmatprep.subr.bf16.mxu0 %v3317_v55  ;;  %968 = vmatprep.subr.bf16.mxu1 %v3329_v56  ;;  %v4251_v56 = vmov 0   ;;  %4253 = vst [vmem:[#allocation25_spill] sm:$0xff] %v3493_v54 }
  0x43   : > { %828 = vmatpush1.bf16.msra.mxu0 %v3334_v57  ;;  %969 = vmatpush1.bf16.msra.mxu1 %v3341_v58  ;;  %v3453_v58 = vld [vmem:[%s4149_s4 + $0x294] ss:$8 sps:$4 sm:$0xff]  }
  0x44   : > { %829 = vmatprep.subr.bf16.mxu0 %v3348_v59  ;;  %970 = vmatprep.subr.bf16.mxu1 %v3353_v60  ;;  %v3434_v60 = vld [vmem:[%s4149_s4 + $0x200] ss:$8 sps:$4 sm:$0xff]   ;;  %4246 = vst [vmem:[#allocation19_spill] sm:$0xff] %v3453_v58 }
  0x47   : > { %830 = vmatpush1.bf16.msra.mxu0 %v3358_v61  ;;  %971 = vmatpush1.bf16.msra.mxu1 %v3365_v62  ;;  %v737_v62 = vrot.slane %v2771_v39, 1  ;;  %v3448_v39 = vld [vmem:[%s4149_s4 + $0x214] ss:$8 sps:$4 sm:$0xff]  }
  0x48   : > { %831 = vmatprep.subr.bf16.mxu0 %v3372_v63  ;;  %972 = vmatprep.subr.bf16.mxu1 %v3377_v1  ;;  %v3426_v1 = vld [vmem:[%s4149_s4 + $0x284] ss:$8 sps:$4 sm:$0xff]   ;;  %4245 = vst [vmem:[#allocation18_spill] sm:$0xff] %v3448_v39 }
  0x49   : > { %4243 = vst [vmem:[#allocation16_spill] sm:$0xff] %v3426_v1 }
  0x4b   : > { %832 = vmatpush1.bf16.msra.mxu0 %v3382_v4  ;;  %973 = vmatpush1.bf16.msra.mxu1 %v3389_v27  ;;  %v3429_v27 = vld [vmem:[%s3322_s14] sm:$0x3] }
  0x4c   : > { %833 = vmatprep.subr.bf16.mxu0 %v3396_v30  ;;  %974 = vmatprep.subr.bf16.mxu1 %v3401_v34  ;;  %v3441_v34 = vld [vmem:[%s4149_s4 + $0x280] ss:$8 sps:$4 sm:$0xff]  }
  0x4d   : > { %4244 = vst [vmem:[#allocation17_spill] sm:$0xff] %v3441_v34 }
  0x4f   : > { %834 = vmatpush1.bf16.msra.mxu0 %v3406_v35  ;;  %975 = vmatpush1.bf16.msra.mxu1 %v3414_v40  ;;  %v3466_v40 = vld [vmem:[%s4149_s4 + $0x290] ss:$8 sps:$4 sm:$0xff]  }
  0x50   : > { %1112 = vmatprep.subr.bf16.mxu0 %v3421_v2  ;;  %1258 = vmatprep.subr.bf16.mxu1 %v3426_v1  ;;  %v3461_v1 = vld [vmem:[%s4149_s4 + $0x210] ss:$8 sps:$4 sm:$0xff]   ;;  %4248 = vst [vmem:[#allocation21_spill] sm:$0xff] %v3466_v40 }
  0x51   : > { %4247 = vst [vmem:[#allocation20_spill] sm:$0xff] %v3461_v1 }
  0x52   : > { %852 = vmatmul.mubr.bf16.vlgmr.msra.gmra.mrb[4].mxu0 %v737_v62  ;;  %993 = vmatmul.mubr.bf16.vlgmr.msra.gmra.mrb[4].mxu1 %v3429_v27  ;;  %v3473_v62 = vld [vmem:[%s4149_s4 + $0x224] ss:$8 sps:$4 sm:$0xff]  }
  0x53   : > { %1113 = vmatpush1.bf16.msra.mxu0 %v3434_v60  ;;  %1259 = vmatpush1.bf16.msra.mxu1 %v3441_v34  ;;  %4249 = vst [vmem:[#allocation22_spill] sm:$0xff] %v3473_v62  ;;  %v3478_v34 = vld [vmem:[%s4149_s4 + $0x2a4] ss:$8 sps:$4 sm:$0xff]  }
  0x54   : > { %1114 = vmatprep.subr.bf16.mxu0 %v3448_v39  ;;  %1260 = vmatprep.subr.bf16.mxu1 %v3453_v58  ;;  %4250 = vst [vmem:[#allocation23_spill] sm:$0xff] %v3478_v34  ;;  %v3488_v58 = vld [vmem:[%s4149_s4 + $0x220] ss:$8 sps:$4 sm:$0xff]  }
  0x55   : > { %1144 = vmatprep.mubr.bf16.mxu0 %v4251_v56  ;;  %1290 = vmatprep.mubr.bf16.mxu1 %v4251_v56  ;;  %4252 = vst [vmem:[#allocation24_spill] sm:$0xff] %v3488_v58  ;;  %v3611_v39 = vld [vmem:[%s3322_s14] ss:$0 sps:$4 sm:$0x66]  }
  0x57   : > { %1115 = vmatpush1.bf16.msra.mxu0 %v3461_v1  ;;  %1261 = vmatpush1.bf16.msra.mxu1 %v3466_v40  ;;  %v3505_v40 = vld [vmem:[%s4149_s4 + $0x2b4] ss:$8 sps:$4 sm:$0xff]  }
  0x58   : > { %1116 = vmatprep.subr.bf16.mxu0 %v3473_v62  ;;  %1262 = vmatprep.subr.bf16.mxu1 %v3478_v34  ;;  %4255 = vst [vmem:[#allocation27_spill] sm:$0xff] %v3505_v40  ;;  %v3512_v34 = vld [vmem:[%s4149_s4 + $0x230] ss:$8 sps:$4 sm:$0xff]   ;;  %v2772_v62 = vld [vmem:[%s3322_s14] ss:$0 sps:$4 sm:$0x77]  }
  0x59   : > { %4256 = vst [vmem:[#allocation28_spill] sm:$0xff] %v3512_v34  ;;  %v1027_v48 = vshll.u32 %v2772_v62, 16  ;;  %v3596_v1 = vld [vmem:[%s4149_s4 + $0x274] ss:$8 sps:$4 sm:$0xff]  }
  0x5a   : > { %4270 = vst [vmem:[#allocation42_spill] sm:$0xff] %v3596_v1 }
  0x5b   : > { %1117 = vmatpush1.bf16.msra.mxu0 %v3488_v58  ;;  %1263 = vmatpush1.bf16.msra.mxu1 %v3493_v54  ;;  %v3524_v54 = vld [vmem:[%s4149_s4 + $0x244] ss:$8 sps:$4 sm:$0xff]   ;;  %v1029_v46 = vrot.slane %v1027_v48, 1 }
  0x5c   : > { %1118 = vmatprep.subr.bf16.mxu0 %v3500_v52  ;;  %1264 = vmatprep.subr.bf16.mxu1 %v3505_v40  ;;  %4258 = vst [vmem:[#allocation30_spill] sm:$0xff] %v3524_v54  ;;  %v3529_v58 = vld [vmem:[%s4149_s4 + $0x2c4] ss:$8 sps:$4 sm:$0xff]   ;;  %v3536_v52 = vld [vmem:[%s4149_s4 + $0x240] ss:$8 sps:$4 sm:$0xff]  }
  0x5d   : > { %4259 = vst [vmem:[#allocation31_spill] sm:$0xff] %v3529_v58  ;;  %4260 = vst [vmem:[#allocation32_spill] sm:$0xff] %v3536_v52  ;;  %v3541_v40 = vld [vmem:[%s4149_s4 + $0x2c0] ss:$8 sps:$4 sm:$0xff]   ;;  %v3630_v48 = vld [vmem:[%s4149_s4 + $0x304] ss:$8 sps:$4 sm:$0xff]  }
  0x5e   : > { %4261 = vst [vmem:[#allocation33_spill] sm:$0xff] %v3541_v40  ;;  %4274 = vst [vmem:[#allocation46_spill] sm:$0xff] %v3630_v48 }
  0x5f   : > { %1119 = vmatpush1.bf16.msra.mxu0 %v3512_v34  ;;  %1265 = vmatpush1.bf16.msra.mxu1 %v3517_v50  ;;  %v3548_v34 = vld [vmem:[%s4149_s4 + $0x254] ss:$8 sps:$4 sm:$0xff]  }
  0x60   : > { %1120 = vmatprep.subr.bf16.mxu0 %v3524_v54  ;;  %1266 = vmatprep.subr.bf16.mxu1 %v3529_v58  ;;  %4262 = vst [vmem:[#allocation34_spill] sm:$0xff] %v3548_v34  ;;  %v3553_v50 = vld [vmem:[%s4149_s4 + $0x2d4] ss:$8 sps:$4 sm:$0xff]   ;;  %v3562_v58 = vld [vmem:[%s4149_s4 + $0x250] ss:$8 sps:$4 sm:$0xff]  }
  0x61   : > { %4263 = vst [vmem:[#allocation35_spill] sm:$0xff] %v3553_v50  ;;  %4264 = vst [vmem:[#allocation36_spill] sm:$0xff] %v3562_v58  ;;  %v3567_v54 = vld [vmem:[%s4149_s4 + $0x2d0] ss:$8 sps:$4 sm:$0xff]  }
  0x62   : > { %4265 = vst [vmem:[#allocation37_spill] sm:$0xff] %v3567_v54 }
  0x63   : > { %1121 = vmatpush1.bf16.msra.mxu0 %v3536_v52  ;;  %1267 = vmatpush1.bf16.msra.mxu1 %v3541_v40  ;;  %v3574_v52 = vld [vmem:[%s4149_s4 + $0x264] ss:$8 sps:$4 sm:$0xff]  }
  0x64   : > { %1122 = vmatprep.subr.bf16.mxu0 %v3548_v34  ;;  %1268 = vmatprep.subr.bf16.mxu1 %v3553_v50  ;;  %4266 = vst [vmem:[#allocation38_spill] sm:$0xff] %v3574_v52  ;;  %v3579_v40 = vld [vmem:[%s4149_s4 + $0x2e4] ss:$8 sps:$4 sm:$0xff]   ;;  %v3586_v50 = vld [vmem:[%s4149_s4 + $0x260] ss:$8 sps:$4 sm:$0xff]  }
  0x65   : > { %4267 = vst [vmem:[#allocation39_spill] sm:$0xff] %v3579_v40  ;;  %4268 = vst [vmem:[#allocation40_spill] sm:$0xff] %v3586_v50  ;;  %v3591_v34 = vld [vmem:[%s4149_s4 + $0x2e0] ss:$8 sps:$4 sm:$0xff]  }
  0x66   : > { %4269 = vst [vmem:[#allocation41_spill] sm:$0xff] %v3591_v34 }
  0x67   : > { %1123 = vmatpush1.bf16.msra.mxu0 %v3562_v58  ;;  %1269 = vmatpush1.bf16.msra.mxu1 %v3567_v54  ;;  %v3608_v54 = vld [vmem:[%s4149_s4 + $0x2f4] ss:$8 sps:$4 sm:$0xff]   ;;  %v1025_v58 = vshrl.u32 %v2772_v62, 16  ;;  %v3635_v62 = vld [vmem:[%s4149_s4 + $0x384] ss:$8 sps:$4 sm:$0xff]  }
  0x68   : > { %1124 = vmatprep.subr.bf16.mxu0 %v3574_v52  ;;  %1270 = vmatprep.subr.bf16.mxu1 %v3579_v40  ;;  %4271 = vst [vmem:[#allocation43_spill] sm:$0xff] %v3608_v54  ;;  %v3623_v40 = vld [vmem:[%s4149_s4 + $0x2f0] ss:$8 sps:$4 sm:$0xff]   ;;  %4275 = vst [vmem:[#allocation47_spill] sm:$0xff] %v3635_v62 }
  0x69   : > { %4273 = vst [vmem:[#allocation45_spill] sm:$0xff] %v3623_v40 }
  0x6b   : > { %1125 = vmatpush1.bf16.msra.mxu0 %v3586_v50  ;;  %1271 = vmatpush1.bf16.msra.mxu1 %v3591_v34  ;;  %v3637_v34 = vor.u32 %v1029_v46, %v1025_v58  ;;  %v4197_v50 = vrot.slane %v3611_v39, 1  ;;  %v3657_v46 = vld [vmem:[%s4149_s4 + $0x314] ss:$8 sps:$4 sm:$0xff]  }
  0x6c   : > { %1126 = vmatprep.subr.bf16.mxu0 %v3596_v1  ;;  %1272 = vmatprep.subr.bf16.mxu1 %v3608_v54  ;;  %v3645_v54 = vld [vmem:[%s4149_s4 + $0x300] ss:$8 sps:$4 sm:$0xff]   ;;  %4278 = vst [vmem:[#allocation50_spill] sm:$0xff] %v3657_v46  ;;  %v3662_v58 = vld [vmem:[%s4149_s4 + $0x394] ss:$8 sps:$4 sm:$0xff]  }
  0x6d   : > { %4276 = vst [vmem:[#allocation48_spill] sm:$0xff] %v3645_v54  ;;  %v3650_v1 = vld [vmem:[%s4149_s4 + $0x380] ss:$8 sps:$4 sm:$0xff]   ;;  %4279 = vst [vmem:[#allocation51_spill] sm:$0xff] %v3662_v58 }
  0x6e   : > { %4277 = vst [vmem:[#allocation49_spill] sm:$0xff] %v3650_v1 }
  0x6f   : > { %1127 = vmatpush1.bf16.msra.mxu0 %v3618_v44  ;;  %1273 = vmatpush1.bf16.msra.mxu1 %v3623_v40  ;;  %v3677_v40 = vld [vmem:[%s4149_s4 + $0x390] ss:$8 sps:$4 sm:$0xff]  }
  0x70   : > { %1399 = vmatprep.subr.bf16.mxu0 %v3630_v48  ;;  %1551 = vmatprep.subr.bf16.mxu1 %v3635_v62  ;;  %v3672_v62 = vld [vmem:[%s4149_s4 + $0x310] ss:$8 sps:$4 sm:$0xff]   ;;  %4281 = vst [vmem:[#allocation53_spill] sm:$0xff] %v3677_v40 }
  0x71   : > { %4280 = vst [vmem:[#allocation52_spill] sm:$0xff] %v3672_v62 }
  0x72   : > { %1145 = vmatmul.mubr.bf16.vlgmr.msra.gmra.mrb[8].mxu0 %v3637_v34  ;;  %1291 = vmatmul.mubr.bf16.vlgmr.msra.gmra.mrb[8].mxu1 %v4197_v50  ;;  %v3684_v50 = vld [vmem:[%s4149_s4 + $0x324] ss:$8 sps:$4 sm:$0xff]  }
  0x73   : > { %1400 = vmatpush1.bf16.msra.mxu0 %v3645_v54  ;;  %1552 = vmatpush1.bf16.msra.mxu1 %v3650_v1  ;;  %4282 = vst [vmem:[#allocation54_spill] sm:$0xff] %v3684_v50  ;;  %v3689_v1 = vld [vmem:[%s4149_s4 + $0x3a4] ss:$8 sps:$4 sm:$0xff]   ;;  %v2870_v54 = vld [vmem:[%s3601_s12] ss:$0 sps:$4 sm:$0x77]  }
  0x74   : > { %1401 = vmatprep.subr.bf16.mxu0 %v3657_v46  ;;  %1553 = vmatprep.subr.bf16.mxu1 %v3662_v58  ;;  %4283 = vst [vmem:[#allocation55_spill] sm:$0xff] %v3689_v1  ;;  %v3698_v58 = vld [vmem:[%s4149_s4 + $0x320] ss:$8 sps:$4 sm:$0xff]   ;;  %v1466_v48 = vshll.u32 %v2870_v54, 16  ;;  %v1464_v44 = vshrl.u32 %v2870_v54, 16 }
  0x75   : > { %1431 = vmatprep.mubr.bf16.mxu0 %v4251_v56  ;;  %1583 = vmatprep.mubr.bf16.mxu1 %v4251_v56  ;;  %4284 = vst [vmem:[#allocation56_spill] sm:$0xff] %v3698_v58  ;;  %v3703_v46 = vld [vmem:[%s4149_s4 + $0x3a0] ss:$8 sps:$4 sm:$0xff]   ;;  %v3832_v54 = vld [vmem:[%s4149_s4 + $0x404] ss:$8 sps:$4 sm:$0xff]  }
  0x76   : > { %4285 = vst [vmem:[#allocation57_spill] sm:$0xff] %v3703_v46  ;;  %v1468_v52 = vrot.slane %v1466_v48, 1 }
  0x77   : > { %1402 = vmatpush1.bf16.msra.mxu0 %v3672_v62  ;;  %1554 = vmatpush1.bf16.msra.mxu1 %v3677_v40  ;;  %v3710_v62 = vld [vmem:[%s4149_s4 + $0x334] ss:$8 sps:$4 sm:$0xff]  }
  0x78   : > { %1403 = vmatprep.subr.bf16.mxu0 %v3684_v50  ;;  %1555 = vmatprep.subr.bf16.mxu1 %v3689_v1  ;;  %4286 = vst [vmem:[#allocation58_spill] sm:$0xff] %v3710_v62  ;;  %v3715_v40 = vld [vmem:[%s4149_s4 + $0x3b4] ss:$8 sps:$4 sm:$0xff]   ;;  %v3722_v50 = vld [vmem:[%s4149_s4 + $0x330] ss:$8 sps:$4 sm:$0xff]   ;;  %v3834_v48 = vor.u32 %v1468_v52, %v1464_v44 }
  0x79   : > { %4287 = vst [vmem:[#allocation59_spill] sm:$0xff] %v3715_v40  ;;  %4288 = vst [vmem:[#allocation60_spill] sm:$0xff] %v3722_v50  ;;  %v3727_v1 = vld [vmem:[%s4149_s4 + $0x3b0] ss:$8 sps:$4 sm:$0xff]   ;;  %v3852_v44 = vld [vmem:[%s4149_s4 + $0x414] ss:$8 sps:$4 sm:$0xff]  }
  0x7a   : > { %4289 = vst [vmem:[#allocation61_spill] sm:$0xff] %v3727_v1  ;;  %v3873_v52 = vld [vmem:[%s4149_s4 + $0x424] ss:$8 sps:$4 sm:$0xff]  }
  0x7b   : > { %1404 = vmatpush1.bf16.msra.mxu0 %v3698_v58  ;;  %1556 = vmatpush1.bf16.msra.mxu1 %v3703_v46  ;;  %v3734_v58 = vld [vmem:[%s4149_s4 + $0x344] ss:$8 sps:$4 sm:$0xff]  }
  0x7c   : > { %1405 = vmatprep.subr.bf16.mxu0 %v3710_v62  ;;  %1557 = vmatprep.subr.bf16.mxu1 %v3715_v40  ;;  %4290 = vst [vmem:[#allocation62_spill] sm:$0xff] %v3734_v58  ;;  %v3739_v46 = vld [vmem:[%s4149_s4 + $0x3c4] ss:$8 sps:$4 sm:$0xff]   ;;  %v3746_v62 = vld [vmem:[%s4149_s4 + $0x340] ss:$8 sps:$4 sm:$0xff]  }
  0x7d   : > { %4291 = vst [vmem:[#allocation63_spill] sm:$0xff] %v3739_v46  ;;  %4292 = vst [vmem:[#allocation64_spill] sm:$0xff] %v3746_v62  ;;  %v3751_v40 = vld [vmem:[%s4149_s4 + $0x3c0] ss:$8 sps:$4 sm:$0xff]  }
  0x7e   : > { %4293 = vst [vmem:[#allocation65_spill] sm:$0xff] %v3751_v40 }
  0x7f   : > { %1406 = vmatpush1.bf16.msra.mxu0 %v3722_v50  ;;  %1558 = vmatpush1.bf16.msra.mxu1 %v3727_v1  ;;  %v3758_v50 = vld [vmem:[%s4149_s4 + $0x354] ss:$8 sps:$4 sm:$0xff]  }
  0x80   : > { %1407 = vmatprep.subr.bf16.mxu0 %v3734_v58  ;;  %1559 = vmatprep.subr.bf16.mxu1 %v3739_v46  ;;  %4294 = vst [vmem:[#allocation66_spill] sm:$0xff] %v3758_v50  ;;  %v3763_v1 = vld [vmem:[%s4149_s4 + $0x3d4] ss:$8 sps:$4 sm:$0xff]   ;;  %v3771_v46 = vld [vmem:[%s4149_s4 + $0x350] ss:$8 sps:$4 sm:$0xff]  }
  0x81   : > { %4295 = vst [vmem:[#allocation67_spill] sm:$0xff] %v3763_v1  ;;  %4296 = vst [vmem:[#allocation68_spill] sm:$0xff] %v3771_v46  ;;  %v3776_v58 = vld [vmem:[%s4149_s4 + $0x3d0] ss:$8 sps:$4 sm:$0xff]  }
  0x82   : > { %4297 = vst [vmem:[#allocation69_spill] sm:$0xff] %v3776_v58 }
  0x83   : > { %1408 = vmatpush1.bf16.msra.mxu0 %v3746_v62  ;;  %1560 = vmatpush1.bf16.msra.mxu1 %v3751_v40  ;;  %v3783_v62 = vld [vmem:[%s4149_s4 + $0x364] ss:$8 sps:$4 sm:$0xff]  }
  0x84   : > { %1409 = vmatprep.subr.bf16.mxu0 %v3758_v50  ;;  %1561 = vmatprep.subr.bf16.mxu1 %v3763_v1  ;;  %4298 = vst [vmem:[#allocation70_spill] sm:$0xff] %v3783_v62  ;;  %v3788_v40 = vld [vmem:[%s4149_s4 + $0x3e4] ss:$8 sps:$4 sm:$0xff]   ;;  %v3795_v50 = vld [vmem:[%s4149_s4 + $0x360] ss:$8 sps:$4 sm:$0xff]  }
  0x85   : > { %4299 = vst [vmem:[#allocation71_spill] sm:$0xff] %v3788_v40  ;;  %v3800_v1 = vld [vmem:[%s4149_s4 + $0x3e0] ss:$8 sps:$4 sm:$0xff]  }
  0x86   : > { %4300 = vst [vmem:[#allocation72_spill] sm:$0xff] %v3800_v1 }
  0x87   : > { %1410 = vmatpush1.bf16.msra.mxu0 %v3771_v46  ;;  %1562 = vmatpush1.bf16.msra.mxu1 %v3776_v58  ;;  %v3807_v46 = vld [vmem:[%s4149_s4 + $0x374] ss:$8 sps:$4 sm:$0xff]  }
  0x88   : > { %1411 = vmatprep.subr.bf16.mxu0 %v3783_v62  ;;  %1563 = vmatprep.subr.bf16.mxu1 %v3788_v40  ;;  %4301 = vst [vmem:[#allocation73_spill] sm:$0xff] %v3807_v46  ;;  %v3812_v58 = vld [vmem:[%s4149_s4 + $0x3f4] ss:$8 sps:$4 sm:$0xff]   ;;  %v3820_v40 = vld [vmem:[%s4149_s4 + $0x370] ss:$8 sps:$4 sm:$0xff]  }
  0x89   : > { %4302 = vst [vmem:[#allocation74_spill] sm:$0xff] %v3812_v58  ;;  %v3825_v62 = vld [vmem:[%s4149_s4 + $0x3f0] ss:$8 sps:$4 sm:$0xff]  }
  0x8a   : > { %4303 = vst [vmem:[#allocation75_spill] sm:$0xff] %v3825_v62 }
  0x8b   : > { %1412 = vmatpush1.bf16.msra.mxu0 %v3795_v50  ;;  %1564 = vmatpush1.bf16.msra.mxu1 %v3800_v1  ;;  %v3840_v1 = vld [vmem:[%s3601_s12] sm:$0x3] }
  0x8c   : > { %1413 = vmatprep.subr.bf16.mxu0 %v3807_v46  ;;  %1565 = vmatprep.subr.bf16.mxu1 %v3812_v58  ;;  %v3845_v46 = vld [vmem:[%s4149_s4 + $0x400] ss:$8 sps:$4 sm:$0xff]   ;;  %v2898_v58 = vld [vmem:[%s4149_s4 + $0x4] ss:$8 sps:$4 sm:$0xff]  }
  0x8f   : > { %1414 = vmatpush1.bf16.msra.mxu0 %v3820_v40  ;;  %1566 = vmatpush1.bf16.msra.mxu1 %v3825_v62  ;;  %v3948_v62 = vld [vmem:[%s3601_s12] ss:$0 sps:$4 sm:$0x66]  }
  0x90   : > { %1697 = vmatprep.subr.bf16.mxu0 %v3832_v54  ;;  %1756 = vmatprep.subr.bf16.mxu1 %v3013_v0  ;;  %v3866_v0 = vld [vmem:[%s4149_s4 + $0x410] ss:$8 sps:$4 sm:$0xff]  }
  0x92   : > { %1432 = vmatmul.mubr.bf16.vlgmr.msra.gmra.mrb[12].mxu0 %v3840_v1  ;;  %1584 = vmatmul.mubr.bf16.vlgmr.msra.gmra.mrb[12].mxu1 %v3834_v48 }
  0x93   : > { %1698 = vmatpush1.bf16.msra.mxu0 %v3845_v46  ;;  %1757 = vmatpush1.bf16.msra.mxu1 %v3028_v3  ;;  %v3882_v3 = vld [vmem:[%s4149_s4 + $0x420] ss:$8 sps:$4 sm:$0xff]  }
  0x94   : > { %1699 = vmatprep.subr.bf16.mxu0 %v3852_v44  ;;  %1758 = vmatprep.subr.bf16.mxu1 %v3036_v5  ;;  %v3889_v5 = vld [vmem:[%s4149_s4 + $0x434] ss:$8 sps:$4 sm:$0xff]  }
  0x95   : > { %1729 = vmatprep.mubr.bf16.mxu0 %v4251_v56  ;;  %1788 = vmatprep.mubr.bf16.mxu1 %v4251_v56 }
  0x97   : > { %1700 = vmatpush1.bf16.msra.mxu0 %v3866_v0  ;;  %1759 = vmatpush1.bf16.msra.mxu1 %v3047_v7  ;;  %v3896_v7 = vld [vmem:[%s4149_s4 + $0x430] ss:$8 sps:$4 sm:$0xff]  }
  0x98   : > { %1701 = vmatprep.subr.bf16.mxu0 %v3873_v52  ;;  %1760 = vmatprep.subr.bf16.mxu1 %v3063_v9  ;;  %v3903_v9 = vld [vmem:[%s4149_s4 + $0x444] ss:$8 sps:$4 sm:$0xff]  }
  0x9b   : > { %1702 = vmatpush1.bf16.msra.mxu0 %v3882_v3  ;;  %1761 = vmatpush1.bf16.msra.mxu1 %v3073_v11  ;;  %v3910_v11 = vld [vmem:[%s4149_s4 + $0x440] ss:$8 sps:$4 sm:$0xff]  }
  0x9c   : > { %1703 = vmatprep.subr.bf16.mxu0 %v3889_v5  ;;  %1762 = vmatprep.subr.bf16.mxu1 %v3085_v13  ;;  %v3917_v13 = vld [vmem:[%s4149_s4 + $0x454] ss:$8 sps:$4 sm:$0xff]  }
  0x9f   : > { %1704 = vmatpush1.bf16.msra.mxu0 %v3896_v7  ;;  %1763 = vmatpush1.bf16.msra.mxu1 %v3101_v15  ;;  %v3924_v15 = vld [vmem:[%s4149_s4 + $0x450] ss:$8 sps:$4 sm:$0xff]  }
  0xa0   : > { %1705 = vmatprep.subr.bf16.mxu0 %v3903_v9  ;;  %1764 = vmatprep.subr.bf16.mxu1 %v3113_v17  ;;  %v3931_v17 = vld [vmem:[%s4149_s4 + $0x464] ss:$8 sps:$4 sm:$0xff]  }
  0xa3   : > { %1706 = vmatpush1.bf16.msra.mxu0 %v3910_v11  ;;  %1765 = vmatpush1.bf16.msra.mxu1 %v3126_v19  ;;  %v3938_v19 = vld [vmem:[%s4149_s4 + $0x460] ss:$8 sps:$4 sm:$0xff]  }
  0xa4   : > { %1707 = vmatprep.subr.bf16.mxu0 %v3917_v13  ;;  %1766 = vmatprep.subr.bf16.mxu1 %v3138_v21  ;;  %v3945_v21 = vld [vmem:[%s4149_s4 + $0x474] ss:$8 sps:$4 sm:$0xff]  }
  0xa7   : > { %1708 = vmatpush1.bf16.msra.mxu0 %v3924_v15  ;;  %1767 = vmatpush1.bf16.msra.mxu1 %v3157_v23  ;;  %v3955_v23 = vld [vmem:[%s4149_s4 + $0x470] ss:$8 sps:$4 sm:$0xff]  }
  0xa8   : > { %1709 = vmatprep.subr.bf16.mxu0 %v3931_v17  ;;  %1768 = vmatprep.subr.bf16.mxu1 %v3169_v25  ;;  %v1615_v25 = vrot.slane %v3948_v62, 1  ;;  %v4367_v62 = vld [vmem:[#allocation55_spill] sm:$0xff] }
  0xab   : > { %1710 = vmatpush1.bf16.msra.mxu0 %v3938_v19  ;;  %1769 = vmatpush1.bf16.msra.mxu1 %v3180_v28  ;;  %v2899_v28 = vld [vmem:[%s4149_s4] ss:$8 sps:$4 sm:$0xff]  }
  0xac   : > { %1711 = vmatprep.subr.bf16.mxu0 %v3945_v21  ;;  %1770 = vmatprep.subr.bf16.mxu1 %v3194_v31  ;;  %v4317_v31 = vld [vmem:[#allocation8_spill] sm:$0xff] }
  0xaf   : > { %1712 = vmatpush1.bf16.msra.mxu0 %v3955_v23  ;;  %1771 = vmatpush1.bf16.msra.mxu1 %v3204_v33  ;;  %v4319_v33 = vld [vmem:[#allocation9_spill] sm:$0xff] }
  0xb0   : > { %1797 = vmatprep.subr.bf16.mxu0 %v2898_v58  ;;  %1838 = vmatprep.subr.bf16.mxu1 %v3217_v37  ;;  %v4321_v37 = vld [vmem:[#allocation10_spill] sm:$0xff]  ;;  %v4344_v58 = vld [vmem:[#allocation56_spill] sm:$0xff] }
  0xb2   : > { %1730 = vmatmul.mubr.bf16.vlgmr.msra.gmra.mrb[16].mxu0 %v1615_v25  ;;  %1789 = vmatmul.mubr.bf16.vlgmr.msra.gmra.mrb[16].mxu1 %v3637_v34  ;;  %v4340_v34 = vld [vmem:[#allocation52_spill] sm:$0xff] }
  0xb3   : > { %1798 = vmatpush1.bf16.msra.mxu0 %v2899_v28  ;;  %1839 = vmatpush1.bf16.msra.mxu1 %v3230_v41  ;;  %v4323_v41 = vld [vmem:[#allocation11_spill] sm:$0xff]  ;;  %v4346_v28 = vld [vmem:[#allocation58_spill] sm:$0xff] }
  0xb4   : > { %1799 = vmatprep.subr.bf16.mxu0 %v3042_v6  ;;  %1840 = vmatprep.subr.bf16.mxu1 %v3242_v43  ;;  %v4304_v6 = vrot.slane %v3611_v39, 1  ;;  %v4325_v43 = vld [vmem:[#allocation12_spill] sm:$0xff]  ;;  %v4343_v39 = vld [vmem:[#allocation25_spill] sm:$0xff] }
  0xb5   : > { %1829 = vmatprep.mubr.bf16.mxu0 %v4251_v56  ;;  %1870 = vmatprep.mubr.bf16.mxu1 %v4251_v56 }
  0xb7   : > { %1800 = vmatpush1.bf16.msra.mxu0 %v3054_v8  ;;  %1841 = vmatpush1.bf16.msra.mxu1 %v3254_v45  ;;  %v4305_v8 = vld [vmem:[#allocation2_spill] sm:$0xff] }
  0xb8   : > { %1801 = vmatprep.subr.bf16.mxu0 %v3068_v10  ;;  %1842 = vmatprep.subr.bf16.mxu1 %v3266_v47  ;;  %v4306_v10 = vld [vmem:[#allocation18_spill] sm:$0xff]  ;;  %v4327_v47 = vld [vmem:[#allocation13_spill] sm:$0xff] }
  0xb9   : > { %v4326_v45 = vld [vmem:[#allocation38_spill] sm:$0xff] }
  0xbb   : > { %1802 = vmatpush1.bf16.msra.mxu0 %v3078_v12  ;;  %1843 = vmatpush1.bf16.msra.mxu1 %v3281_v49  ;;  %v4307_v12 = vld [vmem:[#allocation3_spill] sm:$0xff]  ;;  %v4328_v49 = vld [vmem:[#allocation40_spill] sm:$0xff] }
  0xbc   : > { %1803 = vmatprep.subr.bf16.mxu0 %v3093_v14  ;;  %1844 = vmatprep.subr.bf16.mxu1 %v3293_v51  ;;  %v4309_v14 = vld [vmem:[#allocation4_spill] sm:$0xff]  ;;  %v4329_v51 = vld [vmem:[#allocation14_spill] sm:$0xff] }
  0xbf   : > { %1804 = vmatpush1.bf16.msra.mxu0 %v3108_v16  ;;  %1845 = vmatpush1.bf16.msra.mxu1 %v3305_v53  ;;  %v4310_v16 = vld [vmem:[#allocation22_spill] sm:$0xff] }
  0xc0   : > { %1805 = vmatprep.subr.bf16.mxu0 %v3120_v18  ;;  %1846 = vmatprep.subr.bf16.mxu1 %v3317_v55  ;;  %v4311_v18 = vld [vmem:[#allocation5_spill] sm:$0xff]  ;;  %v4330_v53 = vld [vmem:[#allocation42_spill] sm:$0xff]  ;;  %v4331_v55 = vld [vmem:[#allocation15_spill] sm:$0xff] }
  0xc3   : > { %1806 = vmatpush1.bf16.msra.mxu0 %v3131_v20  ;;  %1847 = vmatpush1.bf16.msra.mxu1 %v3334_v57  ;;  %v4312_v20 = vld [vmem:[#allocation24_spill] sm:$0xff] }
  0xc4   : > { %1807 = vmatprep.subr.bf16.mxu0 %v3145_v22  ;;  %1848 = vmatprep.subr.bf16.mxu1 %v3348_v59  ;;  %v4313_v22 = vld [vmem:[#allocation6_spill] sm:$0xff]  ;;  %v4332_v57 = vld [vmem:[#allocation44_spill] sm:$0xff] }
  0xc5   : > { %v4333_v59 = vld [vmem:[#allocation16_spill] sm:$0xff] }
  0xc7   : > { %1808 = vmatpush1.bf16.msra.mxu0 %v3162_v24  ;;  %1849 = vmatpush1.bf16.msra.mxu1 %v3358_v61  ;;  %v4314_v24 = vld [vmem:[#allocation26_spill] sm:$0xff]  ;;  %v4335_v61 = vld [vmem:[#allocation17_spill] sm:$0xff] }
  0xc8   : > { %1809 = vmatprep.subr.bf16.mxu0 %v3174_v26  ;;  %1850 = vmatprep.subr.bf16.mxu1 %v3372_v63  ;;  %v4315_v26 = vld [vmem:[#allocation7_spill] sm:$0xff]  ;;  %v4336_v63 = vld [vmem:[#allocation48_spill] sm:$0xff] }
  0xcb   : > { %1810 = vmatpush1.bf16.msra.mxu0 %v3187_v29  ;;  %1851 = vmatpush1.bf16.msra.mxu1 %v3382_v4  ;;  %v4316_v29 = vld [vmem:[#allocation28_spill] sm:$0xff]  ;;  %v4337_v4 = vld [vmem:[#allocation19_spill] sm:$0xff] }
  0xcc   : > { %1811 = vmatprep.subr.bf16.mxu0 %v3199_v32  ;;  %1852 = vmatprep.subr.bf16.mxu1 %v3396_v30  ;;  %v4318_v32 = vld [vmem:[#allocation30_spill] sm:$0xff]  ;;  %v4339_v30 = vld [vmem:[#allocation21_spill] sm:$0xff] }
  0xcf   : > { %1812 = vmatpush1.bf16.msra.mxu0 %v3212_v36  ;;  %1853 = vmatpush1.bf16.msra.mxu1 %v3406_v35  ;;  %v4320_v36 = vld [vmem:[#allocation32_spill] sm:$0xff]  ;;  %v4341_v35 = vld [vmem:[#allocation23_spill] sm:$0xff] }
  0xd0   : > { %1881 = vmatprep.subr.bf16.mxu0 %v3224_v38  ;;  %1924 = vmatprep.subr.bf16.mxu1 %v3421_v2  ;;  %v4308_v2 = vld [vmem:[#allocation20_spill] sm:$0xff]  ;;  %v4322_v38 = vld [vmem:[#allocation34_spill] sm:$0xff] }
  0xd2   : > { %1830 = vmatmul.mubr.bf16.vlgmr.msra.gmra.mrb[20].mxu0 %v3429_v27  ;;  %1871 = vmatmul.mubr.bf16.vlgmr.msra.gmra.mrb[20].mxu1 %v4304_v6  ;;  %v4338_v27 = vld [vmem:[#allocation50_spill] sm:$0xff]  ;;  %v4347_v6 = vld [vmem:[#allocation29_spill] sm:$0xff] }
  0xd3   : > { %1882 = vmatpush1.bf16.msra.mxu0 %v3237_v42  ;;  %1925 = vmatpush1.bf16.msra.mxu1 %v3434_v60  ;;  %v4324_v42 = vld [vmem:[#allocation36_spill] sm:$0xff]  ;;  %v4334_v60 = vld [vmem:[#allocation46_spill] sm:$0xff] }
  0xd4   : > { %1883 = vmatprep.subr.bf16.mxu0 %v4305_v8  ;;  %1926 = vmatprep.subr.bf16.mxu1 %v4306_v10  ;;  %v4348_v8 = vld [vmem:[#allocation60_spill] sm:$0xff]  ;;  %v4349_v10 = vld [vmem:[#allocation31_spill] sm:$0xff] }
  0xd5   : > { %1913 = vmatprep.mubr.bf16.mxu0 %v4251_v56  ;;  %1956 = vmatprep.mubr.bf16.mxu1 %v4251_v56 }
  0xd7   : > { %1884 = vmatpush1.bf16.msra.mxu0 %v4307_v12  ;;  %1927 = vmatpush1.bf16.msra.mxu1 %v4308_v2  ;;  %v4350_v12 = vld [vmem:[#allocation62_spill] sm:$0xff]  ;;  %v4351_v2 = vld [vmem:[#allocation33_spill] sm:$0xff] }
  0xd8   : > { %1885 = vmatprep.subr.bf16.mxu0 %v4309_v14  ;;  %1928 = vmatprep.subr.bf16.mxu1 %v4310_v16  ;;  %v4352_v14 = vld [vmem:[#allocation64_spill] sm:$0xff]  ;;  %v4353_v16 = vld [vmem:[#allocation35_spill] sm:$0xff] }
  0xdb   : > { %1886 = vmatpush1.bf16.msra.mxu0 %v4311_v18  ;;  %1929 = vmatpush1.bf16.msra.mxu1 %v4312_v20  ;;  %v4354_v18 = vld [vmem:[#allocation66_spill] sm:$0xff] }
  0xdc   : > { %1887 = vmatprep.subr.bf16.mxu0 %v4313_v22  ;;  %1930 = vmatprep.subr.bf16.mxu1 %v4314_v24 }
  0xdf   : > { %1888 = vmatpush1.bf16.msra.mxu0 %v4315_v26  ;;  %1931 = vmatpush1.bf16.msra.mxu1 %v4316_v29 }
  0xe0   : > { %1889 = vmatprep.subr.bf16.mxu0 %v4317_v31  ;;  %1932 = vmatprep.subr.bf16.mxu1 %v4318_v32 }
  0xe3   : > { %1890 = vmatpush1.bf16.msra.mxu0 %v4319_v33  ;;  %1933 = vmatpush1.bf16.msra.mxu1 %v4320_v36  ;;  %v4355_v36 = vld [vmem:[#allocation37_spill] sm:$0xff] }
  0xe4   : > { %1891 = vmatprep.subr.bf16.mxu0 %v4321_v37  ;;  %1934 = vmatprep.subr.bf16.mxu1 %v4322_v38  ;;  %v4356_v37 = vld [vmem:[#allocation68_spill] sm:$0xff] }
  0xe7   : > { %1892 = vmatpush1.bf16.msra.mxu0 %v4323_v41  ;;  %1935 = vmatpush1.bf16.msra.mxu1 %v4324_v42  ;;  %v4357_v42 = vld [vmem:[#allocation39_spill] sm:$0xff] }
  0xe8   : > { %1893 = vmatprep.subr.bf16.mxu0 %v4325_v43  ;;  %1936 = vmatprep.subr.bf16.mxu1 %v4326_v45  ;;  %v4358_v43 = vld [vmem:[#allocation70_spill] sm:$0xff]  ;;  %v4359_v45 = vld [vmem:[#allocation41_spill] sm:$0xff] }
  0xeb   : > { %1894 = vmatpush1.bf16.msra.mxu0 %v4327_v47  ;;  %1937 = vmatpush1.bf16.msra.mxu1 %v4328_v49  ;;  %v4360_v47 = vld [vmem:[#allocation43_spill] sm:$0xff]  ;;  %v4361_v49 = vld [vmem:[#allocation73_spill] sm:$0xff] }
  0xec   : > { %1895 = vmatprep.subr.bf16.mxu0 %v4329_v51  ;;  %1938 = vmatprep.subr.bf16.mxu1 %v4330_v53  ;;  %v4362_v51 = vld [vmem:[#allocation45_spill] sm:$0xff]  ;;  %v2010_v53 = vld [vmem:[%s3857_s7] sm:$0x3] }
  0xef   : > { %1896 = vmatpush1.bf16.msra.mxu0 %v4331_v55  ;;  %1939 = vmatpush1.bf16.msra.mxu1 %v4332_v57  ;;  %v4363_v55 = vld [vmem:[#allocation47_spill] sm:$0xff]  ;;  %v4364_v57 = vld [vmem:[#allocation49_spill] sm:$0xff] }
  0xf0   : > { %1967 = vmatprep.subr.bf16.mxu0 %v4333_v59  ;;  %2011 = vmatprep.subr.bf16.mxu1 %v4334_v60 }
  0xf2   : > { %1914 = vmatmul.mubr.bf16.vlgmr.msra.gmra.mrb[24].mxu0 %v3840_v1  ;;  %1957 = vmatmul.mubr.bf16.vlgmr.msra.gmra.mrb[24].mxu1 %v3834_v48  ;;  %v4342_v1 = vld [vmem:[#allocation54_spill] sm:$0xff]  ;;  %v4345_v48 = vld [vmem:[#allocation27_spill] sm:$0xff] }
  0xf3   : > { %1968 = vmatpush1.bf16.msra.mxu0 %v4335_v61  ;;  %2012 = vmatpush1.bf16.msra.mxu1 %v4336_v63 }
  0xf4   : > { %1969 = vmatprep.subr.bf16.mxu0 %v4337_v4  ;;  %2013 = vmatprep.subr.bf16.mxu1 %v4338_v27 }
  0xf5   : > { %1999 = vmatprep.mubr.bf16.mxu0 %v4251_v56  ;;  %2043 = vmatprep.mubr.bf16.mxu1 %v4251_v56 }
  0xf7   : > { %1970 = vmatpush1.bf16.msra.mxu0 %v4339_v30  ;;  %2014 = vmatpush1.bf16.msra.mxu1 %v4340_v34 }
  0xf8   : > { %1971 = vmatprep.subr.bf16.mxu0 %v4341_v35  ;;  %2015 = vmatprep.subr.bf16.mxu1 %v4342_v1  ;;  %v4375_v35 = vld [vmem:[#allocation71_spill] sm:$0xff] }
  0xfb   : > { %1972 = vmatpush1.bf16.msra.mxu0 %v4343_v39  ;;  %2016 = vmatpush1.bf16.msra.mxu1 %v4344_v58  ;;  %v2897_v58 = vld [vmem:[%s3857_s7] ss:$0 sps:$4 sm:$0x66]  }
  0xfc   : > { %1973 = vmatprep.subr.bf16.mxu0 %v4345_v48  ;;  %2017 = vmatprep.subr.bf16.mxu1 %v4346_v28  ;;  %v4376_v48 = vld [vmem:[#allocation72_spill] sm:$0xff]  ;;  %v4377_v28 = vld [vmem:[#allocation74_spill] sm:$0xff] }
  0xff   : > { %1974 = vmatpush1.bf16.msra.mxu0 %v4347_v6  ;;  %2018 = vmatpush1.bf16.msra.mxu1 %v4348_v8  ;;  %v2113_v6 = vrot.slane %v2897_v58, 1  ;;  %v4378_v8 = vld [vmem:[#allocation75_spill] sm:$0xff] }
 0x100   : > { %1975 = vmatprep.subr.bf16.mxu0 %v4349_v10  ;;  %2019 = vmatprep.subr.bf16.mxu1 %v4350_v12 }
 0x103   : > { %1976 = vmatpush1.bf16.msra.mxu0 %v4351_v2  ;;  %2020 = vmatpush1.bf16.msra.mxu1 %v4352_v14 }
 0x104   : > { %1977 = vmatprep.subr.bf16.mxu0 %v4353_v16  ;;  %2021 = vmatprep.subr.bf16.mxu1 %v4354_v18 }
 0x105   : > { %v588_v20 = vpop.f32.mrb[0].mxu0  ;;  %v709_v22 = vpop.f32.mrb[0].mxu1 }
 0x106   : > { %v710_v24 = vadd.f32 %v709_v22, %v588_v20  ;;  %v590_v26 = vpop.f32.mrb[1].mxu0  ;;  %v711_v29 = vpop.f32.mrb[1].mxu1 }
 0x107   : > { %v712_v31 = vadd.f32 %v711_v29, %v590_v26  ;;  %v592_v32 = vpop.f32.mrb[2].mxu0  ;;  %v713_v33 = vpop.f32.mrb[2].mxu1  ;;  %1978 = vmatpush1.bf16.msra.mxu0 %v4355_v36  ;;  %2022 = vmatpush1.bf16.msra.mxu1 %v4356_v37 }
 0x108   : > { %v593_v38 = vpop.f32.mrb[3].mxu0  ;;  %v714_v41 = vpop.f32.mrb[3].mxu1  ;;  %1979 = vmatprep.subr.bf16.mxu0 %v4357_v42  ;;  %2023 = vmatprep.subr.bf16.mxu1 %v4358_v43 }
 0x10b   : > { %1980 = vmatpush1.bf16.msra.mxu0 %v4359_v45  ;;  %2024 = vmatpush1.bf16.msra.mxu1 %v3795_v50  ;;  %v4365_v50 = vld [vmem:[#allocation51_spill] sm:$0xff] }
 0x10c   : > { %1981 = vmatprep.subr.bf16.mxu0 %v4360_v47  ;;  %2025 = vmatprep.subr.bf16.mxu1 %v4361_v49 }
 0x10f   : > { %1982 = vmatpush1.bf16.msra.mxu0 %v4362_v51  ;;  %2026 = vmatpush1.bf16.msra.mxu1 %v3820_v40  ;;  %v4366_v40 = vld [vmem:[#allocation53_spill] sm:$0xff] }
 0x110   : > { %2066 = vmatprep.subr.bf16.mxu0 %v4363_v55  ;;  %2115 = vmatprep.subr.bf16.mxu1 %v3832_v54  ;;  %v4368_v54 = vld [vmem:[#allocation57_spill] sm:$0xff] }
 0x112   : > { %2000 = vmatmul.mubr.bf16.vlgmr.msra.gmra.mrb[28].mxu0 %v1615_v25  ;;  %2044 = vmatmul.mubr.bf16.vlgmr.msra.gmra.mrb[28].mxu1 %v2010_v53  ;;  %v4372_v25 = vld [vmem:[#allocation65_spill] sm:$0xff] }
 0x113   : > { %2067 = vmatpush1.bf16.msra.mxu0 %v4364_v57  ;;  %2116 = vmatpush1.bf16.msra.mxu1 %v3845_v46  ;;  %v4369_v46 = vld [vmem:[#allocation59_spill] sm:$0xff] }
 0x114   : > { %2068 = vmatprep.subr.bf16.mxu0 %v4365_v50  ;;  %2117 = vmatprep.subr.bf16.mxu1 %v3852_v44  ;;  %v4370_v44 = vld [vmem:[#allocation61_spill] sm:$0xff] }
 0x115   : > { %2098 = vmatprep.mubr.bf16.mxu0 %v4251_v56  ;;  %2147 = vmatprep.mubr.bf16.mxu1 %v4251_v56  ;;  %v4371_v56 = vld [vmem:[#allocation63_spill] sm:$0xff] }
 0x117   : > { %2069 = vmatpush1.bf16.msra.mxu0 %v4366_v40  ;;  %2118 = vmatpush1.bf16.msra.mxu1 %v3866_v0  ;;  %v2896_v0 = vld [vmem:[%s3857_s7] ss:$0 sps:$4 sm:$0x77]  }
 0x118   : > { %2070 = vmatprep.subr.bf16.mxu0 %v4367_v62  ;;  %2119 = vmatprep.subr.bf16.mxu1 %v3873_v52  ;;  %v4373_v52 = vld [vmem:[#allocation67_spill] sm:$0xff]  ;;  %v2059_v1 = vshrl.u32 %v2896_v0, 16 }
 0x11b   : > { %2071 = vmatpush1.bf16.msra.mxu0 %v4368_v54  ;;  %2120 = vmatpush1.bf16.msra.mxu1 %v3882_v3 }
 0x11c   : > { %2072 = vmatprep.subr.bf16.mxu0 %v4369_v46  ;;  %2121 = vmatprep.subr.bf16.mxu1 %v3889_v5 }
 0x11f   : > { %2073 = vmatpush1.bf16.msra.mxu0 %v4370_v44  ;;  %2122 = vmatpush1.bf16.msra.mxu1 %v3896_v7  ;;  %v2061_v7 = vshll.u32 %v2896_v0, 16 }
 0x120   : > { %2074 = vmatprep.subr.bf16.mxu0 %v4371_v56  ;;  %2123 = vmatprep.subr.bf16.mxu1 %v3903_v9  ;;  %v4374_v9 = vld [vmem:[#allocation69_spill] sm:$0xff] }
 0x121   : > { %v2063_v39 = vrot.slane %v2061_v7, 1 }
 0x123   : > { %2075 = vmatpush1.bf16.msra.mxu0 %v4372_v25  ;;  %2124 = vmatpush1.bf16.msra.mxu1 %v3910_v11 }
 0x124   : > { %2076 = vmatprep.subr.bf16.mxu0 %v4373_v52  ;;  %2125 = vmatprep.subr.bf16.mxu1 %v3917_v13 }
 0x125   : > { %v853_v3 = vpop.f32.mrb[4].mxu0  ;;  %v994_v59 = vpop.f32.mrb[4].mxu1 }
 0x126   : > { %v860_v5 = vadd.f32 %v853_v3, %v710_v24  ;;  %v855_v60 = vpop.f32.mrb[5].mxu0  ;;  %v996_v61 = vpop.f32.mrb[5].mxu1 }
 0x127   : > { %v861_v63 = vadd.f32 %v855_v60, %v712_v31  ;;  %v857_v4 = vpop.f32.mrb[6].mxu0  ;;  %v998_v27 = vpop.f32.mrb[6].mxu1  ;;  %2077 = vmatpush1.bf16.msra.mxu0 %v4374_v9  ;;  %2126 = vmatpush1.bf16.msra.mxu1 %v3924_v15  ;;  %v2064_v15 = vor.u32 %v2063_v39, %v2059_v1 }
 0x128   : > { %v1001_v30 = vadd.f32 %v994_v59, %v860_v5  ;;  %v858_v11 = vpop.f32.mrb[7].mxu0  ;;  %v999_v34 = vpop.f32.mrb[7].mxu1  ;;  %2078 = vmatprep.subr.bf16.mxu0 %v4375_v35  ;;  %2127 = vmatprep.subr.bf16.mxu1 %v3931_v17 }
 0x129   : > { %v1002_v13 = vadd.f32 %v996_v61, %v861_v63 }
 0x12b   : > { %2079 = vmatpush1.bf16.msra.mxu0 %v4376_v48  ;;  %2128 = vmatpush1.bf16.msra.mxu1 %v3938_v19 }
 0x12c   : > { %2080 = vmatprep.subr.bf16.mxu0 %v4377_v28  ;;  %2129 = vmatprep.subr.bf16.mxu1 %v3945_v21 }
 0x12f   : > { %2081 = vmatpush1.bf16.msra.mxu0 %v4378_v8  ;;  %2130 = vmatpush1.bf16.msra.mxu1 %v3955_v23 }
 0x132   : > { %2099 = vmatmul.mubr.bf16.vlgmr.msra.gmra.mrb[32].mxu0 %v2064_v15  ;;  %2148 = vmatmul.mubr.bf16.vlgmr.msra.gmra.mrb[32].mxu1 %v2113_v6 }
 0x145   : > { %v1146_v17 = vpop.f32.mrb[8].mxu0  ;;  %v1292_v10 = vpop.f32.mrb[8].mxu1 }
 0x146   : > { %v1153_v12 = vadd.f32 %v1146_v17, %v1001_v30  ;;  %v1148_v2 = vpop.f32.mrb[9].mxu0  ;;  %v1294_v14 = vpop.f32.mrb[9].mxu1 }
 0x147   : > { %v1154_v16 = vadd.f32 %v1148_v2, %v1002_v13  ;;  %v1150_v18 = vpop.f32.mrb[10].mxu0  ;;  %v1296_v19 = vpop.f32.mrb[10].mxu1 }
 0x148   : > { %v1299_v20 = vadd.f32 %v1292_v10, %v1153_v12  ;;  %v1151_v22 = vpop.f32.mrb[11].mxu0  ;;  %v1297_v24 = vpop.f32.mrb[11].mxu1  ;;  %v1742_v18 = vlaneseq }
 0x149   : > { %v1300_v21 = vadd.f32 %v1294_v14, %v1154_v16  ;;  %v1740_v22 = vld [vmem:[%s4150_s5] sm:$0x3] }
 0x14a   : > { %v1743_v19 = vshrl.u32 %v1742_v18, 7 }
 0x14c   : > { %v1748_v24 = vsub.s32 1, %v1743_v19 }
 0x165   : > { %v1433_v26 = vpop.f32.mrb[12].mxu0  ;;  %v1585_v29 = vpop.f32.mrb[12].mxu1 }
 0x166   : > { %v1440_v31 = vadd.f32 %v1433_v26, %v1299_v20  ;;  %v1435_v32 = vpop.f32.mrb[13].mxu0  ;;  %v1587_v33 = vpop.f32.mrb[13].mxu1  ;;  %v1744_v20 = vsub.s32 0, %v1743_v19  ;;  %v1749_v26 = vrot.slane %v1740_v22, %v1748_v24 }
 0x167   : > { %v1441_v23 = vadd.f32 %v1435_v32, %v1300_v21  ;;  %v1437_v36 = vpop.f32.mrb[14].mxu0  ;;  %v1589_v37 = vpop.f32.mrb[14].mxu1 }
 0x168   : > { %v1592_v38 = vadd.f32 %v1585_v29, %v1440_v31  ;;  %v1438_v41 = vpop.f32.mrb[15].mxu0  ;;  %v1590_v42 = vpop.f32.mrb[15].mxu1  ;;  %v1745_v21 = vrot.slane %v1740_v22, %v1744_v20 }
 0x169   : > { %v1593_v43 = vadd.f32 %v1587_v33, %v1441_v23 }
 0x185   : > { %v1731_v45 = vpop.f32.mrb[16].mxu0  ;;  %v1790_v47 = vpop.f32.mrb[16].mxu1 }
 0x186   : > { %v4115_v49 = vadd.f32 %v1731_v45, %v1592_v38  ;;  %v1733_v51 = vpop.f32.mrb[17].mxu0  ;;  %v1792_v53 = vpop.f32.mrb[17].mxu1 }
 0x187   : > { %v4117_v55 = vadd.f32 %v1733_v51, %v1593_v43  ;;  %v1735_v57 = vpop.f32.mrb[18].mxu0  ;;  %v1794_v50 = vpop.f32.mrb[18].mxu1 }
 0x188   : > { %v1736_v40 = vpop.f32.mrb[19].mxu0  ;;  %v1795_v62 = vpop.f32.mrb[19].mxu1  ;;  %v1752_v41 = vadd.f32 %v1745_v21, %v4115_v49 }
 0x18a   : > { %v1754_v50 = vmax.f32 %v1752_v41, 0.0 }
 0x1a5   : > { %v1831_v54 = vpop.f32.mrb[20].mxu0  ;;  %v1872_v46 = vpop.f32.mrb[20].mxu1 }
 0x1a6   : > { %v1832_v44 = vadd.f32 %v1831_v54, %v1790_v47  ;;  %v1833_v56 = vpop.f32.mrb[21].mxu0  ;;  %v1874_v0 = vpop.f32.mrb[21].mxu1  ;;  %v1753_v47 = vadd.f32 %v1749_v26, %v4117_v55 }
 0x1a7   : > { %v1834_v25 = vadd.f32 %v1833_v56, %v1792_v53  ;;  %v1835_v52 = vpop.f32.mrb[22].mxu0  ;;  %v1876_v3 = vpop.f32.mrb[22].mxu1 }
 0x1a8   : > { %v1879_v59 = vadd.f32 %v1872_v46, %v1832_v44  ;;  %v1836_v5 = vpop.f32.mrb[23].mxu0  ;;  %v1877_v60 = vpop.f32.mrb[23].mxu1  ;;  %v1755_v62 = vmax.f32 %v1753_v47, 0.0 }
 0x1a9   : > { %v1880_v61 = vadd.f32 %v1874_v0, %v1834_v25 }
 0x1c5   : > { %v1915_v7 = vpop.f32.mrb[24].mxu0  ;;  %v1958_v63 = vpop.f32.mrb[24].mxu1 }
 0x1c6   : > { %v1922_v4 = vadd.f32 %v1915_v7, %v1879_v59  ;;  %v1917_v27 = vpop.f32.mrb[25].mxu0  ;;  %v1960_v9 = vpop.f32.mrb[25].mxu1 }
 0x1c7   : > { %v1923_v30 = vadd.f32 %v1917_v27, %v1880_v61  ;;  %v1919_v11 = vpop.f32.mrb[26].mxu0  ;;  %v1962_v34 = vpop.f32.mrb[26].mxu1 }
 0x1c8   : > { %v1965_v35 = vadd.f32 %v1958_v63, %v1922_v4  ;;  %v1920_v13 = vpop.f32.mrb[27].mxu0  ;;  %v1963_v1 = vpop.f32.mrb[27].mxu1 }
 0x1c9   : > { %v1966_v39 = vadd.f32 %v1960_v9, %v1923_v30 }
 0x1e5   : > { %v2001_v58 = vpop.f32.mrb[28].mxu0  ;;  %v2045_v48 = vpop.f32.mrb[28].mxu1 }
 0x1e6   : > { %v2008_v28 = vadd.f32 %v2001_v58, %v1965_v35  ;;  %v2003_v15 = vpop.f32.mrb[29].mxu0  ;;  %v2047_v6 = vpop.f32.mrb[29].mxu1 }
 0x1e7   : > { %v2009_v8 = vadd.f32 %v2003_v15, %v1966_v39  ;;  %v2005_v17 = vpop.f32.mrb[30].mxu0  ;;  %v2049_v10 = vpop.f32.mrb[30].mxu1 }
 0x1e8   : > { %v2052_v12 = vadd.f32 %v2045_v48, %v2008_v28  ;;  %v2006_v2 = vpop.f32.mrb[31].mxu0  ;;  %v2050_v14 = vpop.f32.mrb[31].mxu1 }
 0x1e9   : > { %v2053_v16 = vadd.f32 %v2047_v6, %v2009_v8 }
 0x205   : > { %v2100_v29 = vpop.f32.mrb[32].mxu0  ;;  %v2149_v31 = vpop.f32.mrb[32].mxu1 }
 0x206   : > { %v2107_v32 = vadd.f32 %v2100_v29, %v2052_v12  ;;  %v2102_v33 = vpop.f32.mrb[33].mxu0  ;;  %v2151_v23 = vpop.f32.mrb[33].mxu1 }
 0x207   : > { %v2108_v36 = vadd.f32 %v2102_v33, %v2053_v16  ;;  %v2104_v37 = vpop.f32.mrb[34].mxu0  ;;  %v2153_v38 = vpop.f32.mrb[34].mxu1 }
 0x208   : > { %v2156_v42 = vadd.f32 %v2149_v31, %v2107_v32  ;;  %v2105_v43 = vpop.f32.mrb[35].mxu0  ;;  %v2154_v45 = vpop.f32.mrb[35].mxu1 }
 0x209   : > { %v2157_v51 = vadd.f32 %v2151_v23, %v2108_v36 }
 0x20a   : > { %v2158_v53 = vadd.f32 %v2156_v42, %v1745_v21 }
 0x20b   : > { %v2159_v57 = vadd.f32 %v2157_v51, %v1749_v26 }
 0x20c   : > { %v2160_v40 = vmax.f32 %v2158_v53, 0.0 }
 0x20d   : > { %v2161_v54 = vmax.f32 %v2159_v57, 0.0 }
 0x20e   : > { %v2162_v46 = vmax.f32 %v1754_v50, %v2160_v40 }
 0x20f   : > { %v2163_v44 = vmax.f32 %v1755_v62, %v2161_v54 }
 0x211   : > { %v2628_v49 = vpack.c.bf16 %v2163_v44, %v2162_v46 }
 0x213   : > { %2629 = vst.sshfl [vmem:[%s426_s10] sm:$0x33 pattern:$0x76325410] %v2628_v49 }
 0x214 PF: > { %s16_s25 = sadd.s32 1, %s2938_s25   ;;  %s4379_s21 = smov %s2930_s23 }
 0x215   : > { %p13_p11 = scmp.ge.s32.totalorder %s16_s25, 6   ;;  %s4380_s22 = smov %s2934_s24 }
 0x216   : > { %s4381_s23 = smov %s4384_s26  ;;  %s4382_s24 = smov %s4388_s27 }
 0x217   :  { %15 = sbr.rel (!%p13_p11) target bundleno = 3 (0x3), region = 91 }

// kernel: refugee_camp_detector.10
= control target key start
LH: loop header
LB: loop body
LE: loop exit
PB: predicated region body
PF: predicated region fallthrough
CT: control target
= control target key end

     0   :  { %s7016_s18 = smov 0   ;;  %s7018_s19 = smov 0   ;;  %s8942_s0 = inlined_call_operand.vmem [shape: bf16[2,4,4,256], index: 0, kind: input, shape index: {}, may-alias: {0,1,2}]   ;;  %s8943_s1 = inlined_call_operand.vmem [shape: bf16[2,4,4,256], index: 1, kind: input, shape index: {}, may-alias: {0,1,2}]   ;;  %s8944_s2 = inlined_call_operand.vmem [shape: bf16[2,4,4,256], index: 2, kind: input, shape index: {}, may-alias: {0,1,2}]   ;;  %s8945_s3 = inlined_call_operand.vmem [shape: bf16[3,3,256,512], index: 3, kind: input, shape index: {}]   ;;  %s8946_s4 = inlined_call_operand.vmem [shape: f32[1,512], index: 4, kind: input, shape index: {}]   ;;  %s8947_s5 = inlined_call_operand.vmem [shape: bf16[2,2,2,512], index: 5, kind: output, shape index: {}]  }
   0x1   :  { %s7020_s20 = smov 0   ;;  %s7022_s21 = smov 0  }
   0x2   :  { %s7024_s22 = smov 0  }
   0x3 LB: > { %s24_s23 = sadd.s32 1, %s6975_s20  ;;  %s27_s24 = sadd.s32 1, %s6979_s21  ;;  %s6983_s22 = sphi %s7024_s22, %s15_s22   ;;  %s6979_s21 = sphi %s7022_s21, %s8951_s21   ;;  %s6975_s20 = sphi %s7020_s20, %s8950_s20   ;;  %s6971_s19 = sphi %s7018_s19, %s8949_s19   ;;  %s6967_s18 = sphi %s7016_s18, %s8948_s18  }
   0x4   : > { %p25_p0 = scmp.ge.s32.totalorder %s24_s23, 2  ;;  %p4926_p1 = scmp.ge.s32.totalorder %s6983_s22, 1 }
   0x5   : > { %p247_p2 = scmp.lt.s32.totalorder %s6983_s22, 5 }
   0x6   : > { %s8953_s23 = smov (%p25_p0, %s24_s23), 0  ;;  %s8955_s24 = smov (!%p25_p0, %s27_s24), %s6979_s21 }
   0x7   : > { %p248_p3 = pnand %p4926_p1, %p247_p2  ;;  %p29_p4 = scmp.ge.s32.totalorder %s8955_s24, 2 }
   0x8   : > { %v6081_v0 = vld [vmem:[%s8945_s3 + $0x204] ss:$16 sps:$4 sm:$0xff] (!%p248_p3)   ;;  %v6083_v1 = vld [vmem:[%s8945_s3 + $0x20c] ss:$16 sps:$4 sm:$0xff] (!%p248_p3)   ;;  %v6085_v2 = vld [vmem:[%s8945_s3 + $0x200] ss:$16 sps:$4 sm:$0xff] (!%p248_p3)  }
   0x9   : > { %s8957_s24 = smov (%p29_p4, %s8955_s24), 0  ;;  %251 = sbr.rel (%p248_p3) target bundleno = 812 (0x32c), region = 40 }
   0xa   : > { %817 = vmatprep.subr.bf16.mxu0 (!%p248_p3), %v6081_v0  ;;  %v6086_v3 = vld [vmem:[%s8945_s3 + $0x208] ss:$16 sps:$4 sm:$0xff] (!%p248_p3)   ;;  %858 = vmatprep.subr.bf16.mxu1 (!%p248_p3), %v6083_v1  ;;  %v6087_v4 = vld [vmem:[%s8945_s3 + $0x224] ss:$16 sps:$4 sm:$0xff] (!%p248_p3)   ;;  %v6089_v5 = vld [vmem:[%s8945_s3 + $0x22c] ss:$16 sps:$4 sm:$0xff] (!%p248_p3)  }
   0xb   : > { %818 = vmatpush1.bf16.msra.mxu0 (!%p248_p3), %v6085_v2  ;;  %859 = vmatpush1.bf16.msra.mxu1 (!%p248_p3), %v6086_v3  ;;  %v6091_v6 = vld [vmem:[%s8945_s3 + $0x220] ss:$16 sps:$4 sm:$0xff] (!%p248_p3)   ;;  %v6092_v7 = vld [vmem:[%s8945_s3 + $0x228] ss:$16 sps:$4 sm:$0xff] (!%p248_p3)   ;;  %v6093_v8 = vld [vmem:[%s8945_s3 + $0x244] ss:$16 sps:$4 sm:$0xff] (!%p248_p3)  }
   0xc   : > { %819 = vmatprep.subr.bf16.mxu0 (!%p248_p3), %v6087_v4  ;;  %860 = vmatprep.subr.bf16.mxu1 (!%p248_p3), %v6089_v5  ;;  %v6095_v9 = vld [vmem:[%s8945_s3 + $0x24c] ss:$16 sps:$4 sm:$0xff] (!%p248_p3)   ;;  %v6097_v10 = vld [vmem:[%s8945_s3 + $0x240] ss:$16 sps:$4 sm:$0xff] (!%p248_p3)   ;;  %v6098_v11 = vld [vmem:[%s8945_s3 + $0x248] ss:$16 sps:$4 sm:$0xff] (!%p248_p3)  }
   0xd   : > { %v6099_v12 = vld [vmem:[%s8945_s3 + $0x264] ss:$16 sps:$4 sm:$0xff] (!%p248_p3)   ;;  %v6101_v13 = vld [vmem:[%s8945_s3 + $0x26c] ss:$16 sps:$4 sm:$0xff] (!%p248_p3)   ;;  %v6103_v14 = vld [vmem:[%s8945_s3 + $0x260] ss:$16 sps:$4 sm:$0xff] (!%p248_p3)  }
   0xe   : > { %v6104_v15 = vld [vmem:[%s8945_s3 + $0x268] ss:$16 sps:$4 sm:$0xff] (!%p248_p3)   ;;  %v6105_v16 = vld [vmem:[%s8945_s3 + $0x284] ss:$16 sps:$4 sm:$0xff] (!%p248_p3)   ;;  %v6107_v17 = vld [vmem:[%s8945_s3 + $0x28c] ss:$16 sps:$4 sm:$0xff] (!%p248_p3)  }
   0xf   : > { %820 = vmatpush1.bf16.msra.mxu0 (!%p248_p3), %v6091_v6  ;;  %861 = vmatpush1.bf16.msra.mxu1 (!%p248_p3), %v6092_v7  ;;  %v6109_v18 = vld [vmem:[%s8945_s3 + $0x280] ss:$16 sps:$4 sm:$0xff] (!%p248_p3)   ;;  %v6110_v19 = vld [vmem:[%s8945_s3 + $0x288] ss:$16 sps:$4 sm:$0xff] (!%p248_p3)   ;;  %v6111_v20 = vld [vmem:[%s8945_s3 + $0x2a4] ss:$16 sps:$4 sm:$0xff] (!%p248_p3)  }
  0x10   : > { %821 = vmatprep.subr.bf16.mxu0 %v6093_v8  ;;  %862 = vmatprep.subr.bf16.mxu1 %v6095_v9  ;;  %v6113_v21 = vld [vmem:[%s8945_s3 + $0x2ac] ss:$16 sps:$4 sm:$0xff]   ;;  %v6115_v22 = vld [vmem:[%s8945_s3 + $0x2a0] ss:$16 sps:$4 sm:$0xff]   ;;  %v6116_v23 = vld [vmem:[%s8945_s3 + $0x2a8] ss:$16 sps:$4 sm:$0xff]  }
  0x11   : > { %v6117_v24 = vld [vmem:[%s8945_s3 + $0x2c4] ss:$16 sps:$4 sm:$0xff]   ;;  %v6119_v25 = vld [vmem:[%s8945_s3 + $0x2cc] ss:$16 sps:$4 sm:$0xff]   ;;  %p302_p5 = scmp.lt.s32.totalorder %s6971_s19, 1  ;;  %p304_p6 = scmp.lt.s32.totalorder %s6967_s18, 3 }
  0x12   : > { %v6121_v26 = vld [vmem:[%s8945_s3 + $0x2c0] ss:$16 sps:$4 sm:$0xff]   ;;  %v6122_v27 = vld [vmem:[%s8945_s3 + $0x2c8] ss:$16 sps:$4 sm:$0xff]   ;;  %v6123_v28 = vld [vmem:[%s8945_s3 + $0x2e4] ss:$16 sps:$4 sm:$0xff]  }
  0x13   : > { %822 = vmatpush1.bf16.msra.mxu0 %v6097_v10  ;;  %863 = vmatpush1.bf16.msra.mxu1 %v6098_v11  ;;  %v6125_v29 = vld [vmem:[%s8945_s3 + $0x2ec] ss:$16 sps:$4 sm:$0xff]   ;;  %s8959_s19 = smov (!%p302_p5, %s6971_s19), 1  ;;  %v6127_v30 = vld [vmem:[%s8945_s3 + $0x2e0] ss:$16 sps:$4 sm:$0xff]   ;;  %s311_s28 = sadd.s32 1, %s6967_s18 }
  0x14   : > { %823 = vmatprep.subr.bf16.mxu0 %v6099_v12  ;;  %864 = vmatprep.subr.bf16.mxu1 %v6101_v13  ;;  %s305_s8 = scalar_select %p304_p6, %s6967_s18, 3  ;;  %v6128_v31 = vld [vmem:[%s8945_s3 + $0x2e8] ss:$16 sps:$4 sm:$0xff]   ;;  %v6129_v32 = vld [vmem:[%s8945_s3 + $0x304] ss:$16 sps:$4 sm:$0xff]  }
  0x15   : > { %v6131_v33 = vld [vmem:[%s8945_s3 + $0x30c] ss:$16 sps:$4 sm:$0xff]   ;;  %v6133_v34 = vld [vmem:[%s8945_s3 + $0x300] ss:$16 sps:$4 sm:$0xff]   ;;  %v6134_v35 = vld [vmem:[%s8945_s3 + $0x308] ss:$16 sps:$4 sm:$0xff]  }
  0x16   : > { %s4927_s26 = sshll.u32 %s305_s8, 1  ;;  %s7162_s27 = sshll.u32 %s8959_s19, 3  ;;  %v6135_v36 = vld [vmem:[%s8945_s3 + $0x324] ss:$16 sps:$4 sm:$0xff]   ;;  %v6137_v37 = vld [vmem:[%s8945_s3 + $0x32c] ss:$16 sps:$4 sm:$0xff]  }
  0x17   : > { %824 = vmatpush1.bf16.msra.mxu0 %v6103_v14  ;;  %865 = vmatpush1.bf16.msra.mxu1 %v6104_v15  ;;  %s308_s7 = sadd.s32 %s7162_s27, %s4927_s26  ;;  %v6139_v38 = vld [vmem:[%s8945_s3 + $0x320] ss:$16 sps:$4 sm:$0xff]   ;;  %v6140_v39 = vld [vmem:[%s8945_s3 + $0x328] ss:$16 sps:$4 sm:$0xff]   ;;  %v6141_v40 = vld [vmem:[%s8945_s3 + $0x344] ss:$16 sps:$4 sm:$0xff]  }
  0x18   : > { %825 = vmatprep.subr.bf16.mxu0 %v6105_v16  ;;  %866 = vmatprep.subr.bf16.mxu1 %v6107_v17  ;;  %v6143_v41 = vld [vmem:[%s8945_s3 + $0x34c] ss:$16 sps:$4 sm:$0xff]   ;;  %s4929_s15 = sshll.u32 %s308_s7, 1  ;;  %v6145_v42 = vld [vmem:[%s8945_s3 + $0x340] ss:$16 sps:$4 sm:$0xff]   ;;  %p314_p7 = scmp.lt.s32.totalorder %s311_s28, 3 }
  0x19   : > { %v6146_v43 = vld [vmem:[%s8945_s3 + $0x348] ss:$16 sps:$4 sm:$0xff]   ;;  %v6147_v44 = vld [vmem:[%s8945_s3 + $0x364] ss:$16 sps:$4 sm:$0xff]   ;;  %s7195_s9 = scalar_lea.vmem %s8942_s0, %s4929_s15  ;;  %v6149_v45 = vld [vmem:[%s8945_s3 + $0x36c] ss:$16 sps:$4 sm:$0xff]  }
  0x1a   : > { %v5002_v46 = vld.sshfl [vmem:[%s7195_s9] sm:$0x33 pattern:$0x76325410]  ;;  %v6152_v48 = vld [vmem:[%s8945_s3 + $0x368] ss:$16 sps:$4 sm:$0xff]  }
  0x1b   : > { %826 = vmatpush1.bf16.msra.mxu0 %v6109_v18  ;;  %867 = vmatpush1.bf16.msra.mxu1 %v6110_v19  ;;  %v6151_v47 = vld [vmem:[%s8945_s3 + $0x360] ss:$16 sps:$4 sm:$0xff]   ;;  %v480_v49 = vcombine.high %v5002_v46, %v5002_v46  ;;  %v6153_v50 = vld [vmem:[%s8945_s3 + $0x384] ss:$16 sps:$4 sm:$0xff]   ;;  %v6155_v51 = vld [vmem:[%s8945_s3 + $0x38c] ss:$16 sps:$4 sm:$0xff]  }
  0x1c   : > { %827 = vmatprep.subr.bf16.mxu0 %v6111_v20  ;;  %868 = vmatprep.subr.bf16.mxu1 %v6113_v21  ;;  %v6157_v54 = vld [vmem:[%s8945_s3 + $0x380] ss:$16 sps:$4 sm:$0xff]   ;;  %v6158_v55 = vld [vmem:[%s8945_s3 + $0x388] ss:$16 sps:$4 sm:$0xff]   ;;  %v6159_v57 = vld [vmem:[%s8945_s3 + $0x3a4] ss:$16 sps:$4 sm:$0xff]  }
  0x1d   : > { %v489_v52 = vshrl.u32 %v480_v49, 16  ;;  %v491_v53 = vshll.u32 %v480_v49, 16  ;;  %v6161_v58 = vld [vmem:[%s8945_s3 + $0x3ac] ss:$16 sps:$4 sm:$0xff]   ;;  %v6163_v60 = vld [vmem:[%s8945_s3 + $0x3a0] ss:$16 sps:$4 sm:$0xff]  }
  0x1e   : > { %v6164_v61 = vld [vmem:[%s8945_s3 + $0x3a8] ss:$16 sps:$4 sm:$0xff]   ;;  %v6165_v62 = vld [vmem:[%s8945_s3 + $0x3c4] ss:$16 sps:$4 sm:$0xff]   ;;  %v6167_v63 = vld [vmem:[%s8945_s3 + $0x3cc] ss:$16 sps:$4 sm:$0xff]  }
  0x1f   : > { %828 = vmatpush1.bf16.msra.mxu0 %v6115_v22  ;;  %869 = vmatpush1.bf16.msra.mxu1 %v6116_v23  ;;  %v493_v56 = vrot.slane %v491_v53, 1  ;;  %v484_v0 = vshll.u32 %v5002_v46, 16  ;;  %v6169_v1 = vld [vmem:[%s8945_s3 + $0x3c0] ss:$16 sps:$4 sm:$0xff]   ;;  %v6170_v2 = vld [vmem:[%s8945_s3 + $0x3c8] ss:$16 sps:$4 sm:$0xff]  }
  0x20   : > { %829 = vmatprep.subr.bf16.mxu0 %v6117_v24  ;;  %870 = vmatprep.subr.bf16.mxu1 %v6119_v25  ;;  %v6171_v3 = vld [vmem:[%s8945_s3 + $0x3e4] ss:$16 sps:$4 sm:$0xff]   ;;  %v6173_v4 = vld [vmem:[%s8945_s3 + $0x3ec] ss:$16 sps:$4 sm:$0xff]   ;;  %v482_v5 = vshrl.u32 %v5002_v46, 16  ;;  %s8961_s28 = smov (!%p314_p7, %s311_s28), 3 }
  0x21   : > { %v494_v59 = vor.u32 %v493_v56, %v489_v52  ;;  %v486_v6 = vrot.slane %v484_v0, 1  ;;  %v6175_v7 = vld [vmem:[%s8945_s3 + $0x3e0] ss:$16 sps:$4 sm:$0xff]   ;;  %v6176_v8 = vld [vmem:[%s8945_s3 + $0x3e8] ss:$16 sps:$4 sm:$0xff]   ;;  %s4930_s7 = sshll.u32 %s8961_s28, 1 }
  0x22   : > { %v6179_v9 = vld [vmem:[%s8945_s3 + $0x4] ss:$16 sps:$4 sm:$0xff]   ;;  %v6182_v10 = vld [vmem:[%s8945_s3 + $0xc] ss:$16 sps:$4 sm:$0xff]   ;;  %v6177_v12 = vld [vmem:[%s8945_s3] ss:$16 sps:$4 sm:$0xff]   ;;  %s318_s14 = sadd.s32 %s4930_s7, %s7162_s27 }
  0x23   : > { %830 = vmatpush1.bf16.msra.mxu0 %v6121_v26  ;;  %871 = vmatpush1.bf16.msra.mxu1 %v6122_v27  ;;  %v487_v11 = vor.u32 %v486_v6, %v482_v5  ;;  %v6180_v13 = vld [vmem:[%s8945_s3 + $0x8] ss:$16 sps:$4 sm:$0xff]   ;;  %v6185_v14 = vld [vmem:[%s8945_s3 + $0x24] ss:$16 sps:$4 sm:$0xff]   ;;  %v6188_v15 = vld [vmem:[%s8945_s3 + $0x2c] ss:$16 sps:$4 sm:$0xff]  }
  0x24   : > { %831 = vmatprep.subr.bf16.mxu0 %v6123_v28  ;;  %872 = vmatprep.subr.bf16.mxu1 %v6125_v29  ;;  %v6183_v16 = vld [vmem:[%s8945_s3 + $0x20] ss:$16 sps:$4 sm:$0xff]   ;;  %v6186_v17 = vld [vmem:[%s8945_s3 + $0x28] ss:$16 sps:$4 sm:$0xff]   ;;  %v6191_v18 = vld [vmem:[%s8945_s3 + $0x44] ss:$16 sps:$4 sm:$0xff]  }
  0x25   : > { %849 = vmatprep.mubr.bf16.mxu0 %v494_v59  ;;  %890 = vmatprep.mubr.bf16.mxu1 %v494_v59  ;;  %v6194_v19 = vld [vmem:[%s8945_s3 + $0x4c] ss:$16 sps:$4 sm:$0xff]   ;;  %v6189_v20 = vld [vmem:[%s8945_s3 + $0x40] ss:$16 sps:$4 sm:$0xff]   ;;  %v6192_v21 = vld [vmem:[%s8945_s3 + $0x48] ss:$16 sps:$4 sm:$0xff]  }
  0x26   : > { %v6197_v22 = vld [vmem:[%s8945_s3 + $0x64] ss:$16 sps:$4 sm:$0xff]   ;;  %v6200_v23 = vld [vmem:[%s8945_s3 + $0x6c] ss:$16 sps:$4 sm:$0xff]   ;;  %v6195_v24 = vld [vmem:[%s8945_s3 + $0x60] ss:$16 sps:$4 sm:$0xff]  }
  0x27   : > { %832 = vmatpush1.bf16.msra.mxu0 %v6127_v30  ;;  %873 = vmatpush1.bf16.msra.mxu1 %v6128_v31  ;;  %v6198_v25 = vld [vmem:[%s8945_s3 + $0x68] ss:$16 sps:$4 sm:$0xff]   ;;  %v6203_v26 = vld [vmem:[%s8945_s3 + $0x84] ss:$16 sps:$4 sm:$0xff]   ;;  %v6206_v27 = vld [vmem:[%s8945_s3 + $0x8c] ss:$16 sps:$4 sm:$0xff]  }
  0x28   : > { %833 = vmatprep.subr.bf16.mxu0 %v6129_v32  ;;  %874 = vmatprep.subr.bf16.mxu1 %v6131_v33  ;;  %v6201_v28 = vld [vmem:[%s8945_s3 + $0x80] ss:$16 sps:$4 sm:$0xff]   ;;  %v6204_v29 = vld [vmem:[%s8945_s3 + $0x88] ss:$16 sps:$4 sm:$0xff]   ;;  %v6209_v30 = vld [vmem:[%s8945_s3 + $0xa4] ss:$16 sps:$4 sm:$0xff]  }
  0x29   : > { %v6212_v31 = vld [vmem:[%s8945_s3 + $0xac] ss:$16 sps:$4 sm:$0xff]   ;;  %v6207_v32 = vld [vmem:[%s8945_s3 + $0xa0] ss:$16 sps:$4 sm:$0xff]   ;;  %v6210_v33 = vld [vmem:[%s8945_s3 + $0xa8] ss:$16 sps:$4 sm:$0xff]  }
  0x2a   : > { %v6225_v46 = vld [vmem:[%s8945_s3 + $0x100] ss:$16 sps:$4 sm:$0xff]   ;;  %v6236_v49 = vld [vmem:[%s8945_s3 + $0x12c] ss:$16 sps:$4 sm:$0xff]   ;;  %v6239_v52 = vld [vmem:[%s8945_s3 + $0x144] ss:$16 sps:$4 sm:$0xff]  }
  0x2b   : > { %834 = vmatpush1.bf16.msra.mxu0 %v6133_v34  ;;  %875 = vmatpush1.bf16.msra.mxu1 %v6134_v35  ;;  %v6215_v34 = vld [vmem:[%s8945_s3 + $0xc4] ss:$16 sps:$4 sm:$0xff]   ;;  %v6218_v35 = vld [vmem:[%s8945_s3 + $0xcc] ss:$16 sps:$4 sm:$0xff]   ;;  %v6246_v59 = vld [vmem:[%s8945_s3 + $0x168] ss:$16 sps:$4 sm:$0xff]  }
  0x2c   : > { %835 = vmatprep.subr.bf16.mxu0 %v6135_v36  ;;  %876 = vmatprep.subr.bf16.mxu1 %v6137_v37  ;;  %v7334_v36 = vld.sshfl [vmem:[%s7195_s9] sm:$0x11 pattern:$0x76325410]  ;;  %v6242_v53 = vld [vmem:[%s8945_s3 + $0x14c] ss:$16 sps:$4 sm:$0xff]  }
  0x2d   : > { %v6213_v37 = vld [vmem:[%s8945_s3 + $0xc0] ss:$16 sps:$4 sm:$0xff]   ;;  %v6245_v56 = vld [vmem:[%s8945_s3 + $0x164] ss:$16 sps:$4 sm:$0xff]   ;;  %v6266_v5 = vld [vmem:[%s8945_s3 + $0x1cc] ss:$16 sps:$4 sm:$0xff]  }
  0x2e   : > { %v6257_v0 = vld [vmem:[%s8945_s3 + $0x1a4] ss:$16 sps:$4 sm:$0xff]   ;;  %v6261_v6 = vld [vmem:[%s8945_s3 + $0x1c0] ss:$16 sps:$4 sm:$0xff]   ;;  %s4932_s30 = sshll.u32 %s318_s14, 1  ;;  %s322_s11 = sadd.s32 2, %s6967_s18 }
  0x2f   : > { %836 = vmatpush1.bf16.msra.mxu0 %v6139_v38  ;;  %877 = vmatpush1.bf16.msra.mxu1 %v6140_v39  ;;  %v907_v38 = vcombine.high %v7334_v36, %v7334_v36  ;;  %v6216_v39 = vld [vmem:[%s8945_s3 + $0xc8] ss:$16 sps:$4 sm:$0xff]   ;;  %s7656_s12 = scalar_lea.vmem %s8943_s1, %s4932_s30  ;;  %p325_p8 = scmp.lt.s32.totalorder %s322_s11, 3 }
  0x30   : > { %837 = vmatprep.subr.bf16.mxu0 %v6141_v40  ;;  %878 = vmatprep.subr.bf16.mxu1 %v6143_v41  ;;  %v6221_v40 = vld [vmem:[%s8945_s3 + $0xe4] ss:$16 sps:$4 sm:$0xff]   ;;  %v6224_v41 = vld [vmem:[%s8945_s3 + $0xec] ss:$16 sps:$4 sm:$0xff]   ;;  %p335_p9 = scmp.lt.s32.totalorder %s6967_s18, 1 }
  0x31   : > { %s8963_s11 = smov (!%p325_p8, %s322_s11), 3 }
  0x32   : > { %s8965_s18 = smov (!%p335_p9, %s6967_s18), 1 }
  0x33   : > { %838 = vmatpush1.bf16.msra.mxu0 %v6145_v42  ;;  %879 = vmatpush1.bf16.msra.mxu1 %v6146_v43  ;;  %v6219_v42 = vld [vmem:[%s8945_s3 + $0xe0] ss:$16 sps:$4 sm:$0xff]   ;;  %v6222_v43 = vld [vmem:[%s8945_s3 + $0xe8] ss:$16 sps:$4 sm:$0xff]  }
  0x34   : > { %839 = vmatprep.subr.bf16.mxu0 %v6147_v44  ;;  %880 = vmatprep.subr.bf16.mxu1 %v6149_v45  ;;  %v6227_v44 = vld [vmem:[%s8945_s3 + $0x104] ss:$16 sps:$4 sm:$0xff]   ;;  %v6230_v45 = vld [vmem:[%s8945_s3 + $0x10c] ss:$16 sps:$4 sm:$0xff]  }
  0x37   : > { %840 = vmatpush1.bf16.msra.mxu0 %v6151_v47  ;;  %881 = vmatpush1.bf16.msra.mxu1 %v6152_v48  ;;  %v6228_v47 = vld [vmem:[%s8945_s3 + $0x108] ss:$16 sps:$4 sm:$0xff]   ;;  %v6233_v48 = vld [vmem:[%s8945_s3 + $0x124] ss:$16 sps:$4 sm:$0xff]  }
  0x38   : > { %841 = vmatprep.subr.bf16.mxu0 %v6153_v50  ;;  %882 = vmatprep.subr.bf16.mxu1 %v6155_v51  ;;  %v6231_v50 = vld [vmem:[%s8945_s3 + $0x120] ss:$16 sps:$4 sm:$0xff]   ;;  %v6234_v51 = vld [vmem:[%s8945_s3 + $0x128] ss:$16 sps:$4 sm:$0xff]  }
  0x3b   : > { %842 = vmatpush1.bf16.msra.mxu0 %v6157_v54  ;;  %883 = vmatpush1.bf16.msra.mxu1 %v6158_v55  ;;  %v6237_v54 = vld [vmem:[%s8945_s3 + $0x140] ss:$16 sps:$4 sm:$0xff]   ;;  %v6240_v55 = vld [vmem:[%s8945_s3 + $0x148] ss:$16 sps:$4 sm:$0xff]  }
  0x3c   : > { %843 = vmatprep.subr.bf16.mxu0 %v6159_v57  ;;  %884 = vmatprep.subr.bf16.mxu1 %v6161_v58  ;;  %v6248_v57 = vld [vmem:[%s8945_s3 + $0x16c] ss:$16 sps:$4 sm:$0xff]   ;;  %v6243_v58 = vld [vmem:[%s8945_s3 + $0x160] ss:$16 sps:$4 sm:$0xff]  }
  0x3f   : > { %844 = vmatpush1.bf16.msra.mxu0 %v6163_v60  ;;  %885 = vmatpush1.bf16.msra.mxu1 %v6164_v61  ;;  %v6251_v60 = vld [vmem:[%s8945_s3 + $0x184] ss:$16 sps:$4 sm:$0xff]   ;;  %v6254_v61 = vld [vmem:[%s8945_s3 + $0x18c] ss:$16 sps:$4 sm:$0xff]  }
  0x40   : > { %845 = vmatprep.subr.bf16.mxu0 %v6165_v62  ;;  %886 = vmatprep.subr.bf16.mxu1 %v6167_v63  ;;  %v6249_v62 = vld [vmem:[%s8945_s3 + $0x180] ss:$16 sps:$4 sm:$0xff]   ;;  %v6252_v63 = vld [vmem:[%s8945_s3 + $0x188] ss:$16 sps:$4 sm:$0xff]  }
  0x43   : > { %846 = vmatpush1.bf16.msra.mxu0 %v6169_v1  ;;  %887 = vmatpush1.bf16.msra.mxu1 %v6170_v2  ;;  %v6260_v1 = vld [vmem:[%s8945_s3 + $0x1ac] ss:$16 sps:$4 sm:$0xff]   ;;  %v6255_v2 = vld [vmem:[%s8945_s3 + $0x1a0] ss:$16 sps:$4 sm:$0xff]  }
  0x44   : > { %847 = vmatprep.subr.bf16.mxu0 %v6171_v3  ;;  %888 = vmatprep.subr.bf16.mxu1 %v6173_v4  ;;  %v6258_v3 = vld [vmem:[%s8945_s3 + $0x1a8] ss:$16 sps:$4 sm:$0xff]   ;;  %v6263_v4 = vld [vmem:[%s8945_s3 + $0x1c4] ss:$16 sps:$4 sm:$0xff]  }
  0x47   : > { %848 = vmatpush1.bf16.msra.mxu0 %v6175_v7  ;;  %889 = vmatpush1.bf16.msra.mxu1 %v6176_v8  ;;  %v6264_v7 = vld [vmem:[%s8945_s3 + $0x1c8] ss:$16 sps:$4 sm:$0xff]   ;;  %v6269_v8 = vld [vmem:[%s8945_s3 + $0x1e4] ss:$16 sps:$4 sm:$0xff]  }
  0x48   : > { %1230 = vmatprep.subr.bf16.mxu0 %v6179_v9  ;;  %1271 = vmatprep.subr.bf16.mxu1 %v6182_v10  ;;  %v6272_v9 = vld [vmem:[%s8945_s3 + $0x1ec] ss:$16 sps:$4 sm:$0xff]   ;;  %v6267_v10 = vld [vmem:[%s8945_s3 + $0x1e0] ss:$16 sps:$4 sm:$0xff]  }
  0x4a   : > { %850 = vmatmul.mubr.bf16.vlgmr.msra.gmra.mrb[0].mxu0 %v487_v11  ;;  %891 = vmatmul.mubr.bf16.vlgmr.msra.gmra.mrb[0].mxu1 %v487_v11  ;;  %v6270_v11 = vld [vmem:[%s8945_s3 + $0x1e8] ss:$16 sps:$4 sm:$0xff]  }
  0x4b   : > { %1231 = vmatpush1.bf16.msra.mxu0 %v6177_v12  ;;  %1272 = vmatpush1.bf16.msra.mxu1 %v6180_v13  ;;  %v6275_v12 = vld [vmem:[%s8945_s3 + $0x404] ss:$16 sps:$4 sm:$0xff]   ;;  %v6278_v13 = vld [vmem:[%s8945_s3 + $0x40c] ss:$16 sps:$4 sm:$0xff]  }
  0x4c   : > { %1232 = vmatprep.subr.bf16.mxu0 %v6185_v14  ;;  %1273 = vmatprep.subr.bf16.mxu1 %v6188_v15  ;;  %v6273_v14 = vld [vmem:[%s8945_s3 + $0x400] ss:$16 sps:$4 sm:$0xff]   ;;  %v6276_v15 = vld [vmem:[%s8945_s3 + $0x408] ss:$16 sps:$4 sm:$0xff]  }
  0x4d   : > { %1262 = vmatprep.mubr.bf16.mxu0 %v907_v38  ;;  %1303 = vmatprep.mubr.bf16.mxu1 %v907_v38  ;;  %v6306_v38 = vld [vmem:[%s8945_s3 + $0x4a8] ss:$16 sps:$4 sm:$0xff]  }
  0x4f   : > { %1233 = vmatpush1.bf16.msra.mxu0 %v6183_v16  ;;  %1274 = vmatpush1.bf16.msra.mxu1 %v6186_v17  ;;  %v6281_v16 = vld [vmem:[%s8945_s3 + $0x424] ss:$16 sps:$4 sm:$0xff]   ;;  %v6284_v17 = vld [vmem:[%s8945_s3 + $0x42c] ss:$16 sps:$4 sm:$0xff]  }
  0x50   : > { %1234 = vmatprep.subr.bf16.mxu0 %v6191_v18  ;;  %1275 = vmatprep.subr.bf16.mxu1 %v6194_v19  ;;  %v7471_v18 = vld.sshfl [vmem:[%s7195_s9] sm:$0x22 pattern:$0x76325410] }
  0x51   : > { %v1386_v19 = vcombine.high %v7471_v18, %v7471_v18 }
  0x53   : > { %1235 = vmatpush1.bf16.msra.mxu0 %v6189_v20  ;;  %1276 = vmatpush1.bf16.msra.mxu1 %v6192_v21  ;;  %v6279_v20 = vld [vmem:[%s8945_s3 + $0x420] ss:$16 sps:$4 sm:$0xff]   ;;  %v6282_v21 = vld [vmem:[%s8945_s3 + $0x428] ss:$16 sps:$4 sm:$0xff]  }
  0x54   : > { %1236 = vmatprep.subr.bf16.mxu0 %v6197_v22  ;;  %1277 = vmatprep.subr.bf16.mxu1 %v6200_v23  ;;  %v6287_v22 = vld [vmem:[%s8945_s3 + $0x444] ss:$16 sps:$4 sm:$0xff]   ;;  %v1388_v23 = vrot.slane %v1386_v19, 1  ;;  %v6369_v19 = vld [vmem:[%s8945_s3 + $0x600] ss:$16 sps:$4 sm:$0xff]  }
  0x57   : > { %1237 = vmatpush1.bf16.msra.mxu0 %v6195_v24  ;;  %1278 = vmatpush1.bf16.msra.mxu1 %v6198_v25  ;;  %v6290_v24 = vld [vmem:[%s8945_s3 + $0x44c] ss:$16 sps:$4 sm:$0xff]   ;;  %v6285_v25 = vld [vmem:[%s8945_s3 + $0x440] ss:$16 sps:$4 sm:$0xff]  }
  0x58   : > { %1238 = vmatprep.subr.bf16.mxu0 %v6203_v26  ;;  %1279 = vmatprep.subr.bf16.mxu1 %v6206_v27  ;;  %v6288_v26 = vld [vmem:[%s8945_s3 + $0x448] ss:$16 sps:$4 sm:$0xff]   ;;  %v6293_v27 = vld [vmem:[%s8945_s3 + $0x464] ss:$16 sps:$4 sm:$0xff]  }
  0x5b   : > { %1239 = vmatpush1.bf16.msra.mxu0 %v6201_v28  ;;  %1280 = vmatpush1.bf16.msra.mxu1 %v6204_v29  ;;  %v6296_v28 = vld [vmem:[%s8945_s3 + $0x46c] ss:$16 sps:$4 sm:$0xff]   ;;  %v6291_v29 = vld [vmem:[%s8945_s3 + $0x460] ss:$16 sps:$4 sm:$0xff]  }
  0x5c   : > { %1240 = vmatprep.subr.bf16.mxu0 %v6209_v30  ;;  %1281 = vmatprep.subr.bf16.mxu1 %v6212_v31  ;;  %v6294_v30 = vld [vmem:[%s8945_s3 + $0x468] ss:$16 sps:$4 sm:$0xff]   ;;  %v6299_v31 = vld [vmem:[%s8945_s3 + $0x484] ss:$16 sps:$4 sm:$0xff]  }
  0x5f   : > { %1241 = vmatpush1.bf16.msra.mxu0 %v6207_v32  ;;  %1282 = vmatpush1.bf16.msra.mxu1 %v6210_v33  ;;  %v6302_v32 = vld [vmem:[%s8945_s3 + $0x48c] ss:$16 sps:$4 sm:$0xff]   ;;  %v6297_v33 = vld [vmem:[%s8945_s3 + $0x480] ss:$16 sps:$4 sm:$0xff]  }
  0x60   : > { %1242 = vmatprep.subr.bf16.mxu0 %v6215_v34  ;;  %1283 = vmatprep.subr.bf16.mxu1 %v6218_v35  ;;  %v6300_v34 = vld [vmem:[%s8945_s3 + $0x488] ss:$16 sps:$4 sm:$0xff]   ;;  %v6305_v35 = vld [vmem:[%s8945_s3 + $0x4a4] ss:$16 sps:$4 sm:$0xff]  }
  0x63   : > { %1243 = vmatpush1.bf16.msra.mxu0 %v6213_v37  ;;  %1284 = vmatpush1.bf16.msra.mxu1 %v6216_v39  ;;  %v6303_v37 = vld [vmem:[%s8945_s3 + $0x4a0] ss:$16 sps:$4 sm:$0xff]   ;;  %v6311_v39 = vld [vmem:[%s8945_s3 + $0x4c4] ss:$16 sps:$4 sm:$0xff]  }
  0x64   : > { %1244 = vmatprep.subr.bf16.mxu0 %v6221_v40  ;;  %1285 = vmatprep.subr.bf16.mxu1 %v6224_v41  ;;  %v6314_v40 = vld [vmem:[%s8945_s3 + $0x4cc] ss:$16 sps:$4 sm:$0xff]   ;;  %v6309_v41 = vld [vmem:[%s8945_s3 + $0x4c0] ss:$16 sps:$4 sm:$0xff]  }
  0x67   : > { %1245 = vmatpush1.bf16.msra.mxu0 %v6219_v42  ;;  %1286 = vmatpush1.bf16.msra.mxu1 %v6222_v43  ;;  %v6312_v42 = vld [vmem:[%s8945_s3 + $0x4c8] ss:$16 sps:$4 sm:$0xff]   ;;  %v6317_v43 = vld [vmem:[%s8945_s3 + $0x4e4] ss:$16 sps:$4 sm:$0xff]  }
  0x68   : > { %1246 = vmatprep.subr.bf16.mxu0 %v6227_v44  ;;  %1287 = vmatprep.subr.bf16.mxu1 %v6230_v45  ;;  %v6320_v44 = vld [vmem:[%s8945_s3 + $0x4ec] ss:$16 sps:$4 sm:$0xff]   ;;  %v6315_v45 = vld [vmem:[%s8945_s3 + $0x4e0] ss:$16 sps:$4 sm:$0xff]  }
  0x6b   : > { %1247 = vmatpush1.bf16.msra.mxu0 %v6225_v46  ;;  %1288 = vmatpush1.bf16.msra.mxu1 %v6228_v47  ;;  %v6318_v46 = vld [vmem:[%s8945_s3 + $0x4e8] ss:$16 sps:$4 sm:$0xff]   ;;  %v6323_v47 = vld [vmem:[%s8945_s3 + $0x504] ss:$16 sps:$4 sm:$0xff]  }
  0x6c   : > { %1248 = vmatprep.subr.bf16.mxu0 %v6233_v48  ;;  %1289 = vmatprep.subr.bf16.mxu1 %v6236_v49  ;;  %v6326_v48 = vld [vmem:[%s8945_s3 + $0x50c] ss:$16 sps:$4 sm:$0xff]   ;;  %v6321_v49 = vld [vmem:[%s8945_s3 + $0x500] ss:$16 sps:$4 sm:$0xff]  }
  0x6f   : > { %1249 = vmatpush1.bf16.msra.mxu0 %v6231_v50  ;;  %1290 = vmatpush1.bf16.msra.mxu1 %v6234_v51  ;;  %v6324_v50 = vld [vmem:[%s8945_s3 + $0x508] ss:$16 sps:$4 sm:$0xff]   ;;  %v6329_v51 = vld [vmem:[%s8945_s3 + $0x524] ss:$16 sps:$4 sm:$0xff]  }
  0x70   : > { %1250 = vmatprep.subr.bf16.mxu0 %v6239_v52  ;;  %1291 = vmatprep.subr.bf16.mxu1 %v6242_v53  ;;  %v6332_v52 = vld [vmem:[%s8945_s3 + $0x52c] ss:$16 sps:$4 sm:$0xff]   ;;  %v6327_v53 = vld [vmem:[%s8945_s3 + $0x520] ss:$16 sps:$4 sm:$0xff]  }
  0x73   : > { %1251 = vmatpush1.bf16.msra.mxu0 %v6237_v54  ;;  %1292 = vmatpush1.bf16.msra.mxu1 %v6240_v55  ;;  %v6330_v54 = vld [vmem:[%s8945_s3 + $0x528] ss:$16 sps:$4 sm:$0xff]   ;;  %v6335_v55 = vld [vmem:[%s8945_s3 + $0x544] ss:$16 sps:$4 sm:$0xff]  }
  0x74   : > { %1252 = vmatprep.subr.bf16.mxu0 %v6245_v56  ;;  %1293 = vmatprep.subr.bf16.mxu1 %v6248_v57  ;;  %v6338_v56 = vld [vmem:[%s8945_s3 + $0x54c] ss:$16 sps:$4 sm:$0xff]   ;;  %v6333_v57 = vld [vmem:[%s8945_s3 + $0x540] ss:$16 sps:$4 sm:$0xff]  }
  0x77   : > { %1253 = vmatpush1.bf16.msra.mxu0 %v6243_v58  ;;  %1294 = vmatpush1.bf16.msra.mxu1 %v6246_v59  ;;  %v6336_v58 = vld [vmem:[%s8945_s3 + $0x548] ss:$16 sps:$4 sm:$0xff]   ;;  %v6341_v59 = vld [vmem:[%s8945_s3 + $0x564] ss:$16 sps:$4 sm:$0xff]  }
  0x78   : > { %1254 = vmatprep.subr.bf16.mxu0 %v6251_v60  ;;  %1295 = vmatprep.subr.bf16.mxu1 %v6254_v61  ;;  %v6344_v60 = vld [vmem:[%s8945_s3 + $0x56c] ss:$16 sps:$4 sm:$0xff]   ;;  %v6339_v61 = vld [vmem:[%s8945_s3 + $0x560] ss:$16 sps:$4 sm:$0xff]  }
  0x7b   : > { %1255 = vmatpush1.bf16.msra.mxu0 %v6249_v62  ;;  %1296 = vmatpush1.bf16.msra.mxu1 %v6252_v63  ;;  %v6342_v62 = vld [vmem:[%s8945_s3 + $0x568] ss:$16 sps:$4 sm:$0xff]   ;;  %v6347_v63 = vld [vmem:[%s8945_s3 + $0x584] ss:$16 sps:$4 sm:$0xff]  }
  0x7c   : > { %1256 = vmatprep.subr.bf16.mxu0 %v6257_v0  ;;  %1297 = vmatprep.subr.bf16.mxu1 %v6260_v1  ;;  %v6350_v0 = vld [vmem:[%s8945_s3 + $0x58c] ss:$16 sps:$4 sm:$0xff]   ;;  %v6345_v1 = vld [vmem:[%s8945_s3 + $0x580] ss:$16 sps:$4 sm:$0xff]  }
  0x7f   : > { %1257 = vmatpush1.bf16.msra.mxu0 %v6255_v2  ;;  %1298 = vmatpush1.bf16.msra.mxu1 %v6258_v3  ;;  %v6348_v2 = vld [vmem:[%s8945_s3 + $0x588] ss:$16 sps:$4 sm:$0xff]   ;;  %v6353_v3 = vld [vmem:[%s8945_s3 + $0x5a4] ss:$16 sps:$4 sm:$0xff]  }
  0x80   : > { %1258 = vmatprep.subr.bf16.mxu0 %v6263_v4  ;;  %1299 = vmatprep.subr.bf16.mxu1 %v6266_v5  ;;  %v6356_v4 = vld [vmem:[%s8945_s3 + $0x5ac] ss:$16 sps:$4 sm:$0xff]   ;;  %v6351_v5 = vld [vmem:[%s8945_s3 + $0x5a0] ss:$16 sps:$4 sm:$0xff]  }
  0x83   : > { %1259 = vmatpush1.bf16.msra.mxu0 %v6261_v6  ;;  %1300 = vmatpush1.bf16.msra.mxu1 %v6264_v7  ;;  %v6354_v6 = vld [vmem:[%s8945_s3 + $0x5a8] ss:$16 sps:$4 sm:$0xff]   ;;  %v6359_v7 = vld [vmem:[%s8945_s3 + $0x5c4] ss:$16 sps:$4 sm:$0xff]  }
  0x84   : > { %1260 = vmatprep.subr.bf16.mxu0 %v6269_v8  ;;  %1301 = vmatprep.subr.bf16.mxu1 %v6272_v9  ;;  %v6362_v8 = vld [vmem:[%s8945_s3 + $0x5cc] ss:$16 sps:$4 sm:$0xff]   ;;  %v6357_v9 = vld [vmem:[%s8945_s3 + $0x5c0] ss:$16 sps:$4 sm:$0xff]  }
  0x87   : > { %1261 = vmatpush1.bf16.msra.mxu0 %v6267_v10  ;;  %1302 = vmatpush1.bf16.msra.mxu1 %v6270_v11  ;;  %v6360_v10 = vld [vmem:[%s8945_s3 + $0x5c8] ss:$16 sps:$4 sm:$0xff]   ;;  %v6365_v11 = vld [vmem:[%s8945_s3 + $0x5e4] ss:$16 sps:$4 sm:$0xff]  }
  0x88   : > { %1711 = vmatprep.subr.bf16.mxu0 %v6275_v12  ;;  %1752 = vmatprep.subr.bf16.mxu1 %v6278_v13  ;;  %v6368_v12 = vld [vmem:[%s8945_s3 + $0x5ec] ss:$16 sps:$4 sm:$0xff]   ;;  %v6363_v13 = vld [vmem:[%s8945_s3 + $0x5e0] ss:$16 sps:$4 sm:$0xff]  }
  0x8a   : > { %1263 = vmatmul.mubr.bf16.vlgmr.msra.gmra.mrb[4].mxu0 %v7334_v36  ;;  %1304 = vmatmul.mubr.bf16.vlgmr.msra.gmra.mrb[4].mxu1 %v7334_v36  ;;  %v6308_v36 = vld [vmem:[%s8945_s3 + $0x4ac] ss:$16 sps:$4 sm:$0xff]  }
  0x8b   : > { %1712 = vmatpush1.bf16.msra.mxu0 %v6273_v14  ;;  %1753 = vmatpush1.bf16.msra.mxu1 %v6276_v15  ;;  %v6366_v14 = vld [vmem:[%s8945_s3 + $0x5e8] ss:$16 sps:$4 sm:$0xff]   ;;  %v6371_v15 = vld [vmem:[%s8945_s3 + $0x604] ss:$16 sps:$4 sm:$0xff]  }
  0x8c   : > { %1713 = vmatprep.subr.bf16.mxu0 %v6281_v16  ;;  %1754 = vmatprep.subr.bf16.mxu1 %v6284_v17  ;;  %v6374_v16 = vld [vmem:[%s8945_s3 + $0x60c] ss:$16 sps:$4 sm:$0xff]   ;;  %v1387_v17 = vrot.slane %v7471_v18, 1 }
  0x8d   : > { %1743 = vmatprep.mubr.bf16.mxu0 %v1388_v23  ;;  %1784 = vmatprep.mubr.bf16.mxu1 %v1388_v23  ;;  %v6380_v18 = vld [vmem:[%s8945_s3 + $0x62c] ss:$16 sps:$4 sm:$0xff]  }
  0x8f   : > { %1714 = vmatpush1.bf16.msra.mxu0 %v6279_v20  ;;  %1755 = vmatpush1.bf16.msra.mxu1 %v6282_v21  ;;  %v7669_v20 = vld.sshfl [vmem:[%s7656_s12] sm:$0x11 pattern:$0x76325410]  ;;  %v6372_v21 = vld [vmem:[%s8945_s3 + $0x608] ss:$16 sps:$4 sm:$0xff]  }
  0x90   : > { %1715 = vmatprep.subr.bf16.mxu0 %v6287_v22  ;;  %1756 = vmatprep.subr.bf16.mxu1 %v6290_v24  ;;  %v6377_v22 = vld [vmem:[%s8945_s3 + $0x624] ss:$16 sps:$4 sm:$0xff]   ;;  %v1871_v23 = vcombine.high %v7669_v20, %v7669_v20  ;;  %v6375_v24 = vld [vmem:[%s8945_s3 + $0x620] ss:$16 sps:$4 sm:$0xff]  }
  0x93   : > { %1716 = vmatpush1.bf16.msra.mxu0 %v6285_v25  ;;  %1757 = vmatpush1.bf16.msra.mxu1 %v6288_v26  ;;  %v6378_v25 = vld [vmem:[%s8945_s3 + $0x628] ss:$16 sps:$4 sm:$0xff]   ;;  %v6383_v26 = vld [vmem:[%s8945_s3 + $0x644] ss:$16 sps:$4 sm:$0xff]  }
  0x94   : > { %1717 = vmatprep.subr.bf16.mxu0 %v6293_v27  ;;  %1758 = vmatprep.subr.bf16.mxu1 %v6296_v28  ;;  %v6386_v27 = vld [vmem:[%s8945_s3 + $0x64c] ss:$16 sps:$4 sm:$0xff]   ;;  %v6381_v28 = vld [vmem:[%s8945_s3 + $0x640] ss:$16 sps:$4 sm:$0xff]  }
  0x97   : > { %1718 = vmatpush1.bf16.msra.mxu0 %v6291_v29  ;;  %1759 = vmatpush1.bf16.msra.mxu1 %v6294_v30  ;;  %v6384_v29 = vld [vmem:[%s8945_s3 + $0x648] ss:$16 sps:$4 sm:$0xff]   ;;  %v6389_v30 = vld [vmem:[%s8945_s3 + $0x664] ss:$16 sps:$4 sm:$0xff]  }
  0x98   : > { %1719 = vmatprep.subr.bf16.mxu0 %v6299_v31  ;;  %1760 = vmatprep.subr.bf16.mxu1 %v6302_v32  ;;  %v6392_v31 = vld [vmem:[%s8945_s3 + $0x66c] ss:$16 sps:$4 sm:$0xff]   ;;  %v6387_v32 = vld [vmem:[%s8945_s3 + $0x660] ss:$16 sps:$4 sm:$0xff]  }
  0x9b   : > { %1720 = vmatpush1.bf16.msra.mxu0 %v6297_v33  ;;  %1761 = vmatpush1.bf16.msra.mxu1 %v6300_v34  ;;  %v6390_v33 = vld [vmem:[%s8945_s3 + $0x668] ss:$16 sps:$4 sm:$0xff]   ;;  %v6395_v34 = vld [vmem:[%s8945_s3 + $0x684] ss:$16 sps:$4 sm:$0xff]  }
  0x9c   : > { %1721 = vmatprep.subr.bf16.mxu0 %v6305_v35  ;;  %1762 = vmatprep.subr.bf16.mxu1 %v6308_v36  ;;  %v6398_v35 = vld [vmem:[%s8945_s3 + $0x68c] ss:$16 sps:$4 sm:$0xff]   ;;  %v6393_v36 = vld [vmem:[%s8945_s3 + $0x680] ss:$16 sps:$4 sm:$0xff]  }
  0x9f   : > { %1722 = vmatpush1.bf16.msra.mxu0 %v6303_v37  ;;  %1763 = vmatpush1.bf16.msra.mxu1 %v6306_v38  ;;  %v6396_v37 = vld [vmem:[%s8945_s3 + $0x688] ss:$16 sps:$4 sm:$0xff]   ;;  %v6401_v38 = vld [vmem:[%s8945_s3 + $0x6a4] ss:$16 sps:$4 sm:$0xff]  }
  0xa0   : > { %1723 = vmatprep.subr.bf16.mxu0 %v6311_v39  ;;  %1764 = vmatprep.subr.bf16.mxu1 %v6314_v40  ;;  %v6404_v39 = vld [vmem:[%s8945_s3 + $0x6ac] ss:$16 sps:$4 sm:$0xff]   ;;  %v6399_v40 = vld [vmem:[%s8945_s3 + $0x6a0] ss:$16 sps:$4 sm:$0xff]  }
  0xa3   : > { %1724 = vmatpush1.bf16.msra.mxu0 %v6309_v41  ;;  %1765 = vmatpush1.bf16.msra.mxu1 %v6312_v42  ;;  %v6402_v41 = vld [vmem:[%s8945_s3 + $0x6a8] ss:$16 sps:$4 sm:$0xff]   ;;  %v6407_v42 = vld [vmem:[%s8945_s3 + $0x6c4] ss:$16 sps:$4 sm:$0xff]  }
  0xa4   : > { %1725 = vmatprep.subr.bf16.mxu0 %v6317_v43  ;;  %1766 = vmatprep.subr.bf16.mxu1 %v6320_v44  ;;  %v6410_v43 = vld [vmem:[%s8945_s3 + $0x6cc] ss:$16 sps:$4 sm:$0xff]   ;;  %v6405_v44 = vld [vmem:[%s8945_s3 + $0x6c0] ss:$16 sps:$4 sm:$0xff]  }
  0xa7   : > { %1726 = vmatpush1.bf16.msra.mxu0 %v6315_v45  ;;  %1767 = vmatpush1.bf16.msra.mxu1 %v6318_v46  ;;  %v6408_v45 = vld [vmem:[%s8945_s3 + $0x6c8] ss:$16 sps:$4 sm:$0xff]   ;;  %v6413_v46 = vld [vmem:[%s8945_s3 + $0x6e4] ss:$16 sps:$4 sm:$0xff]  }
  0xa8   : > { %1727 = vmatprep.subr.bf16.mxu0 %v6323_v47  ;;  %1768 = vmatprep.subr.bf16.mxu1 %v6326_v48  ;;  %v6416_v47 = vld [vmem:[%s8945_s3 + $0x6ec] ss:$16 sps:$4 sm:$0xff]   ;;  %v6411_v48 = vld [vmem:[%s8945_s3 + $0x6e0] ss:$16 sps:$4 sm:$0xff]  }
  0xab   : > { %1728 = vmatpush1.bf16.msra.mxu0 %v6321_v49  ;;  %1769 = vmatpush1.bf16.msra.mxu1 %v6324_v50  ;;  %v6414_v49 = vld [vmem:[%s8945_s3 + $0x6e8] ss:$16 sps:$4 sm:$0xff]   ;;  %v6419_v50 = vld [vmem:[%s8945_s3 + $0x704] ss:$16 sps:$4 sm:$0xff]  }
  0xac   : > { %1729 = vmatprep.subr.bf16.mxu0 %v6329_v51  ;;  %1770 = vmatprep.subr.bf16.mxu1 %v6332_v52  ;;  %v6422_v51 = vld [vmem:[%s8945_s3 + $0x70c] ss:$16 sps:$4 sm:$0xff]   ;;  %v6417_v52 = vld [vmem:[%s8945_s3 + $0x700] ss:$16 sps:$4 sm:$0xff]  }
  0xaf   : > { %1730 = vmatpush1.bf16.msra.mxu0 %v6327_v53  ;;  %1771 = vmatpush1.bf16.msra.mxu1 %v6330_v54  ;;  %v6420_v53 = vld [vmem:[%s8945_s3 + $0x708] ss:$16 sps:$4 sm:$0xff]   ;;  %v6425_v54 = vld [vmem:[%s8945_s3 + $0x724] ss:$16 sps:$4 sm:$0xff]  }
  0xb0   : > { %1731 = vmatprep.subr.bf16.mxu0 %v6335_v55  ;;  %1772 = vmatprep.subr.bf16.mxu1 %v6338_v56  ;;  %v6428_v55 = vld [vmem:[%s8945_s3 + $0x72c] ss:$16 sps:$4 sm:$0xff]   ;;  %v6423_v56 = vld [vmem:[%s8945_s3 + $0x720] ss:$16 sps:$4 sm:$0xff]  }
  0xb3   : > { %1732 = vmatpush1.bf16.msra.mxu0 %v6333_v57  ;;  %1773 = vmatpush1.bf16.msra.mxu1 %v6336_v58  ;;  %v6426_v57 = vld [vmem:[%s8945_s3 + $0x728] ss:$16 sps:$4 sm:$0xff]   ;;  %v6431_v58 = vld [vmem:[%s8945_s3 + $0x744] ss:$16 sps:$4 sm:$0xff]  }
  0xb4   : > { %1733 = vmatprep.subr.bf16.mxu0 %v6341_v59  ;;  %1774 = vmatprep.subr.bf16.mxu1 %v6344_v60  ;;  %v6434_v59 = vld [vmem:[%s8945_s3 + $0x74c] ss:$16 sps:$4 sm:$0xff]   ;;  %v6429_v60 = vld [vmem:[%s8945_s3 + $0x740] ss:$16 sps:$4 sm:$0xff]  }
  0xb7   : > { %1734 = vmatpush1.bf16.msra.mxu0 %v6339_v61  ;;  %1775 = vmatpush1.bf16.msra.mxu1 %v6342_v62  ;;  %v6432_v61 = vld [vmem:[%s8945_s3 + $0x748] ss:$16 sps:$4 sm:$0xff]   ;;  %v6437_v62 = vld [vmem:[%s8945_s3 + $0x764] ss:$16 sps:$4 sm:$0xff]  }
  0xb8   : > { %1735 = vmatprep.subr.bf16.mxu0 %v6347_v63  ;;  %1776 = vmatprep.subr.bf16.mxu1 %v6350_v0  ;;  %v6440_v63 = vld [vmem:[%s8945_s3 + $0x76c] ss:$16 sps:$4 sm:$0xff]   ;;  %v6435_v0 = vld [vmem:[%s8945_s3 + $0x760] ss:$16 sps:$4 sm:$0xff]  }
  0xbb   : > { %1736 = vmatpush1.bf16.msra.mxu0 %v6345_v1  ;;  %1777 = vmatpush1.bf16.msra.mxu1 %v6348_v2  ;;  %v6438_v1 = vld [vmem:[%s8945_s3 + $0x768] ss:$16 sps:$4 sm:$0xff]   ;;  %v6443_v2 = vld [vmem:[%s8945_s3 + $0x784] ss:$16 sps:$4 sm:$0xff]  }
  0xbc   : > { %1737 = vmatprep.subr.bf16.mxu0 %v6353_v3  ;;  %1778 = vmatprep.subr.bf16.mxu1 %v6356_v4  ;;  %v6446_v3 = vld [vmem:[%s8945_s3 + $0x78c] ss:$16 sps:$4 sm:$0xff]   ;;  %v6441_v4 = vld [vmem:[%s8945_s3 + $0x780] ss:$16 sps:$4 sm:$0xff]  }
  0xbf   : > { %1738 = vmatpush1.bf16.msra.mxu0 %v6351_v5  ;;  %1779 = vmatpush1.bf16.msra.mxu1 %v6354_v6  ;;  %v6444_v5 = vld [vmem:[%s8945_s3 + $0x788] ss:$16 sps:$4 sm:$0xff]   ;;  %v6449_v6 = vld [vmem:[%s8945_s3 + $0x7a4] ss:$16 sps:$4 sm:$0xff]  }
  0xc0   : > { %1739 = vmatprep.subr.bf16.mxu0 %v6359_v7  ;;  %1780 = vmatprep.subr.bf16.mxu1 %v6362_v8  ;;  %v6452_v7 = vld [vmem:[%s8945_s3 + $0x7ac] ss:$16 sps:$4 sm:$0xff]   ;;  %v6447_v8 = vld [vmem:[%s8945_s3 + $0x7a0] ss:$16 sps:$4 sm:$0xff]  }
  0xc3   : > { %1740 = vmatpush1.bf16.msra.mxu0 %v6357_v9  ;;  %1781 = vmatpush1.bf16.msra.mxu1 %v6360_v10  ;;  %v6450_v9 = vld [vmem:[%s8945_s3 + $0x7a8] ss:$16 sps:$4 sm:$0xff]   ;;  %v7833_v10 = vld.sshfl [vmem:[%s7656_s12] sm:$0x33 pattern:$0x76325410] }
  0xc4   : > { %1741 = vmatprep.subr.bf16.mxu0 %v6365_v11  ;;  %1782 = vmatprep.subr.bf16.mxu1 %v6368_v12  ;;  %v6455_v11 = vld [vmem:[%s8945_s3 + $0x7c4] ss:$16 sps:$4 sm:$0xff]   ;;  %v6458_v12 = vld [vmem:[%s8945_s3 + $0x7cc] ss:$16 sps:$4 sm:$0xff]  }
  0xc7   : > { %1742 = vmatpush1.bf16.msra.mxu0 %v6363_v13  ;;  %1783 = vmatpush1.bf16.msra.mxu1 %v6366_v14  ;;  %v2354_v13 = vcombine.high %v7833_v10, %v7833_v10  ;;  %v6453_v14 = vld [vmem:[%s8945_s3 + $0x7c0] ss:$16 sps:$4 sm:$0xff]  }
  0xc8   : > { %2194 = vmatprep.subr.bf16.mxu0 %v6371_v15  ;;  %2235 = vmatprep.subr.bf16.mxu1 %v6374_v16  ;;  %v6456_v15 = vld [vmem:[%s8945_s3 + $0x7c8] ss:$16 sps:$4 sm:$0xff]   ;;  %v6461_v16 = vld [vmem:[%s8945_s3 + $0x7e4] ss:$16 sps:$4 sm:$0xff]  }
  0xca   : > { %1744 = vmatmul.mubr.bf16.vlgmr.msra.gmra.mrb[8].mxu0 %v1387_v17  ;;  %1785 = vmatmul.mubr.bf16.vlgmr.msra.gmra.mrb[8].mxu1 %v1387_v17  ;;  %v6464_v17 = vld [vmem:[%s8945_s3 + $0x7ec] ss:$16 sps:$4 sm:$0xff]  }
  0xcb   : > { %2195 = vmatpush1.bf16.msra.mxu0 %v6369_v19  ;;  %2236 = vmatpush1.bf16.msra.mxu1 %v6372_v21  ;;  %v2365_v19 = vshll.u32 %v2354_v13, 16  ;;  %v6459_v21 = vld [vmem:[%s8945_s3 + $0x7e0] ss:$16 sps:$4 sm:$0xff]  }
  0xcc   : > { %2196 = vmatprep.subr.bf16.mxu0 %v6377_v22  ;;  %2237 = vmatprep.subr.bf16.mxu1 %v6380_v18  ;;  %v6462_v22 = vld [vmem:[%s8945_s3 + $0x7e8] ss:$16 sps:$4 sm:$0xff]   ;;  %v6467_v18 = vld [vmem:[%s8945_s3 + $0x804] ss:$16 sps:$4 sm:$0xff]  }
  0xcd   : > { %2226 = vmatprep.mubr.bf16.mxu0 %v1871_v23  ;;  %2267 = vmatprep.mubr.bf16.mxu1 %v1871_v23  ;;  %v6470_v23 = vld [vmem:[%s8945_s3 + $0x80c] ss:$16 sps:$4 sm:$0xff]  }
  0xcf   : > { %2197 = vmatpush1.bf16.msra.mxu0 %v6375_v24  ;;  %2238 = vmatpush1.bf16.msra.mxu1 %v6378_v25  ;;  %v2363_v24 = vshrl.u32 %v2354_v13, 16  ;;  %v2367_v25 = vrot.slane %v2365_v19, 1  ;;  %v6533_v13 = vld [vmem:[%s8945_s3 + $0x964] ss:$16 sps:$4 sm:$0xff]   ;;  %v6542_v19 = vld [vmem:[%s8945_s3 + $0x98c] ss:$16 sps:$4 sm:$0xff]  }
  0xd0   : > { %2198 = vmatprep.subr.bf16.mxu0 %v6383_v26  ;;  %2239 = vmatprep.subr.bf16.mxu1 %v6386_v27  ;;  %v6465_v26 = vld [vmem:[%s8945_s3 + $0x800] ss:$16 sps:$4 sm:$0xff]   ;;  %v6468_v27 = vld [vmem:[%s8945_s3 + $0x808] ss:$16 sps:$4 sm:$0xff]  }
  0xd3   : > { %2199 = vmatpush1.bf16.msra.mxu0 %v6381_v28  ;;  %2240 = vmatpush1.bf16.msra.mxu1 %v6384_v29  ;;  %v6473_v28 = vld [vmem:[%s8945_s3 + $0x824] ss:$16 sps:$4 sm:$0xff]   ;;  %v6476_v29 = vld [vmem:[%s8945_s3 + $0x82c] ss:$16 sps:$4 sm:$0xff]  }
  0xd4   : > { %2200 = vmatprep.subr.bf16.mxu0 %v6389_v30  ;;  %2241 = vmatprep.subr.bf16.mxu1 %v6392_v31  ;;  %v2368_v30 = vor.u32 %v2367_v25, %v2363_v24  ;;  %v6471_v31 = vld [vmem:[%s8945_s3 + $0x820] ss:$16 sps:$4 sm:$0xff]   ;;  %v6546_v25 = vld [vmem:[%s8945_s3 + $0x9a8] ss:$16 sps:$4 sm:$0xff]  }
  0xd5   : > { %v6543_v24 = vld [vmem:[%s8945_s3 + $0x9a0] ss:$16 sps:$4 sm:$0xff]  }
  0xd7   : > { %2201 = vmatpush1.bf16.msra.mxu0 %v6387_v32  ;;  %2242 = vmatpush1.bf16.msra.mxu1 %v6390_v33  ;;  %v6474_v32 = vld [vmem:[%s8945_s3 + $0x828] ss:$16 sps:$4 sm:$0xff]   ;;  %v6479_v33 = vld [vmem:[%s8945_s3 + $0x844] ss:$16 sps:$4 sm:$0xff]  }
  0xd8   : > { %2202 = vmatprep.subr.bf16.mxu0 %v6395_v34  ;;  %2243 = vmatprep.subr.bf16.mxu1 %v6398_v35  ;;  %v6477_v34 = vld [vmem:[%s8945_s3 + $0x840] ss:$16 sps:$4 sm:$0xff]   ;;  %v6480_v35 = vld [vmem:[%s8945_s3 + $0x848] ss:$16 sps:$4 sm:$0xff]  }
  0xdb   : > { %2203 = vmatpush1.bf16.msra.mxu0 %v6393_v36  ;;  %2244 = vmatpush1.bf16.msra.mxu1 %v6396_v37  ;;  %v6485_v36 = vld [vmem:[%s8945_s3 + $0x864] ss:$16 sps:$4 sm:$0xff]   ;;  %v6488_v37 = vld [vmem:[%s8945_s3 + $0x86c] ss:$16 sps:$4 sm:$0xff]  }
  0xdc   : > { %2204 = vmatprep.subr.bf16.mxu0 %v6401_v38  ;;  %2245 = vmatprep.subr.bf16.mxu1 %v6404_v39  ;;  %v6483_v38 = vld [vmem:[%s8945_s3 + $0x860] ss:$16 sps:$4 sm:$0xff]   ;;  %v6486_v39 = vld [vmem:[%s8945_s3 + $0x868] ss:$16 sps:$4 sm:$0xff]  }
  0xdf   : > { %2205 = vmatpush1.bf16.msra.mxu0 %v6399_v40  ;;  %2246 = vmatpush1.bf16.msra.mxu1 %v6402_v41  ;;  %v6491_v40 = vld [vmem:[%s8945_s3 + $0x884] ss:$16 sps:$4 sm:$0xff]   ;;  %v6494_v41 = vld [vmem:[%s8945_s3 + $0x88c] ss:$16 sps:$4 sm:$0xff]  }
  0xe0   : > { %2206 = vmatprep.subr.bf16.mxu0 %v6407_v42  ;;  %2247 = vmatprep.subr.bf16.mxu1 %v6410_v43  ;;  %v6489_v42 = vld [vmem:[%s8945_s3 + $0x880] ss:$16 sps:$4 sm:$0xff]   ;;  %v6492_v43 = vld [vmem:[%s8945_s3 + $0x888] ss:$16 sps:$4 sm:$0xff]  }
  0xe3   : > { %2207 = vmatpush1.bf16.msra.mxu0 %v6405_v44  ;;  %2248 = vmatpush1.bf16.msra.mxu1 %v6408_v45  ;;  %v6497_v44 = vld [vmem:[%s8945_s3 + $0x8a4] ss:$16 sps:$4 sm:$0xff]   ;;  %v6500_v45 = vld [vmem:[%s8945_s3 + $0x8ac] ss:$16 sps:$4 sm:$0xff]  }
  0xe4   : > { %2208 = vmatprep.subr.bf16.mxu0 %v6413_v46  ;;  %2249 = vmatprep.subr.bf16.mxu1 %v6416_v47  ;;  %v6495_v46 = vld [vmem:[%s8945_s3 + $0x8a0] ss:$16 sps:$4 sm:$0xff]   ;;  %v6498_v47 = vld [vmem:[%s8945_s3 + $0x8a8] ss:$16 sps:$4 sm:$0xff]  }
  0xe7   : > { %2209 = vmatpush1.bf16.msra.mxu0 %v6411_v48  ;;  %2250 = vmatpush1.bf16.msra.mxu1 %v6414_v49  ;;  %v6503_v48 = vld [vmem:[%s8945_s3 + $0x8c4] ss:$16 sps:$4 sm:$0xff]   ;;  %v6506_v49 = vld [vmem:[%s8945_s3 + $0x8cc] ss:$16 sps:$4 sm:$0xff]  }
  0xe8   : > { %2210 = vmatprep.subr.bf16.mxu0 %v6419_v50  ;;  %2251 = vmatprep.subr.bf16.mxu1 %v6422_v51 }
  0xeb   : > { %2211 = vmatpush1.bf16.msra.mxu0 %v6417_v52  ;;  %2252 = vmatpush1.bf16.msra.mxu1 %v6420_v53  ;;  %v6501_v52 = vld [vmem:[%s8945_s3 + $0x8c0] ss:$16 sps:$4 sm:$0xff]   ;;  %v6504_v53 = vld [vmem:[%s8945_s3 + $0x8c8] ss:$16 sps:$4 sm:$0xff]  }
  0xec   : > { %2212 = vmatprep.subr.bf16.mxu0 %v6425_v54  ;;  %2253 = vmatprep.subr.bf16.mxu1 %v6428_v55 }
  0xef   : > { %2213 = vmatpush1.bf16.msra.mxu0 %v6423_v56  ;;  %2254 = vmatpush1.bf16.msra.mxu1 %v6426_v57 }
  0xf0   : > { %2214 = vmatprep.subr.bf16.mxu0 %v6431_v58  ;;  %2255 = vmatprep.subr.bf16.mxu1 %v6434_v59 }
  0xf3   : > { %2215 = vmatpush1.bf16.msra.mxu0 %v6429_v60  ;;  %2256 = vmatpush1.bf16.msra.mxu1 %v6432_v61  ;;  %v6509_v60 = vld [vmem:[%s8945_s3 + $0x8e4] ss:$16 sps:$4 sm:$0xff]   ;;  %v6512_v61 = vld [vmem:[%s8945_s3 + $0x8ec] ss:$16 sps:$4 sm:$0xff]  }
  0xf4   : > { %2216 = vmatprep.subr.bf16.mxu0 %v6437_v62  ;;  %2257 = vmatprep.subr.bf16.mxu1 %v6440_v63  ;;  %v6507_v62 = vld [vmem:[%s8945_s3 + $0x8e0] ss:$16 sps:$4 sm:$0xff]   ;;  %v6510_v63 = vld [vmem:[%s8945_s3 + $0x8e8] ss:$16 sps:$4 sm:$0xff]  }
  0xf7   : > { %2217 = vmatpush1.bf16.msra.mxu0 %v6435_v0  ;;  %2258 = vmatpush1.bf16.msra.mxu1 %v6438_v1  ;;  %v6515_v0 = vld [vmem:[%s8945_s3 + $0x904] ss:$16 sps:$4 sm:$0xff]   ;;  %v6518_v1 = vld [vmem:[%s8945_s3 + $0x90c] ss:$16 sps:$4 sm:$0xff]  }
  0xf8   : > { %2218 = vmatprep.subr.bf16.mxu0 %v6443_v2  ;;  %2259 = vmatprep.subr.bf16.mxu1 %v6446_v3  ;;  %v6513_v2 = vld [vmem:[%s8945_s3 + $0x900] ss:$16 sps:$4 sm:$0xff]   ;;  %v6516_v3 = vld [vmem:[%s8945_s3 + $0x908] ss:$16 sps:$4 sm:$0xff]  }
  0xfb   : > { %2219 = vmatpush1.bf16.msra.mxu0 %v6441_v4  ;;  %2260 = vmatpush1.bf16.msra.mxu1 %v6444_v5  ;;  %v6521_v4 = vld [vmem:[%s8945_s3 + $0x924] ss:$16 sps:$4 sm:$0xff]   ;;  %v6524_v5 = vld [vmem:[%s8945_s3 + $0x92c] ss:$16 sps:$4 sm:$0xff]  }
  0xfc   : > { %2220 = vmatprep.subr.bf16.mxu0 %v6449_v6  ;;  %2261 = vmatprep.subr.bf16.mxu1 %v6452_v7  ;;  %v6519_v6 = vld [vmem:[%s8945_s3 + $0x920] ss:$16 sps:$4 sm:$0xff]   ;;  %v6522_v7 = vld [vmem:[%s8945_s3 + $0x928] ss:$16 sps:$4 sm:$0xff]  }
  0xff   : > { %2221 = vmatpush1.bf16.msra.mxu0 %v6447_v8  ;;  %2262 = vmatpush1.bf16.msra.mxu1 %v6450_v9  ;;  %v6527_v8 = vld [vmem:[%s8945_s3 + $0x944] ss:$16 sps:$4 sm:$0xff]   ;;  %v6530_v9 = vld [vmem:[%s8945_s3 + $0x94c] ss:$16 sps:$4 sm:$0xff]  }
 0x100   : > { %2222 = vmatprep.subr.bf16.mxu0 %v6455_v11  ;;  %2263 = vmatprep.subr.bf16.mxu1 %v6458_v12  ;;  %v6525_v11 = vld [vmem:[%s8945_s3 + $0x940] ss:$16 sps:$4 sm:$0xff]   ;;  %v6528_v12 = vld [vmem:[%s8945_s3 + $0x948] ss:$16 sps:$4 sm:$0xff]  }
 0x103   : > { %2223 = vmatpush1.bf16.msra.mxu0 %v6453_v14  ;;  %2264 = vmatpush1.bf16.msra.mxu1 %v6456_v15  ;;  %v6536_v14 = vld [vmem:[%s8945_s3 + $0x96c] ss:$16 sps:$4 sm:$0xff]   ;;  %v6531_v15 = vld [vmem:[%s8945_s3 + $0x960] ss:$16 sps:$4 sm:$0xff]  }
 0x104   : > { %2224 = vmatprep.subr.bf16.mxu0 %v6461_v16  ;;  %2265 = vmatprep.subr.bf16.mxu1 %v6464_v17  ;;  %v6534_v16 = vld [vmem:[%s8945_s3 + $0x968] ss:$16 sps:$4 sm:$0xff]   ;;  %v6539_v17 = vld [vmem:[%s8945_s3 + $0x984] ss:$16 sps:$4 sm:$0xff]  }
 0x107   : > { %2225 = vmatpush1.bf16.msra.mxu0 %v6459_v21  ;;  %2266 = vmatpush1.bf16.msra.mxu1 %v6462_v22  ;;  %v6537_v21 = vld [vmem:[%s8945_s3 + $0x980] ss:$16 sps:$4 sm:$0xff]   ;;  %v6540_v22 = vld [vmem:[%s8945_s3 + $0x988] ss:$16 sps:$4 sm:$0xff]  }
 0x108   : > { %2691 = vmatprep.subr.bf16.mxu0 %v6467_v18  ;;  %2732 = vmatprep.subr.bf16.mxu1 %v6470_v23  ;;  %v6545_v18 = vld [vmem:[%s8945_s3 + $0x9a4] ss:$16 sps:$4 sm:$0xff]   ;;  %v6548_v23 = vld [vmem:[%s8945_s3 + $0x9ac] ss:$16 sps:$4 sm:$0xff]  }
 0x10a   : > { %2227 = vmatmul.mubr.bf16.vlgmr.msra.gmra.mrb[12].mxu0 %v7669_v20  ;;  %2268 = vmatmul.mubr.bf16.vlgmr.msra.gmra.mrb[12].mxu1 %v7669_v20  ;;  %v6482_v20 = vld [vmem:[%s8945_s3 + $0x84c] ss:$16 sps:$4 sm:$0xff]  }
 0x10b   : > { %2692 = vmatpush1.bf16.msra.mxu0 %v6465_v26  ;;  %2733 = vmatpush1.bf16.msra.mxu1 %v6468_v27  ;;  %v6551_v26 = vld [vmem:[%s8945_s3 + $0x9c4] ss:$16 sps:$4 sm:$0xff]   ;;  %v6554_v27 = vld [vmem:[%s8945_s3 + $0x9cc] ss:$16 sps:$4 sm:$0xff]  }
 0x10c   : > { %2693 = vmatprep.subr.bf16.mxu0 %v6473_v28  ;;  %2734 = vmatprep.subr.bf16.mxu1 %v6476_v29  ;;  %v6549_v28 = vld [vmem:[%s8945_s3 + $0x9c0] ss:$16 sps:$4 sm:$0xff]   ;;  %v6552_v29 = vld [vmem:[%s8945_s3 + $0x9c8] ss:$16 sps:$4 sm:$0xff]  }
 0x10d   : > { %2723 = vmatprep.mubr.bf16.mxu0 %v2368_v30  ;;  %2764 = vmatprep.mubr.bf16.mxu1 %v2368_v30  ;;  %v2358_v30 = vshll.u32 %v7833_v10, 16 }
 0x10f   : > { %2694 = vmatpush1.bf16.msra.mxu0 %v6471_v31  ;;  %2735 = vmatpush1.bf16.msra.mxu1 %v6474_v32  ;;  %v6557_v31 = vld [vmem:[%s8945_s3 + $0x9e4] ss:$16 sps:$4 sm:$0xff]   ;;  %v6560_v32 = vld [vmem:[%s8945_s3 + $0x9ec] ss:$16 sps:$4 sm:$0xff]  }
 0x110   : > { %2695 = vmatprep.subr.bf16.mxu0 %v6479_v33  ;;  %2736 = vmatprep.subr.bf16.mxu1 %v6482_v20  ;;  %v8059_v33 = vld.sshfl [vmem:[%s7656_s12] sm:$0x22 pattern:$0x76325410]  ;;  %v2356_v20 = vshrl.u32 %v7833_v10, 16  ;;  %s4933_s12 = sshll.u32 %s8963_s11, 1 }
 0x111   : > { %v6566_v10 = vld [vmem:[%s8945_s3 + $0xa0c] ss:$16 sps:$4 sm:$0xff]   ;;  %s329_s11 = sadd.s32 %s4933_s12, %s7162_s27 }
 0x112   : > { %s4935_s12 = sshll.u32 %s329_s11, 1 }
 0x113   : > { %2696 = vmatpush1.bf16.msra.mxu0 %v6477_v34  ;;  %2737 = vmatpush1.bf16.msra.mxu1 %v6480_v35  ;;  %v2360_v34 = vrot.slane %v2358_v30, 1  ;;  %v6555_v35 = vld [vmem:[%s8945_s3 + $0x9e0] ss:$16 sps:$4 sm:$0xff]   ;;  %v6626_v30 = vld [vmem:[%s8945_s3 + $0xb4c] ss:$16 sps:$4 sm:$0xff]   ;;  %s8279_s29 = scalar_lea.vmem %s8944_s2, %s4935_s12 }
 0x114   : > { %2697 = vmatprep.subr.bf16.mxu0 %v6485_v36  ;;  %2738 = vmatprep.subr.bf16.mxu1 %v6488_v37  ;;  %v6558_v36 = vld [vmem:[%s8945_s3 + $0x9e8] ss:$16 sps:$4 sm:$0xff]   ;;  %v6563_v37 = vld [vmem:[%s8945_s3 + $0xa04] ss:$16 sps:$4 sm:$0xff]  }
 0x117   : > { %2698 = vmatpush1.bf16.msra.mxu0 %v6483_v38  ;;  %2739 = vmatpush1.bf16.msra.mxu1 %v6486_v39  ;;  %v6561_v38 = vld [vmem:[%s8945_s3 + $0xa00] ss:$16 sps:$4 sm:$0xff]   ;;  %v2851_v39 = vcombine.high %v8059_v33, %v8059_v33 }
 0x118   : > { %2699 = vmatprep.subr.bf16.mxu0 %v6491_v40  ;;  %2740 = vmatprep.subr.bf16.mxu1 %v6494_v41  ;;  %v2361_v40 = vor.u32 %v2360_v34, %v2356_v20  ;;  %v6564_v41 = vld [vmem:[%s8945_s3 + $0xa08] ss:$16 sps:$4 sm:$0xff]   ;;  %v6629_v20 = vld [vmem:[%s8945_s3 + $0xb64] ss:$16 sps:$4 sm:$0xff]   ;;  %v6632_v34 = vld [vmem:[%s8945_s3 + $0xb6c] ss:$16 sps:$4 sm:$0xff]  }
 0x11b   : > { %2700 = vmatpush1.bf16.msra.mxu0 %v6489_v42  ;;  %2741 = vmatpush1.bf16.msra.mxu1 %v6492_v43  ;;  %v6569_v42 = vld [vmem:[%s8945_s3 + $0xa24] ss:$16 sps:$4 sm:$0xff]   ;;  %v6572_v43 = vld [vmem:[%s8945_s3 + $0xa2c] ss:$16 sps:$4 sm:$0xff]  }
 0x11c   : > { %2701 = vmatprep.subr.bf16.mxu0 %v6497_v44  ;;  %2742 = vmatprep.subr.bf16.mxu1 %v6500_v45  ;;  %v2853_v44 = vrot.slane %v2851_v39, 1  ;;  %v6567_v45 = vld [vmem:[%s8945_s3 + $0xa20] ss:$16 sps:$4 sm:$0xff]   ;;  %v6636_v39 = vld [vmem:[%s8945_s3 + $0xb88] ss:$16 sps:$4 sm:$0xff]  }
 0x11d   : > { %v7941_v50 = vpop.f32.mrb[0].mxu0  ;;  %v7943_v51 = vpop.f32.mrb[0].mxu1 }
 0x11e   : > { %v7951_v54 = vpop.f32.mrb[1].mxu0  ;;  %v7953_v55 = vpop.f32.mrb[1].mxu1 }
 0x11f   : > { %v855_v56 = vpop.f32.mrb[2].mxu0  ;;  %v896_v57 = vpop.f32.mrb[2].mxu1  ;;  %2702 = vmatpush1.bf16.msra.mxu0 %v6495_v46  ;;  %2743 = vmatpush1.bf16.msra.mxu1 %v6498_v47  ;;  %v6570_v46 = vld [vmem:[%s8945_s3 + $0xa28] ss:$16 sps:$4 sm:$0xff]   ;;  %v6575_v47 = vld [vmem:[%s8945_s3 + $0xa44] ss:$16 sps:$4 sm:$0xff]  }
 0x120   : > { %v856_v58 = vpop.f32.mrb[3].mxu0  ;;  %v897_v59 = vpop.f32.mrb[3].mxu1  ;;  %2703 = vmatprep.subr.bf16.mxu0 %v6503_v48  ;;  %2744 = vmatprep.subr.bf16.mxu1 %v6506_v49  ;;  %v6578_v48 = vld [vmem:[%s8945_s3 + $0xa4c] ss:$16 sps:$4 sm:$0xff]   ;;  %v6573_v49 = vld [vmem:[%s8945_s3 + $0xa40] ss:$16 sps:$4 sm:$0xff]  }
 0x121   : > { %v6584_v56 = vld [vmem:[%s8945_s3 + $0xa6c] ss:$16 sps:$4 sm:$0xff]   ;;  %v6579_v57 = vld [vmem:[%s8945_s3 + $0xa60] ss:$16 sps:$4 sm:$0xff]   ;;  %v6582_v58 = vld [vmem:[%s8945_s3 + $0xa68] ss:$16 sps:$4 sm:$0xff]  }
 0x122   : > { %v6587_v59 = vld [vmem:[%s8945_s3 + $0xa84] ss:$16 sps:$4 sm:$0xff]  }
 0x123   : > { %2704 = vmatpush1.bf16.msra.mxu0 %v6501_v52  ;;  %2745 = vmatpush1.bf16.msra.mxu1 %v6504_v53  ;;  %v6576_v52 = vld [vmem:[%s8945_s3 + $0xa48] ss:$16 sps:$4 sm:$0xff]   ;;  %v6581_v53 = vld [vmem:[%s8945_s3 + $0xa64] ss:$16 sps:$4 sm:$0xff]  }
 0x124   : > { %2705 = vmatprep.subr.bf16.mxu0 %v6509_v60  ;;  %2746 = vmatprep.subr.bf16.mxu1 %v6512_v61  ;;  %v6590_v60 = vld [vmem:[%s8945_s3 + $0xa8c] ss:$16 sps:$4 sm:$0xff]   ;;  %v6585_v61 = vld [vmem:[%s8945_s3 + $0xa80] ss:$16 sps:$4 sm:$0xff]  }
 0x127   : > { %2706 = vmatpush1.bf16.msra.mxu0 %v6507_v62  ;;  %2747 = vmatpush1.bf16.msra.mxu1 %v6510_v63  ;;  %v6588_v62 = vld [vmem:[%s8945_s3 + $0xa88] ss:$16 sps:$4 sm:$0xff]   ;;  %v6593_v63 = vld [vmem:[%s8945_s3 + $0xaa4] ss:$16 sps:$4 sm:$0xff]  }
 0x128   : > { %2707 = vmatprep.subr.bf16.mxu0 %v6515_v0  ;;  %2748 = vmatprep.subr.bf16.mxu1 %v6518_v1  ;;  %v6596_v0 = vld [vmem:[%s8945_s3 + $0xaac] ss:$16 sps:$4 sm:$0xff]   ;;  %v6591_v1 = vld [vmem:[%s8945_s3 + $0xaa0] ss:$16 sps:$4 sm:$0xff]  }
 0x12b   : > { %2708 = vmatpush1.bf16.msra.mxu0 %v6513_v2  ;;  %2749 = vmatpush1.bf16.msra.mxu1 %v6516_v3  ;;  %v6594_v2 = vld [vmem:[%s8945_s3 + $0xaa8] ss:$16 sps:$4 sm:$0xff]   ;;  %v6599_v3 = vld [vmem:[%s8945_s3 + $0xac4] ss:$16 sps:$4 sm:$0xff]  }
 0x12c   : > { %2709 = vmatprep.subr.bf16.mxu0 %v6521_v4  ;;  %2750 = vmatprep.subr.bf16.mxu1 %v6524_v5  ;;  %v6602_v4 = vld [vmem:[%s8945_s3 + $0xacc] ss:$16 sps:$4 sm:$0xff]  }
 0x12f   : > { %2710 = vmatpush1.bf16.msra.mxu0 %v6519_v6  ;;  %2751 = vmatpush1.bf16.msra.mxu1 %v6522_v7  ;;  %v6597_v7 = vld [vmem:[%s8945_s3 + $0xac0] ss:$16 sps:$4 sm:$0xff]  }
 0x130   : > { %2711 = vmatprep.subr.bf16.mxu0 %v6527_v8  ;;  %2752 = vmatprep.subr.bf16.mxu1 %v6530_v9  ;;  %v6600_v8 = vld [vmem:[%s8945_s3 + $0xac8] ss:$16 sps:$4 sm:$0xff]  }
 0x133   : > { %2712 = vmatpush1.bf16.msra.mxu0 %v6525_v11  ;;  %2753 = vmatpush1.bf16.msra.mxu1 %v6528_v12 }
 0x134   : > { %2713 = vmatprep.subr.bf16.mxu0 %v6533_v13  ;;  %2754 = vmatprep.subr.bf16.mxu1 %v6536_v14 }
 0x137   : > { %2714 = vmatpush1.bf16.msra.mxu0 %v6531_v15  ;;  %2755 = vmatpush1.bf16.msra.mxu1 %v6534_v16 }
 0x138   : > { %2715 = vmatprep.subr.bf16.mxu0 %v6539_v17  ;;  %2756 = vmatprep.subr.bf16.mxu1 %v6542_v19 }
 0x13b   : > { %2716 = vmatpush1.bf16.msra.mxu0 %v6537_v21  ;;  %2757 = vmatpush1.bf16.msra.mxu1 %v6540_v22  ;;  %v6611_v22 = vld [vmem:[%s8945_s3 + $0xb04] ss:$16 sps:$4 sm:$0xff]  }
 0x13c   : > { %2717 = vmatprep.subr.bf16.mxu0 %v6545_v18  ;;  %2758 = vmatprep.subr.bf16.mxu1 %v6548_v23  ;;  %v6614_v18 = vld [vmem:[%s8945_s3 + $0xb0c] ss:$16 sps:$4 sm:$0xff]   ;;  %v6609_v23 = vld [vmem:[%s8945_s3 + $0xb00] ss:$16 sps:$4 sm:$0xff]  }
 0x13f   : > { %2718 = vmatpush1.bf16.msra.mxu0 %v6543_v24  ;;  %2759 = vmatpush1.bf16.msra.mxu1 %v6546_v25  ;;  %v6612_v24 = vld [vmem:[%s8945_s3 + $0xb08] ss:$16 sps:$4 sm:$0xff]   ;;  %v6617_v25 = vld [vmem:[%s8945_s3 + $0xb24] ss:$16 sps:$4 sm:$0xff]  }
 0x140   : > { %2719 = vmatprep.subr.bf16.mxu0 %v6551_v26  ;;  %2760 = vmatprep.subr.bf16.mxu1 %v6554_v27  ;;  %v6620_v26 = vld [vmem:[%s8945_s3 + $0xb2c] ss:$16 sps:$4 sm:$0xff]   ;;  %v6615_v27 = vld [vmem:[%s8945_s3 + $0xb20] ss:$16 sps:$4 sm:$0xff]  }
 0x143   : > { %2720 = vmatpush1.bf16.msra.mxu0 %v6549_v28  ;;  %2761 = vmatpush1.bf16.msra.mxu1 %v6552_v29  ;;  %v6618_v28 = vld [vmem:[%s8945_s3 + $0xb28] ss:$16 sps:$4 sm:$0xff]   ;;  %v6623_v29 = vld [vmem:[%s8945_s3 + $0xb44] ss:$16 sps:$4 sm:$0xff]  }
 0x144   : > { %2721 = vmatprep.subr.bf16.mxu0 %v6557_v31  ;;  %2762 = vmatprep.subr.bf16.mxu1 %v6560_v32  ;;  %v6621_v31 = vld [vmem:[%s8945_s3 + $0xb40] ss:$16 sps:$4 sm:$0xff]   ;;  %v6624_v32 = vld [vmem:[%s8945_s3 + $0xb48] ss:$16 sps:$4 sm:$0xff]  }
 0x147   : > { %2722 = vmatpush1.bf16.msra.mxu0 %v6555_v35  ;;  %2763 = vmatpush1.bf16.msra.mxu1 %v6558_v36  ;;  %v6627_v35 = vld [vmem:[%s8945_s3 + $0xb60] ss:$16 sps:$4 sm:$0xff]   ;;  %v6630_v36 = vld [vmem:[%s8945_s3 + $0xb68] ss:$16 sps:$4 sm:$0xff]  }
 0x148   : > { %3176 = vmatprep.subr.bf16.mxu0 %v6563_v37  ;;  %3217 = vmatprep.subr.bf16.mxu1 %v6566_v10  ;;  %v6635_v37 = vld [vmem:[%s8945_s3 + $0xb84] ss:$16 sps:$4 sm:$0xff]   ;;  %v6638_v10 = vld [vmem:[%s8945_s3 + $0xb8c] ss:$16 sps:$4 sm:$0xff]  }
 0x14a   : > { %2724 = vmatmul.mubr.bf16.vlgmr.msra.gmra.mrb[16].mxu0 %v2361_v40  ;;  %2765 = vmatmul.mubr.bf16.vlgmr.msra.gmra.mrb[16].mxu1 %v2361_v40  ;;  %v6641_v40 = vld [vmem:[%s8945_s3 + $0xba4] ss:$16 sps:$4 sm:$0xff]  }
 0x14b   : > { %3177 = vmatpush1.bf16.msra.mxu0 %v6561_v38  ;;  %3218 = vmatpush1.bf16.msra.mxu1 %v6564_v41  ;;  %v6633_v38 = vld [vmem:[%s8945_s3 + $0xb80] ss:$16 sps:$4 sm:$0xff]   ;;  %v6644_v41 = vld [vmem:[%s8945_s3 + $0xbac] ss:$16 sps:$4 sm:$0xff]  }
 0x14c   : > { %3178 = vmatprep.subr.bf16.mxu0 %v6569_v42  ;;  %3219 = vmatprep.subr.bf16.mxu1 %v6572_v43  ;;  %v6639_v42 = vld [vmem:[%s8945_s3 + $0xba0] ss:$16 sps:$4 sm:$0xff]   ;;  %v6642_v43 = vld [vmem:[%s8945_s3 + $0xba8] ss:$16 sps:$4 sm:$0xff]  }
 0x14d   : > { %3208 = vmatprep.mubr.bf16.mxu0 %v2853_v44  ;;  %3249 = vmatprep.mubr.bf16.mxu1 %v2853_v44  ;;  %v6647_v44 = vld [vmem:[%s8945_s3 + $0xbc4] ss:$16 sps:$4 sm:$0xff]  }
 0x14f   : > { %3179 = vmatpush1.bf16.msra.mxu0 %v6567_v45  ;;  %3220 = vmatpush1.bf16.msra.mxu1 %v6570_v46  ;;  %v6650_v45 = vld [vmem:[%s8945_s3 + $0xbcc] ss:$16 sps:$4 sm:$0xff]   ;;  %v6645_v46 = vld [vmem:[%s8945_s3 + $0xbc0] ss:$16 sps:$4 sm:$0xff]  }
 0x150   : > { %3180 = vmatprep.subr.bf16.mxu0 %v6575_v47  ;;  %3221 = vmatprep.subr.bf16.mxu1 %v6578_v48  ;;  %v6648_v47 = vld [vmem:[%s8945_s3 + $0xbc8] ss:$16 sps:$4 sm:$0xff]   ;;  %v6653_v48 = vld [vmem:[%s8945_s3 + $0xbe4] ss:$16 sps:$4 sm:$0xff]  }
 0x153   : > { %3181 = vmatpush1.bf16.msra.mxu0 %v6573_v49  ;;  %3222 = vmatpush1.bf16.msra.mxu1 %v6576_v52  ;;  %v6656_v49 = vld [vmem:[%s8945_s3 + $0xbec] ss:$16 sps:$4 sm:$0xff]   ;;  %v6651_v52 = vld [vmem:[%s8945_s3 + $0xbe0] ss:$16 sps:$4 sm:$0xff]  }
 0x154   : > { %3182 = vmatprep.subr.bf16.mxu0 %v6581_v53  ;;  %3223 = vmatprep.subr.bf16.mxu1 %v6584_v56  ;;  %v6654_v53 = vld [vmem:[%s8945_s3 + $0xbe8] ss:$16 sps:$4 sm:$0xff]   ;;  %v6659_v56 = vld [vmem:[%s8945_s3 + $0xc04] ss:$16 sps:$4 sm:$0xff]  }
 0x157   : > { %3183 = vmatpush1.bf16.msra.mxu0 %v6579_v57  ;;  %3224 = vmatpush1.bf16.msra.mxu1 %v6582_v58  ;;  %v6662_v57 = vld [vmem:[%s8945_s3 + $0xc0c] ss:$16 sps:$4 sm:$0xff]   ;;  %v2852_v58 = vrot.slane %v8059_v33, 1 }
 0x158   : > { %3184 = vmatprep.subr.bf16.mxu0 %v6587_v59  ;;  %3225 = vmatprep.subr.bf16.mxu1 %v6590_v60  ;;  %v8289_v59 = vld.sshfl [vmem:[%s8279_s29] sm:$0x11 pattern:$0x76325410]  ;;  %v6668_v33 = vld [vmem:[%s8945_s3 + $0xc2c] ss:$16 sps:$4 sm:$0xff]  }
 0x159   : > { %v6657_v60 = vld [vmem:[%s8945_s3 + $0xc00] ss:$16 sps:$4 sm:$0xff]  }
 0x15b   : > { %3185 = vmatpush1.bf16.msra.mxu0 %v6585_v61  ;;  %3226 = vmatpush1.bf16.msra.mxu1 %v6588_v62  ;;  %v6660_v61 = vld [vmem:[%s8945_s3 + $0xc08] ss:$16 sps:$4 sm:$0xff]   ;;  %v6665_v62 = vld [vmem:[%s8945_s3 + $0xc24] ss:$16 sps:$4 sm:$0xff]  }
 0x15c   : > { %3186 = vmatprep.subr.bf16.mxu0 %v6593_v63  ;;  %3227 = vmatprep.subr.bf16.mxu1 %v6596_v0  ;;  %v3336_v63 = vcombine.high %v8289_v59, %v8289_v59  ;;  %v6663_v0 = vld [vmem:[%s8945_s3 + $0xc20] ss:$16 sps:$4 sm:$0xff]  }
 0x15d   : > { %v1264_v5 = vpop.f32.mrb[4].mxu0  ;;  %v1305_v6 = vpop.f32.mrb[4].mxu1 }
 0x15e   : > { %v8155_v9 = vadd.f32 %v1264_v5, %v7941_v50  ;;  %v8158_v11 = vadd.f32 %v1305_v6, %v7943_v51  ;;  %v1266_v12 = vpop.f32.mrb[5].mxu0  ;;  %v1307_v13 = vpop.f32.mrb[5].mxu1  ;;  %v6605_v50 = vld [vmem:[%s8945_s3 + $0xae4] ss:$16 sps:$4 sm:$0xff]   ;;  %v6608_v51 = vld [vmem:[%s8945_s3 + $0xaec] ss:$16 sps:$4 sm:$0xff]  }
 0x15f   : > { %v8161_v14 = vadd.f32 %v1266_v12, %v7951_v54  ;;  %v8164_v15 = vadd.f32 %v1307_v13, %v7953_v55  ;;  %v1268_v16 = vpop.f32.mrb[6].mxu0  ;;  %v1309_v17 = vpop.f32.mrb[6].mxu1  ;;  %3187 = vmatpush1.bf16.msra.mxu0 %v6591_v1  ;;  %3228 = vmatpush1.bf16.msra.mxu1 %v6594_v2  ;;  %v6603_v54 = vld [vmem:[%s8945_s3 + $0xae0] ss:$16 sps:$4 sm:$0xff]   ;;  %v6606_v55 = vld [vmem:[%s8945_s3 + $0xae8] ss:$16 sps:$4 sm:$0xff]  }
 0x160   : > { %v1269_v19 = vpop.f32.mrb[7].mxu0  ;;  %v1310_v21 = vpop.f32.mrb[7].mxu1  ;;  %3188 = vmatprep.subr.bf16.mxu0 %v6599_v3  ;;  %3229 = vmatprep.subr.bf16.mxu1 %v6602_v4  ;;  %v6666_v1 = vld [vmem:[%s8945_s3 + $0xc28] ss:$16 sps:$4 sm:$0xff]   ;;  %v6671_v2 = vld [vmem:[%s8945_s3 + $0xc44] ss:$16 sps:$4 sm:$0xff]  }
 0x161   : > { %v6674_v3 = vld [vmem:[%s8945_s3 + $0xc4c] ss:$16 sps:$4 sm:$0xff]   ;;  %v6669_v4 = vld [vmem:[%s8945_s3 + $0xc40] ss:$16 sps:$4 sm:$0xff]   ;;  %v6672_v5 = vld [vmem:[%s8945_s3 + $0xc48] ss:$16 sps:$4 sm:$0xff]  }
 0x162   : > { %v6677_v6 = vld [vmem:[%s8945_s3 + $0xc64] ss:$16 sps:$4 sm:$0xff]   ;;  %v6678_v12 = vld [vmem:[%s8945_s3 + $0xc68] ss:$16 sps:$4 sm:$0xff]   ;;  %v6686_v16 = vld [vmem:[%s8945_s3 + $0xc8c] ss:$16 sps:$4 sm:$0xff]  }
 0x163   : > { %3189 = vmatpush1.bf16.msra.mxu0 %v6597_v7  ;;  %3230 = vmatpush1.bf16.msra.mxu1 %v6600_v8  ;;  %v6680_v7 = vld [vmem:[%s8945_s3 + $0xc6c] ss:$16 sps:$4 sm:$0xff]   ;;  %v6675_v8 = vld [vmem:[%s8945_s3 + $0xc60] ss:$16 sps:$4 sm:$0xff]   ;;  %v6683_v13 = vld [vmem:[%s8945_s3 + $0xc84] ss:$16 sps:$4 sm:$0xff]  }
 0x164   : > { %3190 = vmatprep.subr.bf16.mxu0 %v6605_v50  ;;  %3231 = vmatprep.subr.bf16.mxu1 %v6608_v51  ;;  %v6681_v17 = vld [vmem:[%s8945_s3 + $0xc80] ss:$16 sps:$4 sm:$0xff]   ;;  %v6684_v19 = vld [vmem:[%s8945_s3 + $0xc88] ss:$16 sps:$4 sm:$0xff]   ;;  %v6689_v21 = vld [vmem:[%s8945_s3 + $0xca4] ss:$16 sps:$4 sm:$0xff]  }
 0x165   : > { %v6692_v50 = vld [vmem:[%s8945_s3 + $0xcac] ss:$16 sps:$4 sm:$0xff]   ;;  %v6687_v51 = vld [vmem:[%s8945_s3 + $0xca0] ss:$16 sps:$4 sm:$0xff]  }
 0x167   : > { %3191 = vmatpush1.bf16.msra.mxu0 %v6603_v54  ;;  %3232 = vmatpush1.bf16.msra.mxu1 %v6606_v55  ;;  %v6690_v54 = vld [vmem:[%s8945_s3 + $0xca8] ss:$16 sps:$4 sm:$0xff]   ;;  %v6695_v55 = vld [vmem:[%s8945_s3 + $0xcc4] ss:$16 sps:$4 sm:$0xff]  }
 0x168   : > { %3192 = vmatprep.subr.bf16.mxu0 %v6611_v22  ;;  %3233 = vmatprep.subr.bf16.mxu1 %v6614_v18  ;;  %v6698_v22 = vld [vmem:[%s8945_s3 + $0xccc] ss:$16 sps:$4 sm:$0xff]  }
 0x16b   : > { %3193 = vmatpush1.bf16.msra.mxu0 %v6609_v23  ;;  %3234 = vmatpush1.bf16.msra.mxu1 %v6612_v24 }
 0x16c   : > { %3194 = vmatprep.subr.bf16.mxu0 %v6617_v25  ;;  %3235 = vmatprep.subr.bf16.mxu1 %v6620_v26 }
 0x16f   : > { %3195 = vmatpush1.bf16.msra.mxu0 %v6615_v27  ;;  %3236 = vmatpush1.bf16.msra.mxu1 %v6618_v28 }
 0x170   : > { %3196 = vmatprep.subr.bf16.mxu0 %v6623_v29  ;;  %3237 = vmatprep.subr.bf16.mxu1 %v6626_v30 }
 0x173   : > { %3197 = vmatpush1.bf16.msra.mxu0 %v6621_v31  ;;  %3238 = vmatpush1.bf16.msra.mxu1 %v6624_v32 }
 0x174   : > { %3198 = vmatprep.subr.bf16.mxu0 %v6629_v20  ;;  %3239 = vmatprep.subr.bf16.mxu1 %v6632_v34  ;;  %v6699_v34 = vld [vmem:[%s8945_s3 + $0xce0] ss:$16 sps:$4 sm:$0xff]  }
 0x177   : > { %3199 = vmatpush1.bf16.msra.mxu0 %v6627_v35  ;;  %3240 = vmatpush1.bf16.msra.mxu1 %v6630_v36  ;;  %v6702_v35 = vld [vmem:[%s8945_s3 + $0xce8] ss:$16 sps:$4 sm:$0xff]   ;;  %v6707_v36 = vld [vmem:[%s8945_s3 + $0xd04] ss:$16 sps:$4 sm:$0xff]  }
 0x178   : > { %3200 = vmatprep.subr.bf16.mxu0 %v6635_v37  ;;  %3241 = vmatprep.subr.bf16.mxu1 %v6638_v10  ;;  %v6710_v37 = vld [vmem:[%s8945_s3 + $0xd0c] ss:$16 sps:$4 sm:$0xff]   ;;  %v6705_v10 = vld [vmem:[%s8945_s3 + $0xd00] ss:$16 sps:$4 sm:$0xff]  }
 0x17b   : > { %3201 = vmatpush1.bf16.msra.mxu0 %v6633_v38  ;;  %3242 = vmatpush1.bf16.msra.mxu1 %v6636_v39  ;;  %v6708_v38 = vld [vmem:[%s8945_s3 + $0xd08] ss:$16 sps:$4 sm:$0xff]   ;;  %v6713_v39 = vld [vmem:[%s8945_s3 + $0xd24] ss:$16 sps:$4 sm:$0xff]  }
 0x17c   : > { %3202 = vmatprep.subr.bf16.mxu0 %v6641_v40  ;;  %3243 = vmatprep.subr.bf16.mxu1 %v6644_v41  ;;  %v6716_v40 = vld [vmem:[%s8945_s3 + $0xd2c] ss:$16 sps:$4 sm:$0xff]   ;;  %v6711_v41 = vld [vmem:[%s8945_s3 + $0xd20] ss:$16 sps:$4 sm:$0xff]  }
 0x17f   : > { %3203 = vmatpush1.bf16.msra.mxu0 %v6639_v42  ;;  %3244 = vmatpush1.bf16.msra.mxu1 %v6642_v43  ;;  %v6714_v42 = vld [vmem:[%s8945_s3 + $0xd28] ss:$16 sps:$4 sm:$0xff]   ;;  %v6719_v43 = vld [vmem:[%s8945_s3 + $0xd44] ss:$16 sps:$4 sm:$0xff]  }
 0x180   : > { %3204 = vmatprep.subr.bf16.mxu0 %v6647_v44  ;;  %3245 = vmatprep.subr.bf16.mxu1 %v6650_v45  ;;  %v6722_v44 = vld [vmem:[%s8945_s3 + $0xd4c] ss:$16 sps:$4 sm:$0xff]   ;;  %v6717_v45 = vld [vmem:[%s8945_s3 + $0xd40] ss:$16 sps:$4 sm:$0xff]  }
 0x183   : > { %3205 = vmatpush1.bf16.msra.mxu0 %v6645_v46  ;;  %3246 = vmatpush1.bf16.msra.mxu1 %v6648_v47  ;;  %v6720_v46 = vld [vmem:[%s8945_s3 + $0xd48] ss:$16 sps:$4 sm:$0xff]   ;;  %v6725_v47 = vld [vmem:[%s8945_s3 + $0xd64] ss:$16 sps:$4 sm:$0xff]  }
 0x184   : > { %3206 = vmatprep.subr.bf16.mxu0 %v6653_v48  ;;  %3247 = vmatprep.subr.bf16.mxu1 %v6656_v49  ;;  %v6728_v48 = vld [vmem:[%s8945_s3 + $0xd6c] ss:$16 sps:$4 sm:$0xff]   ;;  %v6723_v49 = vld [vmem:[%s8945_s3 + $0xd60] ss:$16 sps:$4 sm:$0xff]  }
 0x187   : > { %3207 = vmatpush1.bf16.msra.mxu0 %v6651_v52  ;;  %3248 = vmatpush1.bf16.msra.mxu1 %v6654_v53  ;;  %v6726_v52 = vld [vmem:[%s8945_s3 + $0xd68] ss:$16 sps:$4 sm:$0xff]   ;;  %v6731_v53 = vld [vmem:[%s8945_s3 + $0xd84] ss:$16 sps:$4 sm:$0xff]  }
 0x188   : > { %3659 = vmatprep.subr.bf16.mxu0 %v6659_v56  ;;  %3700 = vmatprep.subr.bf16.mxu1 %v6662_v57  ;;  %v6734_v56 = vld [vmem:[%s8945_s3 + $0xd8c] ss:$16 sps:$4 sm:$0xff]   ;;  %v6729_v57 = vld [vmem:[%s8945_s3 + $0xd80] ss:$16 sps:$4 sm:$0xff]  }
 0x18a   : > { %3209 = vmatmul.mubr.bf16.vlgmr.msra.gmra.mrb[20].mxu0 %v2852_v58  ;;  %3250 = vmatmul.mubr.bf16.vlgmr.msra.gmra.mrb[20].mxu1 %v2852_v58  ;;  %v6732_v58 = vld [vmem:[%s8945_s3 + $0xd88] ss:$16 sps:$4 sm:$0xff]  }
 0x18b   : > { %3660 = vmatpush1.bf16.msra.mxu0 %v6657_v60  ;;  %3701 = vmatpush1.bf16.msra.mxu1 %v6660_v61  ;;  %v6737_v60 = vld [vmem:[%s8945_s3 + $0xda4] ss:$16 sps:$4 sm:$0xff]   ;;  %v6740_v61 = vld [vmem:[%s8945_s3 + $0xdac] ss:$16 sps:$4 sm:$0xff]  }
 0x18c   : > { %3661 = vmatprep.subr.bf16.mxu0 %v6665_v62  ;;  %3702 = vmatprep.subr.bf16.mxu1 %v6668_v33  ;;  %v8462_v62 = vld.sshfl [vmem:[%s8279_s29] sm:$0x33 pattern:$0x76325410] }
 0x18d   : > { %3691 = vmatprep.mubr.bf16.mxu0 %v3336_v63  ;;  %3732 = vmatprep.mubr.bf16.mxu1 %v3336_v63  ;;  %v6735_v33 = vld [vmem:[%s8945_s3 + $0xda0] ss:$16 sps:$4 sm:$0xff]   ;;  %v6738_v63 = vld [vmem:[%s8945_s3 + $0xda8] ss:$16 sps:$4 sm:$0xff]  }
 0x18f   : > { %3662 = vmatpush1.bf16.msra.mxu0 %v6663_v0  ;;  %3703 = vmatpush1.bf16.msra.mxu1 %v6666_v1  ;;  %v6743_v0 = vld [vmem:[%s8945_s3 + $0xdc4] ss:$16 sps:$4 sm:$0xff]   ;;  %v6746_v1 = vld [vmem:[%s8945_s3 + $0xdcc] ss:$16 sps:$4 sm:$0xff]  }
 0x190   : > { %3663 = vmatprep.subr.bf16.mxu0 %v6671_v2  ;;  %3704 = vmatprep.subr.bf16.mxu1 %v6674_v3  ;;  %v3819_v2 = vcombine.high %v8462_v62, %v8462_v62  ;;  %v6741_v3 = vld [vmem:[%s8945_s3 + $0xdc0] ss:$16 sps:$4 sm:$0xff]  }
 0x193   : > { %3664 = vmatpush1.bf16.msra.mxu0 %v6669_v4  ;;  %3705 = vmatpush1.bf16.msra.mxu1 %v6672_v5  ;;  %v6744_v4 = vld [vmem:[%s8945_s3 + $0xdc8] ss:$16 sps:$4 sm:$0xff]   ;;  %v6749_v5 = vld [vmem:[%s8945_s3 + $0xde4] ss:$16 sps:$4 sm:$0xff]  }
 0x194   : > { %3665 = vmatprep.subr.bf16.mxu0 %v6677_v6  ;;  %3706 = vmatprep.subr.bf16.mxu1 %v6680_v7  ;;  %v6752_v6 = vld [vmem:[%s8945_s3 + $0xdec] ss:$16 sps:$4 sm:$0xff]   ;;  %v3830_v7 = vshll.u32 %v3819_v2, 16 }
 0x197   : > { %3666 = vmatpush1.bf16.msra.mxu0 %v6675_v8  ;;  %3707 = vmatpush1.bf16.msra.mxu1 %v6678_v12  ;;  %v6747_v8 = vld [vmem:[%s8945_s3 + $0xde0] ss:$16 sps:$4 sm:$0xff]   ;;  %v6750_v12 = vld [vmem:[%s8945_s3 + $0xde8] ss:$16 sps:$4 sm:$0xff]  }
 0x198   : > { %3667 = vmatprep.subr.bf16.mxu0 %v6683_v13  ;;  %3708 = vmatprep.subr.bf16.mxu1 %v6686_v16  ;;  %v6755_v13 = vld [vmem:[%s8945_s3 + $0xe04] ss:$16 sps:$4 sm:$0xff]   ;;  %v6758_v16 = vld [vmem:[%s8945_s3 + $0xe0c] ss:$16 sps:$4 sm:$0xff]  }
 0x19b   : > { %3668 = vmatpush1.bf16.msra.mxu0 %v6681_v17  ;;  %3709 = vmatpush1.bf16.msra.mxu1 %v6684_v19  ;;  %v3828_v17 = vshrl.u32 %v3819_v2, 16  ;;  %v3832_v19 = vrot.slane %v3830_v7, 1  ;;  %v6815_v2 = vld [vmem:[%s8945_s3 + $0xf44] ss:$16 sps:$4 sm:$0xff]   ;;  %v6824_v7 = vld [vmem:[%s8945_s3 + $0xf6c] ss:$16 sps:$4 sm:$0xff]  }
 0x19c   : > { %3669 = vmatprep.subr.bf16.mxu0 %v6689_v21  ;;  %3710 = vmatprep.subr.bf16.mxu1 %v6692_v50  ;;  %v6753_v21 = vld [vmem:[%s8945_s3 + $0xe00] ss:$16 sps:$4 sm:$0xff]   ;;  %v6756_v50 = vld [vmem:[%s8945_s3 + $0xe08] ss:$16 sps:$4 sm:$0xff]  }
 0x19d   : > { %v1745_v18 = vpop.f32.mrb[8].mxu0  ;;  %v1786_v23 = vpop.f32.mrb[8].mxu1 }
 0x19e   : > { %v8366_v24 = vadd.f32 %v1745_v18, %v8155_v9  ;;  %v8369_v25 = vadd.f32 %v1786_v23, %v8158_v11  ;;  %v1747_v26 = vpop.f32.mrb[9].mxu0  ;;  %v1788_v27 = vpop.f32.mrb[9].mxu1  ;;  %v6693_v9 = vld [vmem:[%s8945_s3 + $0xcc0] ss:$16 sps:$4 sm:$0xff]   ;;  %v6696_v11 = vld [vmem:[%s8945_s3 + $0xcc8] ss:$16 sps:$4 sm:$0xff]  }
 0x19f   : > { %v8372_v28 = vadd.f32 %v1747_v26, %v8161_v14  ;;  %v8375_v29 = vadd.f32 %v1788_v27, %v8164_v15  ;;  %v1749_v30 = vpop.f32.mrb[10].mxu0  ;;  %v1790_v31 = vpop.f32.mrb[10].mxu1  ;;  %3670 = vmatpush1.bf16.msra.mxu0 %v6687_v51  ;;  %3711 = vmatpush1.bf16.msra.mxu1 %v6690_v54  ;;  %v6701_v14 = vld [vmem:[%s8945_s3 + $0xce4] ss:$16 sps:$4 sm:$0xff]   ;;  %v6704_v15 = vld [vmem:[%s8945_s3 + $0xcec] ss:$16 sps:$4 sm:$0xff]  }
 0x1a0   : > { %v1750_v32 = vpop.f32.mrb[11].mxu0  ;;  %v1791_v20 = vpop.f32.mrb[11].mxu1  ;;  %3671 = vmatprep.subr.bf16.mxu0 %v6695_v55  ;;  %3712 = vmatprep.subr.bf16.mxu1 %v6698_v22  ;;  %v6761_v51 = vld [vmem:[%s8945_s3 + $0xe24] ss:$16 sps:$4 sm:$0xff]   ;;  %v6764_v54 = vld [vmem:[%s8945_s3 + $0xe2c] ss:$16 sps:$4 sm:$0xff]   ;;  %v3833_v55 = vor.u32 %v3832_v19, %v3828_v17 }
 0x1a1   : > { %v6759_v22 = vld [vmem:[%s8945_s3 + $0xe20] ss:$16 sps:$4 sm:$0xff]   ;;  %v6762_v18 = vld [vmem:[%s8945_s3 + $0xe28] ss:$16 sps:$4 sm:$0xff]   ;;  %v6767_v23 = vld [vmem:[%s8945_s3 + $0xe44] ss:$16 sps:$4 sm:$0xff]  }
 0x1a2   : > { %v6765_v26 = vld [vmem:[%s8945_s3 + $0xe40] ss:$16 sps:$4 sm:$0xff]   ;;  %v6768_v27 = vld [vmem:[%s8945_s3 + $0xe48] ss:$16 sps:$4 sm:$0xff]   ;;  %v6773_v30 = vld [vmem:[%s8945_s3 + $0xe64] ss:$16 sps:$4 sm:$0xff]  }
 0x1a3   : > { %3672 = vmatpush1.bf16.msra.mxu0 %v6693_v9  ;;  %3713 = vmatpush1.bf16.msra.mxu1 %v6696_v11  ;;  %v6776_v31 = vld [vmem:[%s8945_s3 + $0xe6c] ss:$16 sps:$4 sm:$0xff]   ;;  %v6771_v9 = vld [vmem:[%s8945_s3 + $0xe60] ss:$16 sps:$4 sm:$0xff]   ;;  %v6774_v11 = vld [vmem:[%s8945_s3 + $0xe68] ss:$16 sps:$4 sm:$0xff]  }
 0x1a4   : > { %3673 = vmatprep.subr.bf16.mxu0 %v6701_v14  ;;  %3714 = vmatprep.subr.bf16.mxu1 %v6704_v15  ;;  %v6779_v32 = vld [vmem:[%s8945_s3 + $0xe84] ss:$16 sps:$4 sm:$0xff]   ;;  %v6782_v20 = vld [vmem:[%s8945_s3 + $0xe8c] ss:$16 sps:$4 sm:$0xff]   ;;  %v6777_v14 = vld [vmem:[%s8945_s3 + $0xe80] ss:$16 sps:$4 sm:$0xff]  }
 0x1a5   : > { %v6780_v15 = vld [vmem:[%s8945_s3 + $0xe88] ss:$16 sps:$4 sm:$0xff]   ;;  %v6825_v17 = vld [vmem:[%s8945_s3 + $0xf80] ss:$16 sps:$4 sm:$0xff]  }
 0x1a6   : > { %v6828_v19 = vld [vmem:[%s8945_s3 + $0xf88] ss:$16 sps:$4 sm:$0xff]  }
 0x1a7   : > { %3674 = vmatpush1.bf16.msra.mxu0 %v6699_v34  ;;  %3715 = vmatpush1.bf16.msra.mxu1 %v6702_v35  ;;  %v6785_v34 = vld [vmem:[%s8945_s3 + $0xea4] ss:$16 sps:$4 sm:$0xff]   ;;  %v6788_v35 = vld [vmem:[%s8945_s3 + $0xeac] ss:$16 sps:$4 sm:$0xff]  }
 0x1a8   : > { %3675 = vmatprep.subr.bf16.mxu0 %v6707_v36  ;;  %3716 = vmatprep.subr.bf16.mxu1 %v6710_v37  ;;  %v6783_v36 = vld [vmem:[%s8945_s3 + $0xea0] ss:$16 sps:$4 sm:$0xff]   ;;  %v6786_v37 = vld [vmem:[%s8945_s3 + $0xea8] ss:$16 sps:$4 sm:$0xff]  }
 0x1ab   : > { %3676 = vmatpush1.bf16.msra.mxu0 %v6705_v10  ;;  %3717 = vmatpush1.bf16.msra.mxu1 %v6708_v38  ;;  %v6791_v10 = vld [vmem:[%s8945_s3 + $0xec4] ss:$16 sps:$4 sm:$0xff]   ;;  %v6794_v38 = vld [vmem:[%s8945_s3 + $0xecc] ss:$16 sps:$4 sm:$0xff]  }
 0x1ac   : > { %3677 = vmatprep.subr.bf16.mxu0 %v6713_v39  ;;  %3718 = vmatprep.subr.bf16.mxu1 %v6716_v40 }
 0x1af   : > { %3678 = vmatpush1.bf16.msra.mxu0 %v6711_v41  ;;  %3719 = vmatpush1.bf16.msra.mxu1 %v6714_v42 }
 0x1b0   : > { %3679 = vmatprep.subr.bf16.mxu0 %v6719_v43  ;;  %3720 = vmatprep.subr.bf16.mxu1 %v6722_v44 }
 0x1b3   : > { %3680 = vmatpush1.bf16.msra.mxu0 %v6717_v45  ;;  %3721 = vmatpush1.bf16.msra.mxu1 %v6720_v46 }
 0x1b4   : > { %3681 = vmatprep.subr.bf16.mxu0 %v6725_v47  ;;  %3722 = vmatprep.subr.bf16.mxu1 %v6728_v48 }
 0x1b7   : > { %3682 = vmatpush1.bf16.msra.mxu0 %v6723_v49  ;;  %3723 = vmatpush1.bf16.msra.mxu1 %v6726_v52 }
 0x1b8   : > { %3683 = vmatprep.subr.bf16.mxu0 %v6731_v53  ;;  %3724 = vmatprep.subr.bf16.mxu1 %v6734_v56  ;;  %v6795_v53 = vld [vmem:[%s8945_s3 + $0xee0] ss:$16 sps:$4 sm:$0xff]   ;;  %v6798_v56 = vld [vmem:[%s8945_s3 + $0xee8] ss:$16 sps:$4 sm:$0xff]  }
 0x1bb   : > { %3684 = vmatpush1.bf16.msra.mxu0 %v6729_v57  ;;  %3725 = vmatpush1.bf16.msra.mxu1 %v6732_v58  ;;  %v6803_v57 = vld [vmem:[%s8945_s3 + $0xf04] ss:$16 sps:$4 sm:$0xff]   ;;  %v6806_v58 = vld [vmem:[%s8945_s3 + $0xf0c] ss:$16 sps:$4 sm:$0xff]  }
 0x1bc   : > { %3685 = vmatprep.subr.bf16.mxu0 %v6737_v60  ;;  %3726 = vmatprep.subr.bf16.mxu1 %v6740_v61  ;;  %v6801_v60 = vld [vmem:[%s8945_s3 + $0xf00] ss:$16 sps:$4 sm:$0xff]   ;;  %v6804_v61 = vld [vmem:[%s8945_s3 + $0xf08] ss:$16 sps:$4 sm:$0xff]  }
 0x1bf   : > { %3686 = vmatpush1.bf16.msra.mxu0 %v6735_v33  ;;  %3727 = vmatpush1.bf16.msra.mxu1 %v6738_v63  ;;  %v6809_v33 = vld [vmem:[%s8945_s3 + $0xf24] ss:$16 sps:$4 sm:$0xff]   ;;  %v6812_v63 = vld [vmem:[%s8945_s3 + $0xf2c] ss:$16 sps:$4 sm:$0xff]  }
 0x1c0   : > { %3687 = vmatprep.subr.bf16.mxu0 %v6743_v0  ;;  %3728 = vmatprep.subr.bf16.mxu1 %v6746_v1  ;;  %v6807_v0 = vld [vmem:[%s8945_s3 + $0xf20] ss:$16 sps:$4 sm:$0xff]   ;;  %v6810_v1 = vld [vmem:[%s8945_s3 + $0xf28] ss:$16 sps:$4 sm:$0xff]  }
 0x1c3   : > { %3688 = vmatpush1.bf16.msra.mxu0 %v6741_v3  ;;  %3729 = vmatpush1.bf16.msra.mxu1 %v6744_v4  ;;  %v6818_v3 = vld [vmem:[%s8945_s3 + $0xf4c] ss:$16 sps:$4 sm:$0xff]   ;;  %v6813_v4 = vld [vmem:[%s8945_s3 + $0xf40] ss:$16 sps:$4 sm:$0xff]  }
 0x1c4   : > { %3689 = vmatprep.subr.bf16.mxu0 %v6749_v5  ;;  %3730 = vmatprep.subr.bf16.mxu1 %v6752_v6  ;;  %v6816_v5 = vld [vmem:[%s8945_s3 + $0xf48] ss:$16 sps:$4 sm:$0xff]   ;;  %v6821_v6 = vld [vmem:[%s8945_s3 + $0xf64] ss:$16 sps:$4 sm:$0xff]  }
 0x1c7   : > { %3690 = vmatpush1.bf16.msra.mxu0 %v6747_v8  ;;  %3731 = vmatpush1.bf16.msra.mxu1 %v6750_v12  ;;  %v6819_v8 = vld [vmem:[%s8945_s3 + $0xf60] ss:$16 sps:$4 sm:$0xff]   ;;  %v6822_v12 = vld [vmem:[%s8945_s3 + $0xf68] ss:$16 sps:$4 sm:$0xff]  }
 0x1c8   : > { %4156 = vmatprep.subr.bf16.mxu0 %v6755_v13  ;;  %4197 = vmatprep.subr.bf16.mxu1 %v6758_v16  ;;  %v6827_v13 = vld [vmem:[%s8945_s3 + $0xf84] ss:$16 sps:$4 sm:$0xff]   ;;  %v6830_v16 = vld [vmem:[%s8945_s3 + $0xf8c] ss:$16 sps:$4 sm:$0xff]  }
 0x1ca   : > { %3692 = vmatmul.mubr.bf16.vlgmr.msra.gmra.mrb[24].mxu0 %v8289_v59  ;;  %3733 = vmatmul.mubr.bf16.vlgmr.msra.gmra.mrb[24].mxu1 %v8289_v59  ;;  %v6770_v59 = vld [vmem:[%s8945_s3 + $0xe4c] ss:$16 sps:$4 sm:$0xff]  }
 0x1cb   : > { %4157 = vmatpush1.bf16.msra.mxu0 %v6753_v21  ;;  %4198 = vmatpush1.bf16.msra.mxu1 %v6756_v50  ;;  %v6833_v21 = vld [vmem:[%s8945_s3 + $0xfa4] ss:$16 sps:$4 sm:$0xff]   ;;  %v6836_v50 = vld [vmem:[%s8945_s3 + $0xfac] ss:$16 sps:$4 sm:$0xff]  }
 0x1cc   : > { %4158 = vmatprep.subr.bf16.mxu0 %v6761_v51  ;;  %4199 = vmatprep.subr.bf16.mxu1 %v6764_v54  ;;  %v6831_v51 = vld [vmem:[%s8945_s3 + $0xfa0] ss:$16 sps:$4 sm:$0xff]   ;;  %v6834_v54 = vld [vmem:[%s8945_s3 + $0xfa8] ss:$16 sps:$4 sm:$0xff]  }
 0x1cd   : > { %4188 = vmatprep.mubr.bf16.mxu0 %v3833_v55  ;;  %4229 = vmatprep.mubr.bf16.mxu1 %v3833_v55  ;;  %v6839_v55 = vld [vmem:[%s8945_s3 + $0xfc4] ss:$16 sps:$4 sm:$0xff]  }
 0x1cf   : > { %4159 = vmatpush1.bf16.msra.mxu0 %v6759_v22  ;;  %4200 = vmatpush1.bf16.msra.mxu1 %v6762_v18  ;;  %v6842_v22 = vld [vmem:[%s8945_s3 + $0xfcc] ss:$16 sps:$4 sm:$0xff]   ;;  %v3823_v18 = vshll.u32 %v8462_v62, 16 }
 0x1d0   : > { %4160 = vmatprep.subr.bf16.mxu0 %v6767_v23  ;;  %4201 = vmatprep.subr.bf16.mxu1 %v6770_v59  ;;  %v6837_v23 = vld [vmem:[%s8945_s3 + $0xfc0] ss:$16 sps:$4 sm:$0xff]   ;;  %v6840_v59 = vld [vmem:[%s8945_s3 + $0xfc8] ss:$16 sps:$4 sm:$0xff]  }
 0x1d3   : > { %4161 = vmatpush1.bf16.msra.mxu0 %v6765_v26  ;;  %4202 = vmatpush1.bf16.msra.mxu1 %v6768_v27  ;;  %v6845_v26 = vld [vmem:[%s8945_s3 + $0xfe4] ss:$16 sps:$4 sm:$0xff]   ;;  %v6848_v27 = vld [vmem:[%s8945_s3 + $0xfec] ss:$16 sps:$4 sm:$0xff]  }
 0x1d4   : > { %4162 = vmatprep.subr.bf16.mxu0 %v6773_v30  ;;  %4203 = vmatprep.subr.bf16.mxu1 %v6776_v31  ;;  %v3821_v30 = vshrl.u32 %v8462_v62, 16  ;;  %v3825_v31 = vrot.slane %v3823_v18, 1  ;;  %v6854_v62 = vld [vmem:[%s8945_s3 + $0x100c] ss:$16 sps:$4 sm:$0xff]   ;;  %v6906_v18 = vld [vmem:[%s8945_s3 + $0x1128] ss:$16 sps:$4 sm:$0xff]  }
 0x1d7   : > { %4163 = vmatpush1.bf16.msra.mxu0 %v6771_v9  ;;  %4204 = vmatpush1.bf16.msra.mxu1 %v6774_v11  ;;  %v8699_v9 = vld.sshfl [vmem:[%s8279_s29] sm:$0x22 pattern:$0x76325410]  ;;  %s4936_s29 = sshll.u32 %s8965_s18, 2 }
 0x1d8   : > { %4164 = vmatprep.subr.bf16.mxu0 %v6779_v32  ;;  %4205 = vmatprep.subr.bf16.mxu1 %v6782_v20  ;;  %v6843_v11 = vld [vmem:[%s8945_s3 + $0xfe0] ss:$16 sps:$4 sm:$0xff]   ;;  %v6846_v32 = vld [vmem:[%s8945_s3 + $0xfe8] ss:$16 sps:$4 sm:$0xff]   ;;  %v6851_v20 = vld [vmem:[%s8945_s3 + $0x1004] ss:$16 sps:$4 sm:$0xff]   ;;  %s339_s19 = sadd.s32 %s4936_s29, %s7162_s27 }
 0x1d9   : > { %s340_s14 = scalar_lea.vmem %s8947_s5, %s339_s19 }
 0x1db   : > { %4165 = vmatpush1.bf16.msra.mxu0 %v6777_v14  ;;  %4206 = vmatpush1.bf16.msra.mxu1 %v6780_v15  ;;  %v4316_v14 = vcombine.high %v8699_v9, %v8699_v9  ;;  %v3826_v15 = vor.u32 %v3825_v31, %v3821_v30  ;;  %v6917_v30 = vld [vmem:[%s8945_s3 + $0x1164] ss:$16 sps:$4 sm:$0xff]   ;;  %v6920_v31 = vld [vmem:[%s8945_s3 + $0x116c] ss:$16 sps:$4 sm:$0xff]  }
 0x1dc   : > { %4166 = vmatprep.subr.bf16.mxu0 %v6785_v34  ;;  %4207 = vmatprep.subr.bf16.mxu1 %v6788_v35  ;;  %v6849_v34 = vld [vmem:[%s8945_s3 + $0x1000] ss:$16 sps:$4 sm:$0xff]   ;;  %v6852_v35 = vld [vmem:[%s8945_s3 + $0x1008] ss:$16 sps:$4 sm:$0xff]  }
 0x1dd   : > { %v2228_v39 = vpop.f32.mrb[12].mxu0  ;;  %v2269_v40 = vpop.f32.mrb[12].mxu1 }
 0x1de   : > { %v8577_v41 = vadd.f32 %v2228_v39, %v8366_v24  ;;  %v8580_v42 = vadd.f32 %v2269_v40, %v8369_v25  ;;  %v2230_v43 = vpop.f32.mrb[13].mxu0  ;;  %v2271_v44 = vpop.f32.mrb[13].mxu1  ;;  %v6789_v24 = vld [vmem:[%s8945_s3 + $0xec0] ss:$16 sps:$4 sm:$0xff]   ;;  %v6792_v25 = vld [vmem:[%s8945_s3 + $0xec8] ss:$16 sps:$4 sm:$0xff]  }
 0x1df   : > { %v8583_v45 = vadd.f32 %v2230_v43, %v8372_v28  ;;  %v8586_v46 = vadd.f32 %v2271_v44, %v8375_v29  ;;  %v2232_v47 = vpop.f32.mrb[14].mxu0  ;;  %v2273_v48 = vpop.f32.mrb[14].mxu1  ;;  %4167 = vmatpush1.bf16.msra.mxu0 %v6783_v36  ;;  %4208 = vmatpush1.bf16.msra.mxu1 %v6786_v37  ;;  %v6797_v28 = vld [vmem:[%s8945_s3 + $0xee4] ss:$16 sps:$4 sm:$0xff]   ;;  %v6800_v29 = vld [vmem:[%s8945_s3 + $0xeec] ss:$16 sps:$4 sm:$0xff]  }
 0x1e0   : > { %v2233_v49 = vpop.f32.mrb[15].mxu0  ;;  %v2274_v52 = vpop.f32.mrb[15].mxu1  ;;  %4168 = vmatprep.subr.bf16.mxu0 %v6791_v10  ;;  %4209 = vmatprep.subr.bf16.mxu1 %v6794_v38  ;;  %v6857_v36 = vld [vmem:[%s8945_s3 + $0x1024] ss:$16 sps:$4 sm:$0xff]   ;;  %v6860_v37 = vld [vmem:[%s8945_s3 + $0x102c] ss:$16 sps:$4 sm:$0xff]  }
 0x1e1   : > { %v4318_v10 = vrot.slane %v4316_v14, 1  ;;  %v6855_v38 = vld [vmem:[%s8945_s3 + $0x1020] ss:$16 sps:$4 sm:$0xff]   ;;  %v6858_v39 = vld [vmem:[%s8945_s3 + $0x1028] ss:$16 sps:$4 sm:$0xff]  }
 0x1e2   : > { %v6863_v40 = vld [vmem:[%s8945_s3 + $0x1044] ss:$16 sps:$4 sm:$0xff]   ;;  %v6866_v43 = vld [vmem:[%s8945_s3 + $0x104c] ss:$16 sps:$4 sm:$0xff]   ;;  %v6861_v44 = vld [vmem:[%s8945_s3 + $0x1040] ss:$16 sps:$4 sm:$0xff]  }
 0x1e3   : > { %4169 = vmatpush1.bf16.msra.mxu0 %v6789_v24  ;;  %4210 = vmatpush1.bf16.msra.mxu1 %v6792_v25  ;;  %v6864_v47 = vld [vmem:[%s8945_s3 + $0x1048] ss:$16 sps:$4 sm:$0xff]   ;;  %v6869_v48 = vld [vmem:[%s8945_s3 + $0x1064] ss:$16 sps:$4 sm:$0xff]   ;;  %v6872_v24 = vld [vmem:[%s8945_s3 + $0x106c] ss:$16 sps:$4 sm:$0xff]  }
 0x1e4   : > { %4170 = vmatprep.subr.bf16.mxu0 %v6797_v28  ;;  %4211 = vmatprep.subr.bf16.mxu1 %v6800_v29  ;;  %v6867_v25 = vld [vmem:[%s8945_s3 + $0x1060] ss:$16 sps:$4 sm:$0xff]   ;;  %v6870_v49 = vld [vmem:[%s8945_s3 + $0x1068] ss:$16 sps:$4 sm:$0xff]   ;;  %v6875_v52 = vld [vmem:[%s8945_s3 + $0x1084] ss:$16 sps:$4 sm:$0xff]  }
 0x1e5   : > { %v6878_v28 = vld [vmem:[%s8945_s3 + $0x108c] ss:$16 sps:$4 sm:$0xff]   ;;  %v6873_v29 = vld [vmem:[%s8945_s3 + $0x1080] ss:$16 sps:$4 sm:$0xff]  }
 0x1e6   : > { %v6921_v14 = vld [vmem:[%s8945_s3 + $0x1180] ss:$16 sps:$4 sm:$0xff]  }
 0x1e7   : > { %4171 = vmatpush1.bf16.msra.mxu0 %v6795_v53  ;;  %4212 = vmatpush1.bf16.msra.mxu1 %v6798_v56  ;;  %v6876_v53 = vld [vmem:[%s8945_s3 + $0x1088] ss:$16 sps:$4 sm:$0xff]   ;;  %v6881_v56 = vld [vmem:[%s8945_s3 + $0x10a4] ss:$16 sps:$4 sm:$0xff]  }
 0x1e8   : > { %4172 = vmatprep.subr.bf16.mxu0 %v6803_v57  ;;  %4213 = vmatprep.subr.bf16.mxu1 %v6806_v58  ;;  %v6884_v57 = vld [vmem:[%s8945_s3 + $0x10ac] ss:$16 sps:$4 sm:$0xff]   ;;  %v6879_v58 = vld [vmem:[%s8945_s3 + $0x10a0] ss:$16 sps:$4 sm:$0xff]  }
 0x1eb   : > { %4173 = vmatpush1.bf16.msra.mxu0 %v6801_v60  ;;  %4214 = vmatpush1.bf16.msra.mxu1 %v6804_v61  ;;  %v6882_v60 = vld [vmem:[%s8945_s3 + $0x10a8] ss:$16 sps:$4 sm:$0xff]   ;;  %v6887_v61 = vld [vmem:[%s8945_s3 + $0x10c4] ss:$16 sps:$4 sm:$0xff]  }
 0x1ec   : > { %4174 = vmatprep.subr.bf16.mxu0 %v6809_v33  ;;  %4215 = vmatprep.subr.bf16.mxu1 %v6812_v63  ;;  %v6890_v33 = vld [vmem:[%s8945_s3 + $0x10cc] ss:$16 sps:$4 sm:$0xff]  }
 0x1ef   : > { %4175 = vmatpush1.bf16.msra.mxu0 %v6807_v0  ;;  %4216 = vmatpush1.bf16.msra.mxu1 %v6810_v1 }
 0x1f0   : > { %4176 = vmatprep.subr.bf16.mxu0 %v6815_v2  ;;  %4217 = vmatprep.subr.bf16.mxu1 %v6818_v3 }
 0x1f3   : > { %4177 = vmatpush1.bf16.msra.mxu0 %v6813_v4  ;;  %4218 = vmatpush1.bf16.msra.mxu1 %v6816_v5 }
 0x1f4   : > { %4178 = vmatprep.subr.bf16.mxu0 %v6821_v6  ;;  %4219 = vmatprep.subr.bf16.mxu1 %v6824_v7 }
 0x1f7   : > { %4179 = vmatpush1.bf16.msra.mxu0 %v6819_v8  ;;  %4220 = vmatpush1.bf16.msra.mxu1 %v6822_v12 }
 0x1f8   : > { %4180 = vmatprep.subr.bf16.mxu0 %v6827_v13  ;;  %4221 = vmatprep.subr.bf16.mxu1 %v6830_v16  ;;  %v6891_v16 = vld [vmem:[%s8945_s3 + $0x10e0] ss:$16 sps:$4 sm:$0xff]  }
 0x1fb   : > { %4181 = vmatpush1.bf16.msra.mxu0 %v6825_v17  ;;  %4222 = vmatpush1.bf16.msra.mxu1 %v6828_v19  ;;  %v6894_v17 = vld [vmem:[%s8945_s3 + $0x10e8] ss:$16 sps:$4 sm:$0xff]   ;;  %v6899_v19 = vld [vmem:[%s8945_s3 + $0x1104] ss:$16 sps:$4 sm:$0xff]  }
 0x1fc   : > { %4182 = vmatprep.subr.bf16.mxu0 %v6833_v21  ;;  %4223 = vmatprep.subr.bf16.mxu1 %v6836_v50  ;;  %v6902_v21 = vld [vmem:[%s8945_s3 + $0x110c] ss:$16 sps:$4 sm:$0xff]   ;;  %v6897_v50 = vld [vmem:[%s8945_s3 + $0x1100] ss:$16 sps:$4 sm:$0xff]  }
 0x1ff   : > { %4183 = vmatpush1.bf16.msra.mxu0 %v6831_v51  ;;  %4224 = vmatpush1.bf16.msra.mxu1 %v6834_v54  ;;  %v6900_v51 = vld [vmem:[%s8945_s3 + $0x1108] ss:$16 sps:$4 sm:$0xff]   ;;  %v6905_v54 = vld [vmem:[%s8945_s3 + $0x1124] ss:$16 sps:$4 sm:$0xff]  }
 0x200   : > { %4184 = vmatprep.subr.bf16.mxu0 %v6839_v55  ;;  %4225 = vmatprep.subr.bf16.mxu1 %v6842_v22  ;;  %v6908_v55 = vld [vmem:[%s8945_s3 + $0x112c] ss:$16 sps:$4 sm:$0xff]   ;;  %v6903_v22 = vld [vmem:[%s8945_s3 + $0x1120] ss:$16 sps:$4 sm:$0xff]  }
 0x203   : > { %4185 = vmatpush1.bf16.msra.mxu0 %v6837_v23  ;;  %4226 = vmatpush1.bf16.msra.mxu1 %v6840_v59  ;;  %v6911_v23 = vld [vmem:[%s8945_s3 + $0x1144] ss:$16 sps:$4 sm:$0xff]   ;;  %v6914_v59 = vld [vmem:[%s8945_s3 + $0x114c] ss:$16 sps:$4 sm:$0xff]  }
 0x204   : > { %4186 = vmatprep.subr.bf16.mxu0 %v6845_v26  ;;  %4227 = vmatprep.subr.bf16.mxu1 %v6848_v27  ;;  %v6909_v26 = vld [vmem:[%s8945_s3 + $0x1140] ss:$16 sps:$4 sm:$0xff]   ;;  %v6912_v27 = vld [vmem:[%s8945_s3 + $0x1148] ss:$16 sps:$4 sm:$0xff]  }
 0x207   : > { %4187 = vmatpush1.bf16.msra.mxu0 %v6843_v11  ;;  %4228 = vmatpush1.bf16.msra.mxu1 %v6846_v32  ;;  %v6915_v11 = vld [vmem:[%s8945_s3 + $0x1160] ss:$16 sps:$4 sm:$0xff]   ;;  %v6918_v32 = vld [vmem:[%s8945_s3 + $0x1168] ss:$16 sps:$4 sm:$0xff]  }
 0x208   : > { %4641 = vmatprep.subr.bf16.mxu0 %v6851_v20  ;;  %4682 = vmatprep.subr.bf16.mxu1 %v6854_v62  ;;  %v6923_v20 = vld [vmem:[%s8945_s3 + $0x1184] ss:$16 sps:$4 sm:$0xff]   ;;  %v6926_v62 = vld [vmem:[%s8945_s3 + $0x118c] ss:$16 sps:$4 sm:$0xff]  }
 0x20a   : > { %4189 = vmatmul.mubr.bf16.vlgmr.msra.gmra.mrb[28].mxu0 %v3826_v15  ;;  %4230 = vmatmul.mubr.bf16.vlgmr.msra.gmra.mrb[28].mxu1 %v3826_v15  ;;  %v6924_v15 = vld [vmem:[%s8945_s3 + $0x1188] ss:$16 sps:$4 sm:$0xff]  }
 0x20b   : > { %4642 = vmatpush1.bf16.msra.mxu0 %v6849_v34  ;;  %4683 = vmatpush1.bf16.msra.mxu1 %v6852_v35  ;;  %v6929_v34 = vld [vmem:[%s8945_s3 + $0x11a4] ss:$16 sps:$4 sm:$0xff]   ;;  %v6932_v35 = vld [vmem:[%s8945_s3 + $0x11ac] ss:$16 sps:$4 sm:$0xff]  }
 0x20c   : > { %4643 = vmatprep.subr.bf16.mxu0 %v6857_v36  ;;  %4684 = vmatprep.subr.bf16.mxu1 %v6860_v37  ;;  %v6927_v36 = vld [vmem:[%s8945_s3 + $0x11a0] ss:$16 sps:$4 sm:$0xff]   ;;  %v6930_v37 = vld [vmem:[%s8945_s3 + $0x11a8] ss:$16 sps:$4 sm:$0xff]  }
 0x20d   : > { %4673 = vmatprep.mubr.bf16.mxu0 %v4318_v10  ;;  %4714 = vmatprep.mubr.bf16.mxu1 %v4318_v10  ;;  %v6935_v10 = vld [vmem:[%s8945_s3 + $0x11c4] ss:$16 sps:$4 sm:$0xff]  }
 0x20f   : > { %4644 = vmatpush1.bf16.msra.mxu0 %v6855_v38  ;;  %4685 = vmatpush1.bf16.msra.mxu1 %v6858_v39  ;;  %v6938_v38 = vld [vmem:[%s8945_s3 + $0x11cc] ss:$16 sps:$4 sm:$0xff]   ;;  %v6933_v39 = vld [vmem:[%s8945_s3 + $0x11c0] ss:$16 sps:$4 sm:$0xff]  }
 0x210   : > { %4645 = vmatprep.subr.bf16.mxu0 %v6863_v40  ;;  %4686 = vmatprep.subr.bf16.mxu1 %v6866_v43  ;;  %v6936_v40 = vld [vmem:[%s8945_s3 + $0x11c8] ss:$16 sps:$4 sm:$0xff]   ;;  %v6941_v43 = vld [vmem:[%s8945_s3 + $0x11e4] ss:$16 sps:$4 sm:$0xff]  }
 0x213   : > { %4646 = vmatpush1.bf16.msra.mxu0 %v6861_v44  ;;  %4687 = vmatpush1.bf16.msra.mxu1 %v6864_v47  ;;  %v6944_v44 = vld [vmem:[%s8945_s3 + $0x11ec] ss:$16 sps:$4 sm:$0xff]   ;;  %v6939_v47 = vld [vmem:[%s8945_s3 + $0x11e0] ss:$16 sps:$4 sm:$0xff]  }
 0x214   : > { %4647 = vmatprep.subr.bf16.mxu0 %v6869_v48  ;;  %4688 = vmatprep.subr.bf16.mxu1 %v6872_v24  ;;  %v6942_v48 = vld [vmem:[%s8945_s3 + $0x11e8] ss:$16 sps:$4 sm:$0xff]   ;;  %v4317_v24 = vrot.slane %v8699_v9, 1 }
 0x217   : > { %4648 = vmatpush1.bf16.msra.mxu0 %v6867_v25  ;;  %4689 = vmatpush1.bf16.msra.mxu1 %v6870_v49 }
 0x218   : > { %4649 = vmatprep.subr.bf16.mxu0 %v6875_v52  ;;  %4690 = vmatprep.subr.bf16.mxu1 %v6878_v28 }
 0x21b   : > { %4650 = vmatpush1.bf16.msra.mxu0 %v6873_v29  ;;  %4691 = vmatpush1.bf16.msra.mxu1 %v6876_v53 }
 0x21c   : > { %4651 = vmatprep.subr.bf16.mxu0 %v6881_v56  ;;  %4692 = vmatprep.subr.bf16.mxu1 %v6884_v57 }
 0x21d   : > { %v2725_v63 = vpop.f32.mrb[16].mxu0  ;;  %v2766_v0 = vpop.f32.mrb[16].mxu1 }
 0x21e   : > { %v8788_v1 = vadd.f32 %v2725_v63, %v8577_v41  ;;  %v8791_v2 = vadd.f32 %v2766_v0, %v8580_v42  ;;  %v2727_v3 = vpop.f32.mrb[17].mxu0  ;;  %v2768_v4 = vpop.f32.mrb[17].mxu1  ;;  %v6885_v41 = vld [vmem:[%s8945_s3 + $0x10c0] ss:$16 sps:$4 sm:$0xff]   ;;  %v6888_v42 = vld [vmem:[%s8945_s3 + $0x10c8] ss:$16 sps:$4 sm:$0xff]  }
 0x21f   : > { %v8794_v5 = vadd.f32 %v2727_v3, %v8583_v45  ;;  %v8797_v6 = vadd.f32 %v2768_v4, %v8586_v46  ;;  %v2729_v7 = vpop.f32.mrb[18].mxu0  ;;  %v2770_v8 = vpop.f32.mrb[18].mxu1  ;;  %4652 = vmatpush1.bf16.msra.mxu0 %v6879_v58  ;;  %4693 = vmatpush1.bf16.msra.mxu1 %v6882_v60  ;;  %v6893_v45 = vld [vmem:[%s8945_s3 + $0x10e4] ss:$16 sps:$4 sm:$0xff]   ;;  %v6896_v46 = vld [vmem:[%s8945_s3 + $0x10ec] ss:$16 sps:$4 sm:$0xff]  }
 0x220   : > { %v2730_v12 = vpop.f32.mrb[19].mxu0  ;;  %v2771_v13 = vpop.f32.mrb[19].mxu1  ;;  %4653 = vmatprep.subr.bf16.mxu0 %v6887_v61  ;;  %4694 = vmatprep.subr.bf16.mxu1 %v6890_v33 }
 0x223   : > { %4654 = vmatpush1.bf16.msra.mxu0 %v6885_v41  ;;  %4695 = vmatpush1.bf16.msra.mxu1 %v6888_v42 }
 0x224   : > { %4655 = vmatprep.subr.bf16.mxu0 %v6893_v45  ;;  %4696 = vmatprep.subr.bf16.mxu1 %v6896_v46 }
 0x227   : > { %4656 = vmatpush1.bf16.msra.mxu0 %v6891_v16  ;;  %4697 = vmatpush1.bf16.msra.mxu1 %v6894_v17 }
 0x228   : > { %4657 = vmatprep.subr.bf16.mxu0 %v6899_v19  ;;  %4698 = vmatprep.subr.bf16.mxu1 %v6902_v21 }
 0x22b   : > { %4658 = vmatpush1.bf16.msra.mxu0 %v6897_v50  ;;  %4699 = vmatpush1.bf16.msra.mxu1 %v6900_v51 }
 0x22c   : > { %4659 = vmatprep.subr.bf16.mxu0 %v6905_v54  ;;  %4700 = vmatprep.subr.bf16.mxu1 %v6908_v55  ;;  %v4729_v55 = vlaneseq }
 0x22f   : > { %4660 = vmatpush1.bf16.msra.mxu0 %v6903_v22  ;;  %4701 = vmatpush1.bf16.msra.mxu1 %v6906_v18  ;;  %v4730_v22 = vshrl.u32 %v4729_v55, 7 }
 0x230   : > { %4661 = vmatprep.subr.bf16.mxu0 %v6911_v23  ;;  %4702 = vmatprep.subr.bf16.mxu1 %v6914_v59  ;;  %v4727_v59 = vld [vmem:[%s8946_s4] sm:$0xf] }
 0x231   : > { %v4731_v18 = vsub.s32 0, %v4730_v22  ;;  %v4739_v23 = vsub.s32 2, %v4730_v22 }
 0x233   : > { %4662 = vmatpush1.bf16.msra.mxu0 %v6909_v26  ;;  %4703 = vmatpush1.bf16.msra.mxu1 %v6912_v27  ;;  %v4735_v26 = vsub.s32 1, %v4730_v22  ;;  %v4743_v27 = vsub.s32 3, %v4730_v22 }
 0x234   : > { %4663 = vmatprep.subr.bf16.mxu0 %v6917_v30  ;;  %4704 = vmatprep.subr.bf16.mxu1 %v6920_v31  ;;  %v6985_v30 = vmov 1966171168  }
 0x235   : > { %v4768_v31 = vunpack.c.l.s4 %v6985_v30 }
 0x237   : > { %4664 = vmatpush1.bf16.msra.mxu0 %v6915_v11  ;;  %4705 = vmatpush1.bf16.msra.mxu1 %v6918_v32  ;;  %v4732_v11 = vrot.slane %v4727_v59, %v4731_v18  ;;  %v4740_v32 = vrot.slane %v4727_v59, %v4739_v23 }
 0x238   : > { %4665 = vmatprep.subr.bf16.mxu0 %v6923_v20  ;;  %4706 = vmatprep.subr.bf16.mxu1 %v6926_v62 }
 0x23b   : > { %4666 = vmatpush1.bf16.msra.mxu0 %v6921_v14  ;;  %4707 = vmatpush1.bf16.msra.mxu1 %v6924_v15  ;;  %v4736_v14 = vrot.slane %v4727_v59, %v4735_v26  ;;  %v4744_v15 = vrot.slane %v4727_v59, %v4743_v27 }
 0x23c   : > { %4667 = vmatprep.subr.bf16.mxu0 %v6929_v34  ;;  %4708 = vmatprep.subr.bf16.mxu1 %v6932_v35 }
 0x23f   : > { %4668 = vmatpush1.bf16.msra.mxu0 %v6927_v36  ;;  %4709 = vmatpush1.bf16.msra.mxu1 %v6930_v37 }
 0x240   : > { %4669 = vmatprep.subr.bf16.mxu0 %v6935_v10  ;;  %4710 = vmatprep.subr.bf16.mxu1 %v6938_v38  ;;  %v4769_v38 = vunpack.c.0.s8 %v4768_v31 }
 0x243   : > { %4670 = vmatpush1.bf16.msra.mxu0 %v6933_v39  ;;  %4711 = vmatpush1.bf16.msra.mxu1 %v6936_v40 }
 0x244   : > { %4671 = vmatprep.subr.bf16.mxu0 %v6941_v43  ;;  %4712 = vmatprep.subr.bf16.mxu1 %v6944_v44 }
 0x247   : > { %4672 = vmatpush1.bf16.msra.mxu0 %v6939_v47  ;;  %4713 = vmatpush1.bf16.msra.mxu1 %v6942_v48 }
 0x24a   : > { %4674 = vmatmul.mubr.bf16.vlgmr.msra.gmra.mrb[32].mxu0 %v4317_v24  ;;  %4715 = vmatmul.mubr.bf16.vlgmr.msra.gmra.mrb[32].mxu1 %v4317_v24 }
 0x25d   : > { %v3210_v25 = vpop.f32.mrb[20].mxu0  ;;  %v3251_v49 = vpop.f32.mrb[20].mxu1 }
 0x25e   : > { %v3258_v52 = vadd.f32 %v3210_v25, %v8788_v1  ;;  %v3260_v28 = vadd.f32 %v3251_v49, %v8791_v2  ;;  %v3212_v29 = vpop.f32.mrb[21].mxu0  ;;  %v3253_v53 = vpop.f32.mrb[21].mxu1 }
 0x25f   : > { %v3259_v56 = vadd.f32 %v3212_v29, %v8794_v5  ;;  %v3261_v57 = vadd.f32 %v3253_v53, %v8797_v6  ;;  %v3214_v58 = vpop.f32.mrb[22].mxu0  ;;  %v3255_v60 = vpop.f32.mrb[22].mxu1  ;;  %v4772_v53 = vsub.s32 %v4769_v38, %v4730_v22 }
 0x260   : > { %v3215_v61 = vpop.f32.mrb[23].mxu0  ;;  %v3256_v9 = vpop.f32.mrb[23].mxu1 }
 0x29d   : > { %v3693_v33 = vpop.f32.mrb[24].mxu0  ;;  %v3734_v63 = vpop.f32.mrb[24].mxu1 }
 0x29e   : > { %v3741_v0 = vadd.f32 %v3693_v33, %v3258_v52  ;;  %v3743_v3 = vadd.f32 %v3734_v63, %v3260_v28  ;;  %v3695_v4 = vpop.f32.mrb[25].mxu0  ;;  %v3736_v7 = vpop.f32.mrb[25].mxu1 }
 0x29f   : > { %v3742_v8 = vadd.f32 %v3695_v4, %v3259_v56  ;;  %v3744_v1 = vadd.f32 %v3736_v7, %v3261_v57  ;;  %v3697_v41 = vpop.f32.mrb[26].mxu0  ;;  %v3738_v2 = vpop.f32.mrb[26].mxu1 }
 0x2a0   : > { %v3698_v42 = vpop.f32.mrb[27].mxu0  ;;  %v3739_v12 = vpop.f32.mrb[27].mxu1 }
 0x2dd   : > { %v4190_v13 = vpop.f32.mrb[28].mxu0  ;;  %v4231_v5 = vpop.f32.mrb[28].mxu1 }
 0x2de   : > { %v4238_v45 = vadd.f32 %v4190_v13, %v3741_v0  ;;  %v4240_v6 = vadd.f32 %v4231_v5, %v3743_v3  ;;  %v4192_v46 = vpop.f32.mrb[29].mxu0  ;;  %v4233_v16 = vpop.f32.mrb[29].mxu1 }
 0x2df   : > { %v4239_v17 = vadd.f32 %v4192_v46, %v3742_v8  ;;  %v4241_v19 = vadd.f32 %v4233_v16, %v3744_v1  ;;  %v4194_v21 = vpop.f32.mrb[30].mxu0  ;;  %v4235_v50 = vpop.f32.mrb[30].mxu1 }
 0x2e0   : > { %v4195_v51 = vpop.f32.mrb[31].mxu0  ;;  %v4236_v54 = vpop.f32.mrb[31].mxu1 }
 0x31d   : > { %v4675_v20 = vpop.f32.mrb[32].mxu0  ;;  %v4716_v62 = vpop.f32.mrb[32].mxu1 }
 0x31e   : > { %v4723_v34 = vadd.f32 %v4675_v20, %v4238_v45  ;;  %v4725_v35 = vadd.f32 %v4716_v62, %v4240_v6  ;;  %v4677_v36 = vpop.f32.mrb[33].mxu0  ;;  %v4718_v37 = vpop.f32.mrb[33].mxu1 }
 0x31f   : > { %v4724_v10 = vadd.f32 %v4677_v36, %v4239_v17  ;;  %v4726_v39 = vadd.f32 %v4718_v37, %v4241_v19  ;;  %v4679_v40 = vpop.f32.mrb[34].mxu0  ;;  %v4720_v43 = vpop.f32.mrb[34].mxu1 }
 0x320   : > { %v4749_v44 = vadd.f32 %v4732_v11, %v4723_v34  ;;  %v4751_v47 = vadd.f32 %v4740_v32, %v4725_v35  ;;  %v4680_v48 = vpop.f32.mrb[35].mxu0  ;;  %v4721_v24 = vpop.f32.mrb[35].mxu1 }
 0x321   : > { %v4750_v25 = vadd.f32 %v4736_v14, %v4724_v10  ;;  %v4752_v49 = vadd.f32 %v4744_v15, %v4726_v39 }
 0x322   : > { %v4753_v52 = vmax.f32 %v4749_v44, 0.0  ;;  %v4755_v28 = vmax.f32 %v4751_v47, 0.0 }
 0x323   : > { %v4754_v29 = vmax.f32 %v4750_v25, 0.0  ;;  %v4756_v56 = vmax.f32 %v4752_v49, 0.0 }
 0x325   : > { %v6035_v57 = vpack.c.bf16 %v4754_v29, %v4753_v52  ;;  %v6036_v58 = vpack.c.bf16 %v4756_v56, %v4755_v28 }
 0x327   : > { %v4773_v60 = vrot.slane %v6035_v57, %v4772_v53  ;;  %v4780_v61 = vrot.slane %v6036_v58, %v4772_v53 }
 0x329   : > { %v4781_v9 = vcombine.low %v4773_v60, %v4780_v61 }
 0x32b   : > { %6037 = vst.sshfl [vmem:[%s340_s14] sm:$0x55 pattern:$0x73625140] %v4781_v9 }
 0x32c PF: > { %s15_s22 = sadd.s32 1, %s6983_s22   ;;  %s8948_s18 = smov %s6975_s20 }
 0x32d   : > { %p12_p10 = scmp.ge.s32.totalorder %s15_s22, 6   ;;  %s8949_s19 = smov %s6979_s21 }
 0x32e   : > { %s8950_s20 = smov %s8953_s23  ;;  %s8951_s21 = smov %s8957_s24 }
 0x32f   :  { %14 = sbr.rel (!%p12_p10) target bundleno = 3 (0x3), region = 84 }

// kernel: refugee_camp_detector.11
= control target key start
LH: loop header
LB: loop body
LE: loop exit
PB: predicated region body
PF: predicated region fallthrough
CT: control target
= control target key end

     0   :  { %s2650_s12 = smov 0   ;;  %s2652_s13 = smov 0   ;;  %s3516_s0 = inlined_call_operand.vmem [shape: bf16[2,4,512], index: 0, kind: input, shape index: {}]   ;;  %s3517_s1 = inlined_call_operand.vmem [shape: bf16[512,1024], index: 1, kind: input, shape index: {}]   ;;  %s3518_s2 = inlined_call_operand.vmem [shape: f32[1,1024], index: 2, kind: input, shape index: {}]   ;;  %s3519_s3 = inlined_call_operand.vmem [shape: bf16[2,4,1024], index: 3, kind: output, shape index: {}]  }
   0x1   :  { %s2654_s14 = smov 0  }
   0x2 LB: > { %s25_s15 = sadd.s32 1, %s2623_s13  ;;  %p2286_p0 = scmp.ge.s32.totalorder %s2627_s14, 1  ;;  %s2627_s14 = sphi %s2654_s14, %s13_s14   ;;  %s2623_s13 = sphi %s2652_s13, %s3521_s13   ;;  %s2619_s12 = sphi %s2650_s12, %s3520_s12  }
   0x3   : > { %p27_p1 = scmp.ge.s32.totalorder %s25_s15, 2  ;;  %p157_p2 = scmp.lt.s32.totalorder %s2627_s14, 3 }
   0x5   : > { %s3523_s15 = smov (%p27_p1, %s25_s15), 0  ;;  %p158_p3 = pnand %p2286_p0, %p157_p2 }
   0x6   : > { %v208_v0 = vld [vmem:[%s3517_s1] sm:$0xff] (!%p158_p3)  ;;  %v209_v2 = vld [vmem:[%s3517_s1 + $0x8] sm:$0xff] (!%p158_p3)  ;;  %p189_p4 = scmp.lt.s32.totalorder (!%p158_p3), %s2619_s12, 1  ;;  %v466_v32 = vlaneseq (!%p158_p3)  ;;  %v2629_v33 = vmov (!%p158_p3), 1983009808  }
   0x7   : > { %161 = sbr.rel (%p158_p3) target bundleno = 488 (0x1e8), region = 32  ;;  %v212_v1 = vld [vmem:[%s3517_s1 + $0x20] sm:$0xff] (!%p158_p3)  ;;  %v213_v4 = vld [vmem:[%s3517_s1 + $0x28] sm:$0xff] (!%p158_p3)  ;;  %v509_v34 = vunpack.c.l.s4 (!%p158_p3), %v2629_v33 }
   0x8   : > { %v2292_v3 = vcombine.high (!%p158_p3), %v208_v0, %v212_v1  ;;  %v2291_v5 = vcombine.low (!%p158_p3), %v208_v0, %v212_v1  ;;  %v216_v6 = vld [vmem:[%s3517_s1 + $0x40] sm:$0xff] (!%p158_p3)  ;;  %v2294_v8 = vcombine.high (!%p158_p3), %v209_v2, %v213_v4  ;;  %v2293_v9 = vcombine.low (!%p158_p3), %v209_v2, %v213_v4  ;;  %v217_v11 = vld [vmem:[%s3517_s1 + $0x48] sm:$0xff] (!%p158_p3) }
   0x9   : > { %v220_v7 = vld [vmem:[%s3517_s1 + $0x60] sm:$0xff] (!%p158_p3)  ;;  %v221_v12 = vld [vmem:[%s3517_s1 + $0x68] sm:$0xff] (!%p158_p3)  ;;  %v2742_v43 = vshrl.u32 (!%p158_p3), %v466_v32, 7  ;;  %v510_v44 = vunpack.c.0.s8 (!%p158_p3), %v509_v34 }
   0xa   : > { %v2300_v10 = vcombine.high (!%p158_p3), %v216_v6, %v220_v7  ;;  %v224_v13 = vld [vmem:[%s3517_s1 + $0x80] sm:$0xff] (!%p158_p3)  ;;  %1808 = vmatprep.subr.bf16.mxu0 (!%p158_p3), %v2292_v3  ;;  %v2302_v14 = vcombine.high (!%p158_p3), %v217_v11, %v221_v12  ;;  %v225_v16 = vld [vmem:[%s3517_s1 + $0x88] sm:$0xff] (!%p158_p3)  ;;  %1890 = vmatprep.subr.bf16.mxu1 (!%p158_p3), %v2294_v8  ;;  %v2299_v18 = vcombine.low (!%p158_p3), %v216_v6, %v220_v7 }
   0xb   : > { %v228_v15 = vld [vmem:[%s3517_s1 + $0xa0] sm:$0xff] (!%p158_p3)  ;;  %v229_v17 = vld [vmem:[%s3517_s1 + $0xa8] sm:$0xff] (!%p158_p3)  ;;  %1809 = vmatpush1.bf16.msra.mxu0 (!%p158_p3), %v2291_v5  ;;  %1891 = vmatpush1.bf16.msra.mxu1 (!%p158_p3), %v2293_v9  ;;  %v2301_v19 = vcombine.low (!%p158_p3), %v217_v11, %v221_v12  ;;  %v2761_v53 = vsub.s32 (!%p158_p3), %v510_v44, %v2742_v43 }
   0xc   : > { %1810 = vmatprep.subr.bf16.mxu0 (!%p158_p3), %v2300_v10  ;;  %v2308_v20 = vcombine.high (!%p158_p3), %v224_v13, %v228_v15  ;;  %1892 = vmatprep.subr.bf16.mxu1 (!%p158_p3), %v2302_v14  ;;  %v2310_v21 = vcombine.high (!%p158_p3), %v225_v16, %v229_v17  ;;  %v232_v22 = vld [vmem:[%s3517_s1 + $0xc0] sm:$0xff] (!%p158_p3)  ;;  %v233_v24 = vld [vmem:[%s3517_s1 + $0xc8] sm:$0xff] (!%p158_p3)  ;;  %v2307_v26 = vcombine.low (!%p158_p3), %v224_v13, %v228_v15 }
   0xd   : > { %v236_v23 = vld [vmem:[%s3517_s1 + $0xe0] sm:$0xff] (!%p158_p3)  ;;  %v237_v25 = vld [vmem:[%s3517_s1 + $0xe8] sm:$0xff] (!%p158_p3)  ;;  %v2309_v27 = vcombine.low (!%p158_p3), %v225_v16, %v229_v17 }
   0xe   : > { %v2316_v28 = vcombine.high %v232_v22, %v236_v23  ;;  %v2318_v29 = vcombine.high %v233_v24, %v237_v25  ;;  %v240_v30 = vld [vmem:[%s3517_s1 + $0x100] sm:$0xff]  ;;  %v241_v35 = vld [vmem:[%s3517_s1 + $0x108] sm:$0xff]  ;;  %s3525_s12 = smov (!%p189_p4, %s2619_s12), 1  ;;  %v2315_v37 = vcombine.low %v232_v22, %v236_v23  ;;  %v2317_v38 = vcombine.low %v233_v24, %v237_v25 }
   0xf   : > { %1811 = vmatpush1.bf16.msra.mxu0 %v2299_v18  ;;  %1893 = vmatpush1.bf16.msra.mxu1 %v2301_v19  ;;  %v244_v31 = vld [vmem:[%s3517_s1 + $0x120] sm:$0xff]  ;;  %v245_v36 = vld [vmem:[%s3517_s1 + $0x128] sm:$0xff]  ;;  %s2553_s18 = sshll.u32 %s3525_s12, 3  ;;  %s2554_s28 = sshll.u32 %s3525_s12, 4 }
  0x10   : > { %1812 = vmatprep.subr.bf16.mxu0 %v2308_v20  ;;  %1894 = vmatprep.subr.bf16.mxu1 %v2310_v21  ;;  %v2324_v39 = vcombine.high %v240_v30, %v244_v31  ;;  %v2326_v40 = vcombine.high %v241_v35, %v245_v36  ;;  %v248_v41 = vld [vmem:[%s3517_s1 + $0x140] sm:$0xff]  ;;  %v249_v45 = vld [vmem:[%s3517_s1 + $0x148] sm:$0xff]  ;;  %v2323_v47 = vcombine.low %v240_v30, %v244_v31  ;;  %s197_s25 = scalar_lea.vmem %s3516_s0, %s2553_s18  ;;  %s206_s4 = scalar_lea.vmem %s3519_s3, %s2554_s28 }
  0x11   : > { %v252_v42 = vld [vmem:[%s3517_s1 + $0x160] sm:$0xff]  ;;  %v253_v46 = vld [vmem:[%s3517_s1 + $0x168] sm:$0xff]  ;;  %v2325_v48 = vcombine.low %v241_v35, %v245_v36 }
  0x12   : > { %v2332_v49 = vcombine.high %v248_v41, %v252_v42  ;;  %v2334_v50 = vcombine.high %v249_v45, %v253_v46  ;;  %v256_v51 = vld [vmem:[%s3517_s1 + $0x180] sm:$0xff]  ;;  %v257_v54 = vld [vmem:[%s3517_s1 + $0x188] sm:$0xff]  ;;  %v2331_v56 = vcombine.low %v248_v41, %v252_v42  ;;  %v2333_v57 = vcombine.low %v249_v45, %v253_v46 }
  0x13   : > { %1813 = vmatpush1.bf16.msra.mxu0 %v2307_v26  ;;  %1895 = vmatpush1.bf16.msra.mxu1 %v2309_v27  ;;  %v260_v52 = vld [vmem:[%s3517_s1 + $0x1a0] sm:$0xff]  ;;  %v261_v55 = vld [vmem:[%s3517_s1 + $0x1a8] sm:$0xff] }
  0x14   : > { %1814 = vmatprep.subr.bf16.mxu0 %v2316_v28  ;;  %1896 = vmatprep.subr.bf16.mxu1 %v2318_v29  ;;  %v2340_v58 = vcombine.high %v256_v51, %v260_v52  ;;  %v2769_v59 = vld [vmem:[%s197_s25] sm:$0xff]  ;;  %v2342_v60 = vcombine.high %v257_v54, %v261_v55  ;;  %v265_v0 = vld [vmem:[%s3517_s1 + $0x1c8] sm:$0xff]  ;;  %v2339_v2 = vcombine.low %v256_v51, %v260_v52 }
  0x15   : > { %v264_v61 = vld [vmem:[%s3517_s1 + $0x1c0] sm:$0xff]  ;;  %v2779_v63 = vrot.slane %v2769_v59, %v2761_v53  ;;  %v269_v1 = vld [vmem:[%s3517_s1 + $0x1e8] sm:$0xff]  ;;  %v2341_v4 = vcombine.low %v257_v54, %v261_v55 }
  0x16   : > { %v268_v62 = vld [vmem:[%s3517_s1 + $0x1e0] sm:$0xff]  ;;  %v2350_v6 = vcombine.high %v265_v0, %v269_v1  ;;  %v273_v9 = vld [vmem:[%s3517_s1 + $0x208] sm:$0xff]  ;;  %v2349_v12 = vcombine.low %v265_v0, %v269_v1 }
  0x17   : > { %1815 = vmatpush1.bf16.msra.mxu0 %v2315_v37  ;;  %1897 = vmatpush1.bf16.msra.mxu1 %v2317_v38  ;;  %v2789_v3 = vcombine.high %v2779_v63, %v2779_v63  ;;  %v2348_v5 = vcombine.high %v264_v61, %v268_v62  ;;  %v272_v7 = vld [vmem:[%s3517_s1 + $0x200] sm:$0xff]  ;;  %v277_v10 = vld [vmem:[%s3517_s1 + $0x228] sm:$0xff]  ;;  %v2347_v11 = vcombine.low %v264_v61, %v268_v62 }
  0x18   : > { %1816 = vmatprep.subr.bf16.mxu0 %v2324_v39  ;;  %1898 = vmatprep.subr.bf16.mxu1 %v2326_v40  ;;  %v276_v8 = vld [vmem:[%s3517_s1 + $0x220] sm:$0xff]  ;;  %v2358_v14 = vcombine.high %v273_v9, %v277_v10  ;;  %v281_v17 = vld [vmem:[%s3517_s1 + $0x248] sm:$0xff]  ;;  %v2357_v20 = vcombine.low %v273_v9, %v277_v10 }
  0x19   : > { %1840 = vmatprep.mubr.bf16.mxu0 %v2789_v3  ;;  %1922 = vmatprep.mubr.bf16.mxu1 %v2789_v3  ;;  %v2356_v13 = vcombine.high %v272_v7, %v276_v8  ;;  %v280_v15 = vld [vmem:[%s3517_s1 + $0x240] sm:$0xff]  ;;  %v285_v18 = vld [vmem:[%s3517_s1 + $0x268] sm:$0xff]  ;;  %v2355_v19 = vcombine.low %v272_v7, %v276_v8 }
  0x1a   : > { %v284_v16 = vld [vmem:[%s3517_s1 + $0x260] sm:$0xff]  ;;  %v2366_v22 = vcombine.high %v281_v17, %v285_v18  ;;  %v289_v25 = vld [vmem:[%s3517_s1 + $0x288] sm:$0xff]  ;;  %v2365_v28 = vcombine.low %v281_v17, %v285_v18 }
  0x1b   : > { %1817 = vmatpush1.bf16.msra.mxu0 %v2323_v47  ;;  %1899 = vmatpush1.bf16.msra.mxu1 %v2325_v48  ;;  %v2364_v21 = vcombine.high %v280_v15, %v284_v16  ;;  %v288_v23 = vld [vmem:[%s3517_s1 + $0x280] sm:$0xff]  ;;  %v293_v26 = vld [vmem:[%s3517_s1 + $0x2a8] sm:$0xff]  ;;  %v2363_v27 = vcombine.low %v280_v15, %v284_v16 }
  0x1c   : > { %1818 = vmatprep.subr.bf16.mxu0 %v2332_v49  ;;  %1900 = vmatprep.subr.bf16.mxu1 %v2334_v50  ;;  %v292_v24 = vld [vmem:[%s3517_s1 + $0x2a0] sm:$0xff]  ;;  %v2374_v30 = vcombine.high %v289_v25, %v293_v26  ;;  %v297_v33 = vld [vmem:[%s3517_s1 + $0x2c8] sm:$0xff]  ;;  %v2373_v36 = vcombine.low %v289_v25, %v293_v26 }
  0x1d   : > { %v2372_v29 = vcombine.high %v288_v23, %v292_v24  ;;  %v296_v31 = vld [vmem:[%s3517_s1 + $0x2c0] sm:$0xff]  ;;  %v301_v34 = vld [vmem:[%s3517_s1 + $0x2e8] sm:$0xff]  ;;  %v2371_v35 = vcombine.low %v288_v23, %v292_v24 }
  0x1e   : > { %v300_v32 = vld [vmem:[%s3517_s1 + $0x2e0] sm:$0xff]  ;;  %v2382_v38 = vcombine.high %v297_v33, %v301_v34  ;;  %v305_v41 = vld [vmem:[%s3517_s1 + $0x308] sm:$0xff]  ;;  %v2381_v45 = vcombine.low %v297_v33, %v301_v34 }
  0x1f   : > { %1819 = vmatpush1.bf16.msra.mxu0 %v2331_v56  ;;  %1901 = vmatpush1.bf16.msra.mxu1 %v2333_v57  ;;  %v2380_v37 = vcombine.high %v296_v31, %v300_v32  ;;  %v304_v39 = vld [vmem:[%s3517_s1 + $0x300] sm:$0xff]  ;;  %v309_v42 = vld [vmem:[%s3517_s1 + $0x328] sm:$0xff]  ;;  %v2379_v44 = vcombine.low %v296_v31, %v300_v32 }
  0x20   : > { %1820 = vmatprep.subr.bf16.mxu0 %v2340_v58  ;;  %1902 = vmatprep.subr.bf16.mxu1 %v2342_v60  ;;  %v308_v40 = vld [vmem:[%s3517_s1 + $0x320] sm:$0xff]  ;;  %v2390_v47 = vcombine.high %v305_v41, %v309_v42  ;;  %v313_v50 = vld [vmem:[%s3517_s1 + $0x348] sm:$0xff]  ;;  %v2389_v54 = vcombine.low %v305_v41, %v309_v42 }
  0x21   : > { %v2388_v46 = vcombine.high %v304_v39, %v308_v40  ;;  %v312_v48 = vld [vmem:[%s3517_s1 + $0x340] sm:$0xff]  ;;  %v317_v51 = vld [vmem:[%s3517_s1 + $0x368] sm:$0xff]  ;;  %v2387_v52 = vcombine.low %v304_v39, %v308_v40 }
  0x22   : > { %v316_v49 = vld [vmem:[%s3517_s1 + $0x360] sm:$0xff]  ;;  %v2398_v56 = vcombine.high %v313_v50, %v317_v51  ;;  %v321_v60 = vld [vmem:[%s3517_s1 + $0x388] sm:$0xff]  ;;  %v2397_v0 = vcombine.low %v313_v50, %v317_v51 }
  0x23   : > { %1821 = vmatpush1.bf16.msra.mxu0 %v2339_v2  ;;  %1903 = vmatpush1.bf16.msra.mxu1 %v2341_v4  ;;  %v2396_v55 = vcombine.high %v312_v48, %v316_v49  ;;  %v320_v57 = vld [vmem:[%s3517_s1 + $0x380] sm:$0xff]  ;;  %v325_v61 = vld [vmem:[%s3517_s1 + $0x3a8] sm:$0xff]  ;;  %v2395_v62 = vcombine.low %v312_v48, %v316_v49 }
  0x24   : > { %1822 = vmatprep.subr.bf16.mxu0 %v2348_v5  ;;  %1904 = vmatprep.subr.bf16.mxu1 %v2350_v6  ;;  %v324_v58 = vld [vmem:[%s3517_s1 + $0x3a0] sm:$0xff]  ;;  %v2406_v2 = vcombine.high %v321_v60, %v325_v61  ;;  %v329_v6 = vld [vmem:[%s3517_s1 + $0x3c8] sm:$0xff]  ;;  %v2405_v9 = vcombine.low %v321_v60, %v325_v61 }
  0x25   : > { %v2404_v1 = vcombine.high %v320_v57, %v324_v58  ;;  %v328_v4 = vld [vmem:[%s3517_s1 + $0x3c0] sm:$0xff]  ;;  %v333_v7 = vld [vmem:[%s3517_s1 + $0x3e8] sm:$0xff]  ;;  %v2403_v8 = vcombine.low %v320_v57, %v324_v58 }
  0x26   : > { %v332_v5 = vld [vmem:[%s3517_s1 + $0x3e0] sm:$0xff]  ;;  %v337_v15 = vld [vmem:[%s3517_s1 + $0x408] sm:$0xff]  ;;  %v2413_v18 = vcombine.low %v329_v6, %v333_v7 }
  0x27   : > { %1823 = vmatpush1.bf16.msra.mxu0 %v2347_v11  ;;  %1905 = vmatpush1.bf16.msra.mxu1 %v2349_v12  ;;  %v2412_v10 = vcombine.high %v328_v4, %v332_v5  ;;  %v2414_v11 = vcombine.high %v329_v6, %v333_v7  ;;  %v336_v12 = vld [vmem:[%s3517_s1 + $0x400] sm:$0xff]  ;;  %v341_v16 = vld [vmem:[%s3517_s1 + $0x428] sm:$0xff]  ;;  %v2411_v17 = vcombine.low %v328_v4, %v332_v5 }
  0x28   : > { %1824 = vmatprep.subr.bf16.mxu0 %v2356_v13  ;;  %1906 = vmatprep.subr.bf16.mxu1 %v2358_v14  ;;  %v340_v13 = vld [vmem:[%s3517_s1 + $0x420] sm:$0xff]  ;;  %v507_v14 = vcombine.high %v2769_v59, %v2769_v59  ;;  %v345_v23 = vld [vmem:[%s3517_s1 + $0x448] sm:$0xff]  ;;  %v2421_v26 = vcombine.low %v337_v15, %v341_v16 }
  0x29   : > { %v344_v59 = vld [vmem:[%s3517_s1 + $0x440] sm:$0xff]  ;;  %v349_v24 = vld [vmem:[%s3517_s1 + $0x468] sm:$0xff]  ;;  %v2419_v25 = vcombine.low %v336_v12, %v340_v13 }
  0x2a   : > { %v353_v32 = vld [vmem:[%s3517_s1 + $0x488] sm:$0xff]  ;;  %v364_v39 = vld [vmem:[%s3517_s1 + $0x4e0] sm:$0xff] }
  0x2b   : > { %1825 = vmatpush1.bf16.msra.mxu0 %v2355_v19  ;;  %1907 = vmatpush1.bf16.msra.mxu1 %v2357_v20  ;;  %v2420_v19 = vcombine.high %v336_v12, %v340_v13  ;;  %v2422_v20 = vcombine.high %v337_v15, %v341_v16  ;;  %v357_v33 = vld [vmem:[%s3517_s1 + $0x4a8] sm:$0xff]  ;;  %v372_v48 = vld [vmem:[%s3517_s1 + $0x520] sm:$0xff] }
  0x2c   : > { %1826 = vmatprep.subr.bf16.mxu0 %v2364_v21  ;;  %1908 = vmatprep.subr.bf16.mxu1 %v2366_v22  ;;  %v348_v21 = vld [vmem:[%s3517_s1 + $0x460] sm:$0xff]  ;;  %v2910_v22 = vrot.slane %v507_v14, %v2761_v53  ;;  %v361_v40 = vld [vmem:[%s3517_s1 + $0x4c8] sm:$0xff] }
  0x2d   : > { %v2427_v34 = vcombine.low %v344_v59, %v348_v21  ;;  %v365_v41 = vld [vmem:[%s3517_s1 + $0x4e8] sm:$0xff]  ;;  %v380_v57 = vld [vmem:[%s3517_s1 + $0x560] sm:$0xff] }
  0x2e   : > { %v2926_v31 = vcombine.high %v2910_v22, %v2910_v22  ;;  %v369_v49 = vld [vmem:[%s3517_s1 + $0x508] sm:$0xff]  ;;  %v388_v4 = vld [vmem:[%s3517_s1 + $0x5a0] sm:$0xff] }
  0x2f   : > { %1827 = vmatpush1.bf16.msra.mxu0 %v2363_v27  ;;  %1909 = vmatpush1.bf16.msra.mxu1 %v2365_v28  ;;  %v2428_v27 = vcombine.high %v344_v59, %v348_v21  ;;  %v2430_v28 = vcombine.high %v345_v23, %v349_v24  ;;  %v373_v50 = vld [vmem:[%s3517_s1 + $0x528] sm:$0xff]  ;;  %v396_v12 = vld [vmem:[%s3517_s1 + $0x5e0] sm:$0xff] }
  0x30   : > { %1828 = vmatprep.subr.bf16.mxu0 %v2372_v29  ;;  %1910 = vmatprep.subr.bf16.mxu1 %v2374_v30  ;;  %v352_v29 = vld [vmem:[%s3517_s1 + $0x480] sm:$0xff]  ;;  %v377_v58 = vld [vmem:[%s3517_s1 + $0x548] sm:$0xff] }
  0x31   : > { %v356_v30 = vld [vmem:[%s3517_s1 + $0x4a0] sm:$0xff]  ;;  %v381_v60 = vld [vmem:[%s3517_s1 + $0x568] sm:$0xff] }
  0x32   : > { %v2435_v42 = vcombine.low %v352_v29, %v356_v30  ;;  %v385_v5 = vld [vmem:[%s3517_s1 + $0x588] sm:$0xff] }
  0x33   : > { %1829 = vmatpush1.bf16.msra.mxu0 %v2371_v35  ;;  %1911 = vmatpush1.bf16.msra.mxu1 %v2373_v36  ;;  %v2429_v35 = vcombine.low %v345_v23, %v349_v24  ;;  %v2436_v36 = vcombine.high %v352_v29, %v356_v30  ;;  %v389_v6 = vld [vmem:[%s3517_s1 + $0x5a8] sm:$0xff] }
  0x34   : > { %1830 = vmatprep.subr.bf16.mxu0 %v2380_v37  ;;  %1912 = vmatprep.subr.bf16.mxu1 %v2382_v38  ;;  %v2438_v37 = vcombine.high %v353_v32, %v357_v33  ;;  %v360_v38 = vld [vmem:[%s3517_s1 + $0x4c0] sm:$0xff]  ;;  %v393_v13 = vld [vmem:[%s3517_s1 + $0x5c8] sm:$0xff]  ;;  %v2469_v16 = vcombine.low %v385_v5, %v389_v6 }
  0x35   : > { %v2443_v51 = vcombine.low %v360_v38, %v364_v39  ;;  %v397_v14 = vld [vmem:[%s3517_s1 + $0x5e8] sm:$0xff] }
  0x36   : > { %v401_v59 = vld [vmem:[%s3517_s1 + $0x608] sm:$0xff]  ;;  %v2477_v24 = vcombine.low %v393_v13, %v397_v14 }
  0x37   : > { %1831 = vmatpush1.bf16.msra.mxu0 %v2379_v44  ;;  %1913 = vmatpush1.bf16.msra.mxu1 %v2381_v45  ;;  %v2437_v44 = vcombine.low %v353_v32, %v357_v33  ;;  %v2444_v45 = vcombine.high %v360_v38, %v364_v39  ;;  %v405_v21 = vld [vmem:[%s3517_s1 + $0x628] sm:$0xff] }
  0x38   : > { %1832 = vmatprep.subr.bf16.mxu0 %v2388_v46  ;;  %1914 = vmatprep.subr.bf16.mxu1 %v2390_v47  ;;  %v2446_v46 = vcombine.high %v361_v40, %v365_v41  ;;  %v368_v47 = vld [vmem:[%s3517_s1 + $0x500] sm:$0xff]  ;;  %v409_v29 = vld [vmem:[%s3517_s1 + $0x648] sm:$0xff]  ;;  %v2485_v33 = vcombine.low %v401_v59, %v405_v21 }
  0x39   : > { %v2451_v61 = vcombine.low %v368_v47, %v372_v48  ;;  %v413_v30 = vld [vmem:[%s3517_s1 + $0x668] sm:$0xff] }
  0x3a   : > { %v417_v38 = vld [vmem:[%s3517_s1 + $0x688] sm:$0xff] }
  0x3b   : > { %1833 = vmatpush1.bf16.msra.mxu0 %v2387_v52  ;;  %1915 = vmatpush1.bf16.msra.mxu1 %v2389_v54  ;;  %v2445_v52 = vcombine.low %v361_v40, %v365_v41  ;;  %v2452_v54 = vcombine.high %v368_v47, %v372_v48  ;;  %v421_v39 = vld [vmem:[%s3517_s1 + $0x6a8] sm:$0xff]  ;;  %v2493_v41 = vcombine.low %v409_v29, %v413_v30 }
  0x3c   : > { %1834 = vmatprep.subr.bf16.mxu0 %v2396_v55  ;;  %1916 = vmatprep.subr.bf16.mxu1 %v2398_v56  ;;  %v2454_v55 = vcombine.high %v369_v49, %v373_v50  ;;  %v376_v56 = vld [vmem:[%s3517_s1 + $0x540] sm:$0xff]  ;;  %v425_v47 = vld [vmem:[%s3517_s1 + $0x6c8] sm:$0xff] }
  0x3d   : > { %v2459_v7 = vcombine.low %v376_v56, %v380_v57  ;;  %v429_v48 = vld [vmem:[%s3517_s1 + $0x6e8] sm:$0xff] }
  0x3f   : > { %1835 = vmatpush1.bf16.msra.mxu0 %v2395_v62  ;;  %1917 = vmatpush1.bf16.msra.mxu1 %v2397_v0  ;;  %v2453_v62 = vcombine.low %v369_v49, %v373_v50  ;;  %v2460_v0 = vcombine.high %v376_v56, %v380_v57  ;;  %v2501_v50 = vcombine.low %v417_v38, %v421_v39  ;;  %v433_v56 = vld [vmem:[%s3517_s1 + $0x708] sm:$0xff] }
  0x40   : > { %1836 = vmatprep.subr.bf16.mxu0 %v2404_v1  ;;  %1918 = vmatprep.subr.bf16.mxu1 %v2406_v2  ;;  %v2462_v1 = vcombine.high %v377_v58, %v381_v60  ;;  %v384_v2 = vld [vmem:[%s3517_s1 + $0x580] sm:$0xff]  ;;  %v437_v57 = vld [vmem:[%s3517_s1 + $0x728] sm:$0xff] }
  0x41   : > { %v2467_v15 = vcombine.low %v384_v2, %v388_v4 }
  0x43   : > { %1837 = vmatpush1.bf16.msra.mxu0 %v2403_v8  ;;  %1919 = vmatpush1.bf16.msra.mxu1 %v2405_v9  ;;  %v2461_v8 = vcombine.low %v377_v58, %v381_v60  ;;  %v2468_v9 = vcombine.high %v384_v2, %v388_v4  ;;  %v2509_v60 = vcombine.low %v425_v47, %v429_v48  ;;  %v441_v2 = vld [vmem:[%s3517_s1 + $0x748] sm:$0xff] }
  0x44   : > { %1838 = vmatprep.subr.bf16.mxu0 %v2412_v10  ;;  %1920 = vmatprep.subr.bf16.mxu1 %v2414_v11  ;;  %v2470_v10 = vcombine.high %v385_v5, %v389_v6  ;;  %v392_v11 = vld [vmem:[%s3517_s1 + $0x5c0] sm:$0xff]  ;;  %v445_v4 = vld [vmem:[%s3517_s1 + $0x768] sm:$0xff]  ;;  %v2517_v6 = vcombine.low %v433_v56, %v437_v57 }
  0x45   : > { %v2475_v23 = vcombine.low %v392_v11, %v396_v12 }
  0x47   : > { %1839 = vmatpush1.bf16.msra.mxu0 %v2411_v17  ;;  %1921 = vmatpush1.bf16.msra.mxu1 %v2413_v18  ;;  %v2476_v17 = vcombine.high %v392_v11, %v396_v12  ;;  %v2478_v18 = vcombine.high %v393_v13, %v397_v14  ;;  %v449_v11 = vld [vmem:[%s3517_s1 + $0x788] sm:$0xff]  ;;  %v2525_v14 = vcombine.low %v441_v2, %v445_v4 }
  0x48   : > { %1849 = vmatprep.subr.bf16.mxu0 %v2420_v19  ;;  %1931 = vmatprep.subr.bf16.mxu1 %v2422_v20  ;;  %v400_v19 = vld [vmem:[%s3517_s1 + $0x600] sm:$0xff]  ;;  %v453_v12 = vld [vmem:[%s3517_s1 + $0x7a8] sm:$0xff] }
  0x49   : > { %v404_v20 = vld [vmem:[%s3517_s1 + $0x620] sm:$0xff] }
  0x4a   : > { %1841 = vmatmul.mubr.bf16.vlgmr.msra.gmra.mrb[0].mxu0 %v2779_v63  ;;  %1923 = vmatmul.mubr.bf16.vlgmr.msra.gmra.mrb[0].mxu1 %v2779_v63  ;;  %v2483_v32 = vcombine.low %v400_v19, %v404_v20 }
  0x4b   : > { %1850 = vmatpush1.bf16.msra.mxu0 %v2419_v25  ;;  %1932 = vmatpush1.bf16.msra.mxu1 %v2421_v26  ;;  %v2484_v25 = vcombine.high %v400_v19, %v404_v20  ;;  %v2486_v26 = vcombine.high %v401_v59, %v405_v21  ;;  %v457_v19 = vld [vmem:[%s3517_s1 + $0x7c8] sm:$0xff]  ;;  %v2533_v21 = vcombine.low %v449_v11, %v453_v12 }
  0x4c   : > { %1851 = vmatprep.subr.bf16.mxu0 %v2428_v27  ;;  %1933 = vmatprep.subr.bf16.mxu1 %v2430_v28  ;;  %v408_v27 = vld [vmem:[%s3517_s1 + $0x640] sm:$0xff]  ;;  %v461_v20 = vld [vmem:[%s3517_s1 + $0x7e8] sm:$0xff] }
  0x4d   : > { %1881 = vmatprep.mubr.bf16.mxu0 %v2926_v31  ;;  %1963 = vmatprep.mubr.bf16.mxu1 %v2926_v31  ;;  %v412_v28 = vld [vmem:[%s3517_s1 + $0x660] sm:$0xff] }
  0x4e   : > { %v2491_v40 = vcombine.low %v408_v27, %v412_v28 }
  0x4f   : > { %1852 = vmatpush1.bf16.msra.mxu0 %v2427_v34  ;;  %1934 = vmatpush1.bf16.msra.mxu1 %v2429_v35  ;;  %v2492_v34 = vcombine.high %v408_v27, %v412_v28  ;;  %v2494_v35 = vcombine.high %v409_v29, %v413_v30  ;;  %v211_v27 = vld [vmem:[%s3517_s1 + $0x18] sm:$0xff]  ;;  %v2541_v30 = vcombine.low %v457_v19, %v461_v20 }
  0x50   : > { %1853 = vmatprep.subr.bf16.mxu0 %v2436_v36  ;;  %1935 = vmatprep.subr.bf16.mxu1 %v2438_v37  ;;  %v416_v36 = vld [vmem:[%s3517_s1 + $0x680] sm:$0xff]  ;;  %v215_v28 = vld [vmem:[%s3517_s1 + $0x38] sm:$0xff] }
  0x51   : > { %v420_v37 = vld [vmem:[%s3517_s1 + $0x6a0] sm:$0xff] }
  0x52   : > { %v2499_v49 = vcombine.low %v416_v36, %v420_v37 }
  0x53   : > { %1854 = vmatpush1.bf16.msra.mxu0 %v2435_v42  ;;  %1936 = vmatpush1.bf16.msra.mxu1 %v2437_v44  ;;  %v2500_v42 = vcombine.high %v416_v36, %v420_v37  ;;  %v2502_v44 = vcombine.high %v417_v38, %v421_v39  ;;  %v219_v36 = vld [vmem:[%s3517_s1 + $0x58] sm:$0xff]  ;;  %v2297_v39 = vcombine.low %v211_v27, %v215_v28 }
  0x54   : > { %1855 = vmatprep.subr.bf16.mxu0 %v2444_v45  ;;  %1937 = vmatprep.subr.bf16.mxu1 %v2446_v46  ;;  %v424_v45 = vld [vmem:[%s3517_s1 + $0x6c0] sm:$0xff]  ;;  %v223_v37 = vld [vmem:[%s3517_s1 + $0x78] sm:$0xff] }
  0x55   : > { %v428_v46 = vld [vmem:[%s3517_s1 + $0x6e0] sm:$0xff] }
  0x56   : > { %v2507_v58 = vcombine.low %v424_v45, %v428_v46 }
  0x57   : > { %1856 = vmatpush1.bf16.msra.mxu0 %v2443_v51  ;;  %1938 = vmatpush1.bf16.msra.mxu1 %v2445_v52  ;;  %v2508_v51 = vcombine.high %v424_v45, %v428_v46  ;;  %v2510_v52 = vcombine.high %v425_v47, %v429_v48  ;;  %v227_v45 = vld [vmem:[%s3517_s1 + $0x98] sm:$0xff]  ;;  %v2305_v48 = vcombine.low %v219_v36, %v223_v37 }
  0x58   : > { %1857 = vmatprep.subr.bf16.mxu0 %v2452_v54  ;;  %1939 = vmatprep.subr.bf16.mxu1 %v2454_v55  ;;  %v432_v54 = vld [vmem:[%s3517_s1 + $0x700] sm:$0xff]  ;;  %v231_v46 = vld [vmem:[%s3517_s1 + $0xb8] sm:$0xff] }
  0x59   : > { %v436_v55 = vld [vmem:[%s3517_s1 + $0x720] sm:$0xff] }
  0x5a   : > { %v2515_v5 = vcombine.low %v432_v54, %v436_v55 }
  0x5b   : > { %1858 = vmatpush1.bf16.msra.mxu0 %v2451_v61  ;;  %1940 = vmatpush1.bf16.msra.mxu1 %v2453_v62  ;;  %v2516_v61 = vcombine.high %v432_v54, %v436_v55  ;;  %v2518_v62 = vcombine.high %v433_v56, %v437_v57  ;;  %v235_v54 = vld [vmem:[%s3517_s1 + $0xd8] sm:$0xff]  ;;  %v2313_v57 = vcombine.low %v227_v45, %v231_v46 }
  0x5c   : > { %1859 = vmatprep.subr.bf16.mxu0 %v2460_v0  ;;  %1941 = vmatprep.subr.bf16.mxu1 %v2462_v1  ;;  %v440_v0 = vld [vmem:[%s3517_s1 + $0x740] sm:$0xff]  ;;  %v239_v55 = vld [vmem:[%s3517_s1 + $0xf8] sm:$0xff] }
  0x5d   : > { %v444_v1 = vld [vmem:[%s3517_s1 + $0x760] sm:$0xff] }
  0x5e   : > { %v2523_v13 = vcombine.low %v440_v0, %v444_v1 }
  0x5f   : > { %1860 = vmatpush1.bf16.msra.mxu0 %v2459_v7  ;;  %1942 = vmatpush1.bf16.msra.mxu1 %v2461_v8  ;;  %v2524_v7 = vcombine.high %v440_v0, %v444_v1  ;;  %v2526_v8 = vcombine.high %v441_v2, %v445_v4  ;;  %v247_v0 = vld [vmem:[%s3517_s1 + $0x138] sm:$0xff]  ;;  %v2321_v2 = vcombine.low %v235_v54, %v239_v55 }
  0x60   : > { %1861 = vmatprep.subr.bf16.mxu0 %v2468_v9  ;;  %1943 = vmatprep.subr.bf16.mxu1 %v2470_v10  ;;  %v448_v9 = vld [vmem:[%s3517_s1 + $0x780] sm:$0xff] }
  0x61   : > { %v452_v10 = vld [vmem:[%s3517_s1 + $0x7a0] sm:$0xff] }
  0x62   : > { %v2531_v59 = vcombine.low %v448_v9, %v452_v10 }
  0x63   : > { %1862 = vmatpush1.bf16.msra.mxu0 %v2467_v15  ;;  %1944 = vmatpush1.bf16.msra.mxu1 %v2469_v16  ;;  %v2532_v15 = vcombine.high %v448_v9, %v452_v10  ;;  %v2534_v16 = vcombine.high %v449_v11, %v453_v12  ;;  %v255_v9 = vld [vmem:[%s3517_s1 + $0x178] sm:$0xff] }
  0x64   : > { %1863 = vmatprep.subr.bf16.mxu0 %v2476_v17  ;;  %1945 = vmatprep.subr.bf16.mxu1 %v2478_v18  ;;  %v456_v17 = vld [vmem:[%s3517_s1 + $0x7c0] sm:$0xff] }
  0x65   : > { %v460_v18 = vld [vmem:[%s3517_s1 + $0x7e0] sm:$0xff] }
  0x66   : > { %v2539_v29 = vcombine.low %v456_v17, %v460_v18 }
  0x67   : > { %1864 = vmatpush1.bf16.msra.mxu0 %v2475_v23  ;;  %1946 = vmatpush1.bf16.msra.mxu1 %v2477_v24  ;;  %v2540_v23 = vcombine.high %v456_v17, %v460_v18  ;;  %v2542_v24 = vcombine.high %v457_v19, %v461_v20  ;;  %v263_v17 = vld [vmem:[%s3517_s1 + $0x1b8] sm:$0xff] }
  0x68   : > { %1865 = vmatprep.subr.bf16.mxu0 %v2484_v25  ;;  %1947 = vmatprep.subr.bf16.mxu1 %v2486_v26  ;;  %v210_v25 = vld [vmem:[%s3517_s1 + $0x10] sm:$0xff] }
  0x69   : > { %v214_v26 = vld [vmem:[%s3517_s1 + $0x30] sm:$0xff] }
  0x6a   : > { %v2295_v38 = vcombine.low %v210_v25, %v214_v26 }
  0x6b   : > { %1866 = vmatpush1.bf16.msra.mxu0 %v2483_v32  ;;  %1948 = vmatpush1.bf16.msra.mxu1 %v2485_v33  ;;  %v2296_v32 = vcombine.high %v210_v25, %v214_v26  ;;  %v2298_v33 = vcombine.high %v211_v27, %v215_v28  ;;  %v271_v25 = vld [vmem:[%s3517_s1 + $0x1f8] sm:$0xff] }
  0x6c   : > { %1867 = vmatprep.subr.bf16.mxu0 %v2492_v34  ;;  %1949 = vmatprep.subr.bf16.mxu1 %v2494_v35  ;;  %v218_v34 = vld [vmem:[%s3517_s1 + $0x50] sm:$0xff] }
  0x6d   : > { %v222_v35 = vld [vmem:[%s3517_s1 + $0x70] sm:$0xff] }
  0x6e   : > { %v2303_v47 = vcombine.low %v218_v34, %v222_v35 }
  0x6f   : > { %1868 = vmatpush1.bf16.msra.mxu0 %v2491_v40  ;;  %1950 = vmatpush1.bf16.msra.mxu1 %v2493_v41  ;;  %v2304_v40 = vcombine.high %v218_v34, %v222_v35  ;;  %v2306_v41 = vcombine.high %v219_v36, %v223_v37  ;;  %v279_v34 = vld [vmem:[%s3517_s1 + $0x238] sm:$0xff] }
  0x70   : > { %1869 = vmatprep.subr.bf16.mxu0 %v2500_v42  ;;  %1951 = vmatprep.subr.bf16.mxu1 %v2502_v44  ;;  %v226_v42 = vld [vmem:[%s3517_s1 + $0x90] sm:$0xff] }
  0x71   : > { %v230_v44 = vld [vmem:[%s3517_s1 + $0xb0] sm:$0xff] }
  0x72   : > { %v2311_v56 = vcombine.low %v226_v42, %v230_v44 }
  0x73   : > { %1870 = vmatpush1.bf16.msra.mxu0 %v2499_v49  ;;  %1952 = vmatpush1.bf16.msra.mxu1 %v2501_v50  ;;  %v2312_v49 = vcombine.high %v226_v42, %v230_v44  ;;  %v2314_v50 = vcombine.high %v227_v45, %v231_v46  ;;  %v287_v42 = vld [vmem:[%s3517_s1 + $0x278] sm:$0xff] }
  0x74   : > { %1871 = vmatprep.subr.bf16.mxu0 %v2508_v51  ;;  %1953 = vmatprep.subr.bf16.mxu1 %v2510_v52  ;;  %v234_v51 = vld [vmem:[%s3517_s1 + $0xd0] sm:$0xff] }
  0x75   : > { %v238_v52 = vld [vmem:[%s3517_s1 + $0xf0] sm:$0xff] }
  0x76   : > { %v2319_v1 = vcombine.low %v234_v51, %v238_v52 }
  0x77   : > { %1872 = vmatpush1.bf16.msra.mxu0 %v2507_v58  ;;  %1954 = vmatpush1.bf16.msra.mxu1 %v2509_v60  ;;  %v2320_v58 = vcombine.high %v234_v51, %v238_v52  ;;  %v2322_v60 = vcombine.high %v235_v54, %v239_v55  ;;  %v295_v51 = vld [vmem:[%s3517_s1 + $0x2b8] sm:$0xff] }
  0x78   : > { %1873 = vmatprep.subr.bf16.mxu0 %v2516_v61  ;;  %1955 = vmatprep.subr.bf16.mxu1 %v2518_v62  ;;  %v242_v61 = vld [vmem:[%s3517_s1 + $0x110] sm:$0xff] }
  0x79   : > { %v246_v62 = vld [vmem:[%s3517_s1 + $0x130] sm:$0xff] }
  0x7a   : > { %v2328_v4 = vcombine.high %v242_v61, %v246_v62  ;;  %v2327_v10 = vcombine.low %v242_v61, %v246_v62  ;;  %v303_v61 = vld [vmem:[%s3517_s1 + $0x2f8] sm:$0xff] }
  0x7b   : > { %1874 = vmatpush1.bf16.msra.mxu0 %v2515_v5  ;;  %1956 = vmatpush1.bf16.msra.mxu1 %v2517_v6  ;;  %v250_v6 = vld [vmem:[%s3517_s1 + $0x150] sm:$0xff] }
  0x7c   : > { %1875 = vmatprep.subr.bf16.mxu0 %v2524_v7  ;;  %1957 = vmatprep.subr.bf16.mxu1 %v2526_v8  ;;  %v254_v7 = vld [vmem:[%s3517_s1 + $0x170] sm:$0xff]  ;;  %v251_v8 = vld [vmem:[%s3517_s1 + $0x158] sm:$0xff] }
  0x7d   : > { %v2336_v12 = vcombine.high %v250_v6, %v254_v7  ;;  %v2335_v18 = vcombine.low %v250_v6, %v254_v7  ;;  %v2337_v19 = vcombine.low %v251_v8, %v255_v9  ;;  %v311_v6 = vld [vmem:[%s3517_s1 + $0x338] sm:$0xff] }
  0x7f   : > { %1876 = vmatpush1.bf16.msra.mxu0 %v2523_v13  ;;  %1958 = vmatpush1.bf16.msra.mxu1 %v2525_v14  ;;  %v2338_v13 = vcombine.high %v251_v8, %v255_v9  ;;  %v258_v14 = vld [vmem:[%s3517_s1 + $0x190] sm:$0xff] }
  0x80   : > { %1877 = vmatprep.subr.bf16.mxu0 %v2532_v15  ;;  %1959 = vmatprep.subr.bf16.mxu1 %v2534_v16  ;;  %v262_v15 = vld [vmem:[%s3517_s1 + $0x1b0] sm:$0xff]  ;;  %v259_v16 = vld [vmem:[%s3517_s1 + $0x198] sm:$0xff] }
  0x81   : > { %v2344_v20 = vcombine.high %v258_v14, %v262_v15  ;;  %v2343_v26 = vcombine.low %v258_v14, %v262_v15  ;;  %v2345_v27 = vcombine.low %v259_v16, %v263_v17  ;;  %v319_v14 = vld [vmem:[%s3517_s1 + $0x378] sm:$0xff] }
  0x83   : > { %1878 = vmatpush1.bf16.msra.mxu0 %v2531_v59  ;;  %1960 = vmatpush1.bf16.msra.mxu1 %v2533_v21  ;;  %v2346_v59 = vcombine.high %v259_v16, %v263_v17  ;;  %v266_v21 = vld [vmem:[%s3517_s1 + $0x1d0] sm:$0xff] }
  0x84   : > { %1879 = vmatprep.subr.bf16.mxu0 %v2540_v23  ;;  %1961 = vmatprep.subr.bf16.mxu1 %v2542_v24  ;;  %v270_v23 = vld [vmem:[%s3517_s1 + $0x1f0] sm:$0xff]  ;;  %v267_v24 = vld [vmem:[%s3517_s1 + $0x1d8] sm:$0xff] }
  0x85   : > { %v2352_v28 = vcombine.high %v266_v21, %v270_v23  ;;  %v2351_v35 = vcombine.low %v266_v21, %v270_v23  ;;  %v2353_v36 = vcombine.low %v267_v24, %v271_v25  ;;  %v327_v21 = vld [vmem:[%s3517_s1 + $0x3b8] sm:$0xff] }
  0x87   : > { %1880 = vmatpush1.bf16.msra.mxu0 %v2539_v29  ;;  %1962 = vmatpush1.bf16.msra.mxu1 %v2541_v30  ;;  %v2354_v29 = vcombine.high %v267_v24, %v271_v25  ;;  %v274_v30 = vld [vmem:[%s3517_s1 + $0x210] sm:$0xff] }
  0x88   : > { %1972 = vmatprep.subr.bf16.mxu0 %v2296_v32  ;;  %2054 = vmatprep.subr.bf16.mxu1 %v2298_v33  ;;  %v278_v32 = vld [vmem:[%s3517_s1 + $0x230] sm:$0xff]  ;;  %v275_v33 = vld [vmem:[%s3517_s1 + $0x218] sm:$0xff] }
  0x89   : > { %v2360_v37 = vcombine.high %v274_v30, %v278_v32  ;;  %v2359_v44 = vcombine.low %v274_v30, %v278_v32  ;;  %v2361_v45 = vcombine.low %v275_v33, %v279_v34  ;;  %v335_v30 = vld [vmem:[%s3517_s1 + $0x3f8] sm:$0xff] }
  0x8a   : > { %1882 = vmatmul.mubr.bf16.vlgmr.msra.gmra.mrb[0].mxu0 %v2910_v22  ;;  %1964 = vmatmul.mubr.bf16.vlgmr.msra.gmra.mrb[0].mxu1 %v2910_v22 }
  0x8b   : > { %1973 = vmatpush1.bf16.msra.mxu0 %v2295_v38  ;;  %2055 = vmatpush1.bf16.msra.mxu1 %v2297_v39  ;;  %v2362_v38 = vcombine.high %v275_v33, %v279_v34  ;;  %v282_v39 = vld [vmem:[%s3517_s1 + $0x250] sm:$0xff] }
  0x8c   : > { %1974 = vmatprep.subr.bf16.mxu0 %v2304_v40  ;;  %2056 = vmatprep.subr.bf16.mxu1 %v2306_v41  ;;  %v286_v40 = vld [vmem:[%s3517_s1 + $0x270] sm:$0xff]  ;;  %v283_v41 = vld [vmem:[%s3517_s1 + $0x258] sm:$0xff] }
  0x8d   : > { %2004 = vmatprep.mubr.bf16.mxu0 %v2789_v3  ;;  %2086 = vmatprep.mubr.bf16.mxu1 %v2789_v3  ;;  %v243_v3 = vld [vmem:[%s3517_s1 + $0x118] sm:$0xff]  ;;  %v2368_v46 = vcombine.high %v282_v39, %v286_v40  ;;  %v2367_v52 = vcombine.low %v282_v39, %v286_v40  ;;  %v2369_v54 = vcombine.low %v283_v41, %v287_v42 }
  0x8e   : > { %v2330_v5 = vcombine.high %v243_v3, %v247_v0  ;;  %v2329_v11 = vcombine.low %v243_v3, %v247_v0  ;;  %v343_v39 = vld [vmem:[%s3517_s1 + $0x438] sm:$0xff] }
  0x8f   : > { %1975 = vmatpush1.bf16.msra.mxu0 %v2303_v47  ;;  %2057 = vmatpush1.bf16.msra.mxu1 %v2305_v48  ;;  %v2370_v47 = vcombine.high %v283_v41, %v287_v42  ;;  %v290_v48 = vld [vmem:[%s3517_s1 + $0x290] sm:$0xff] }
  0x90   : > { %1976 = vmatprep.subr.bf16.mxu0 %v2312_v49  ;;  %2058 = vmatprep.subr.bf16.mxu1 %v2314_v50  ;;  %v294_v49 = vld [vmem:[%s3517_s1 + $0x2b0] sm:$0xff]  ;;  %v291_v50 = vld [vmem:[%s3517_s1 + $0x298] sm:$0xff] }
  0x91   : > { %v2376_v55 = vcombine.high %v290_v48, %v294_v49  ;;  %v2375_v62 = vcombine.low %v290_v48, %v294_v49  ;;  %v2377_v3 = vcombine.low %v291_v50, %v295_v51  ;;  %v351_v48 = vld [vmem:[%s3517_s1 + $0x478] sm:$0xff] }
  0x93   : > { %1977 = vmatpush1.bf16.msra.mxu0 %v2311_v56  ;;  %2059 = vmatpush1.bf16.msra.mxu1 %v2313_v57  ;;  %v2378_v56 = vcombine.high %v291_v50, %v295_v51  ;;  %v298_v57 = vld [vmem:[%s3517_s1 + $0x2d0] sm:$0xff] }
  0x94   : > { %1978 = vmatprep.subr.bf16.mxu0 %v2320_v58  ;;  %2060 = vmatprep.subr.bf16.mxu1 %v2322_v60  ;;  %v302_v58 = vld [vmem:[%s3517_s1 + $0x2f0] sm:$0xff]  ;;  %v299_v60 = vld [vmem:[%s3517_s1 + $0x2d8] sm:$0xff] }
  0x95   : > { %v2384_v0 = vcombine.high %v298_v57, %v302_v58  ;;  %v2383_v7 = vcombine.low %v298_v57, %v302_v58  ;;  %v2385_v8 = vcombine.low %v299_v60, %v303_v61  ;;  %v359_v57 = vld [vmem:[%s3517_s1 + $0x4b8] sm:$0xff] }
  0x97   : > { %1979 = vmatpush1.bf16.msra.mxu0 %v2319_v1  ;;  %2061 = vmatpush1.bf16.msra.mxu1 %v2321_v2  ;;  %v2386_v1 = vcombine.high %v299_v60, %v303_v61  ;;  %v306_v2 = vld [vmem:[%s3517_s1 + $0x310] sm:$0xff] }
  0x98   : > { %1980 = vmatprep.subr.bf16.mxu0 %v2328_v4  ;;  %2062 = vmatprep.subr.bf16.mxu1 %v2330_v5  ;;  %v310_v4 = vld [vmem:[%s3517_s1 + $0x330] sm:$0xff]  ;;  %v307_v5 = vld [vmem:[%s3517_s1 + $0x318] sm:$0xff] }
  0x99   : > { %v2392_v9 = vcombine.high %v306_v2, %v310_v4  ;;  %v2391_v15 = vcombine.low %v306_v2, %v310_v4  ;;  %v2393_v16 = vcombine.low %v307_v5, %v311_v6 }
  0x9b   : > { %1981 = vmatpush1.bf16.msra.mxu0 %v2327_v10  ;;  %2063 = vmatpush1.bf16.msra.mxu1 %v2329_v11  ;;  %v2394_v10 = vcombine.high %v307_v5, %v311_v6  ;;  %v314_v11 = vld [vmem:[%s3517_s1 + $0x350] sm:$0xff] }
  0x9c   : > { %1982 = vmatprep.subr.bf16.mxu0 %v2336_v12  ;;  %2064 = vmatprep.subr.bf16.mxu1 %v2338_v13  ;;  %v318_v12 = vld [vmem:[%s3517_s1 + $0x370] sm:$0xff]  ;;  %v315_v13 = vld [vmem:[%s3517_s1 + $0x358] sm:$0xff] }
  0x9d   : > { %v2400_v17 = vcombine.high %v314_v11, %v318_v12  ;;  %v2399_v23 = vcombine.low %v314_v11, %v318_v12  ;;  %v2401_v24 = vcombine.low %v315_v13, %v319_v14 }
  0x9f   : > { %1983 = vmatpush1.bf16.msra.mxu0 %v2335_v18  ;;  %2065 = vmatpush1.bf16.msra.mxu1 %v2337_v19  ;;  %v2402_v18 = vcombine.high %v315_v13, %v319_v14  ;;  %v322_v19 = vld [vmem:[%s3517_s1 + $0x390] sm:$0xff] }
  0xa0   : > { %1984 = vmatprep.subr.bf16.mxu0 %v2344_v20  ;;  %2066 = vmatprep.subr.bf16.mxu1 %v2346_v59  ;;  %v326_v20 = vld [vmem:[%s3517_s1 + $0x3b0] sm:$0xff]  ;;  %v323_v59 = vld [vmem:[%s3517_s1 + $0x398] sm:$0xff] }
  0xa1   : > { %v2408_v25 = vcombine.high %v322_v19, %v326_v20  ;;  %v2407_v32 = vcombine.low %v322_v19, %v326_v20  ;;  %v2409_v33 = vcombine.low %v323_v59, %v327_v21  ;;  %v378_v14 = vld [vmem:[%s3517_s1 + $0x550] sm:$0xff] }
  0xa3   : > { %1985 = vmatpush1.bf16.msra.mxu0 %v2343_v26  ;;  %2067 = vmatpush1.bf16.msra.mxu1 %v2345_v27  ;;  %v2410_v26 = vcombine.high %v323_v59, %v327_v21  ;;  %v330_v27 = vld [vmem:[%s3517_s1 + $0x3d0] sm:$0xff] }
  0xa4   : > { %1986 = vmatprep.subr.bf16.mxu0 %v2352_v28  ;;  %2068 = vmatprep.subr.bf16.mxu1 %v2354_v29  ;;  %v334_v28 = vld [vmem:[%s3517_s1 + $0x3f0] sm:$0xff]  ;;  %v331_v29 = vld [vmem:[%s3517_s1 + $0x3d8] sm:$0xff] }
  0xa5   : > { %v2416_v34 = vcombine.high %v330_v27, %v334_v28  ;;  %v2415_v40 = vcombine.low %v330_v27, %v334_v28  ;;  %v2417_v41 = vcombine.low %v331_v29, %v335_v30  ;;  %v386_v21 = vld [vmem:[%s3517_s1 + $0x590] sm:$0xff] }
  0xa7   : > { %1987 = vmatpush1.bf16.msra.mxu0 %v2351_v35  ;;  %2069 = vmatpush1.bf16.msra.mxu1 %v2353_v36  ;;  %v2418_v35 = vcombine.high %v331_v29, %v335_v30  ;;  %v338_v36 = vld [vmem:[%s3517_s1 + $0x410] sm:$0xff] }
  0xa8   : > { %1988 = vmatprep.subr.bf16.mxu0 %v2360_v37  ;;  %2070 = vmatprep.subr.bf16.mxu1 %v2362_v38  ;;  %v342_v37 = vld [vmem:[%s3517_s1 + $0x430] sm:$0xff]  ;;  %v339_v38 = vld [vmem:[%s3517_s1 + $0x418] sm:$0xff] }
  0xa9   : > { %v2424_v42 = vcombine.high %v338_v36, %v342_v37  ;;  %v2423_v49 = vcombine.low %v338_v36, %v342_v37  ;;  %v2425_v50 = vcombine.low %v339_v38, %v343_v39  ;;  %v394_v30 = vld [vmem:[%s3517_s1 + $0x5d0] sm:$0xff] }
  0xab   : > { %1989 = vmatpush1.bf16.msra.mxu0 %v2359_v44  ;;  %2071 = vmatpush1.bf16.msra.mxu1 %v2361_v45  ;;  %v2426_v44 = vcombine.high %v339_v38, %v343_v39  ;;  %v346_v45 = vld [vmem:[%s3517_s1 + $0x450] sm:$0xff] }
  0xac   : > { %1990 = vmatprep.subr.bf16.mxu0 %v2368_v46  ;;  %2072 = vmatprep.subr.bf16.mxu1 %v2370_v47  ;;  %v350_v46 = vld [vmem:[%s3517_s1 + $0x470] sm:$0xff]  ;;  %v347_v47 = vld [vmem:[%s3517_s1 + $0x458] sm:$0xff] }
  0xad   : > { %v2432_v51 = vcombine.high %v346_v45, %v350_v46  ;;  %v2431_v58 = vcombine.low %v346_v45, %v350_v46  ;;  %v2433_v60 = vcombine.low %v347_v47, %v351_v48  ;;  %v402_v39 = vld [vmem:[%s3517_s1 + $0x610] sm:$0xff] }
  0xaf   : > { %1991 = vmatpush1.bf16.msra.mxu0 %v2367_v52  ;;  %2073 = vmatpush1.bf16.msra.mxu1 %v2369_v54  ;;  %v2434_v52 = vcombine.high %v347_v47, %v351_v48  ;;  %v354_v54 = vld [vmem:[%s3517_s1 + $0x490] sm:$0xff] }
  0xb0   : > { %1992 = vmatprep.subr.bf16.mxu0 %v2376_v55  ;;  %2074 = vmatprep.subr.bf16.mxu1 %v2378_v56  ;;  %v358_v55 = vld [vmem:[%s3517_s1 + $0x4b0] sm:$0xff]  ;;  %v355_v56 = vld [vmem:[%s3517_s1 + $0x498] sm:$0xff] }
  0xb1   : > { %v2440_v61 = vcombine.high %v354_v54, %v358_v55  ;;  %v2439_v2 = vcombine.low %v354_v54, %v358_v55  ;;  %v2441_v4 = vcombine.low %v355_v56, %v359_v57  ;;  %v410_v48 = vld [vmem:[%s3517_s1 + $0x650] sm:$0xff] }
  0xb3   : > { %1993 = vmatpush1.bf16.msra.mxu0 %v2375_v62  ;;  %2075 = vmatpush1.bf16.msra.mxu1 %v2377_v3  ;;  %v2442_v62 = vcombine.high %v355_v56, %v359_v57  ;;  %v362_v3 = vld [vmem:[%s3517_s1 + $0x4d0] sm:$0xff] }
  0xb4   : > { %1994 = vmatprep.subr.bf16.mxu0 %v2384_v0  ;;  %2076 = vmatprep.subr.bf16.mxu1 %v2386_v1  ;;  %v366_v0 = vld [vmem:[%s3517_s1 + $0x4f0] sm:$0xff]  ;;  %v367_v1 = vld [vmem:[%s3517_s1 + $0x4f8] sm:$0xff] }
  0xb5   : > { %v2448_v5 = vcombine.high %v362_v3, %v366_v0  ;;  %v418_v57 = vld [vmem:[%s3517_s1 + $0x690] sm:$0xff] }
  0xb7   : > { %1995 = vmatpush1.bf16.msra.mxu0 %v2383_v7  ;;  %2077 = vmatpush1.bf16.msra.mxu1 %v2385_v8  ;;  %v370_v7 = vld [vmem:[%s3517_s1 + $0x510] sm:$0xff] }
  0xb8   : > { %1996 = vmatprep.subr.bf16.mxu0 %v2392_v9  ;;  %2078 = vmatprep.subr.bf16.mxu1 %v2394_v10  ;;  %v374_v8 = vld [vmem:[%s3517_s1 + $0x530] sm:$0xff]  ;;  %v375_v9 = vld [vmem:[%s3517_s1 + $0x538] sm:$0xff]  ;;  %v2447_v10 = vcombine.low %v362_v3, %v366_v0 }
  0xb9   : > { %v2456_v12 = vcombine.high %v370_v7, %v374_v8 }
  0xbb   : > { %1997 = vmatpush1.bf16.msra.mxu0 %v2391_v15  ;;  %2079 = vmatpush1.bf16.msra.mxu1 %v2393_v16  ;;  %v382_v15 = vld [vmem:[%s3517_s1 + $0x570] sm:$0xff]  ;;  %v379_v16 = vld [vmem:[%s3517_s1 + $0x558] sm:$0xff] }
  0xbc   : > { %1998 = vmatprep.subr.bf16.mxu0 %v2400_v17  ;;  %2080 = vmatprep.subr.bf16.mxu1 %v2402_v18  ;;  %v383_v17 = vld [vmem:[%s3517_s1 + $0x578] sm:$0xff]  ;;  %v2455_v18 = vcombine.low %v370_v7, %v374_v8  ;;  %v2464_v20 = vcombine.high %v378_v14, %v382_v15 }
  0xbd   : > { %v2466_v59 = vcombine.high %v379_v16, %v383_v17  ;;  %v2465_v27 = vcombine.low %v379_v16, %v383_v17  ;;  %v442_v17 = vld [vmem:[%s3517_s1 + $0x750] sm:$0xff] }
  0xbf   : > { %1999 = vmatpush1.bf16.msra.mxu0 %v2399_v23  ;;  %2081 = vmatpush1.bf16.msra.mxu1 %v2401_v24  ;;  %v390_v23 = vld [vmem:[%s3517_s1 + $0x5b0] sm:$0xff]  ;;  %v387_v24 = vld [vmem:[%s3517_s1 + $0x598] sm:$0xff] }
  0xc0   : > { %2000 = vmatprep.subr.bf16.mxu0 %v2408_v25  ;;  %2082 = vmatprep.subr.bf16.mxu1 %v2410_v26  ;;  %v391_v25 = vld [vmem:[%s3517_s1 + $0x5b8] sm:$0xff]  ;;  %v2463_v26 = vcombine.low %v378_v14, %v382_v15  ;;  %v2472_v28 = vcombine.high %v386_v21, %v390_v23 }
  0xc1   : > { %v2474_v29 = vcombine.high %v387_v24, %v391_v25  ;;  %v2473_v36 = vcombine.low %v387_v24, %v391_v25  ;;  %v450_v25 = vld [vmem:[%s3517_s1 + $0x790] sm:$0xff] }
  0xc3   : > { %2001 = vmatpush1.bf16.msra.mxu0 %v2407_v32  ;;  %2083 = vmatpush1.bf16.msra.mxu1 %v2409_v33  ;;  %v398_v32 = vld [vmem:[%s3517_s1 + $0x5f0] sm:$0xff]  ;;  %v395_v33 = vld [vmem:[%s3517_s1 + $0x5d8] sm:$0xff] }
  0xc4   : > { %2002 = vmatprep.subr.bf16.mxu0 %v2416_v34  ;;  %2084 = vmatprep.subr.bf16.mxu1 %v2418_v35  ;;  %v399_v34 = vld [vmem:[%s3517_s1 + $0x5f8] sm:$0xff]  ;;  %v2471_v35 = vcombine.low %v386_v21, %v390_v23  ;;  %v2480_v37 = vcombine.high %v394_v30, %v398_v32 }
  0xc5   : > { %v2482_v38 = vcombine.high %v395_v33, %v399_v34  ;;  %v2481_v45 = vcombine.low %v395_v33, %v399_v34  ;;  %v458_v34 = vld [vmem:[%s3517_s1 + $0x7d0] sm:$0xff] }
  0xc7   : > { %2003 = vmatpush1.bf16.msra.mxu0 %v2415_v40  ;;  %2085 = vmatpush1.bf16.msra.mxu1 %v2417_v41  ;;  %v406_v40 = vld [vmem:[%s3517_s1 + $0x630] sm:$0xff]  ;;  %v403_v41 = vld [vmem:[%s3517_s1 + $0x618] sm:$0xff] }
  0xc8   : > { %2013 = vmatprep.subr.bf16.mxu0 %v2424_v42  ;;  %2095 = vmatprep.subr.bf16.mxu1 %v2426_v44  ;;  %v407_v42 = vld [vmem:[%s3517_s1 + $0x638] sm:$0xff]  ;;  %v2479_v44 = vcombine.low %v394_v30, %v398_v32  ;;  %v2488_v46 = vcombine.high %v402_v39, %v406_v40 }
  0xc9   : > { %v2490_v47 = vcombine.high %v403_v41, %v407_v42  ;;  %v2489_v54 = vcombine.low %v403_v41, %v407_v42 }
  0xca   : > { %2005 = vmatmul.mubr.bf16.vlgmr.msra.gmra.mrb[4].mxu0 %v2779_v63  ;;  %2087 = vmatmul.mubr.bf16.vlgmr.msra.gmra.mrb[4].mxu1 %v2779_v63  ;;  %v363_v63 = vld [vmem:[%s3517_s1 + $0x4d8] sm:$0xff] }
  0xcb   : > { %2014 = vmatpush1.bf16.msra.mxu0 %v2423_v49  ;;  %2096 = vmatpush1.bf16.msra.mxu1 %v2425_v50  ;;  %v2450_v6 = vcombine.high %v363_v63, %v367_v1  ;;  %v2449_v11 = vcombine.low %v363_v63, %v367_v1  ;;  %v414_v49 = vld [vmem:[%s3517_s1 + $0x670] sm:$0xff]  ;;  %v411_v50 = vld [vmem:[%s3517_s1 + $0x658] sm:$0xff] }
  0xcc   : > { %2015 = vmatprep.subr.bf16.mxu0 %v2432_v51  ;;  %2097 = vmatprep.subr.bf16.mxu1 %v2434_v52  ;;  %v415_v51 = vld [vmem:[%s3517_s1 + $0x678] sm:$0xff]  ;;  %v2487_v52 = vcombine.low %v402_v39, %v406_v40  ;;  %v2496_v55 = vcombine.high %v410_v48, %v414_v49  ;;  %v426_v1 = vld [vmem:[%s3517_s1 + $0x6d0] sm:$0xff] }
  0xcd   : > { %2045 = vmatprep.mubr.bf16.mxu0 %v2926_v31  ;;  %2127 = vmatprep.mubr.bf16.mxu1 %v2926_v31  ;;  %v371_v31 = vld [vmem:[%s3517_s1 + $0x518] sm:$0xff]  ;;  %v2498_v56 = vcombine.high %v411_v50, %v415_v51  ;;  %v2497_v3 = vcombine.low %v411_v50, %v415_v51 }
  0xce   : > { %v2458_v13 = vcombine.high %v371_v31, %v375_v9  ;;  %v2457_v19 = vcombine.low %v371_v31, %v375_v9  ;;  %v434_v9 = vld [vmem:[%s3517_s1 + $0x710] sm:$0xff] }
  0xcf   : > { %2016 = vmatpush1.bf16.msra.mxu0 %v2431_v58  ;;  %2098 = vmatpush1.bf16.msra.mxu1 %v2433_v60  ;;  %v422_v58 = vld [vmem:[%s3517_s1 + $0x6b0] sm:$0xff]  ;;  %v419_v60 = vld [vmem:[%s3517_s1 + $0x698] sm:$0xff] }
  0xd0   : > { %2017 = vmatprep.subr.bf16.mxu0 %v2440_v61  ;;  %2099 = vmatprep.subr.bf16.mxu1 %v2442_v62  ;;  %v423_v61 = vld [vmem:[%s3517_s1 + $0x6b8] sm:$0xff]  ;;  %v2495_v62 = vcombine.low %v410_v48, %v414_v49  ;;  %v2504_v0 = vcombine.high %v418_v57, %v422_v58  ;;  %v472_v48 = vsub.s32 1, %v2742_v43  ;;  %v480_v49 = vsub.s32 3, %v2742_v43 }
  0xd1   : > { %v2506_v63 = vcombine.high %v419_v60, %v423_v61  ;;  %v2505_v7 = vcombine.low %v419_v60, %v423_v61 }
  0xd3   : > { %2018 = vmatpush1.bf16.msra.mxu0 %v2439_v2  ;;  %2100 = vmatpush1.bf16.msra.mxu1 %v2441_v4  ;;  %v430_v2 = vld [vmem:[%s3517_s1 + $0x6f0] sm:$0xff]  ;;  %v427_v4 = vld [vmem:[%s3517_s1 + $0x6d8] sm:$0xff] }
  0xd4   : > { %2019 = vmatprep.subr.bf16.mxu0 %v2448_v5  ;;  %2101 = vmatprep.subr.bf16.mxu1 %v2450_v6  ;;  %v431_v5 = vld [vmem:[%s3517_s1 + $0x6f8] sm:$0xff]  ;;  %v2503_v6 = vcombine.low %v418_v57, %v422_v58  ;;  %v2512_v8 = vcombine.high %v426_v1, %v430_v2 }
  0xd5   : > { %v2514_v31 = vcombine.high %v427_v4, %v431_v5  ;;  %v2513_v14 = vcombine.low %v427_v4, %v431_v5 }
  0xd7   : > { %2020 = vmatpush1.bf16.msra.mxu0 %v2447_v10  ;;  %2102 = vmatpush1.bf16.msra.mxu1 %v2449_v11  ;;  %v438_v10 = vld [vmem:[%s3517_s1 + $0x730] sm:$0xff]  ;;  %v435_v11 = vld [vmem:[%s3517_s1 + $0x718] sm:$0xff] }
  0xd8   : > { %2021 = vmatprep.subr.bf16.mxu0 %v2456_v12  ;;  %2103 = vmatprep.subr.bf16.mxu1 %v2458_v13  ;;  %v439_v12 = vld [vmem:[%s3517_s1 + $0x738] sm:$0xff]  ;;  %v2511_v13 = vcombine.low %v426_v1, %v430_v2  ;;  %v2520_v15 = vcombine.high %v434_v9, %v438_v10 }
  0xd9   : > { %v2522_v16 = vcombine.high %v435_v11, %v439_v12  ;;  %v2521_v21 = vcombine.low %v435_v11, %v439_v12 }
  0xdb   : > { %2022 = vmatpush1.bf16.msra.mxu0 %v2455_v18  ;;  %2104 = vmatpush1.bf16.msra.mxu1 %v2457_v19  ;;  %v446_v18 = vld [vmem:[%s3517_s1 + $0x770] sm:$0xff]  ;;  %v443_v19 = vld [vmem:[%s3517_s1 + $0x758] sm:$0xff] }
  0xdc   : > { %2023 = vmatprep.subr.bf16.mxu0 %v2464_v20  ;;  %2105 = vmatprep.subr.bf16.mxu1 %v2466_v59  ;;  %v447_v20 = vld [vmem:[%s3517_s1 + $0x778] sm:$0xff]  ;;  %v2519_v59 = vcombine.low %v434_v9, %v438_v10  ;;  %v2528_v23 = vcombine.high %v442_v17, %v446_v18  ;;  %v488_v9 = vsub.s32 5, %v2742_v43  ;;  %v496_v10 = vsub.s32 7, %v2742_v43 }
  0xdd   : > { %v2530_v24 = vcombine.high %v443_v19, %v447_v20  ;;  %v2529_v30 = vcombine.low %v443_v19, %v447_v20 }
  0xdf   : > { %2024 = vmatpush1.bf16.msra.mxu0 %v2463_v26  ;;  %2106 = vmatpush1.bf16.msra.mxu1 %v2465_v27  ;;  %v454_v26 = vld [vmem:[%s3517_s1 + $0x7b0] sm:$0xff]  ;;  %v451_v27 = vld [vmem:[%s3517_s1 + $0x798] sm:$0xff] }
  0xe0   : > { %2025 = vmatprep.subr.bf16.mxu0 %v2472_v28  ;;  %2107 = vmatprep.subr.bf16.mxu1 %v2474_v29  ;;  %v455_v28 = vld [vmem:[%s3517_s1 + $0x7b8] sm:$0xff]  ;;  %v2527_v29 = vcombine.low %v442_v17, %v446_v18  ;;  %v2536_v32 = vcombine.high %v450_v25, %v454_v26 }
  0xe1   : > { %v2538_v33 = vcombine.high %v451_v27, %v455_v28  ;;  %v2537_v39 = vcombine.low %v451_v27, %v455_v28 }
  0xe3   : > { %2026 = vmatpush1.bf16.msra.mxu0 %v2471_v35  ;;  %2108 = vmatpush1.bf16.msra.mxu1 %v2473_v36  ;;  %v462_v35 = vld [vmem:[%s3517_s1 + $0x7f0] sm:$0xff]  ;;  %v459_v36 = vld [vmem:[%s3517_s1 + $0x7d8] sm:$0xff] }
  0xe4   : > { %2027 = vmatprep.subr.bf16.mxu0 %v2480_v37  ;;  %2109 = vmatprep.subr.bf16.mxu1 %v2482_v38  ;;  %v463_v37 = vld [vmem:[%s3517_s1 + $0x7f8] sm:$0xff]  ;;  %v2535_v38 = vcombine.low %v450_v25, %v454_v26  ;;  %v2544_v40 = vcombine.high %v458_v34, %v462_v35  ;;  %v2543_v42 = vcombine.low %v458_v34, %v462_v35 }
  0xe5   : > { %v2546_v41 = vcombine.high %v459_v36, %v463_v37 }
  0xe7   : > { %2028 = vmatpush1.bf16.msra.mxu0 %v2479_v44  ;;  %2110 = vmatpush1.bf16.msra.mxu1 %v2481_v45  ;;  %v2545_v44 = vcombine.low %v459_v36, %v463_v37  ;;  %v468_v45 = vsub.s32 0, %v2742_v43 }
  0xe8   : > { %2029 = vmatprep.subr.bf16.mxu0 %v2488_v46  ;;  %2111 = vmatprep.subr.bf16.mxu1 %v2490_v47  ;;  %v464_v46 = vld [vmem:[%s3518_s2] sm:$0xff]  ;;  %v476_v47 = vsub.s32 2, %v2742_v43 }
  0xe9   : > { %v469_v50 = vrot.slane %v464_v46, %v468_v45 }
  0xea   : > { %v477_v51 = vrot.slane %v464_v46, %v476_v47 }
  0xeb   : > { %2030 = vmatpush1.bf16.msra.mxu0 %v2487_v52  ;;  %2112 = vmatpush1.bf16.msra.mxu1 %v2489_v54  ;;  %v473_v52 = vrot.slane %v464_v46, %v472_v48  ;;  %v481_v54 = vrot.slane %v464_v46, %v480_v49 }
  0xec   : > { %2031 = vmatprep.subr.bf16.mxu0 %v2496_v55  ;;  %2113 = vmatprep.subr.bf16.mxu1 %v2498_v56 }
  0xef   : > { %2032 = vmatpush1.bf16.msra.mxu0 %v2495_v62  ;;  %2114 = vmatpush1.bf16.msra.mxu1 %v2497_v3 }
  0xf0   : > { %2033 = vmatprep.subr.bf16.mxu0 %v2504_v0  ;;  %2115 = vmatprep.subr.bf16.mxu1 %v2506_v63 }
  0xf3   : > { %2034 = vmatpush1.bf16.msra.mxu0 %v2503_v6  ;;  %2116 = vmatpush1.bf16.msra.mxu1 %v2505_v7 }
  0xf4   : > { %2035 = vmatprep.subr.bf16.mxu0 %v2512_v8  ;;  %2117 = vmatprep.subr.bf16.mxu1 %v2514_v31  ;;  %v484_v8 = vsub.s32 4, %v2742_v43  ;;  %v492_v31 = vsub.s32 6, %v2742_v43 }
  0xf6   : > { %v485_v11 = vrot.slane %v464_v46, %v484_v8  ;;  %v493_v12 = vrot.slane %v464_v46, %v492_v31 }
  0xf7   : > { %2036 = vmatpush1.bf16.msra.mxu0 %v2511_v13  ;;  %2118 = vmatpush1.bf16.msra.mxu1 %v2513_v14  ;;  %v489_v13 = vrot.slane %v464_v46, %v488_v9  ;;  %v497_v14 = vrot.slane %v464_v46, %v496_v10 }
  0xf8   : > { %2037 = vmatprep.subr.bf16.mxu0 %v2520_v15  ;;  %2119 = vmatprep.subr.bf16.mxu1 %v2522_v16 }
  0xfb   : > { %2038 = vmatpush1.bf16.msra.mxu0 %v2519_v59  ;;  %2120 = vmatpush1.bf16.msra.mxu1 %v2521_v21 }
  0xfc   : > { %2039 = vmatprep.subr.bf16.mxu0 %v2528_v23  ;;  %2121 = vmatprep.subr.bf16.mxu1 %v2530_v24 }
  0xff   : > { %2040 = vmatpush1.bf16.msra.mxu0 %v2527_v29  ;;  %2122 = vmatpush1.bf16.msra.mxu1 %v2529_v30 }
 0x100   : > { %2041 = vmatprep.subr.bf16.mxu0 %v2536_v32  ;;  %2123 = vmatprep.subr.bf16.mxu1 %v2538_v33 }
 0x103   : > { %2042 = vmatpush1.bf16.msra.mxu0 %v2535_v38  ;;  %2124 = vmatpush1.bf16.msra.mxu1 %v2537_v39 }
 0x104   : > { %2043 = vmatprep.subr.bf16.mxu0 %v2544_v40  ;;  %2125 = vmatprep.subr.bf16.mxu1 %v2546_v41 }
 0x107   : > { %2044 = vmatpush1.bf16.msra.mxu0 %v2543_v42  ;;  %2126 = vmatpush1.bf16.msra.mxu1 %v2545_v44 }
 0x10a   : > { %2046 = vmatmul.mubr.bf16.vlgmr.msra.gmra.mrb[4].mxu0 %v2910_v22  ;;  %2128 = vmatmul.mubr.bf16.vlgmr.msra.gmra.mrb[4].mxu1 %v2910_v22 }
 0x15d   : > { %v1883_v55 = vpop.f32.mrb[0].mxu0  ;;  %v1965_v22 = vpop.f32.mrb[0].mxu1 }
 0x15e   : > { %v2555_v56 = vadd.f32 %v1883_v55, %v469_v50  ;;  %v1885_v57 = vpop.f32.mrb[1].mxu0  ;;  %v2557_v58 = vadd.f32 %v1965_v22, %v477_v51  ;;  %v1967_v61 = vpop.f32.mrb[1].mxu1 }
 0x15f   : > { %v2556_v60 = vadd.f32 %v1885_v57, %v473_v52  ;;  %v1887_v62 = vpop.f32.mrb[2].mxu0  ;;  %v2558_v3 = vadd.f32 %v1967_v61, %v481_v54  ;;  %v1969_v0 = vpop.f32.mrb[2].mxu1 }
 0x160   : > { %v1888_v63 = vpop.f32.mrb[3].mxu0  ;;  %v1970_v2 = vpop.f32.mrb[3].mxu1 }
 0x161   : > { %v2547_v1 = vpack.c.bf16 %v2556_v60, %v2555_v56  ;;  %v2548_v4 = vpack.c.bf16 %v2558_v3, %v2557_v58 }
 0x163   : > { %v2160_v5 = vrot.slane %v2547_v1, %v2761_v53  ;;  %v2167_v6 = vrot.slane %v2548_v4, %v2761_v53 }
 0x165   : > { %v2168_v7 = vcombine.low %v2160_v5, %v2167_v6 }
 0x167   : > { %2188 = vst [vmem:[%s206_s4] sm:$0xff] %v2168_v7 }
 0x1dd   : > { %v2047_v15 = vpop.f32.mrb[4].mxu0  ;;  %v2129_v17 = vpop.f32.mrb[4].mxu1 }
 0x1de   : > { %v2559_v16 = vadd.f32 %v2047_v15, %v485_v11  ;;  %v2049_v18 = vpop.f32.mrb[5].mxu0  ;;  %v2561_v19 = vadd.f32 %v2129_v17, %v493_v12  ;;  %v2131_v59 = vpop.f32.mrb[5].mxu1 }
 0x1df   : > { %v2560_v20 = vadd.f32 %v2049_v18, %v489_v13  ;;  %v2051_v21 = vpop.f32.mrb[6].mxu0  ;;  %v2562_v23 = vadd.f32 %v2131_v59, %v497_v14  ;;  %v2133_v24 = vpop.f32.mrb[6].mxu1 }
 0x1e0   : > { %v2052_v25 = vpop.f32.mrb[7].mxu0  ;;  %v2134_v27 = vpop.f32.mrb[7].mxu1 }
 0x1e1   : > { %v2549_v26 = vpack.c.bf16 %v2560_v20, %v2559_v16  ;;  %v2550_v28 = vpack.c.bf16 %v2562_v23, %v2561_v19 }
 0x1e3   : > { %v2177_v43 = vrot.slane %v2549_v26, %v2761_v53  ;;  %v2184_v29 = vrot.slane %v2550_v28, %v2761_v53 }
 0x1e5   : > { %v2185_v30 = vcombine.low %v2177_v43, %v2184_v29 }
 0x1e7   : > { %2189 = vst [vmem:[%s206_s4 + $0x8] sm:$0xff] %v2185_v30 }
 0x1e8 PF: > { %s13_s14 = sadd.s32 1, %s2627_s14   ;;  %s3520_s12 = smov %s2623_s13 }
 0x1e9   : > { %p10_p5 = scmp.ge.s32.totalorder %s13_s14, 4   ;;  %s3521_s13 = smov %s3523_s15 }
 0x1eb   :  { %12 = sbr.rel (!%p10_p5) target bundleno = 2 (0x2), region = 62 }

// kernel: tile.23
= control target key start
LH: loop header
LB: loop body
LE: loop exit
PB: predicated region body
PF: predicated region fallthrough
CT: control target
= control target key end

     0   :  { %s22_s0 = inlined_call_operand.vmem [shape: f32[128], index: 0, kind: input, shape index: {}]   ;;  %s23_s1 = inlined_call_operand.vmem [shape: f32[4,128], index: 1, kind: output, shape index: {}]  }
   0x1   :  { %v4_v0 = vld [vmem:[%s22_s0] ss:$0 sm:$0xff] }
   0x2   :  { %5 = vst [vmem:[%s23_s1] sm:$0xf] %v4_v0 }

// kernel: refugee_camp_detector.12
= control target key start
LH: loop header
LB: loop body
LE: loop exit
PB: predicated region body
PF: predicated region fallthrough
CT: control target
= control target key end

     0   :  { %s1097_s12 = smov 0   ;;  %s1099_s13 = smov 0   ;;  %s1337_s0 = inlined_call_operand.vmem [shape: bf16[2,16,256], index: 0, kind: input, shape index: {}]   ;;  %s1338_s1 = inlined_call_operand.vmem [shape: bf16[256,512], index: 1, kind: input, shape index: {}]   ;;  %s1339_s2 = inlined_call_operand.vmem [shape: f32[1,512], index: 2, kind: input, shape index: {}]   ;;  %s1340_s3 = inlined_call_operand.vmem [shape: bf16[2,16,512], index: 3, kind: output, shape index: {}]  }
   0x1   :  { %s1101_s14 = smov 0  }
   0x2 LB: > { %s25_s15 = sadd.s32 1, %s1071_s13  ;;  %p847_p0 = scmp.ge.s32.totalorder %s1075_s14, 1  ;;  %s1075_s14 = sphi %s1101_s14, %s13_s14   ;;  %s1071_s13 = sphi %s1099_s13, %s1342_s13   ;;  %s1067_s12 = sphi %s1097_s12, %s1341_s12  }
   0x3   : > { %p27_p1 = scmp.ge.s32.totalorder %s25_s15, 2  ;;  %p159_p2 = scmp.lt.s32.totalorder %s1075_s14, 3 }
   0x5   : > { %s1344_s15 = smov (%p27_p1, %s25_s15), 0  ;;  %p160_p3 = pnand %p847_p0, %p159_p2 }
   0x6   : > { %v954_v0 = vld [vmem:[%s1338_s1 + $0x4] ss:$16 sps:$4 sm:$0xff] (!%p160_p3)   ;;  %v956_v1 = vld [vmem:[%s1338_s1 + $0xc] ss:$16 sps:$4 sm:$0xff] (!%p160_p3)   ;;  %v958_v2 = vld [vmem:[%s1338_s1] ss:$16 sps:$4 sm:$0xff] (!%p160_p3)  }
   0x7   : > { %163 = sbr.rel (%p160_p3) target bundleno = 291 (0x123), region = 32  ;;  %633 = vmatprep.subr.bf16.mxu0 (!%p160_p3), %v954_v0  ;;  %v959_v3 = vld [vmem:[%s1338_s1 + $0x8] ss:$16 sps:$4 sm:$0xff] (!%p160_p3)   ;;  %676 = vmatprep.subr.bf16.mxu1 (!%p160_p3), %v956_v1  ;;  %v960_v4 = vld [vmem:[%s1338_s1 + $0x24] ss:$16 sps:$4 sm:$0xff] (!%p160_p3)   ;;  %p194_p4 = scmp.lt.s32.totalorder (!%p160_p3), %s1067_s12, 1 }
   0x8   : > { %634 = vmatpush1.bf16.msra.mxu0 (!%p160_p3), %v958_v2  ;;  %677 = vmatpush1.bf16.msra.mxu1 (!%p160_p3), %v959_v3  ;;  %v962_v5 = vld [vmem:[%s1338_s1 + $0x2c] ss:$16 sps:$4 sm:$0xff] (!%p160_p3)   ;;  %v964_v6 = vld [vmem:[%s1338_s1 + $0x20] ss:$16 sps:$4 sm:$0xff] (!%p160_p3)   ;;  %v965_v7 = vld [vmem:[%s1338_s1 + $0x28] ss:$16 sps:$4 sm:$0xff] (!%p160_p3)   ;;  %v283_v2 = vlaneseq (!%p160_p3) }
   0x9   : > { %635 = vmatprep.subr.bf16.mxu0 (!%p160_p3), %v960_v4  ;;  %678 = vmatprep.subr.bf16.mxu1 (!%p160_p3), %v962_v5  ;;  %v966_v8 = vld [vmem:[%s1338_s1 + $0x44] ss:$16 sps:$4 sm:$0xff] (!%p160_p3)   ;;  %v968_v9 = vld [vmem:[%s1338_s1 + $0x4c] ss:$16 sps:$4 sm:$0xff] (!%p160_p3)   ;;  %v970_v10 = vld [vmem:[%s1338_s1 + $0x40] ss:$16 sps:$4 sm:$0xff] (!%p160_p3)  }
   0xa   : > { %v971_v11 = vld [vmem:[%s1338_s1 + $0x48] ss:$16 sps:$4 sm:$0xff] (!%p160_p3)   ;;  %v972_v12 = vld [vmem:[%s1338_s1 + $0x64] ss:$16 sps:$4 sm:$0xff] (!%p160_p3)   ;;  %v974_v13 = vld [vmem:[%s1338_s1 + $0x6c] ss:$16 sps:$4 sm:$0xff] (!%p160_p3)  }
   0xb   : > { %v976_v14 = vld [vmem:[%s1338_s1 + $0x60] ss:$16 sps:$4 sm:$0xff] (!%p160_p3)   ;;  %v977_v15 = vld [vmem:[%s1338_s1 + $0x68] ss:$16 sps:$4 sm:$0xff] (!%p160_p3)   ;;  %v978_v16 = vld [vmem:[%s1338_s1 + $0x84] ss:$16 sps:$4 sm:$0xff] (!%p160_p3)  }
   0xc   : > { %636 = vmatpush1.bf16.msra.mxu0 (!%p160_p3), %v964_v6  ;;  %679 = vmatpush1.bf16.msra.mxu1 (!%p160_p3), %v965_v7  ;;  %v980_v17 = vld [vmem:[%s1338_s1 + $0x8c] ss:$16 sps:$4 sm:$0xff] (!%p160_p3)   ;;  %v982_v18 = vld [vmem:[%s1338_s1 + $0x80] ss:$16 sps:$4 sm:$0xff] (!%p160_p3)   ;;  %v983_v19 = vld [vmem:[%s1338_s1 + $0x88] ss:$16 sps:$4 sm:$0xff] (!%p160_p3)  }
   0xd   : > { %637 = vmatprep.subr.bf16.mxu0 (!%p160_p3), %v966_v8  ;;  %680 = vmatprep.subr.bf16.mxu1 (!%p160_p3), %v968_v9  ;;  %v984_v20 = vld [vmem:[%s1338_s1 + $0xa4] ss:$16 sps:$4 sm:$0xff] (!%p160_p3)   ;;  %v986_v21 = vld [vmem:[%s1338_s1 + $0xac] ss:$16 sps:$4 sm:$0xff] (!%p160_p3)   ;;  %v988_v22 = vld [vmem:[%s1338_s1 + $0xa0] ss:$16 sps:$4 sm:$0xff] (!%p160_p3)  }
   0xe   : > { %v989_v23 = vld [vmem:[%s1338_s1 + $0xa8] ss:$16 sps:$4 sm:$0xff]   ;;  %v990_v24 = vld [vmem:[%s1338_s1 + $0xc4] ss:$16 sps:$4 sm:$0xff]   ;;  %v992_v25 = vld [vmem:[%s1338_s1 + $0xcc] ss:$16 sps:$4 sm:$0xff]  }
   0xf   : > { %v994_v26 = vld [vmem:[%s1338_s1 + $0xc0] ss:$16 sps:$4 sm:$0xff]   ;;  %v995_v27 = vld [vmem:[%s1338_s1 + $0xc8] ss:$16 sps:$4 sm:$0xff]   ;;  %v996_v28 = vld [vmem:[%s1338_s1 + $0xe4] ss:$16 sps:$4 sm:$0xff]  }
  0x10   : > { %638 = vmatpush1.bf16.msra.mxu0 %v970_v10  ;;  %681 = vmatpush1.bf16.msra.mxu1 %v971_v11  ;;  %v998_v29 = vld [vmem:[%s1338_s1 + $0xec] ss:$16 sps:$4 sm:$0xff]   ;;  %v1000_v30 = vld [vmem:[%s1338_s1 + $0xe0] ss:$16 sps:$4 sm:$0xff]   ;;  %v1001_v31 = vld [vmem:[%s1338_s1 + $0xe8] ss:$16 sps:$4 sm:$0xff]  }
  0x11   : > { %639 = vmatprep.subr.bf16.mxu0 %v972_v12  ;;  %682 = vmatprep.subr.bf16.mxu1 %v974_v13  ;;  %v1002_v32 = vld [vmem:[%s1338_s1 + $0x104] ss:$16 sps:$4 sm:$0xff]   ;;  %v1004_v33 = vld [vmem:[%s1338_s1 + $0x10c] ss:$16 sps:$4 sm:$0xff]   ;;  %v1006_v34 = vld [vmem:[%s1338_s1 + $0x100] ss:$16 sps:$4 sm:$0xff]  }
  0x12   : > { %v1007_v35 = vld [vmem:[%s1338_s1 + $0x108] ss:$16 sps:$4 sm:$0xff]   ;;  %v1008_v36 = vld [vmem:[%s1338_s1 + $0x124] ss:$16 sps:$4 sm:$0xff]   ;;  %v1010_v37 = vld [vmem:[%s1338_s1 + $0x12c] ss:$16 sps:$4 sm:$0xff]  }
  0x13   : > { %s1346_s12 = smov (!%p194_p4, %s1067_s12), 1  ;;  %v1012_v38 = vld [vmem:[%s1338_s1 + $0x120] ss:$16 sps:$4 sm:$0xff]   ;;  %v1013_v39 = vld [vmem:[%s1338_s1 + $0x128] ss:$16 sps:$4 sm:$0xff]   ;;  %v284_v3 = vshrl.u32 %v283_v2, 7 }
  0x14   : > { %640 = vmatpush1.bf16.msra.mxu0 %v976_v14  ;;  %683 = vmatpush1.bf16.msra.mxu1 %v977_v15  ;;  %v1014_v40 = vld [vmem:[%s1338_s1 + $0x144] ss:$16 sps:$4 sm:$0xff]   ;;  %v1016_v41 = vld [vmem:[%s1338_s1 + $0x14c] ss:$16 sps:$4 sm:$0xff]   ;;  %s924_s4 = sshll.u32 %s1346_s12, 4 }
  0x15   : > { %641 = vmatprep.subr.bf16.mxu0 %v978_v16  ;;  %684 = vmatprep.subr.bf16.mxu1 %v980_v17  ;;  %v1018_v42 = vld [vmem:[%s1338_s1 + $0x140] ss:$16 sps:$4 sm:$0xff]   ;;  %v1019_v43 = vld [vmem:[%s1338_s1 + $0x148] ss:$16 sps:$4 sm:$0xff]   ;;  %v1020_v44 = vld [vmem:[%s1338_s1 + $0x164] ss:$16 sps:$4 sm:$0xff]   ;;  %s1260_s17 = scalar_lea.vmem %s1337_s0, %s924_s4 }
  0x16   : > { %v1022_v45 = vld [vmem:[%s1338_s1 + $0x16c] ss:$16 sps:$4 sm:$0xff]   ;;  %v1024_v47 = vld [vmem:[%s1338_s1 + $0x160] ss:$16 sps:$4 sm:$0xff]   ;;  %v1025_v48 = vld [vmem:[%s1338_s1 + $0x168] ss:$16 sps:$4 sm:$0xff]  }
  0x17   : > { %v1052_v46 = vld [vmem:[%s1260_s17 + $0x4] ss:$8 sps:$4 sm:$0xff]   ;;  %v1030_v51 = vld [vmem:[%s1338_s1 + $0x180] ss:$16 sps:$4 sm:$0xff]   ;;  %v1031_v52 = vld [vmem:[%s1338_s1 + $0x188] ss:$16 sps:$4 sm:$0xff]  }
  0x18   : > { %642 = vmatpush1.bf16.msra.mxu0 %v982_v18  ;;  %685 = vmatpush1.bf16.msra.mxu1 %v983_v19  ;;  %v1026_v49 = vld [vmem:[%s1338_s1 + $0x184] ss:$16 sps:$4 sm:$0xff]   ;;  %v1028_v50 = vld [vmem:[%s1338_s1 + $0x18c] ss:$16 sps:$4 sm:$0xff]   ;;  %v1036_v55 = vld [vmem:[%s1338_s1 + $0x1a0] ss:$16 sps:$4 sm:$0xff]  }
  0x19   : > { %643 = vmatprep.subr.bf16.mxu0 %v984_v20  ;;  %686 = vmatprep.subr.bf16.mxu1 %v986_v21  ;;  %v1032_v53 = vld [vmem:[%s1338_s1 + $0x1a4] ss:$16 sps:$4 sm:$0xff]   ;;  %v1034_v54 = vld [vmem:[%s1338_s1 + $0x1ac] ss:$16 sps:$4 sm:$0xff]   ;;  %v1037_v56 = vld [vmem:[%s1338_s1 + $0x1a8] ss:$16 sps:$4 sm:$0xff]  }
  0x1a   : > { %665 = vmatprep.mubr.bf16.mxu0 %v1052_v46  ;;  %708 = vmatprep.mubr.bf16.mxu1 %v1052_v46  ;;  %v1038_v57 = vld [vmem:[%s1338_s1 + $0x1c4] ss:$16 sps:$4 sm:$0xff]   ;;  %v1040_v58 = vld [vmem:[%s1338_s1 + $0x1cc] ss:$16 sps:$4 sm:$0xff]   ;;  %v1042_v59 = vld [vmem:[%s1338_s1 + $0x1c0] ss:$16 sps:$4 sm:$0xff]  }
  0x1b   : > { %v1043_v60 = vld [vmem:[%s1338_s1 + $0x1c8] ss:$16 sps:$4 sm:$0xff]   ;;  %v1044_v61 = vld [vmem:[%s1338_s1 + $0x1e4] ss:$16 sps:$4 sm:$0xff]   ;;  %v1046_v62 = vld [vmem:[%s1338_s1 + $0x1ec] ss:$16 sps:$4 sm:$0xff]  }
  0x1c   : > { %644 = vmatpush1.bf16.msra.mxu0 %v988_v22  ;;  %687 = vmatpush1.bf16.msra.mxu1 %v989_v23  ;;  %v1048_v63 = vld [vmem:[%s1338_s1 + $0x1e0] ss:$16 sps:$4 sm:$0xff]   ;;  %v1049_v0 = vld [vmem:[%s1338_s1 + $0x1e8] ss:$16 sps:$4 sm:$0xff]   ;;  %v285_v4 = vsub.s32 0, %v284_v3  ;;  %v293_v5 = vsub.s32 2, %v284_v3 }
  0x1d   : > { %645 = vmatprep.subr.bf16.mxu0 %v990_v24  ;;  %688 = vmatprep.subr.bf16.mxu1 %v992_v25  ;;  %v1050_v1 = vld [vmem:[%s1260_s17] ss:$8 sps:$4 sm:$0xff]   ;;  %v289_v7 = vsub.s32 1, %v284_v3  ;;  %v297_v8 = vsub.s32 3, %v284_v3  ;;  %s925_s17 = sshll.u32 %s1346_s12, 5 }
  0x1e   : > { %v281_v6 = vld [vmem:[%s1339_s2] sm:$0xf]  ;;  %s213_s11 = scalar_lea.vmem %s1340_s3, %s925_s17 }
  0x1f   : > { %v286_v9 = vrot.slane %v281_v6, %v285_v4  ;;  %v294_v10 = vrot.slane %v281_v6, %v293_v5  ;;  %v290_v11 = vrot.slane %v281_v6, %v289_v7  ;;  %v298_v12 = vrot.slane %v281_v6, %v297_v8 }
  0x20   : > { %646 = vmatpush1.bf16.msra.mxu0 %v994_v26  ;;  %689 = vmatpush1.bf16.msra.mxu1 %v995_v27 }
  0x21   : > { %647 = vmatprep.subr.bf16.mxu0 %v996_v28  ;;  %690 = vmatprep.subr.bf16.mxu1 %v998_v29 }
  0x24   : > { %648 = vmatpush1.bf16.msra.mxu0 %v1000_v30  ;;  %691 = vmatpush1.bf16.msra.mxu1 %v1001_v31 }
  0x25   : > { %649 = vmatprep.subr.bf16.mxu0 %v1002_v32  ;;  %692 = vmatprep.subr.bf16.mxu1 %v1004_v33 }
  0x28   : > { %650 = vmatpush1.bf16.msra.mxu0 %v1006_v34  ;;  %693 = vmatpush1.bf16.msra.mxu1 %v1007_v35 }
  0x29   : > { %651 = vmatprep.subr.bf16.mxu0 %v1008_v36  ;;  %694 = vmatprep.subr.bf16.mxu1 %v1010_v37 }
  0x2c   : > { %652 = vmatpush1.bf16.msra.mxu0 %v1012_v38  ;;  %695 = vmatpush1.bf16.msra.mxu1 %v1013_v39 }
  0x2d   : > { %653 = vmatprep.subr.bf16.mxu0 %v1014_v40  ;;  %696 = vmatprep.subr.bf16.mxu1 %v1016_v41 }
  0x30   : > { %654 = vmatpush1.bf16.msra.mxu0 %v1018_v42  ;;  %697 = vmatpush1.bf16.msra.mxu1 %v1019_v43 }
  0x31   : > { %655 = vmatprep.subr.bf16.mxu0 %v1020_v44  ;;  %698 = vmatprep.subr.bf16.mxu1 %v1022_v45 }
  0x34   : > { %656 = vmatpush1.bf16.msra.mxu0 %v1024_v47  ;;  %699 = vmatpush1.bf16.msra.mxu1 %v1025_v48 }
  0x35   : > { %657 = vmatprep.subr.bf16.mxu0 %v1026_v49  ;;  %700 = vmatprep.subr.bf16.mxu1 %v1028_v50 }
  0x38   : > { %658 = vmatpush1.bf16.msra.mxu0 %v1030_v51  ;;  %701 = vmatpush1.bf16.msra.mxu1 %v1031_v52 }
  0x39   : > { %659 = vmatprep.subr.bf16.mxu0 %v1032_v53  ;;  %702 = vmatprep.subr.bf16.mxu1 %v1034_v54 }
  0x3c   : > { %660 = vmatpush1.bf16.msra.mxu0 %v1036_v55  ;;  %703 = vmatpush1.bf16.msra.mxu1 %v1037_v56 }
  0x3d   : > { %661 = vmatprep.subr.bf16.mxu0 %v1038_v57  ;;  %704 = vmatprep.subr.bf16.mxu1 %v1040_v58 }
  0x40   : > { %662 = vmatpush1.bf16.msra.mxu0 %v1042_v59  ;;  %705 = vmatpush1.bf16.msra.mxu1 %v1043_v60 }
  0x41   : > { %663 = vmatprep.subr.bf16.mxu0 %v1044_v61  ;;  %706 = vmatprep.subr.bf16.mxu1 %v1046_v62 }
  0x44   : > { %664 = vmatpush1.bf16.msra.mxu0 %v1048_v63  ;;  %707 = vmatpush1.bf16.msra.mxu1 %v1049_v0 }
  0x47   : > { %666 = vmatmul.mubr.bf16.vlgmr.msra.gmra.mrb[0].mxu0 %v1050_v1  ;;  %709 = vmatmul.mubr.bf16.vlgmr.msra.gmra.mrb[0].mxu1 %v1050_v1 }
 0x11a   : > { %v667_v13 = vpop.f32.mrb[0].mxu0  ;;  %v710_v14 = vpop.f32.mrb[0].mxu1 }
 0x11b   : > { %v668_v15 = vadd.f32 %v667_v13, %v286_v9  ;;  %v711_v16 = vadd.f32 %v710_v14, %v294_v10  ;;  %v669_v17 = vpop.f32.mrb[1].mxu0  ;;  %v712_v18 = vpop.f32.mrb[1].mxu1 }
 0x11c   : > { %v670_v19 = vadd.f32 %v669_v17, %v290_v11  ;;  %v713_v20 = vadd.f32 %v712_v18, %v298_v12  ;;  %v671_v21 = vpop.f32.mrb[2].mxu0  ;;  %v714_v22 = vpop.f32.mrb[2].mxu1 }
 0x11d   : > { %v672_v23 = vadd.f32 %v671_v21, %v286_v9  ;;  %v715_v24 = vadd.f32 %v714_v22, %v294_v10  ;;  %v673_v25 = vpop.f32.mrb[3].mxu0  ;;  %v716_v26 = vpop.f32.mrb[3].mxu1 }
 0x11e   : > { %v926_v27 = vpack.c.bf16 %v670_v19, %v668_v15  ;;  %v927_v28 = vpack.c.bf16 %v713_v20, %v711_v16  ;;  %v674_v29 = vadd.f32 %v673_v25, %v290_v11  ;;  %v717_v30 = vadd.f32 %v716_v26, %v298_v12 }
 0x120   : > { %743 = vst [vmem:[%s213_s11] sm:$0xff] %v926_v27  ;;  %744 = vst [vmem:[%s213_s11 + $0x8] sm:$0xff] %v927_v28  ;;  %v928_v31 = vpack.c.bf16 %v674_v29, %v672_v23  ;;  %v929_v32 = vpack.c.bf16 %v717_v30, %v715_v24 }
 0x122   : > { %745 = vst [vmem:[%s213_s11 + $0x10] sm:$0xff] %v928_v31  ;;  %746 = vst [vmem:[%s213_s11 + $0x18] sm:$0xff] %v929_v32 }
 0x123 PF: > { %s13_s14 = sadd.s32 1, %s1075_s14   ;;  %s1341_s12 = smov %s1071_s13 }
 0x124   : > { %p10_p5 = scmp.ge.s32.totalorder %s13_s14, 4   ;;  %s1342_s13 = smov %s1344_s15 }
 0x126   :  { %12 = sbr.rel (!%p10_p5) target bundleno = 2 (0x2), region = 62 }

// kernel: tile.29
= control target key start
LH: loop header
LB: loop body
LE: loop exit
PB: predicated region body
PF: predicated region fallthrough
CT: control target
= control target key end

     0   :  { %s6_s8 = smov 3  ;;  %vm8_vm0 = vcmask 523264   ;;  %s30_s9 = smov 64   ;;  %vm15_vm1 = vcmask 1048064   ;;  %s50_s0 = inlined_call_operand.vmem [shape: f32[4,64], index: 0, kind: input, shape index: {}]   ;;  %s51_s1 = inlined_call_operand.vmem [shape: f32[1,256], index: 1, kind: output, shape index: {}]  }
   0x1   :  { %v4_v0 = vld [vmem:[%s50_s0] sm:$0xf]  ;;  %s11_s0 = smov 3 }
   0x2   :  { %5 = vst [vmem:[#allocation1] sm:$0xf] %v4_v0 }
   0x9   :  { %v12_v1 = vld [vmem:[#allocation1 + $0x1] ss:$2 sm:%s11_s0]   ;;  %v7_v2 = vld [vmem:[#allocation1] ss:$2 sm:%s6_s8]  }
   0xa   :  { %13 = vrot.lane.b32.xlu0 %v12_v1, %s30_s9  ;;  %9 = vst.msk [vmem:[#allocation0] ss:$8 sm:$0x3] %vm8_vm0, %v7_v2  }
  0x7c   :  { %v14_v3 = vpop.permute.xlu0 %13  }
  0x7d   :  { %16 = vst.msk [vmem:[#allocation0] ss:$8 sm:$0x3] %vm15_vm1, %v14_v3  }
  0x84   :  { %v20_v4 = vld [vmem:[#allocation0] sm:$0x1]  ;;  %v24_v5 = vld [vmem:[#allocation0 + $0x8] sm:$0x1] }
  0x85   :  { %22 = vst [vmem:[%s51_s1] sm:$0x1] %v20_v4  ;;  %28 = vst [vmem:[%s51_s1 + $0x1] sm:$0x1] %v24_v5 }

// kernel: refugee_camp_detector.13
= control target key start
LH: loop header
LB: loop body
LE: loop exit
PB: predicated region body
PF: predicated region fallthrough
CT: control target
= control target key end

     0   :  { %s1093_s20 = smov 0   ;;  %s1095_s21 = smov 0   ;;  %s1258_s0 = inlined_call_operand.vmem [shape: bf16[2,64,128], index: 0, kind: input, shape index: {}]   ;;  %s1259_s1 = inlined_call_operand.vmem [shape: bf16[128,256], index: 1, kind: input, shape index: {}]   ;;  %s1260_s2 = inlined_call_operand.vmem [shape: f32[1,256], index: 2, kind: input, shape index: {}]   ;;  %s1261_s3 = inlined_call_operand.vmem [shape: bf16[256,4], index: 3, kind: input, shape index: {}]   ;;  %s1262_s4 = inlined_call_operand.<no memory space> [shape: f32[1,1], index: 4, kind: input, shape index: {}]   ;;  %s1263_s5 = inlined_call_operand.vmem [shape: f32[2,64,4], index: 5, kind: output, shape index: {}]  }
   0x1   :  { %v10_v0 = vstv %s1262_s4  ;;  %s1097_s22 = smov 0  }
   0x2   :  { %11 = vst [vmem:[#allocation2] sm:$0x1] %v10_v0 }
   0x3 LB: > { %s29_s4 = sadd.s32 1, %s1053_s21  ;;  %p839_p0 = scmp.ge.s32.totalorder %s1057_s22, 1  ;;  %s1057_s22 = sphi %s1097_s22, %s17_s22   ;;  %s1053_s21 = sphi %s1095_s21, %s1265_s21   ;;  %s1049_s20 = sphi %s1093_s20, %s1264_s20  }
   0x4   : > { %p31_p1 = scmp.ge.s32.totalorder %s29_s4, 2  ;;  %p210_p2 = scmp.lt.s32.totalorder %s1057_s22, 3 }
   0x6   : > { %s1267_s4 = smov (%p31_p1, %s29_s4), 0  ;;  %p211_p3 = pnand %p839_p0, %p210_p2 }
   0x7   : > { %v959_v1 = vld [vmem:[%s1259_s1 + $0x4] ss:$8 sps:$4 sm:$0xff] (!%p211_p3)   ;;  %p247_p4 = scmp.lt.s32.totalorder (!%p211_p3), %s1049_s20, 1  ;;  %v961_v2 = vld [vmem:[%s1259_s1] ss:$8 sps:$4 sm:$0xff] (!%p211_p3)   ;;  %v1059_v3 = vmov (!%p211_p3), 0   ;;  %v293_v39 = vlaneseq (!%p211_p3) }
   0x8   : > { %214 = sbr.rel (%p211_p3) target bundleno = 531 (0x213), region = 40  ;;  %439 = vmatprep.mubr.bf16.mxu0 (!%p211_p3), %v1059_v3  ;;  %958 = vset.pattern.permute.xlu0 (!%p211_p3), %v1059_v3  ;;  %v962_v4 = vld [vmem:[%s1259_s1 + $0x14] ss:$8 sps:$4 sm:$0xff] (!%p211_p3)   ;;  %v964_v5 = vld [vmem:[%s1259_s1 + $0x10] ss:$8 sps:$4 sm:$0xff] (!%p211_p3)   ;;  %v987_v13 = vld [vmem:[%s1261_s3 + $0x40] sm:$0xff] (!%p211_p3)  }
   0x9   : > { %407 = vmatprep.subr.bf16.mxu0 (!%p211_p3), %v959_v1  ;;  %v965_v6 = vld [vmem:[%s1259_s1 + $0x24] ss:$8 sps:$4 sm:$0xff] (!%p211_p3)   ;;  %v967_v7 = vld [vmem:[%s1259_s1 + $0x20] ss:$8 sps:$4 sm:$0xff] (!%p211_p3)   ;;  %v968_v8 = vld [vmem:[%s1259_s1 + $0x34] ss:$8 sps:$4 sm:$0xff] (!%p211_p3)   ;;  %893 = vmatprep.subr.bf16.mxu1 (!%p211_p3), %v987_v13 }
   0xa   : > { %408 = vmatpush1.bf16.msra.mxu0 (!%p211_p3), %v961_v2  ;;  %v970_v9 = vld [vmem:[%s1259_s1 + $0x30] ss:$8 sps:$4 sm:$0xff] (!%p211_p3)   ;;  %v971_v10 = vld [vmem:[%s1259_s1 + $0x44] ss:$8 sps:$4 sm:$0xff] (!%p211_p3)   ;;  %v973_v11 = vld [vmem:[%s1259_s1 + $0x40] ss:$8 sps:$4 sm:$0xff] (!%p211_p3)  }
   0xb   : > { %409 = vmatprep.subr.bf16.mxu0 (!%p211_p3), %v962_v4  ;;  %v974_v12 = vld [vmem:[%s1259_s1 + $0x54] ss:$8 sps:$4 sm:$0xff] (!%p211_p3)   ;;  %v988_v14 = vld [vmem:[%s1261_s3] sm:$0xff] (!%p211_p3)   ;;  %v976_v15 = vld [vmem:[%s1259_s1 + $0x50] ss:$8 sps:$4 sm:$0xff] (!%p211_p3)   ;;  %v294_v40 = vshrl.u32 (!%p211_p3), %v293_v39, 7 }
   0xc   : > { %v989_v16 = vld [vmem:[%s1261_s3 + $0x48] sm:$0xff] (!%p211_p3)   ;;  %894 = vmatpush3.bf16.msra.mxu1 (!%p211_p3), %v988_v14  ;;  %v991_v18 = vld [vmem:[%s1261_s3 + $0x50] sm:$0xff] (!%p211_p3)   ;;  %v993_v22 = vld [vmem:[%s1261_s3 + $0x58] sm:$0xff] (!%p211_p3)   ;;  %vm739_vm0 = vcmask (!%p211_p3), 31744  }
   0xd   : > { %v990_v17 = vld [vmem:[%s1261_s3 + $0x8] sm:$0xff] (!%p211_p3)   ;;  %895 = vmatprep.subr.bf16.mxu1 (!%p211_p3), %v989_v16  ;;  %v992_v21 = vld [vmem:[%s1261_s3 + $0x10] sm:$0xff] (!%p211_p3)   ;;  %v994_v25 = vld [vmem:[%s1261_s3 + $0x18] sm:$0xff] (!%p211_p3)   ;;  %v295_v41 = vsub.s32 (!%p211_p3), 0, %v294_v40  ;;  %v299_v43 = vsub.s32 (!%p211_p3), 1, %v294_v40 }
   0xe   : > { %410 = vmatpush1.bf16.msra.mxu0 (!%p211_p3), %v964_v5  ;;  %v977_v19 = vld [vmem:[%s1259_s1 + $0x64] ss:$8 sps:$4 sm:$0xff] (!%p211_p3)   ;;  %v979_v20 = vld [vmem:[%s1259_s1 + $0x60] ss:$8 sps:$4 sm:$0xff] (!%p211_p3)   ;;  %v980_v23 = vld [vmem:[%s1259_s1 + $0x74] ss:$8 sps:$4 sm:$0xff] (!%p211_p3)  }
   0xf   : > { %s1269_s20 = smov (!%p247_p4, %s1049_s20), 1  ;;  %411 = vmatprep.subr.bf16.mxu0 %v965_v6  ;;  %v982_v24 = vld [vmem:[%s1259_s1 + $0x70] ss:$8 sps:$4 sm:$0xff]   ;;  %v995_v26 = vld [vmem:[%s1261_s3 + $0x60] sm:$0xff]   ;;  %v997_v29 = vld [vmem:[%s1261_s3 + $0x68] sm:$0xff]  }
  0x10   : > { %s891_s8 = sshll.u32 %s1269_s20, 5  ;;  %896 = vmatpush3.bf16.msra.mxu1 %v990_v17  ;;  %v996_v28 = vld [vmem:[%s1261_s3 + $0x20] sm:$0xff]   ;;  %v998_v30 = vld [vmem:[%s1261_s3 + $0x28] sm:$0xff]   ;;  %v999_v34 = vld [vmem:[%s1261_s3 + $0x70] sm:$0xff]   ;;  %s892_s28 = sshll.u32 %s1269_s20, 6 }
  0x11   : > { %s1140_s15 = scalar_lea.vmem %s1258_s0, %s891_s8  ;;  %897 = vmatprep.subr.bf16.mxu1 %v991_v18  ;;  %v1000_v35 = vld [vmem:[%s1261_s3 + $0x30] sm:$0xff]   ;;  %v1001_v36 = vld [vmem:[%s1261_s3 + $0x78] sm:$0xff]   ;;  %v864_v38 = vld [vmem:[#allocation2] ss:$0 sm:$0xff]  ;;  %s1231_s6 = scalar_lea.vmem %s1263_s5, %s892_s28 }
  0x12   : > { %412 = vmatpush1.bf16.msra.mxu0 %v967_v7  ;;  %v983_v27 = vld [vmem:[%s1140_s15] sm:$0xff]   ;;  %v984_v31 = vld [vmem:[%s1140_s15 + $0x8] sm:$0xff]   ;;  %v985_v32 = vld [vmem:[%s1140_s15 + $0x10] sm:$0xff]   ;;  %527 = vperm.xlu0 %958, %v864_v38  }
  0x13   : > { %413 = vmatprep.subr.bf16.mxu0 %v968_v8  ;;  %v986_v33 = vld [vmem:[%s1140_s15 + $0x18] sm:$0xff]   ;;  %v291_v42 = vld [vmem:[%s1260_s2] sm:$0x3] }
  0x14   : > { %898 = vmatpush3.bf16.msra.mxu1 %v992_v21  ;;  %v1002_v37 = vld [vmem:[%s1261_s3 + $0x38] sm:$0xff]   ;;  %v296_v44 = vrot.slane %v291_v42, %v295_v41  ;;  %v300_v46 = vrot.slane %v291_v42, %v299_v43 }
  0x15   : > { %899 = vmatprep.subr.bf16.mxu1 %v993_v22 }
  0x16   : > { %414 = vmatpush1.bf16.msra.mxu0 %v970_v9 }
  0x17   : > { %415 = vmatprep.subr.bf16.mxu0 %v971_v10 }
  0x18   : > { %900 = vmatpush3.bf16.msra.mxu1 %v994_v25 }
  0x19   : > { %901 = vmatprep.subr.bf16.mxu1 %v995_v26 }
  0x1a   : > { %416 = vmatpush1.bf16.msra.mxu0 %v973_v11 }
  0x1b   : > { %417 = vmatprep.subr.bf16.mxu0 %v974_v12 }
  0x1c   : > { %902 = vmatpush3.bf16.msra.mxu1 %v996_v28 }
  0x1d   : > { %903 = vmatprep.subr.bf16.mxu1 %v997_v29 }
  0x1e   : > { %418 = vmatpush1.bf16.msra.mxu0 %v976_v15 }
  0x1f   : > { %419 = vmatprep.subr.bf16.mxu0 %v977_v19 }
  0x20   : > { %904 = vmatpush3.bf16.msra.mxu1 %v998_v30 }
  0x21   : > { %905 = vmatprep.subr.bf16.mxu1 %v999_v34 }
  0x22   : > { %420 = vmatpush1.bf16.msra.mxu0 %v979_v20 }
  0x23   : > { %421 = vmatprep.subr.bf16.mxu0 %v980_v23 }
  0x24   : > { %906 = vmatpush3.bf16.msra.mxu1 %v1000_v35 }
  0x25   : > { %907 = vmatprep.subr.bf16.mxu1 %v1001_v36 }
  0x26   : > { %422 = vmatpush1.bf16.msra.mxu0 %v982_v24 }
  0x28   : > { %908 = vmatpush3.bf16.msra.mxu1 %v1002_v37 }
  0x29   : > { %440 = vmatmul.mubr.bf16.vlgmr.msra.gmra.mrb[0].mxu0 %v983_v27 }
  0x2a   : > { %449 = vmatprep.mubr.bf16.mxu0 %v1059_v3 }
  0x31   : > { %450 = vmatmul.mubr.bf16.gmra.mrb[4].mxu0 %v984_v31 }
  0x32   : > { %459 = vmatprep.mubr.bf16.mxu0 %v1059_v3 }
  0x39   : > { %460 = vmatmul.mubr.bf16.gmra.mrb[8].mxu0 %v985_v32 }
  0x3a   : > { %469 = vmatprep.mubr.bf16.mxu0 %v1059_v3 }
  0x41   : > { %470 = vmatmul.mubr.bf16.gmra.mrb[12].mxu0 %v986_v33 }
  0x91   : > { %v528_v24 = vpop.permute.xlu0 %527 }
  0xfc   : > { %v441_v45 = vpop.f32.mrb[0].mxu0 }
  0xfd   : > { %v443_v47 = vpop.f32.mrb[1].mxu0  ;;  %v442_v49 = vadd.f32 %v441_v45, %v296_v44 }
  0xfe   : > { %v445_v48 = vpop.f32.mrb[2].mxu0  ;;  %v444_v52 = vadd.f32 %v443_v47, %v300_v46 }
  0xff   : > { %v446_v50 = vadd.f32 %v445_v48, %v296_v44  ;;  %v447_v51 = vpop.f32.mrb[3].mxu0 }
 0x100   : > { %v448_v53 = vadd.f32 %v447_v51, %v300_v46 }
 0x101   : > { %v480_v54 = vpack.c.bf16 %v446_v50, %v442_v49 }
 0x102   : > { %v481_v55 = vpack.c.bf16 %v448_v53, %v444_v52 }
 0x104   : > { %v451_v56 = vpop.f32.mrb[4].mxu0  ;;  %658 = vmatprep.mubr.bf16.mxu1 %v481_v55 }
 0x105   : > { %v453_v57 = vpop.f32.mrb[5].mxu0  ;;  %659 = vmatmul.mubr.bf16.vlgmr.msra.gmra.mrb[0].mxu1 %v480_v54  ;;  %v452_v59 = vadd.f32 %v451_v56, %v296_v44 }
 0x106   : > { %v455_v58 = vpop.f32.mrb[6].mxu0  ;;  %v454_v62 = vadd.f32 %v453_v57, %v300_v46 }
 0x107   : > { %v456_v60 = vadd.f32 %v455_v58, %v296_v44  ;;  %v457_v61 = vpop.f32.mrb[7].mxu0 }
 0x108   : > { %v458_v63 = vadd.f32 %v457_v61, %v300_v46 }
 0x109   : > { %v482_v0 = vpack.c.bf16 %v456_v60, %v452_v59 }
 0x10a   : > { %v483_v1 = vpack.c.bf16 %v458_v63, %v454_v62 }
 0x10c   : > { %v461_v2 = vpop.f32.mrb[8].mxu0  ;;  %666 = vmatprep.mubr.bf16.mxu1 %v483_v1 }
 0x10d   : > { %v463_v3 = vpop.f32.mrb[9].mxu0  ;;  %667 = vmatmul.mubr.bf16.gmra.mrb[4].mxu1 %v482_v0  ;;  %v462_v5 = vadd.f32 %v461_v2, %v296_v44 }
 0x10e   : > { %v465_v4 = vpop.f32.mrb[10].mxu0  ;;  %v464_v8 = vadd.f32 %v463_v3, %v300_v46 }
 0x10f   : > { %v466_v6 = vadd.f32 %v465_v4, %v296_v44  ;;  %v467_v7 = vpop.f32.mrb[11].mxu0 }
 0x110   : > { %v468_v9 = vadd.f32 %v467_v7, %v300_v46 }
 0x111   : > { %v484_v10 = vpack.c.bf16 %v466_v6, %v462_v5 }
 0x112   : > { %v485_v11 = vpack.c.bf16 %v468_v9, %v464_v8 }
 0x114   : > { %v471_v12 = vpop.f32.mrb[12].mxu0  ;;  %674 = vmatprep.mubr.bf16.mxu1 %v485_v11 }
 0x115   : > { %v473_v13 = vpop.f32.mrb[13].mxu0  ;;  %675 = vmatmul.mubr.bf16.gmra.mrb[8].mxu1 %v484_v10  ;;  %v472_v15 = vadd.f32 %v471_v12, %v296_v44 }
 0x116   : > { %v475_v14 = vpop.f32.mrb[14].mxu0  ;;  %v474_v18 = vadd.f32 %v473_v13, %v300_v46 }
 0x117   : > { %v476_v16 = vadd.f32 %v475_v14, %v296_v44  ;;  %v477_v17 = vpop.f32.mrb[15].mxu0 }
 0x118   : > { %v478_v19 = vadd.f32 %v477_v17, %v300_v46 }
 0x119   : > { %v486_v20 = vpack.c.bf16 %v476_v16, %v472_v15 }
 0x11a   : > { %v487_v21 = vpack.c.bf16 %v478_v19, %v474_v18 }
 0x11c   : > { %682 = vmatprep.mubr.bf16.mxu1 %v487_v21 }
 0x11d   : > { %683 = vmatmul.mubr.bf16.gmra.mrb[12].mxu1 %v486_v20 }
 0x1d8   : > { %v909_v22 = vpop.f32.mrb[0].mxu1 }
 0x1d9   : > { %v910_v23 = vpop.f32.mrb[1].mxu1 }
 0x1da   : > { %v911_v25 = vadd.f32 %v910_v23, %v909_v22  ;;  %v912_v26 = vpop.f32.mrb[2].mxu1 }
 0x1db   : > { %v913_v27 = vpop.f32.mrb[3].mxu1 }
 0x1dc   : > { %v661_v28 = vadd.f32 %v911_v25, %v528_v24  ;;  %v914_v29 = vadd.f32 %v913_v27, %v912_v26 }
 0x1de   : > { %v881_v30 = vmul.f32 -1.442695, %v661_v28  ;;  %v664_v31 = vadd.f32 %v914_v29, %v528_v24 }
 0x1e0   : > { %1003 = vpow2.f32 %v881_v30  ;;  %v882_v32 = vmul.f32 -1.442695, %v664_v31  ;;  %v915_v33 = vpop.f32.mrb[4].mxu1 }
 0x1e1   : > { %v916_v34 = vpop.f32.mrb[5].mxu1 }
 0x1e2   : > { %1005 = vpow2.f32 %v882_v32  ;;  %v917_v35 = vadd.f32 %v916_v34, %v915_v33  ;;  %v918_v36 = vpop.f32.mrb[6].mxu1 }
 0x1e3   : > { %v919_v37 = vpop.f32.mrb[7].mxu1 }
 0x1e4   : > { %v669_v38 = vadd.f32 %v917_v35, %v528_v24  ;;  %v920_v39 = vadd.f32 %v919_v37, %v918_v36 }
 0x1e6   : > { %v883_v40 = vmul.f32 -1.442695, %v669_v38  ;;  %v672_v41 = vadd.f32 %v920_v39, %v528_v24 }
 0x1e8   : > { %1007 = vpow2.f32 %v883_v40  ;;  %v884_v42 = vmul.f32 -1.442695, %v672_v41  ;;  %v921_v43 = vpop.f32.mrb[8].mxu1 }
 0x1e9   : > { %v922_v44 = vpop.f32.mrb[9].mxu1 }
 0x1ea   : > { %v1004_v45 = vpop.eup %1003  ;;  %1009 = vpow2.f32 %v884_v42  ;;  %v923_v46 = vadd.f32 %v922_v44, %v921_v43  ;;  %v924_v47 = vpop.f32.mrb[10].mxu1 }
 0x1eb   : > { %v715_v48 = vadd.f32 1.0, %v1004_v45  ;;  %v925_v49 = vpop.f32.mrb[11].mxu1 }
 0x1ec   : > { %v1006_v50 = vpop.eup %1005  ;;  %v677_v51 = vadd.f32 %v923_v46, %v528_v24  ;;  %v926_v52 = vadd.f32 %v925_v49, %v924_v47 }
 0x1ed   : > { %1011 = vrcp.f32 %v715_v48  ;;  %v716_v53 = vadd.f32 1.0, %v1006_v50 }
 0x1ee   : > { %v885_v54 = vmul.f32 -1.442695, %v677_v51  ;;  %v680_v55 = vadd.f32 %v926_v52, %v528_v24 }
 0x1ef   : > { %1013 = vrcp.f32 %v716_v53 }
 0x1f0   : > { %1015 = vpow2.f32 %v885_v54  ;;  %v886_v56 = vmul.f32 -1.442695, %v680_v55  ;;  %v927_v57 = vpop.f32.mrb[12].mxu1 }
 0x1f1   : > { %v928_v58 = vpop.f32.mrb[13].mxu1 }
 0x1f2   : > { %v1008_v59 = vpop.eup %1007  ;;  %1017 = vpow2.f32 %v886_v56  ;;  %v929_v60 = vadd.f32 %v928_v58, %v927_v57  ;;  %v930_v61 = vpop.f32.mrb[14].mxu1 }
 0x1f3   : > { %v717_v62 = vadd.f32 1.0, %v1008_v59  ;;  %v931_v63 = vpop.f32.mrb[15].mxu1 }
 0x1f4   : > { %v1010_v0 = vpop.eup %1009  ;;  %v685_v1 = vadd.f32 %v929_v60, %v528_v24  ;;  %v932_v2 = vadd.f32 %v931_v63, %v930_v61 }
 0x1f5   : > { %1019 = vrcp.f32 %v717_v62  ;;  %v718_v3 = vadd.f32 1.0, %v1010_v0 }
 0x1f6   : > { %v887_v4 = vmul.f32 -1.442695, %v685_v1  ;;  %v688_v5 = vadd.f32 %v932_v2, %v528_v24 }
 0x1f7   : > { %v1012_v6 = vpop.eup %1011  ;;  %1021 = vrcp.f32 %v718_v3 }
 0x1f8   : > { %740 = vst.msk [vmem:[%s1231_s6] sm:$0xff] %vm739_vm0, %v1012_v6  ;;  %1023 = vpow2.f32 %v887_v4  ;;  %v888_v7 = vmul.f32 -1.442695, %v688_v5 }
 0x1f9   : > { %v1014_v8 = vpop.eup %1013 }
 0x1fa   : > { %v1016_v9 = vpop.eup %1015  ;;  %741 = vst.msk [vmem:[%s1231_s6 + $0x8] sm:$0xff] %vm739_vm0, %v1014_v8  ;;  %1025 = vpow2.f32 %v888_v7 }
 0x1fb   : > { %v719_v10 = vadd.f32 1.0, %v1016_v9 }
 0x1fc   : > { %v1018_v11 = vpop.eup %1017 }
 0x1fd   : > { %1027 = vrcp.f32 %v719_v10  ;;  %v720_v12 = vadd.f32 1.0, %v1018_v11 }
 0x1ff   : > { %v1020_v13 = vpop.eup %1019  ;;  %1029 = vrcp.f32 %v720_v12 }
 0x200   : > { %742 = vst.msk [vmem:[%s1231_s6 + $0x10] sm:$0xff] %vm739_vm0, %v1020_v13 }
 0x201   : > { %v1022_v14 = vpop.eup %1021 }
 0x202   : > { %v1024_v15 = vpop.eup %1023  ;;  %743 = vst.msk [vmem:[%s1231_s6 + $0x18] sm:$0xff] %vm739_vm0, %v1022_v14 }
 0x203   : > { %v721_v16 = vadd.f32 1.0, %v1024_v15 }
 0x204   : > { %v1026_v17 = vpop.eup %1025 }
 0x205   : > { %1031 = vrcp.f32 %v721_v16  ;;  %v722_v18 = vadd.f32 1.0, %v1026_v17 }
 0x207   : > { %v1028_v19 = vpop.eup %1027  ;;  %1033 = vrcp.f32 %v722_v18 }
 0x208   : > { %744 = vst.msk [vmem:[%s1231_s6 + $0x20] sm:$0xff] %vm739_vm0, %v1028_v19 }
 0x209   : > { %v1030_v20 = vpop.eup %1029 }
 0x20a   : > { %745 = vst.msk [vmem:[%s1231_s6 + $0x28] sm:$0xff] %vm739_vm0, %v1030_v20 }
 0x20f   : > { %v1032_v21 = vpop.eup %1031 }
 0x210   : > { %746 = vst.msk [vmem:[%s1231_s6 + $0x30] sm:$0xff] %vm739_vm0, %v1032_v21 }
 0x211   : > { %v1034_v22 = vpop.eup %1033 }
 0x212   : > { %747 = vst.msk [vmem:[%s1231_s6 + $0x38] sm:$0xff] %vm739_vm0, %v1034_v22 }
 0x213 PF: > { %s17_s22 = sadd.s32 1, %s1057_s22   ;;  %s1264_s20 = smov %s1053_s21 }
 0x214   : > { %p14_p5 = scmp.ge.s32.totalorder %s17_s22, 4   ;;  %s1265_s21 = smov %s1267_s4 }
 0x216   :  { %16 = sbr.rel (!%p14_p5) target bundleno = 3 (0x3), region = 70 }

</bundles_post_ra>
